<compile_context>
chip_gen: v6e
topology: v6e:2x2x1
jax: 0.10.0
libtpu: 0.0.40
codegen_flags: <defaults>
</compile_context>

<pallas_src>
import functools

import jax
import jax.numpy as jnp
from jax.experimental import pallas as pl
from jax.experimental.pallas import tpu as pltpu


def _round_up(x, m):
    return ((x + m - 1) // m) * m


def _single_buffered(shape, index_map):
    """Grid-invariant block: double-buffering would only duplicate it in VMEM."""
    try:
        return pl.BlockSpec(shape, index_map, pipeline_mode=pl.Buffered(1))
    except TypeError:  # pragma: no cover - BlockSpec without pipeline_mode kwarg
        return pl.BlockSpec(shape, index_map)


def _vmem_budget_bytes():
    try:
        cap = int(pltpu.get_tpu_info().vmem_capacity_bytes)
    except Exception:
        cap = 64 << 20  # conservative fallback: v7x per-TensorCore VMEM
    # ~56 MiB on v7x (64 MiB/TC), ~112 MiB on v5e/v6e (128 MiB); never above 112 MiB.
    return min((cap * 7) // 8, 112 << 20)


# ----------------------------- encoder kernel ------------------------------ #
def _encoder_kernel(x_ref, w_ref, b_ref, o_ref):
    acc = jnp.dot(x_ref[...], w_ref[...], preferred_element_type=jnp.float32)
    o_ref[...] = jnp.maximum(acc + b_ref[...], 0.0).astype(o_ref.dtype)


def encoder_forward(images, w_enc, b_enc):
    """images (B, C, H, W) f32 -> features (B, H*W, F) bf16."""
    B, C, H, W = images.shape
    F = w_enc.shape[1]
    M = B * H * W
    x = jnp.transpose(images, (0, 2, 3, 1)).reshape(M, C).astype(jnp.bfloat16)
    w = w_enc.astype(jnp.bfloat16)

    # Fixed row tile; remainder block handled by Pallas padding/masking.
    tm = M if M < 512 else 512

    out = pl.pallas_call(
        _encoder_kernel,
        out_shape=jax.ShapeDtypeStruct((M, F), jnp.bfloat16),
        grid_spec=pltpu.PrefetchScalarGridSpec(
            num_scalar_prefetch=0,
            grid=(pl.cdiv(M, tm),),
            in_specs=[
                pl.BlockSpec((tm, C), lambda i: (i, 0)),
                _single_buffered((C, F), lambda i: (0, 0)),
                _single_buffered((1, F), lambda i: (0, 0)),
            ],
            out_specs=pl.BlockSpec((tm, F), lambda i: (i, 0)),
        ),
        compiler_params=pltpu.CompilerParams(dimension_semantics=("parallel",)),
    )(x, w, b_enc)
    return out.reshape(B, H * W, F)


# ----------------------------- decoder kernel ------------------------------ #
def _decoder_step_kernel(
    feats_ref, emb_ref,
    w_init_ref, b_init_ref,
    w_enc_att_ref, b_enc_att_ref,
    w_h_all_ref, b_h_all_ref,
    w_full_att_ref,
    w_ih_all_ref, b_lstm_ref,
    w_fc_ref, b_fc_ref,
    logits_ref, alphas_ref,
    h_ref, c_ref, att_enc_ref,
    *, Hd, A, F, P, P_pad,
):
    t = pl.program_id(1)
    tb = h_ref.shape[0]
    bf16 = jnp.bfloat16
    f32 = jnp.float32

    feats = feats_ref[...]                                   # (tb, P, F) bf16

    # ---- once per batch block: h0/c0 init + hoisted encoder-attention proj ----
    @pl.when(t == 0)
    def _init():
        fmean = jnp.mean(feats.astype(f32), axis=1)          # (tb, F)
        init = (jnp.dot(fmean.astype(bf16), w_init_ref[...],
                        preferred_element_type=f32) + b_init_ref[...])
        h_ref[...] = init[:, :Hd]
        c_ref[...] = init[:, Hd:]
        ae = jnp.dot(feats.reshape(tb * P, F), w_enc_att_ref[...],
                     preferred_element_type=f32)
        att_enc_ref[...] = (ae.reshape(tb, P, A)
                            + b_enc_att_ref[...]).astype(bf16)

    h = h_ref[...]                                           # (tb, Hd) f32
    c = c_ref[...]                                           # (tb, Hd) f32
    emb = emb_ref[0]                                         # (tb, E)  bf16

    # ---- one fused MXU matmul for every consumer of h ----
    # columns: [ W_dec_att (A) | W_f_beta (F) | W_hh (4*Hd) ]
    hproj = (jnp.dot(h.astype(bf16), w_h_all_ref[...],
                     preferred_element_type=f32) + b_h_all_ref[...])
    att_dec = hproj[:, :A]                                   # (tb, A)
    fbeta_pre = hproj[:, A:A + F]                            # (tb, F)
    hh_gates = hproj[:, A + F:]                              # (tb, 4*Hd)

    # ---- soft attention: alpha = softmax(w_f . relu(att_enc + att_dec)) ----
    att = jnp.maximum(att_enc_ref[...] + att_dec[:, None, :], 0.0)   # (tb, P, A) f32
    # b_full_att omitted: softmax is shift-invariant.
    e = jnp.sum(att * w_full_att_ref[...][None], axis=-1)    # (tb, P)
    e = e - jnp.max(e, axis=-1, keepdims=True)
    p_exp = jnp.exp(e)
    alpha = p_exp / jnp.sum(p_exp, axis=-1, keepdims=True)   # (tb, P), exact

    # context = sum_p alpha * feats  -> batched MXU matmul
    # TODO(synk): at tb >= 128 compare against VPU broadcast-mul + sublane reduce.
    context = jnp.einsum(
        "bqp,bpf->bqf", alpha[:, None, :].astype(bf16), feats,
        preferred_element_type=f32)[:, 0, :]                  # (tb, F)

    # ---- sigmoid gate, gated context ----
    gate = jax.nn.sigmoid(fbeta_pre)
    gated = gate * context                                    # (tb, F)

    # ---- LSTMCell on concat(embedding, gated_context); gate order i, f, g, o ----
    lstm_in = jnp.concatenate([emb, gated.astype(bf16)], axis=-1)       # (tb, E+F) bf16
    gates = (jnp.dot(lstm_in, w_ih_all_ref[...], preferred_element_type=f32)
             + hh_gates + b_lstm_ref[...])                    # (tb, 4*Hd)
    i_g = jax.nn.sigmoid(gates[:, 0:Hd])
    f_g = jax.nn.sigmoid(gates[:, Hd:2 * Hd])
    g_g = jnp.tanh(gates[:, 2 * Hd:3 * Hd])
    o_g = jax.nn.sigmoid(gates[:, 3 * Hd:4 * Hd])
    c_new = f_g * c + i_g * g_g
    h_new = o_g * jnp.tanh(c_new)

    # ---- vocab logits (fc weight pre-padded to a 128-multiple lane width) ----
    logits = (jnp.dot(h_new.astype(bf16), w_fc_ref[...],
                      preferred_element_type=f32) + b_fc_ref[...])   # (tb, V_pad)

    logits_ref[0] = logits
    if P_pad > P:                                             # lane-dense alpha store
        alpha = jnp.concatenate(
            [alpha, jnp.zeros((tb, P_pad - P), f32)], axis=-1)
    alphas_ref[0] = alpha
    h_ref[...] = h_new
    c_ref[...] = c_new


def _pick_batch_tile(B, P, F, A, E, Hd, V_pad, P_pad, vmem_budget):
    """Largest legal batch tile that fits the per-chip VMEM budget (cap 256)."""
    bf, fl = 2, 4
    # Single-buffered grid-invariant weights (pl.Buffered(1)).
    weight_bytes = (
        F * 2 * Hd * bf + 2 * Hd * fl                      # w_init / b_init
        + F * A * bf + A * fl                              # w_enc_att / b_enc_att
        + Hd * (A + F + 4 * Hd) * bf + (A + F + 4 * Hd) * fl  # w_h_all / b_h_all
        + A * fl                                           # w_full_att
        + (E + F) * 4 * Hd * bf + 4 * Hd * fl              # w_ih_all / b_lstm
        + Hd * V_pad * bf + V_pad * fl)                    # w_fc / b_fc
    # Per-batch-row bytes: double-buffered streaming blocks + persistent scratch.
    per_row = (
        2 * P * F * bf          # feats block (x2 buffers)
        + 2 * E * bf            # embedding block (x2)
        + 2 * V_pad * fl        # logits out block (x2)
        + 2 * P_pad * fl        # alphas out block (x2)
        + 2 * Hd * fl           # h + c carries
        + P * A * bf)           # hoisted encoder-attention projection (bf16)

    cands = [tb for tb in range(1, min(B, 256) + 1)
             if B % tb == 0 and (tb % 8 == 0 or tb == B)
             and weight_bytes + tb * per_row <= vmem_budget]
    if not cands:
        return 8 if B % 8 == 0 else B     # smallest layout-legal tile
    tb = max(cands)
    # Prefer >=2 batch blocks (megacore on v7x) when the tile stays >= 64 rows.
    split = [t for t in cands if B // t >= 2 and t >= 64]
    if tb == B and split:
        tb = max(split)
    return tb


def decoder_forward(features, captions, params):
    """features (B, P, F) bf16, captions (B, T) int32 -> (outputs (B,T,V), alphas (B,T,P))."""
    B, P, F = features.shape
    T = captions.shape[1]
    E = params["embedding"].shape[1]
    Hd = params["w_hh"].shape[0]
    V = params["w_fc"].shape[1]
    A = params["w_enc_att"].shape[1]

    P_pad = _round_up(P, 128)
    V_pad = _round_up(V, 128)

    bf16 = jnp.bfloat16
    f32 = jnp.float32

    # ---- fused / padded / bf16 weights (constant-folded under jit) ----
    w_init = jnp.concatenate(
        [params["w_init_h"], params["w_init_c"]], axis=1).astype(bf16)      # (F, 2Hd)
    b_init = jnp.concatenate(
        [params["b_init_h"], params["b_init_c"]], axis=1).astype(f32)       # (1, 2Hd)
    w_enc_att = params["w_enc_att"].astype(bf16)                            # (F, A)
    b_enc_att = params["b_enc_att"].astype(f32)                             # (1, A)
    w_h_all = jnp.concatenate(
        [params["w_dec_att"], params["w_fbeta"], params["w_hh"]],
        axis=1).astype(bf16)                                                # (Hd, A+F+4Hd)
    b_h_all = jnp.concatenate(
        [params["b_dec_att"], params["b_fbeta"], jnp.zeros((1, 4 * Hd), f32)],
        axis=1).astype(f32)                                                 # (1, A+F+4Hd)
    w_full_att = params["w_full_att"].astype(f32)                           # (1, A)
    w_ih_all = jnp.concatenate(
        [params["w_ih_e"], params["w_ih_f"]], axis=0).astype(bf16)          # (E+F, 4Hd)
    b_lstm = params["b_lstm"].astype(f32)                                   # (1, 4Hd)
    w_fc = params["w_fc"]
    b_fc = params["b_fc"]
    if V_pad > V:
        w_fc = jnp.pad(w_fc, ((0, 0), (0, V_pad - V)))
        b_fc = jnp.pad(b_fc, ((0, 0), (0, V_pad - V)))
    w_fc = w_fc.astype(bf16)                                                # (Hd, V_pad)
    b_fc = b_fc.astype(f32)                                                 # (1, V_pad)

    # Embedding lookup with teacher forcing (glue, plain JAX gather), time-major.
    emb = jnp.take(params["embedding"], captions, axis=0)                   # (B, T, E)
    emb = jnp.transpose(emb, (1, 0, 2)).astype(bf16)                        # (T, B, E)

    feats = features.astype(bf16)

    # Batch tile (leading "parallel" grid axis; recurrent T axis last, "arbitrary").
    vmem_budget = _vmem_budget_bytes()
    tb = _pick_batch_tile(B, P, F, A, E, Hd, V_pad, P_pad, vmem_budget)
    nb = B // tb

    def const_spec(shape):
        n = len(shape)
        return _single_buffered(shape, lambda b, t, _n=n: (0,) * _n)

    in_specs = [
        pl.BlockSpec((tb, P, F), lambda b, t: (b, 0, 0)),    # features (resident per tile)
        pl.BlockSpec((1, tb, E), lambda b, t: (t, b, 0)),    # embedding at step t
        const_spec(w_init.shape), const_spec(b_init.shape),
        const_spec(w_enc_att.shape), const_spec(b_enc_att.shape),
        const_spec(w_h_all.shape), const_spec(b_h_all.shape),
        const_spec(w_full_att.shape),
        const_spec(w_ih_all.shape), const_spec(b_lstm.shape),
        const_spec(w_fc.shape), const_spec(b_fc.shape),
    ]
    out_specs = [
        pl.BlockSpec((1, tb, V_pad), lambda b, t: (t, b, 0)),
        pl.BlockSpec((1, tb, P_pad), lambda b, t: (t, b, 0)),
    ]

    kernel = functools.partial(
        _decoder_step_kernel, Hd=Hd, A=A, F=F, P=P, P_pad=P_pad)

    outputs_tm, alphas_tm = pl.pallas_call(
        kernel,
        out_shape=(jax.ShapeDtypeStruct((T, B, V_pad), f32),
                   jax.ShapeDtypeStruct((T, B, P_pad), f32)),
        grid_spec=pltpu.PrefetchScalarGridSpec(
            num_scalar_prefetch=0,
            grid=(nb, T),
            in_specs=in_specs,
            out_specs=out_specs,
            scratch_shapes=[
                pltpu.VMEM((tb, Hd), f32),       # h carry (per batch tile)
                pltpu.VMEM((tb, Hd), f32),       # c carry
                pltpu.VMEM((tb, P, A), bf16),    # hoisted encoder-attention proj (bf16)
            ],
        ),
        compiler_params=pltpu.CompilerParams(
            dimension_semantics=("parallel", "arbitrary"),
            vmem_limit_bytes=vmem_budget),
    )(feats, emb, w_init, b_init, w_enc_att, b_enc_att,
      w_h_all, b_h_all, w_full_att, w_ih_all, b_lstm, w_fc, b_fc)

    outputs = jnp.transpose(outputs_tm, (1, 0, 2))[:, :, :V]   # (B, T, V)
    alphas = jnp.transpose(alphas_tm, (1, 0, 2))[:, :, :P]     # (B, T, P)
    return outputs, alphas


# ------------------------------ full forward ------------------------------- #
def attention_caption_generator_forward(images, captions, params):
    features = encoder_forward(images, params["w_conv"], params["b_conv"])
    return decoder_forward(features, captions, params)


# --------------------------- deterministic params --------------------------- #
def make_params(key, *, C, F, E, Hd, A, V):
    keys = jax.random.split(key, 16)
    n = lambda k, shape, s=0.05: (s * jax.random.normal(k, shape)).astype(jnp.float32)
    z = lambda shape: jnp.zeros(shape, jnp.float32)
    return {
        # synthetic encoder (1x1 conv): weights stored (in, out)
        "w_conv": n(keys[0], (C, F)), "b_conv": z((1, F)),
        # decoder init_h / init_c : Linear(F, Hd)
        "w_init_h": n(keys[1], (F, Hd)), "b_init_h": z((1, Hd)),
        "w_init_c": n(keys[2], (F, Hd)), "b_init_c": z((1, Hd)),
        # attention: encoder_att Linear(F, A), decoder_att Linear(Hd, A), full_att Linear(A, 1)
        "w_enc_att": n(keys[3], (F, A)), "b_enc_att": z((1, A)),
        "w_dec_att": n(keys[4], (Hd, A)), "b_dec_att": z((1, A)),
        "w_full_att": n(keys[5], (1, A)), "b_full_att": z((1, 1)),
        # f_beta: Linear(Hd, F)
        "w_fbeta": n(keys[6], (Hd, F)), "b_fbeta": z((1, F)),
        # LSTMCell(E + F, Hd): input weights split (embedding / context parts)
        "w_ih_e": n(keys[7], (E, 4 * Hd)),
        "w_ih_f": n(keys[8], (F, 4 * Hd)),
        "w_hh": n(keys[9], (Hd, 4 * Hd)),
        "b_lstm": z((1, 4 * Hd)),          # b_ih + b_hh folded together
        # fc: Linear(Hd, V)
        "w_fc": n(keys[10], (Hd, V)), "b_fc": z((1, V)),
        # embedding table (V, E)
        "embedding": n(keys[11], (V, E)),
    }


if __name__ == "__main__":
    B, C, H, W = 2, 4, 4, 4          # small images -> P = 16 pixels
    F = 2048                         # feature_size=2048 (as in the module)
    E, Hd, A, V, T = 128, 128, 128, 256, 8   # 128-aligned for lane-aligned slices

    key = jax.random.PRNGKey(0)
    k_img, k_cap, k_par = jax.random.split(key, 3)
    images = jax.random.normal(k_img, (B, C, H, W), dtype=jnp.float32)
    captions = jax.random.randint(k_cap, (B, T), 0, V, dtype=jnp.int32)
    params = make_params(k_par, C=C, F=F, E=E, Hd=Hd, A=A, V=V)

    fwd = jax.jit(attention_caption_generator_forward)
    outputs, alphas = fwd(images, captions, params)
    jax.block_until_ready((outputs, alphas))

    assert outputs.shape == (B, T, V)
    assert alphas.shape == (B, T, H * W)
    assert bool(jnp.all(jnp.isfinite(outputs)))
    assert bool(jnp.allclose(jnp.sum(alphas, axis=-1), 1.0, atol=1e-2))
    print("KERNEL_OK")
</pallas_src>

<mosaic_0001>
module attributes {stable_mosaic.version = 11 : i64} {
  func.func @_encoder_kernel(%arg0: i32, %arg1: memref<32x4xbf16, #tpu.memory_space<vmem>>, %arg2: memref<4x2048xbf16, #tpu.memory_space<vmem>>, %arg3: memref<1x2048xf32, #tpu.memory_space<vmem>>, %arg4: memref<32x2048xbf16, #tpu.memory_space<vmem>>) attributes {dimension_semantics = [#tpu.dimension_semantics<parallel>], iteration_bounds = array<i64: 1>, scalar_prefetch = 0 : i64, scratch_operands = 0 : i64, tpu.core_type = #tpu.core_type<tc>, window_params = [{transform_indices = @transform_0, window_bounds = array<i64: 32, 4>}, {pipeline_mode = #tpu.pipeline_mode<synchronous>, transform_indices = @transform_1, window_bounds = array<i64: 4, 2048>}, {pipeline_mode = #tpu.pipeline_mode<synchronous>, transform_indices = @transform_2, window_bounds = array<i64: 1, 2048>}, {transform_indices = @transform_3, window_bounds = array<i64: 32, 2048>}]} {
    %c0 = arith.constant 0 : index
    %c0_0 = arith.constant 0 : index
    %0 = vector.load %arg1[%c0, %c0_0] : memref<32x4xbf16, #tpu.memory_space<vmem>>, vector<32x4xbf16>
    %c0_1 = arith.constant 0 : index
    %c0_2 = arith.constant 0 : index
    %1 = vector.load %arg2[%c0_1, %c0_2] : memref<4x2048xbf16, #tpu.memory_space<vmem>>, vector<4x2048xbf16>
    %cst = arith.constant dense<0.000000e+00> : vector<32x2048xf32>
    %2 = tpu.matmul %0, %1, %cst {dimension_numbers = #tpu.dot_dimension_numbers<[1], [0], [0], [1], [0, 0, 1, 1], [], []>} : vector<32x4xbf16>, vector<4x2048xbf16>, vector<32x2048xf32> -> vector<32x2048xf32>
    %c0_3 = arith.constant 0 : index
    %c0_4 = arith.constant 0 : index
    %3 = vector.load %arg3[%c0_3, %c0_4] : memref<1x2048xf32, #tpu.memory_space<vmem>>, vector<1x2048xf32>
    %4 = vector.broadcast %3 : vector<1x2048xf32> to vector<32x2048xf32>
    %5 = arith.addf %2, %4 : vector<32x2048xf32>
    %cst_5 = arith.constant 0.000000e+00 : f32
    %6 = vector.broadcast %cst_5 : f32 to vector<32x2048xf32>
    %7 = arith.maximumf %5, %6 : vector<32x2048xf32>
    %8 = arith.truncf %7 : vector<32x2048xf32> to vector<32x2048xbf16>
    %c0_6 = arith.constant 0 : index
    %c0_7 = arith.constant 0 : index
    %9 = vector.load %arg4[%c0_6, %c0_7] : memref<32x2048xbf16, #tpu.memory_space<vmem>>, vector<32x2048xbf16>
    tpu.vector_store %arg4[%c0_6, %c0_7], %8 {strides = array<i32>} : memref<32x2048xbf16, #tpu.memory_space<vmem>>, vector<32x2048xbf16>,
    return
  }
  func.func @transform_0(%arg0: i32) -> (i32, i32) {
    %c0_i32 = arith.constant 0 : i32
    %c0_i32_0 = arith.constant 0 : i32
    return %arg0, %c0_i32 : i32, i32
  }
  func.func @transform_1(%arg0: i32) -> (i32, i32) {
    %c0_i32 = arith.constant 0 : i32
    %c0_i32_0 = arith.constant 0 : i32
    %c0_i32_1 = arith.constant 0 : i32
    return %c0_i32, %c0_i32_0 : i32, i32
  }
  func.func @transform_2(%arg0: i32) -> (i32, i32) {
    %c0_i32 = arith.constant 0 : i32
    %c0_i32_0 = arith.constant 0 : i32
    %c0_i32_1 = arith.constant 0 : i32
    return %c0_i32, %c0_i32_0 : i32, i32
  }
  func.func @transform_3(%arg0: i32) -> (i32, i32) {
    %c0_i32 = arith.constant 0 : i32
    %c0_i32_0 = arith.constant 0 : i32
    return %arg0, %c0_i32 : i32, i32
  }
}

module attributes {stable_mosaic.version = 11 : i64} {
  func.func @_decoder_step_kernel(%arg0: i32, %arg1: i32, %arg2: memref<2x16x2048xbf16, #tpu.memory_space<vmem>>, %arg3: memref<1x2x128xbf16, #tpu.memory_space<vmem>>, %arg4: memref<2048x256xbf16, #tpu.memory_space<vmem>>, %arg5: memref<1x256xf32, #tpu.memory_space<vmem>>, %arg6: memref<2048x128xbf16, #tpu.memory_space<vmem>>, %arg7: memref<1x128xf32, #tpu.memory_space<vmem>>, %arg8: memref<128x2688xbf16, #tpu.memory_space<vmem>>, %arg9: memref<1x2688xf32, #tpu.memory_space<vmem>>, %arg10: memref<1x128xf32, #tpu.memory_space<vmem>>, %arg11: memref<2176x512xbf16, #tpu.memory_space<vmem>>, %arg12: memref<1x512xf32, #tpu.memory_space<vmem>>, %arg13: memref<128x256xbf16, #tpu.memory_space<vmem>>, %arg14: memref<1x256xf32, #tpu.memory_space<vmem>>, %arg15: memref<1x2x256xf32, #tpu.memory_space<vmem>>, %arg16: memref<1x2x128xf32, #tpu.memory_space<vmem>>, %arg17: memref<2x128xf32, #tpu.memory_space<vmem>>, %arg18: memref<2x128xf32, #tpu.memory_space<vmem>>, %arg19: memref<2x16x128xbf16, #tpu.memory_space<vmem>>) attributes {dimension_semantics = [#tpu.dimension_semantics<parallel>, #tpu.dimension_semantics<arbitrary>], iteration_bounds = array<i64: 1, 8>, scalar_prefetch = 0 : i64, scratch_operands = 3 : i64, tpu.core_type = #tpu.core_type<tc>, window_params = [{transform_indices = @transform_0, window_bounds = array<i64: 2, 16, 2048>}, {transform_indices = @transform_1, window_bounds = array<i64: 1, 2, 128>}, {pipeline_mode = #tpu.pipeline_mode<synchronous>, transform_indices = @transform_2, window_bounds = array<i64: 2048, 256>}, {pipeline_mode = #tpu.pipeline_mode<synchronous>, transform_indices = @transform_3, window_bounds = array<i64: 1, 256>}, {pipeline_mode = #tpu.pipeline_mode<synchronous>, transform_indices = @transform_4, window_bounds = array<i64: 2048, 128>}, {pipeline_mode = #tpu.pipeline_mode<synchronous>, transform_indices = @transform_5, window_bounds = array<i64: 1, 128>}, {pipeline_mode = #tpu.pipeline_mode<synchronous>, transform_indices = @transform_6, window_bounds = array<i64: 128, 2688>}, {pipeline_mode = #tpu.pipeline_mode<synchronous>, transform_indices = @transform_7, window_bounds = array<i64: 1, 2688>}, {pipeline_mode = #tpu.pipeline_mode<synchronous>, transform_indices = @transform_8, window_bounds = array<i64: 1, 128>}, {pipeline_mode = #tpu.pipeline_mode<synchronous>, transform_indices = @transform_9, window_bounds = array<i64: 2176, 512>}, {pipeline_mode = #tpu.pipeline_mode<synchronous>, transform_indices = @transform_10, window_bounds = array<i64: 1, 512>}, {pipeline_mode = #tpu.pipeline_mode<synchronous>, transform_indices = @transform_11, window_bounds = array<i64: 128, 256>}, {pipeline_mode = #tpu.pipeline_mode<synchronous>, transform_indices = @transform_12, window_bounds = array<i64: 1, 256>}, {transform_indices = @transform_13, window_bounds = array<i64: 1, 2, 256>}, {transform_indices = @transform_14, window_bounds = array<i64: 1, 2, 128>}]} {
    %c0 = arith.constant 0 : index
    %c0_0 = arith.constant 0 : index
    %c0_1 = arith.constant 0 : index
    %0 = vector.load %arg2[%c0, %c0_0, %c0_1] : memref<2x16x2048xbf16, #tpu.memory_space<vmem>>, vector<2x16x2048xbf16>
    %c0_i32 = arith.constant 0 : i32
    %1 = arith.cmpi eq, %arg1, %c0_i32 : i32
    %2 = arith.extui %1 : i1 to i32
    %c0_i32_2 = arith.constant 0 : i32
    %3 = arith.cmpi ne, %2, %c0_i32_2 : i32
    scf.if %3 {
      %97 = arith.extf %0 : vector<2x16x2048xbf16> to vector<2x16x2048xf32>
      %cst_49 = arith.constant dense<0.000000e+00> : vector<2x2048xf32>
      %98 = vector.multi_reduction <add>, %97, %cst_49 [1] : vector<2x16x2048xf32> to vector<2x2048xf32>
      %cst_50 = arith.constant 1.600000e+01 : f32
      %99 = vector.broadcast %cst_50 : f32 to vector<2x2048xf32>
      %100 = arith.divf %98, %99 : vector<2x2048xf32>
      %101 = arith.truncf %100 : vector<2x2048xf32> to vector<2x2048xbf16>
      %c0_51 = arith.constant 0 : index
      %c0_52 = arith.constant 0 : index
      %102 = vector.load %arg4[%c0_51, %c0_52] : memref<2048x256xbf16, #tpu.memory_space<vmem>>, vector<2048x256xbf16>
      %cst_53 = arith.constant dense<0.000000e+00> : vector<2x256xf32>
      %103 = tpu.matmul %101, %102, %cst_53 {dimension_numbers = #tpu.dot_dimension_numbers<[1], [0], [0], [1], [0, 0, 1, 1], [], []>} : vector<2x2048xbf16>, vector<2048x256xbf16>, vector<2x256xf32> -> vector<2x256xf32>
      %c0_54 = arith.constant 0 : index
      %c0_55 = arith.constant 0 : index
      %104 = vector.load %arg5[%c0_54, %c0_55] : memref<1x256xf32, #tpu.memory_space<vmem>>, vector<1x256xf32>
      %105 = vector.broadcast %104 : vector<1x256xf32> to vector<2x256xf32>
      %106 = arith.addf %103, %105 : vector<2x256xf32>
      %107 = vector.extract_strided_slice %106 {offsets = [0, 0], sizes = [2, 128], strides = [1, 1]} : vector<2x256xf32> to vector<2x128xf32>
      %c0_56 = arith.constant 0 : index
      %c0_57 = arith.constant 0 : index
      %108 = vector.load %arg17[%c0_56, %c0_57] : memref<2x128xf32, #tpu.memory_space<vmem>>, vector<2x128xf32>
      tpu.vector_store %arg17[%c0_56, %c0_57], %107 {strides = array<i32>} : memref<2x128xf32, #tpu.memory_space<vmem>>, vector<2x128xf32>,
      %109 = vector.extract_strided_slice %106 {offsets = [0, 128], sizes = [2, 128], strides = [1, 1]} : vector<2x256xf32> to vector<2x128xf32>
      %c0_58 = arith.constant 0 : index
      %c0_59 = arith.constant 0 : index
      %110 = vector.load %arg18[%c0_58, %c0_59] : memref<2x128xf32, #tpu.memory_space<vmem>>, vector<2x128xf32>
      tpu.vector_store %arg18[%c0_58, %c0_59], %109 {strides = array<i32>} : memref<2x128xf32, #tpu.memory_space<vmem>>, vector<2x128xf32>,
      %111 = vector.shape_cast %0 : vector<2x16x2048xbf16> to vector<32x2048xbf16>
      %c0_60 = arith.constant 0 : index
      %c0_61 = arith.constant 0 : index
      %112 = vector.load %arg6[%c0_60, %c0_61] : memref<2048x128xbf16, #tpu.memory_space<vmem>>, vector<2048x128xbf16>
      %cst_62 = arith.constant dense<0.000000e+00> : vector<32x128xf32>
      %113 = tpu.matmul %111, %112, %cst_62 {dimension_numbers = #tpu.dot_dimension_numbers<[1], [0], [0], [1], [0, 0, 1, 1], [], []>} : vector<32x2048xbf16>, vector<2048x128xbf16>, vector<32x128xf32> -> vector<32x128xf32>
      %114 = vector.shape_cast %113 : vector<32x128xf32> to vector<2x16x128xf32>
      %c0_63 = arith.constant 0 : index
      %c0_64 = arith.constant 0 : index
      %115 = vector.load %arg7[%c0_63, %c0_64] : memref<1x128xf32, #tpu.memory_space<vmem>>, vector<1x128xf32>
      %116 = vector.shape_cast %115 : vector<1x128xf32> to vector<1x1x128xf32>
      %117 = vector.broadcast %116 : vector<1x1x128xf32> to vector<2x16x128xf32>
      %118 = arith.addf %114, %117 : vector<2x16x128xf32>
      %119 = arith.truncf %118 : vector<2x16x128xf32> to vector<2x16x128xbf16>
      %c0_65 = arith.constant 0 : index
      %c0_66 = arith.constant 0 : index
      %c0_67 = arith.constant 0 : index
      %120 = vector.load %arg19[%c0_65, %c0_66, %c0_67] : memref<2x16x128xbf16, #tpu.memory_space<vmem>>, vector<2x16x128xbf16>
      tpu.vector_store %arg19[%c0_65, %c0_66, %c0_67], %119 {strides = array<i32>} : memref<2x16x128xbf16, #tpu.memory_space<vmem>>, vector<2x16x128xbf16>,
    } else {
    }
    %c0_3 = arith.constant 0 : index
    %c0_4 = arith.constant 0 : index
    %4 = vector.load %arg17[%c0_3, %c0_4] : memref<2x128xf32, #tpu.memory_space<vmem>>, vector<2x128xf32>
    %c0_5 = arith.constant 0 : index
    %c0_6 = arith.constant 0 : index
    %5 = vector.load %arg18[%c0_5, %c0_6] : memref<2x128xf32, #tpu.memory_space<vmem>>, vector<2x128xf32>
    %c0_7 = arith.constant 0 : index
    %c0_8 = arith.constant 0 : index
    %c0_9 = arith.constant 0 : index
    %6 = vector.load %arg3[%c0_7, %c0_8, %c0_9] : memref<1x2x128xbf16, #tpu.memory_space<vmem>>, vector<1x2x128xbf16>
    %7 = vector.shape_cast %6 : vector<1x2x128xbf16> to vector<2x128xbf16>
    %8 = arith.truncf %4 : vector<2x128xf32> to vector<2x128xbf16>
    %c0_10 = arith.constant 0 : index
    %c0_11 = arith.constant 0 : index
    %9 = vector.load %arg8[%c0_10, %c0_11] : memref<128x2688xbf16, #tpu.memory_space<vmem>>, vector<128x2688xbf16>
    %cst = arith.constant dense<0.000000e+00> : vector<2x2688xf32>
    %10 = tpu.matmul %8, %9, %cst {dimension_numbers = #tpu.dot_dimension_numbers<[1], [0], [0], [1], [0, 0, 1, 1], [], []>} : vector<2x128xbf16>, vector<128x2688xbf16>, vector<2x2688xf32> -> vector<2x2688xf32>
    %c0_12 = arith.constant 0 : index
    %c0_13 = arith.constant 0 : index
    %11 = vector.load %arg9[%c0_12, %c0_13] : memref<1x2688xf32, #tpu.memory_space<vmem>>, vector<1x2688xf32>
    %12 = vector.broadcast %11 : vector<1x2688xf32> to vector<2x2688xf32>
    %13 = arith.addf %10, %12 : vector<2x2688xf32>
    %14 = vector.extract_strided_slice %13 {offsets = [0, 0], sizes = [2, 128], strides = [1, 1]} : vector<2x2688xf32> to vector<2x128xf32>
    %15 = vector.extract_strided_slice %13 {offsets = [0, 128], sizes = [2, 2048], strides = [1, 1]} : vector<2x2688xf32> to vector<2x2048xf32>
    %16 = vector.extract_strided_slice %13 {offsets = [0, 2176], sizes = [2, 512], strides = [1, 1]} : vector<2x2688xf32> to vector<2x512xf32>
    %c0_14 = arith.constant 0 : index
    %c0_15 = arith.constant 0 : index
    %c0_16 = arith.constant 0 : index
    %17 = vector.load %arg19[%c0_14, %c0_15, %c0_16] : memref<2x16x128xbf16, #tpu.memory_space<vmem>>, vector<2x16x128xbf16>
    %18 = vector.shape_cast %14 : vector<2x128xf32> to vector<2x1x128xf32>
    %19 = arith.extf %17 : vector<2x16x128xbf16> to vector<2x16x128xf32>
    %20 = vector.broadcast %18 : vector<2x1x128xf32> to vector<2x16x128xf32>
    %21 = arith.addf %19, %20 : vector<2x16x128xf32>
    %cst_17 = arith.constant 0.000000e+00 : f32
    %22 = vector.broadcast %cst_17 : f32 to vector<2x16x128xf32>
    %23 = arith.maximumf %21, %22 : vector<2x16x128xf32>
    %c0_18 = arith.constant 0 : index
    %c0_19 = arith.constant 0 : index
    %24 = vector.load %arg10[%c0_18, %c0_19] : memref<1x128xf32, #tpu.memory_space<vmem>>, vector<1x128xf32>
    %25 = vector.shape_cast %24 : vector<1x128xf32> to vector<1x1x128xf32>
    %26 = vector.broadcast %25 : vector<1x1x128xf32> to vector<2x16x128xf32>
    %27 = arith.mulf %23, %26 : vector<2x16x128xf32>
    %cst_20 = arith.constant dense<0.000000e+00> : vector<2x16xf32>
    %28 = vector.multi_reduction <add>, %27, %cst_20 [2] : vector<2x16x128xf32> to vector<2x16xf32>
    %cst_21 = arith.constant dense<0xFF800000> : vector<2xf32>
    %29 = vector.multi_reduction <maximumf>, %28, %cst_21 [1] : vector<2x16xf32> to vector<2xf32>
    %30 = vector.shape_cast %29 : vector<2xf32> to vector<2x1xf32>
    %31 = vector.broadcast %30 : vector<2x1xf32> to vector<2x16xf32>
    %32 = arith.subf %28, %31 : vector<2x16xf32>
    %33 = math.exp %32 : vector<2x16xf32>
    %cst_22 = arith.constant dense<0.000000e+00> : vector<2xf32>
    %34 = vector.multi_reduction <add>, %33, %cst_22 [1] : vector<2x16xf32> to vector<2xf32>
    %35 = vector.shape_cast %34 : vector<2xf32> to vector<2x1xf32>
    %36 = vector.broadcast %35 : vector<2x1xf32> to vector<2x16xf32>
    %37 = arith.divf %33, %36 : vector<2x16xf32>
    %38 = vector.shape_cast %37 : vector<2x16xf32> to vector<2x1x16xf32>
    %39 = arith.truncf %38 : vector<2x1x16xf32> to vector<2x1x16xbf16>
    "tpu.trace_start"() <{level = 10 : i32, message = "bqp,bpf->bqf"}> : () -> ()
    %cst_23 = arith.constant dense<0.000000e+00> : vector<2x1x2048xf32>
    %40 = tpu.matmul %39, %0, %cst_23 {dimension_numbers = #tpu.dot_dimension_numbers<[2], [1], [1], [2], [0, 0, 0, 1, 1, 2], [0], [0]>} : vector<2x1x16xbf16>, vector<2x16x2048xbf16>, vector<2x1x2048xf32> -> vector<2x1x2048xf32>
    "tpu.trace_stop"() : () -> ()
    %41 = vector.shape_cast %40 : vector<2x1x2048xf32> to vector<2x2048xf32>
    %42 = arith.negf %15 : vector<2x2048xf32>
    %43 = math.exp %42 : vector<2x2048xf32>
    %cst_24 = arith.constant 1.000000e+00 : f32
    %44 = vector.broadcast %cst_24 : f32 to vector<2x2048xf32>
    %45 = arith.addf %44, %43 : vector<2x2048xf32>
    %46 = arith.divf %44, %45 : vector<2x2048xf32>
    %47 = arith.mulf %46, %41 : vector<2x2048xf32>
    %48 = arith.truncf %47 : vector<2x2048xf32> to vector<2x2048xbf16>
    %49 = tpu.concatenate %7, %48 in 1 : vector<2x128xbf16>, vector<2x2048xbf16> -> vector<2x2176xbf16>
    %c0_25 = arith.constant 0 : index
    %c0_26 = arith.constant 0 : index
    %50 = vector.load %arg11[%c0_25, %c0_26] : memref<2176x512xbf16, #tpu.memory_space<vmem>>, vector<2176x512xbf16>
    %cst_27 = arith.constant dense<0.000000e+00> : vector<2x512xf32>
    %51 = tpu.matmul %49, %50, %cst_27 {dimension_numbers = #tpu.dot_dimension_numbers<[1], [0], [0], [1], [0, 0, 1, 1], [], []>} : vector<2x2176xbf16>, vector<2176x512xbf16>, vector<2x512xf32> -> vector<2x512xf32>
    %52 = arith.addf %51, %16 : vector<2x512xf32>
    %c0_28 = arith.constant 0 : index
    %c0_29 = arith.constant 0 : index
    %53 = vector.load %arg12[%c0_28, %c0_29] : memref<1x512xf32, #tpu.memory_space<vmem>>, vector<1x512xf32>
    %54 = vector.broadcast %53 : vector<1x512xf32> to vector<2x512xf32>
    %55 = arith.addf %52, %54 : vector<2x512xf32>
    %56 = vector.extract_strided_slice %55 {offsets = [0, 0], sizes = [2, 128], strides = [1, 1]} : vector<2x512xf32> to vector<2x128xf32>
    %57 = arith.negf %56 : vector<2x128xf32>
    %58 = math.exp %57 : vector<2x128xf32>
    %cst_30 = arith.constant 1.000000e+00 : f32
    %59 = vector.broadcast %cst_30 : f32 to vector<2x128xf32>
    %60 = arith.addf %59, %58 : vector<2x128xf32>
    %61 = arith.divf %59, %60 : vector<2x128xf32>
    %62 = vector.extract_strided_slice %55 {offsets = [0, 128], sizes = [2, 128], strides = [1, 1]} : vector<2x512xf32> to vector<2x128xf32>
    %63 = arith.negf %62 : vector<2x128xf32>
    %64 = math.exp %63 : vector<2x128xf32>
    %cst_31 = arith.constant 1.000000e+00 : f32
    %65 = vector.broadcast %cst_31 : f32 to vector<2x128xf32>
    %66 = arith.addf %65, %64 : vector<2x128xf32>
    %67 = arith.divf %65, %66 : vector<2x128xf32>
    %68 = vector.extract_strided_slice %55 {offsets = [0, 256], sizes = [2, 128], strides = [1, 1]} : vector<2x512xf32> to vector<2x128xf32>
    %69 = math.tanh %68 : vector<2x128xf32>
    %70 = vector.extract_strided_slice %55 {offsets = [0, 384], sizes = [2, 128], strides = [1, 1]} : vector<2x512xf32> to vector<2x128xf32>
    %71 = arith.negf %70 : vector<2x128xf32>
    %72 = math.exp %71 : vector<2x128xf32>
    %cst_32 = arith.constant 1.000000e+00 : f32
    %73 = vector.broadcast %cst_32 : f32 to vector<2x128xf32>
    %74 = arith.addf %73, %72 : vector<2x128xf32>
    %75 = arith.divf %73, %74 : vector<2x128xf32>
    %76 = arith.mulf %67, %5 : vector<2x128xf32>
    %77 = arith.mulf %61, %69 : vector<2x128xf32>
    %78 = arith.addf %76, %77 : vector<2x128xf32>
    %79 = math.tanh %78 : vector<2x128xf32>
    %80 = arith.mulf %75, %79 : vector<2x128xf32>
    %81 = arith.truncf %80 : vector<2x128xf32> to vector<2x128xbf16>
    %c0_33 = arith.constant 0 : index
    %c0_34 = arith.constant 0 : index
    %82 = vector.load %arg13[%c0_33, %c0_34] : memref<128x256xbf16, #tpu.memory_space<vmem>>, vector<128x256xbf16>
    %cst_35 = arith.constant dense<0.000000e+00> : vector<2x256xf32>
    %83 = tpu.matmul %81, %82, %cst_35 {dimension_numbers = #tpu.dot_dimension_numbers<[1], [0], [0], [1], [0, 0, 1, 1], [], []>} : vector<2x128xbf16>, vector<128x256xbf16>, vector<2x256xf32> -> vector<2x256xf32>
    %c0_36 = arith.constant 0 : index
    %c0_37 = arith.constant 0 : index
    %84 = vector.load %arg14[%c0_36, %c0_37] : memref<1x256xf32, #tpu.memory_space<vmem>>, vector<1x256xf32>
    %85 = vector.broadcast %84 : vector<1x256xf32> to vector<2x256xf32>
    %86 = arith.addf %83, %85 : vector<2x256xf32>
    %c0_38 = arith.constant 0 : index
    %c0_39 = arith.constant 0 : index
    %c0_40 = arith.constant 0 : index
    %87 = vector.load %arg15[%c0_38, %c0_39, %c0_40] : memref<1x2x256xf32, #tpu.memory_space<vmem>>, vector<1x2x256xf32>
    %88 = vector.shape_cast %87 : vector<1x2x256xf32> to vector<2x256xf32>
    %89 = vector.shape_cast %86 : vector<2x256xf32> to vector<1x2x256xf32>
    tpu.vector_store %arg15[%c0_38, %c0_39, %c0_40], %89 {strides = array<i32>} : memref<1x2x256xf32, #tpu.memory_space<vmem>>, vector<1x2x256xf32>,
    %cst_41 = arith.constant 0.000000e+00 : f32
    %90 = vector.broadcast %cst_41 : f32 to vector<2x112xf32>
    %91 = tpu.concatenate %37, %90 in 1 : vector<2x16xf32>, vector<2x112xf32> -> vector<2x128xf32>
    %c0_42 = arith.constant 0 : index
    %c0_43 = arith.constant 0 : index
    %c0_44 = arith.constant 0 : index
    %92 = vector.load %arg16[%c0_42, %c0_43, %c0_44] : memref<1x2x128xf32, #tpu.memory_space<vmem>>, vector<1x2x128xf32>
    %93 = vector.shape_cast %92 : vector<1x2x128xf32> to vector<2x128xf32>
    %94 = vector.shape_cast %91 : vector<2x128xf32> to vector<1x2x128xf32>
    tpu.vector_store %arg16[%c0_42, %c0_43, %c0_44], %94 {strides = array<i32>} : memref<1x2x128xf32, #tpu.memory_space<vmem>>, vector<1x2x128xf32>,
    %c0_45 = arith.constant 0 : index
    %c0_46 = arith.constant 0 : index
    %95 = vector.load %arg17[%c0_45, %c0_46] : memref<2x128xf32, #tpu.memory_space<vmem>>, vector<2x128xf32>
    tpu.vector_store %arg17[%c0_45, %c0_46], %80 {strides = array<i32>} : memref<2x128xf32, #tpu.memory_space<vmem>>, vector<2x128xf32>,
    %c0_47 = arith.constant 0 : index
    %c0_48 = arith.constant 0 : index
    %96 = vector.load %arg18[%c0_47, %c0_48] : memref<2x128xf32, #tpu.memory_space<vmem>>, vector<2x128xf32>
    tpu.vector_store %arg18[%c0_47, %c0_48], %78 {strides = array<i32>} : memref<2x128xf32, #tpu.memory_space<vmem>>, vector<2x128xf32>,
    return
  }
  func.func @transform_0(%arg0: i32, %arg1: i32) -> (i32, i32, i32) {
    %c0_i32 = arith.constant 0 : i32
    %c0_i32_0 = arith.constant 0 : i32
    %c0_i32_1 = arith.constant 0 : i32
    return %arg0, %c0_i32, %c0_i32_0 : i32, i32, i32
  }
  func.func @transform_1(%arg0: i32, %arg1: i32) -> (i32, i32, i32) {
    %c0_i32 = arith.constant 0 : i32
    %c0_i32_0 = arith.constant 0 : i32
    return %arg1, %arg0, %c0_i32 : i32, i32, i32
  }
  func.func @transform_2(%arg0: i32, %arg1: i32) -> (i32, i32) {
    %c0_i32 = arith.constant 0 : i32
    %c0_i32_0 = arith.constant 0 : i32
    %c0_i32_1 = arith.constant 0 : i32
    return %c0_i32, %c0_i32_0 : i32, i32
  }
  func.func @transform_3(%arg0: i32, %arg1: i32) -> (i32, i32) {
    %c0_i32 = arith.constant 0 : i32
    %c0_i32_0 = arith.constant 0 : i32
    %c0_i32_1 = arith.constant 0 : i32
    return %c0_i32, %c0_i32_0 : i32, i32
  }
  func.func @transform_4(%arg0: i32, %arg1: i32) -> (i32, i32) {
    %c0_i32 = arith.constant 0 : i32
    %c0_i32_0 = arith.constant 0 : i32
    %c0_i32_1 = arith.constant 0 : i32
    return %c0_i32, %c0_i32_0 : i32, i32
  }
  func.func @transform_5(%arg0: i32, %arg1: i32) -> (i32, i32) {
    %c0_i32 = arith.constant 0 : i32
    %c0_i32_0 = arith.constant 0 : i32
    %c0_i32_1 = arith.constant 0 : i32
    return %c0_i32, %c0_i32_0 : i32, i32
  }
  func.func @transform_6(%arg0: i32, %arg1: i32) -> (i32, i32) {
    %c0_i32 = arith.constant 0 : i32
    %c0_i32_0 = arith.constant 0 : i32
    %c0_i32_1 = arith.constant 0 : i32
    return %c0_i32, %c0_i32_0 : i32, i32
  }
  func.func @transform_7(%arg0: i32, %arg1: i32) -> (i32, i32) {
    %c0_i32 = arith.constant 0 : i32
    %c0_i32_0 = arith.constant 0 : i32
    %c0_i32_1 = arith.constant 0 : i32
    return %c0_i32, %c0_i32_0 : i32, i32
  }
  func.func @transform_8(%arg0: i32, %arg1: i32) -> (i32, i32) {
    %c0_i32 = arith.constant 0 : i32
    %c0_i32_0 = arith.constant 0 : i32
    %c0_i32_1 = arith.constant 0 : i32
    return %c0_i32, %c0_i32_0 : i32, i32
  }
  func.func @transform_9(%arg0: i32, %arg1: i32) -> (i32, i32) {
    %c0_i32 = arith.constant 0 : i32
    %c0_i32_0 = arith.constant 0 : i32
    %c0_i32_1 = arith.constant 0 : i32
    return %c0_i32, %c0_i32_0 : i32, i32
  }
  func.func @transform_10(%arg0: i32, %arg1: i32) -> (i32, i32) {
    %c0_i32 = arith.constant 0 : i32
    %c0_i32_0 = arith.constant 0 : i32
    %c0_i32_1 = arith.constant 0 : i32
    return %c0_i32, %c0_i32_0 : i32, i32
  }
  func.func @transform_11(%arg0: i32, %arg1: i32) -> (i32, i32) {
    %c0_i32 = arith.constant 0 : i32
    %c0_i32_0 = arith.constant 0 : i32
    %c0_i32_1 = arith.constant 0 : i32
    return %c0_i32, %c0_i32_0 : i32, i32
  }
  func.func @transform_12(%arg0: i32, %arg1: i32) -> (i32, i32) {
    %c0_i32 = arith.constant 0 : i32
    %c0_i32_0 = arith.constant 0 : i32
    %c0_i32_1 = arith.constant 0 : i32
    return %c0_i32, %c0_i32_0 : i32, i32
  }
  func.func @transform_13(%arg0: i32, %arg1: i32) -> (i32, i32, i32) {
    %c0_i32 = arith.constant 0 : i32
    %c0_i32_0 = arith.constant 0 : i32
    return %arg1, %arg0, %c0_i32 : i32, i32, i32
  }
  func.func @transform_14(%arg0: i32, %arg1: i32) -> (i32, i32, i32) {
    %c0_i32 = arith.constant 0 : i32
    %c0_i32_0 = arith.constant 0 : i32
    return %arg1, %arg0, %c0_i32 : i32, i32, i32
  }
}

</mosaic_0001>

<bundles_post_ra>
// kernel: attention_caption_generator_forward.2
= control target key start
LH: loop header
LB: loop body
LE: loop exit
PB: predicated region body
PF: predicated region fallthrough
CT: control target
= control target key end

     0   :  { %v27_v0 = vlaneseq  ;;  %v1059_v2 = vmov 1983009808   ;;  %v1060_v4 = vmov 0   ;;  %vm196_vm0 = vcmask 1041408   ;;  %s1396_s1 = inlined_call_operand.vmem [shape: bf16[4,2048], index: 1, kind: input, shape index: {}]   ;;  %s1397_s0 = inlined_call_operand.vmem [shape: bf16[32,4], index: 0, kind: input, shape index: {}]   ;;  %s1398_s2 = inlined_call_operand.vmem [shape: f32[1,2048], index: 2, kind: input, shape index: {}]   ;;  %s1399_s3 = inlined_call_operand.vmem [shape: bf16[32,2048], index: 3, kind: output, shape index: {}]  }
   0x1   :  { %v19_v1 = vld [vmem:[%s1396_s1] sm:$0xff]  ;;  %v123_v3 = vunpack.c.l.s4 %v1059_v2  ;;  %277 = vmatprep.mubr.bf16.mxu0 %v1060_v4  ;;  %330 = vmatprep.mubr.bf16.mxu1 %v1060_v4  ;;  %v20_v6 = vld [vmem:[%s1396_s1 + $0x8] sm:$0xff]  ;;  %v21_v10 = vld [vmem:[%s1396_s1 + $0x10] sm:$0xff]  ;;  %vm189_vm1 = vcmask 31744  }
   0x2   :  { %v1086_v5 = vshrl.u32 %v27_v0, 7  ;;  %v121_v8 = vcombine.high %v19_v1, %v19_v1  ;;  %v138_v9 = vcombine.high %v20_v6, %v20_v6  ;;  %v155_v12 = vcombine.high %v21_v10, %v21_v10  ;;  %v1054_v25 = vld [vmem:[%s1397_s0] sm:$0xff]   ;;  %v1056_v30 = vld [vmem:[%s1397_s0 + $0x8] sm:$0xff]   ;;  %v22_v31 = vld [vmem:[%s1396_s1 + $0x18] sm:$0xff] }
   0x3   :  { %v124_v7 = vunpack.c.0.s8 %v123_v3  ;;  %v172_v32 = vcombine.high %v22_v31, %v22_v31  ;;  %v1155_v43 = vld [vmem:[%s1398_s2] sm:$0xff] }
   0x4   :  { %v29_v41 = vsub.s32 0, %v1086_v5  ;;  %v37_v42 = vsub.s32 2, %v1086_v5  ;;  %v33_v44 = vsub.s32 1, %v1086_v5  ;;  %v41_v45 = vsub.s32 3, %v1086_v5 }
   0x5   :  { %v127_v11 = vsub.s32 %v124_v7, %v1086_v5 }
   0x6   :  { %v30_v46 = vrot.slane %v1155_v43, %v29_v41  ;;  %v38_v47 = vrot.slane %v1155_v43, %v37_v42  ;;  %v1168_v48 = vrot.slane %v1155_v43, %v33_v44  ;;  %v1173_v49 = vrot.slane %v1155_v43, %v41_v45 }
   0x7   :  { %v128_v13 = vrot.slane %v19_v1, %v127_v11  ;;  %v135_v14 = vrot.slane %v121_v8, %v127_v11  ;;  %v145_v15 = vrot.slane %v20_v6, %v127_v11  ;;  %v152_v16 = vrot.slane %v138_v9, %v127_v11 }
   0x8   :  { %v162_v23 = vrot.slane %v21_v10, %v127_v11  ;;  %v169_v24 = vrot.slane %v155_v12, %v127_v11  ;;  %v179_v33 = vrot.slane %v22_v31, %v127_v11  ;;  %v186_v34 = vrot.slane %v172_v32, %v127_v11 }
   0x9   :  { %v136_v17 = vcombine.high %v128_v13, %v128_v13  ;;  %v137_v18 = vcombine.high %v135_v14, %v135_v14  ;;  %v198_v19 = vsel %vm196_vm0, %v128_v13, 0  ;;  %v204_v20 = vsel %vm196_vm0, %v135_v14, 0 }
   0xa   :  { %v153_v21 = vcombine.high %v145_v15, %v145_v15  ;;  %v154_v22 = vcombine.high %v152_v16, %v152_v16  ;;  %v210_v26 = vsel %vm196_vm0, %v145_v15, 0  ;;  %v216_v27 = vsel %vm196_vm0, %v152_v16, 0 }
   0xb   :  { %963 = vmatprep.subr.msk.bf16.mxu0 %vm196_vm0, %v136_v17  ;;  %966 = vmatprep.subr.msk.bf16.mxu1 %vm196_vm0, %v137_v18  ;;  %v170_v28 = vcombine.high %v162_v23, %v162_v23  ;;  %v171_v29 = vcombine.high %v169_v24, %v169_v24  ;;  %v222_v35 = vsel %vm196_vm0, %v162_v23, 0  ;;  %v228_v36 = vsel %vm196_vm0, %v169_v24, 0 }
   0xc   :  { %260 = vmatpush1.bf16.msra.mxu0 %v198_v19  ;;  %313 = vmatpush1.bf16.msra.mxu1 %v204_v20  ;;  %v187_v37 = vcombine.high %v179_v33, %v179_v33  ;;  %v188_v38 = vcombine.high %v186_v34, %v186_v34  ;;  %v234_v39 = vsel %vm196_vm0, %v179_v33, 0  ;;  %v240_v40 = vsel %vm196_vm0, %v186_v34, 0 }
   0xd   :  { %969 = vmatprep.subr.msk.bf16.mxu0 %vm196_vm0, %v153_v21  ;;  %972 = vmatprep.subr.msk.bf16.mxu1 %vm196_vm0, %v154_v22  ;;  %v45_v11 = vsub.s32 4, %v1086_v5  ;;  %v53_v12 = vsub.s32 6, %v1086_v5  ;;  %v49_v23 = vsub.s32 5, %v1086_v5  ;;  %v57_v24 = vsub.s32 7, %v1086_v5 }
   0xf   :  { %964 = vmatmul.mubr.msk.bf16.vlgmr.msra.gmra.mxu0 %vm189_vm1, %v1054_v25  ;;  %967 = vmatmul.mubr.msk.bf16.vlgmr.msra.gmra.mxu1 %vm189_vm1, %v1054_v25 }
  0x10   :  { %366 = vmatpush1.bf16.msra.mxu0 %v210_v26  ;;  %419 = vmatpush1.bf16.msra.mxu1 %v216_v27 }
  0x11   :  { %287 = vmatprep.mubr.bf16.mxu0 %v1060_v4  ;;  %340 = vmatprep.mubr.bf16.mxu1 %v1060_v4 }
  0x12   :  { %975 = vmatprep.subr.msk.bf16.mxu0 %vm196_vm0, %v170_v28  ;;  %978 = vmatprep.subr.msk.bf16.mxu1 %vm196_vm0, %v171_v29  ;;  %v1194_v29 = vrot.slane %v1155_v43, %v45_v11 }
  0x17   :  { %965 = vmatmul.mubr.msk.bf16.gmra.mxu0 %vm189_vm1, %v1056_v30  ;;  %968 = vmatmul.mubr.msk.bf16.gmra.mxu1 %vm189_vm1, %v1056_v30 }
  0x18   :  { %383 = vmatprep.mubr.bf16.mxu0 %v1060_v4  ;;  %436 = vmatprep.mubr.bf16.mxu1 %v1060_v4 }
  0x1f   :  { %970 = vmatmul.mubr.msk.bf16.vlgmr.msra.gmra.mxu0 %vm189_vm1, %v1054_v25  ;;  %973 = vmatmul.mubr.msk.bf16.vlgmr.msra.gmra.mxu1 %vm189_vm1, %v1054_v25 }
  0x20   :  { %472 = vmatpush1.bf16.msra.mxu0 %v222_v35  ;;  %525 = vmatpush1.bf16.msra.mxu1 %v228_v36 }
  0x21   :  { %393 = vmatprep.mubr.bf16.mxu0 %v1060_v4  ;;  %446 = vmatprep.mubr.bf16.mxu1 %v1060_v4 }
  0x22   :  { %981 = vmatprep.subr.msk.bf16.mxu0 %vm196_vm0, %v187_v37  ;;  %984 = vmatprep.subr.msk.bf16.mxu1 %vm196_vm0, %v188_v38 }
  0x27   :  { %971 = vmatmul.mubr.msk.bf16.gmra.mxu0 %vm189_vm1, %v1056_v30  ;;  %974 = vmatmul.mubr.msk.bf16.gmra.mxu1 %vm189_vm1, %v1056_v30 }
  0x28   :  { %489 = vmatprep.mubr.bf16.mxu0 %v1060_v4  ;;  %542 = vmatprep.mubr.bf16.mxu1 %v1060_v4 }
  0x2f   :  { %976 = vmatmul.mubr.msk.bf16.vlgmr.msra.gmra.mxu0 %vm189_vm1, %v1054_v25  ;;  %979 = vmatmul.mubr.msk.bf16.vlgmr.msra.gmra.mxu1 %vm189_vm1, %v1054_v25 }
  0x30   :  { %578 = vmatpush1.bf16.msra.mxu0 %v234_v39  ;;  %631 = vmatpush1.bf16.msra.mxu1 %v240_v40 }
  0x31   :  { %499 = vmatprep.mubr.bf16.mxu0 %v1060_v4  ;;  %552 = vmatprep.mubr.bf16.mxu1 %v1060_v4 }
  0x37   :  { %977 = vmatmul.mubr.msk.bf16.gmra.mxu0 %vm189_vm1, %v1056_v30  ;;  %980 = vmatmul.mubr.msk.bf16.gmra.mxu1 %vm189_vm1, %v1056_v30 }
  0x38   :  { %595 = vmatprep.mubr.bf16.mxu0 %v1060_v4  ;;  %648 = vmatprep.mubr.bf16.mxu1 %v1060_v4 }
  0x3f   :  { %982 = vmatmul.mubr.msk.bf16.vlgmr.msra.gmra.mxu0 %vm189_vm1, %v1054_v25  ;;  %985 = vmatmul.mubr.msk.bf16.vlgmr.msra.gmra.mxu1 %vm189_vm1, %v1054_v25 }
  0x40   :  { %605 = vmatprep.mubr.bf16.mxu0 %v1060_v4  ;;  %658 = vmatprep.mubr.bf16.mxu1 %v1060_v4 }
  0x47   :  { %983 = vmatmul.mubr.msk.bf16.gmra.mxu0 %vm189_vm1, %v1056_v30  ;;  %986 = vmatmul.mubr.msk.bf16.gmra.mxu1 %vm189_vm1, %v1056_v30  ;;  %v1199_v30 = vrot.slane %v1155_v43, %v53_v12 }
  0xcf   :  { %v279_v50 = vpop.f32.mrf.mxu0  ;;  %v332_v51 = vpop.f32.mrf.mxu1 }
  0xd0   :  { %v280_v52 = vadd.f32 %v279_v50, %v30_v46  ;;  %v333_v53 = vadd.f32 %v332_v51, %v38_v47  ;;  %v1210_v50 = vrot.slane %v1155_v43, %v49_v23  ;;  %v1215_v51 = vrot.slane %v1155_v43, %v57_v24 }
  0xd1   :  { %v281_v54 = vpop.f32.mrf.mxu0  ;;  %v334_v55 = vpop.f32.mrf.mxu1 }
  0xd2   :  { %v282_v56 = vadd.f32 %v281_v54, %v1168_v48  ;;  %v335_v57 = vadd.f32 %v334_v55, %v1173_v49  ;;  %v669_v60 = vmax.f32 %v280_v52, 0.0  ;;  %v671_v61 = vmax.f32 %v333_v53, 0.0 }
  0xd3   :  { %v283_v58 = vpop.f32.mrf.mxu0  ;;  %v336_v59 = vpop.f32.mrf.mxu1 }
  0xd4   :  { %v670_v62 = vmax.f32 %v282_v56, 0.0  ;;  %v672_v63 = vmax.f32 %v335_v57, 0.0  ;;  %v284_v0 = vadd.f32 %v283_v58, %v30_v46  ;;  %v337_v1 = vadd.f32 %v336_v59, %v38_v47 }
  0xd5   :  { %v285_v2 = vpop.f32.mrf.mxu0  ;;  %v338_v3 = vpop.f32.mrf.mxu1 }
  0xd6   :  { %v1019_v4 = vpack.c.bf16 %v670_v62, %v669_v60  ;;  %v1020_v6 = vpack.c.bf16 %v672_v63, %v671_v61  ;;  %v286_v7 = vadd.f32 %v285_v2, %v1168_v48  ;;  %v339_v8 = vadd.f32 %v338_v3, %v1173_v49 }
  0xd7   :  { %v289_v9 = vpop.f32.mrf.mxu0  ;;  %v342_v10 = vpop.f32.mrf.mxu1  ;;  %v685_v15 = vmax.f32 %v284_v0, 0.0  ;;  %v687_v16 = vmax.f32 %v337_v1, 0.0 }
  0xd8   :  { %925 = vst [vmem:[%s1399_s3] sm:$0xff] %v1019_v4  ;;  %926 = vst [vmem:[%s1399_s3 + $0x8] sm:$0xff] %v1020_v6  ;;  %v290_v13 = vadd.f32 %v289_v9, %v30_v46  ;;  %v343_v14 = vadd.f32 %v342_v10, %v38_v47  ;;  %v686_v17 = vmax.f32 %v286_v7, 0.0  ;;  %v688_v18 = vmax.f32 %v339_v8, 0.0 }
  0xd9   :  { %v291_v19 = vpop.f32.mrf.mxu0  ;;  %v344_v20 = vpop.f32.mrf.mxu1 }
  0xda   :  { %v292_v21 = vadd.f32 %v291_v19, %v1168_v48  ;;  %v345_v22 = vadd.f32 %v344_v20, %v1173_v49  ;;  %v1027_v25 = vpack.c.bf16 %v686_v17, %v685_v15  ;;  %v1028_v26 = vpack.c.bf16 %v688_v18, %v687_v16  ;;  %v1250_v20 = vld [vmem:[%s1398_s2 + $0x8] sm:$0xff] }
  0xdb   :  { %v293_v27 = vpop.f32.mrf.mxu0  ;;  %v346_v28 = vpop.f32.mrf.mxu1  ;;  %v701_v31 = vmax.f32 %v290_v13, 0.0  ;;  %v703_v32 = vmax.f32 %v343_v14, 0.0 }
  0xdc   :  { %v702_v33 = vmax.f32 %v292_v21, 0.0  ;;  %v704_v34 = vmax.f32 %v345_v22, 0.0  ;;  %933 = vst [vmem:[%s1399_s3 + $0x40] sm:$0xff] %v1027_v25  ;;  %934 = vst [vmem:[%s1399_s3 + $0x48] sm:$0xff] %v1028_v26  ;;  %v294_v35 = vadd.f32 %v293_v27, %v30_v46  ;;  %v347_v36 = vadd.f32 %v346_v28, %v38_v47 }
  0xdd   :  { %v295_v37 = vpop.f32.mrf.mxu0  ;;  %v348_v38 = vpop.f32.mrf.mxu1 }
  0xde   :  { %v1035_v39 = vpack.c.bf16 %v702_v33, %v701_v31  ;;  %v1036_v40 = vpack.c.bf16 %v704_v34, %v703_v32  ;;  %v296_v52 = vadd.f32 %v295_v37, %v1168_v48  ;;  %v349_v53 = vadd.f32 %v348_v38, %v1173_v49 }
  0xdf   :  { %v385_v46 = vpop.f32.mrf.mxu0  ;;  %v438_v47 = vpop.f32.mrf.mxu1  ;;  %v717_v43 = vmax.f32 %v294_v35, 0.0  ;;  %v719_v56 = vmax.f32 %v347_v36, 0.0  ;;  %v1257_v37 = vrot.slane %v1250_v20, %v29_v41  ;;  %v1262_v38 = vrot.slane %v1250_v20, %v37_v42 }
  0xe0   :  { %941 = vst [vmem:[%s1399_s3 + $0x80] sm:$0xff] %v1035_v39  ;;  %942 = vst [vmem:[%s1399_s3 + $0x88] sm:$0xff] %v1036_v40  ;;  %v386_v54 = vadd.f32 %v385_v46, %v1194_v29  ;;  %v439_v55 = vadd.f32 %v438_v47, %v1199_v30  ;;  %v718_v57 = vmax.f32 %v296_v52, 0.0  ;;  %v720_v48 = vmax.f32 %v349_v53, 0.0 }
  0xe1   :  { %v387_v58 = vpop.f32.mrf.mxu0  ;;  %v440_v49 = vpop.f32.mrf.mxu1 }
  0xe2   :  { %v388_v59 = vadd.f32 %v387_v58, %v1210_v50  ;;  %v441_v60 = vadd.f32 %v440_v49, %v1215_v51  ;;  %v1043_v61 = vpack.c.bf16 %v718_v57, %v717_v43  ;;  %v1044_v62 = vpack.c.bf16 %v720_v48, %v719_v56 }
  0xe3   :  { %v389_v63 = vpop.f32.mrf.mxu0  ;;  %v442_v0 = vpop.f32.mrf.mxu1  ;;  %v673_v1 = vmax.f32 %v386_v54, 0.0  ;;  %v675_v2 = vmax.f32 %v439_v55, 0.0  ;;  %v1275_v43 = vrot.slane %v1250_v20, %v33_v44  ;;  %v1280_v56 = vrot.slane %v1250_v20, %v41_v45 }
  0xe4   :  { %v674_v3 = vmax.f32 %v388_v59, 0.0  ;;  %v676_v4 = vmax.f32 %v441_v60, 0.0  ;;  %949 = vst [vmem:[%s1399_s3 + $0xc0] sm:$0xff] %v1043_v61  ;;  %950 = vst [vmem:[%s1399_s3 + $0xc8] sm:$0xff] %v1044_v62  ;;  %v390_v6 = vadd.f32 %v389_v63, %v1194_v29  ;;  %v443_v7 = vadd.f32 %v442_v0, %v1199_v30 }
  0xe5   :  { %v391_v8 = vpop.f32.mrf.mxu0  ;;  %v444_v9 = vpop.f32.mrf.mxu1 }
  0xe6   :  { %v1021_v10 = vpack.c.bf16 %v674_v3, %v673_v1  ;;  %v1022_v13 = vpack.c.bf16 %v676_v4, %v675_v2  ;;  %v392_v14 = vadd.f32 %v391_v8, %v1210_v50  ;;  %v445_v15 = vadd.f32 %v444_v9, %v1215_v51 }
  0xe7   :  { %v395_v16 = vpop.f32.mrf.mxu0  ;;  %v448_v17 = vpop.f32.mrf.mxu1  ;;  %v689_v21 = vmax.f32 %v390_v6, 0.0  ;;  %v691_v22 = vmax.f32 %v443_v7, 0.0 }
  0xe8   :  { %927 = vst [vmem:[%s1399_s3 + $0x10] sm:$0xff] %v1021_v10  ;;  %928 = vst [vmem:[%s1399_s3 + $0x18] sm:$0xff] %v1022_v13  ;;  %v396_v18 = vadd.f32 %v395_v16, %v1194_v29  ;;  %v449_v19 = vadd.f32 %v448_v17, %v1199_v30  ;;  %v690_v25 = vmax.f32 %v392_v14, 0.0  ;;  %v692_v26 = vmax.f32 %v445_v15, 0.0 }
  0xe9   :  { %v397_v27 = vpop.f32.mrf.mxu0  ;;  %v450_v28 = vpop.f32.mrf.mxu1 }
  0xea   :  { %v398_v31 = vadd.f32 %v397_v27, %v1210_v50  ;;  %v451_v32 = vadd.f32 %v450_v28, %v1215_v51  ;;  %v1029_v33 = vpack.c.bf16 %v690_v25, %v689_v21  ;;  %v1030_v34 = vpack.c.bf16 %v692_v26, %v691_v22 }
  0xeb   :  { %v399_v35 = vpop.f32.mrf.mxu0  ;;  %v452_v36 = vpop.f32.mrf.mxu1  ;;  %v705_v39 = vmax.f32 %v396_v18, 0.0  ;;  %v707_v40 = vmax.f32 %v449_v19, 0.0 }
  0xec   :  { %v706_v52 = vmax.f32 %v398_v31, 0.0  ;;  %v708_v53 = vmax.f32 %v451_v32, 0.0  ;;  %935 = vst [vmem:[%s1399_s3 + $0x50] sm:$0xff] %v1029_v33  ;;  %936 = vst [vmem:[%s1399_s3 + $0x58] sm:$0xff] %v1030_v34  ;;  %v400_v41 = vadd.f32 %v399_v35, %v1194_v29  ;;  %v453_v46 = vadd.f32 %v452_v36, %v1199_v30 }
  0xed   :  { %v401_v47 = vpop.f32.mrf.mxu0  ;;  %v454_v54 = vpop.f32.mrf.mxu1 }
  0xee   :  { %v1037_v42 = vpack.c.bf16 %v706_v52, %v705_v39  ;;  %v1038_v55 = vpack.c.bf16 %v708_v53, %v707_v40  ;;  %v402_v57 = vadd.f32 %v401_v47, %v1210_v50  ;;  %v455_v29 = vadd.f32 %v454_v54, %v1215_v51 }
  0xef   :  { %v491_v48 = vpop.f32.mrf.mxu0  ;;  %v544_v30 = vpop.f32.mrf.mxu1  ;;  %v721_v45 = vmax.f32 %v400_v41, 0.0  ;;  %v723_v49 = vmax.f32 %v453_v46, 0.0  ;;  %v1317_v52 = vrot.slane %v1250_v20, %v45_v11  ;;  %v1322_v53 = vrot.slane %v1250_v20, %v53_v12 }
  0xf0   :  { %943 = vst [vmem:[%s1399_s3 + $0x90] sm:$0xff] %v1037_v42  ;;  %944 = vst [vmem:[%s1399_s3 + $0x98] sm:$0xff] %v1038_v55  ;;  %v492_v44 = vadd.f32 %v491_v48, %v1257_v37  ;;  %v545_v58 = vadd.f32 %v544_v30, %v1262_v38  ;;  %v722_v59 = vmax.f32 %v402_v57, 0.0  ;;  %v724_v50 = vmax.f32 %v455_v29, 0.0 }
  0xf1   :  { %v493_v60 = vpop.f32.mrf.mxu0  ;;  %v546_v51 = vpop.f32.mrf.mxu1  ;;  %v1335_v48 = vrot.slane %v1250_v20, %v49_v23  ;;  %v1340_v30 = vrot.slane %v1250_v20, %v57_v24 }
  0xf2   :  { %v494_v61 = vadd.f32 %v493_v60, %v1275_v43  ;;  %v547_v62 = vadd.f32 %v546_v51, %v1280_v56  ;;  %v1045_v63 = vpack.c.bf16 %v722_v59, %v721_v45  ;;  %v1046_v0 = vpack.c.bf16 %v724_v50, %v723_v49 }
  0xf3   :  { %v495_v1 = vpop.f32.mrf.mxu0  ;;  %v548_v2 = vpop.f32.mrf.mxu1  ;;  %v677_v3 = vmax.f32 %v492_v44, 0.0  ;;  %v679_v4 = vmax.f32 %v545_v58, 0.0 }
  0xf4   :  { %v678_v6 = vmax.f32 %v494_v61, 0.0  ;;  %v680_v7 = vmax.f32 %v547_v62, 0.0  ;;  %951 = vst [vmem:[%s1399_s3 + $0xd0] sm:$0xff] %v1045_v63  ;;  %952 = vst [vmem:[%s1399_s3 + $0xd8] sm:$0xff] %v1046_v0  ;;  %v496_v8 = vadd.f32 %v495_v1, %v1257_v37  ;;  %v549_v9 = vadd.f32 %v548_v2, %v1262_v38 }
  0xf5   :  { %v497_v10 = vpop.f32.mrf.mxu0  ;;  %v550_v13 = vpop.f32.mrf.mxu1 }
  0xf6   :  { %v1023_v14 = vpack.c.bf16 %v678_v6, %v677_v3  ;;  %v1024_v15 = vpack.c.bf16 %v680_v7, %v679_v4  ;;  %v498_v16 = vadd.f32 %v497_v10, %v1275_v43  ;;  %v551_v17 = vadd.f32 %v550_v13, %v1280_v56 }
  0xf7   :  { %v501_v18 = vpop.f32.mrf.mxu0  ;;  %v554_v19 = vpop.f32.mrf.mxu1  ;;  %v693_v25 = vmax.f32 %v496_v8, 0.0  ;;  %v695_v26 = vmax.f32 %v549_v9, 0.0 }
  0xf8   :  { %929 = vst [vmem:[%s1399_s3 + $0x20] sm:$0xff] %v1023_v14  ;;  %930 = vst [vmem:[%s1399_s3 + $0x28] sm:$0xff] %v1024_v15  ;;  %v502_v21 = vadd.f32 %v501_v18, %v1257_v37  ;;  %v555_v22 = vadd.f32 %v554_v19, %v1262_v38  ;;  %v694_v27 = vmax.f32 %v498_v16, 0.0  ;;  %v696_v28 = vmax.f32 %v551_v17, 0.0 }
  0xf9   :  { %v503_v31 = vpop.f32.mrf.mxu0  ;;  %v556_v32 = vpop.f32.mrf.mxu1 }
  0xfa   :  { %v504_v33 = vadd.f32 %v503_v31, %v1275_v43  ;;  %v557_v34 = vadd.f32 %v556_v32, %v1280_v56  ;;  %v1031_v35 = vpack.c.bf16 %v694_v27, %v693_v25  ;;  %v1032_v36 = vpack.c.bf16 %v696_v28, %v695_v26 }
  0xfb   :  { %v505_v39 = vpop.f32.mrf.mxu0  ;;  %v558_v40 = vpop.f32.mrf.mxu1  ;;  %v709_v41 = vmax.f32 %v502_v21, 0.0  ;;  %v711_v46 = vmax.f32 %v555_v22, 0.0 }
  0xfc   :  { %v710_v47 = vmax.f32 %v504_v33, 0.0  ;;  %v712_v54 = vmax.f32 %v557_v34, 0.0  ;;  %937 = vst [vmem:[%s1399_s3 + $0x60] sm:$0xff] %v1031_v35  ;;  %938 = vst [vmem:[%s1399_s3 + $0x68] sm:$0xff] %v1032_v36  ;;  %v506_v11 = vadd.f32 %v505_v39, %v1257_v37  ;;  %v559_v42 = vadd.f32 %v558_v40, %v1262_v38 }
  0xfd   :  { %v507_v55 = vpop.f32.mrf.mxu0  ;;  %v560_v57 = vpop.f32.mrf.mxu1 }
  0xfe   :  { %v1039_v12 = vpack.c.bf16 %v710_v47, %v709_v41  ;;  %v1040_v29 = vpack.c.bf16 %v712_v54, %v711_v46  ;;  %v508_v44 = vadd.f32 %v507_v55, %v1275_v43  ;;  %v561_v37 = vadd.f32 %v560_v57, %v1280_v56 }
  0xff   :  { %v597_v58 = vpop.f32.mrf.mxu0  ;;  %v650_v38 = vpop.f32.mrf.mxu1  ;;  %v725_v24 = vmax.f32 %v506_v11, 0.0  ;;  %v727_v20 = vmax.f32 %v559_v42, 0.0 }
 0x100   :  { %945 = vst [vmem:[%s1399_s3 + $0xa0] sm:$0xff] %v1039_v12  ;;  %946 = vst [vmem:[%s1399_s3 + $0xa8] sm:$0xff] %v1040_v29  ;;  %v598_v23 = vadd.f32 %v597_v58, %v1317_v52  ;;  %v651_v5 = vadd.f32 %v650_v38, %v1322_v53  ;;  %v726_v45 = vmax.f32 %v508_v44, 0.0  ;;  %v728_v43 = vmax.f32 %v561_v37, 0.0 }
 0x101   :  { %v599_v49 = vpop.f32.mrf.mxu0  ;;  %v652_v56 = vpop.f32.mrf.mxu1 }
 0x102   :  { %v600_v59 = vadd.f32 %v599_v49, %v1335_v48  ;;  %v653_v50 = vadd.f32 %v652_v56, %v1340_v30  ;;  %v1047_v60 = vpack.c.bf16 %v726_v45, %v725_v24  ;;  %v1048_v51 = vpack.c.bf16 %v728_v43, %v727_v20 }
 0x103   :  { %v601_v61 = vpop.f32.mrf.mxu0  ;;  %v654_v62 = vpop.f32.mrf.mxu1  ;;  %v681_v63 = vmax.f32 %v598_v23, 0.0  ;;  %v683_v0 = vmax.f32 %v651_v5, 0.0 }
 0x104   :  { %v682_v1 = vmax.f32 %v600_v59, 0.0  ;;  %v684_v2 = vmax.f32 %v653_v50, 0.0  ;;  %953 = vst [vmem:[%s1399_s3 + $0xe0] sm:$0xff] %v1047_v60  ;;  %954 = vst [vmem:[%s1399_s3 + $0xe8] sm:$0xff] %v1048_v51  ;;  %v602_v3 = vadd.f32 %v601_v61, %v1317_v52  ;;  %v655_v4 = vadd.f32 %v654_v62, %v1322_v53 }
 0x105   :  { %v603_v6 = vpop.f32.mrf.mxu0  ;;  %v656_v7 = vpop.f32.mrf.mxu1 }
 0x106   :  { %v1025_v8 = vpack.c.bf16 %v682_v1, %v681_v63  ;;  %v1026_v9 = vpack.c.bf16 %v684_v2, %v683_v0  ;;  %v604_v10 = vadd.f32 %v603_v6, %v1335_v48  ;;  %v657_v13 = vadd.f32 %v656_v7, %v1340_v30 }
 0x107   :  { %v607_v14 = vpop.f32.mrf.mxu0  ;;  %v660_v15 = vpop.f32.mrf.mxu1  ;;  %v697_v18 = vmax.f32 %v602_v3, 0.0  ;;  %v699_v19 = vmax.f32 %v655_v4, 0.0 }
 0x108   :  { %931 = vst [vmem:[%s1399_s3 + $0x30] sm:$0xff] %v1025_v8  ;;  %932 = vst [vmem:[%s1399_s3 + $0x38] sm:$0xff] %v1026_v9  ;;  %v608_v16 = vadd.f32 %v607_v14, %v1317_v52  ;;  %v661_v17 = vadd.f32 %v660_v15, %v1322_v53  ;;  %v698_v21 = vmax.f32 %v604_v10, 0.0  ;;  %v700_v22 = vmax.f32 %v657_v13, 0.0 }
 0x109   :  { %v609_v25 = vpop.f32.mrf.mxu0  ;;  %v662_v26 = vpop.f32.mrf.mxu1 }
 0x10a   :  { %v610_v27 = vadd.f32 %v609_v25, %v1335_v48  ;;  %v663_v28 = vadd.f32 %v662_v26, %v1340_v30  ;;  %v1033_v31 = vpack.c.bf16 %v698_v21, %v697_v18  ;;  %v1034_v32 = vpack.c.bf16 %v700_v22, %v699_v19 }
 0x10b   :  { %v611_v33 = vpop.f32.mrf.mxu0  ;;  %v664_v34 = vpop.f32.mrf.mxu1  ;;  %v713_v35 = vmax.f32 %v608_v16, 0.0  ;;  %v715_v36 = vmax.f32 %v661_v17, 0.0 }
 0x10c   :  { %v714_v39 = vmax.f32 %v610_v27, 0.0  ;;  %v716_v40 = vmax.f32 %v663_v28, 0.0  ;;  %939 = vst [vmem:[%s1399_s3 + $0x70] sm:$0xff] %v1033_v31  ;;  %940 = vst [vmem:[%s1399_s3 + $0x78] sm:$0xff] %v1034_v32  ;;  %v612_v41 = vadd.f32 %v611_v33, %v1317_v52  ;;  %v665_v46 = vadd.f32 %v664_v34, %v1322_v53 }
 0x10d   :  { %v613_v47 = vpop.f32.mrf.mxu0  ;;  %v666_v54 = vpop.f32.mrf.mxu1 }
 0x10e   :  { %v1041_v11 = vpack.c.bf16 %v714_v39, %v713_v35  ;;  %v1042_v42 = vpack.c.bf16 %v716_v40, %v715_v36  ;;  %v614_v55 = vadd.f32 %v613_v47, %v1335_v48  ;;  %v667_v57 = vadd.f32 %v666_v54, %v1340_v30 }
 0x10f   :  { %v729_v12 = vmax.f32 %v612_v41, 0.0  ;;  %v731_v52 = vmax.f32 %v665_v46, 0.0 }
 0x110   :  { %947 = vst [vmem:[%s1399_s3 + $0xb0] sm:$0xff] %v1041_v11  ;;  %948 = vst [vmem:[%s1399_s3 + $0xb8] sm:$0xff] %v1042_v42  ;;  %v730_v29 = vmax.f32 %v614_v55, 0.0  ;;  %v732_v53 = vmax.f32 %v667_v57, 0.0 }
 0x112   :  { %v1049_v44 = vpack.c.bf16 %v730_v29, %v729_v12  ;;  %v1050_v37 = vpack.c.bf16 %v732_v53, %v731_v52 }
 0x114   :  { %955 = vst [vmem:[%s1399_s3 + $0xf0] sm:$0xff] %v1049_v44  ;;  %956 = vst [vmem:[%s1399_s3 + $0xf8] sm:$0xff] %v1050_v37 }

// kernel: attention_caption_generator_forward.3
= control target key start
LH: loop header
LB: loop body
LE: loop exit
PB: predicated region body
PF: predicated region fallthrough
CT: control target
= control target key end

     0   :  { %s15096_s29 = smov 0   ;;  %s15098_s30 = smov 0   ;;  %s19392_s0 = inlined_call_operand.vmem [shape: bf16[2,16,2048], index: 0, kind: input, shape index: {}]   ;;  %s19393_s1 = inlined_call_operand.vmem [shape: bf16[8,2,128], index: 1, kind: input, shape index: {}]   ;;  %s19394_s2 = inlined_call_operand.vmem [shape: bf16[2048,256], index: 2, kind: input, shape index: {}]   ;;  %s19395_s3 = inlined_call_operand.vmem [shape: f32[1,256], index: 3, kind: input, shape index: {}]   ;;  %s19396_s4 = inlined_call_operand.vmem [shape: bf16[2048,128], index: 4, kind: input, shape index: {}]   ;;  %s19397_s5 = inlined_call_operand.vmem [shape: f32[1,128], index: 5, kind: input, shape index: {}]   ;;  %s19398_s6 = inlined_call_operand.vmem [shape: bf16[128,2688], index: 6, kind: input, shape index: {}]   ;;  %s19399_s7 = inlined_call_operand.vmem [shape: f32[1,2688], index: 7, kind: input, shape index: {}]   ;;  %s19400_s8 = inlined_call_operand.vmem [shape: f32[1,128], index: 8, kind: input, shape index: {}]   ;;  %s19401_s9 = inlined_call_operand.vmem [shape: bf16[2176,512], index: 9, kind: input, shape index: {}]   ;;  %s19402_s10 = inlined_call_operand.vmem [shape: f32[1,512], index: 10, kind: input, shape index: {}]   ;;  %s19403_s11 = inlined_call_operand.vmem [shape: bf16[128,256], index: 11, kind: input, shape index: {}]   ;;  %s19404_s12 = inlined_call_operand.vmem [shape: f32[1,256], index: 12, kind: input, shape index: {}]   ;;  %s19405_s13 = inlined_call_operand.vmem [shape: f32[8,2,256], index: 13, kind: output, shape index: {0}]   ;;  %s19406_s14 = inlined_call_operand.vmem [shape: f32[8,2,128], index: 14, kind: output, shape index: {1}]  }
   0x1   :  { %19469 = sst [smem:[#allocation36_spill]] %s19393_s1  ;;  %s15100_s15 = smov 0  }
   0x2 LB: > { %s34_s16 = sadd.s32 1, %s15011_s30  ;;  %p11766_p0 = scmp.ge.s32.totalorder %s15015_s15, 1  ;;  %s15015_s15 = sphi %s15100_s15, %s25_s15   ;;  %s15011_s30 = sphi %s15098_s30, %s19536_s30   ;;  %s15007_s29 = sphi %s15096_s29, %s19535_s29  }
   0x3   : > { %p35_p1 = scmp.ge.s32.totalorder %s34_s16, 8  ;;  %p446_p2 = scmp.lt.s32.totalorder %s15015_s15, 9 }
   0x5   : > { %s19538_s16 = smov (%p35_p1, %s34_s16), 0  ;;  %p447_p3 = pnand %p11766_p0, %p446_p2 }
   0x6   : > { %19470 = sst [smem:[#allocation5_spill]] %s19538_s16 }
   0x7   : > { %450 = sbr.rel (%p447_p3) target bundleno = 2790 (0xae6), region = 72 }
   0xc   : > { %p517_p4 = scmp.lt.s32.totalorder %s15007_s29, 7  ;;  %v15120_v0 = vld [vmem:[%s19392_s0] sm:$0xff]  ;;  %v15125_v1 = vld [vmem:[%s19392_s0 + $0x8] sm:$0xff]  ;;  %v15130_v2 = vld [vmem:[%s19392_s0 + $0x10] sm:$0xff]  ;;  %s19481_s1 = sld [smem:[#allocation36_spill]] }
   0xd   : > { %19471 = vst [vmem:[#allocation6_spill] sm:$0xff] %v15125_v1  ;;  %19472 = vst [vmem:[#allocation7_spill] sm:$0xff] %v15130_v2  ;;  %v15135_v3 = vld [vmem:[%s19392_s0 + $0x18] sm:$0xff]  ;;  %v15140_v4 = vld [vmem:[%s19392_s0 + $0x20] sm:$0xff]  ;;  %p11770_p5 = scmp.ne.s32.totalorder %s15007_s29, 0 }
   0xe   : > { %19473 = vst [vmem:[#allocation8_spill] sm:$0xff] %v15135_v3  ;;  %19474 = vst [vmem:[#allocation9_spill] sm:$0xff] %v15140_v4  ;;  %v15145_v5 = vld [vmem:[%s19392_s0 + $0x28] sm:$0xff]  ;;  %s518_s17 = scalar_select %p517_p4, %s15007_s29, 7  ;;  %v15151_v6 = vld [vmem:[%s19392_s0 + $0x30] sm:$0xff] }
   0xf   : > { %19475 = vst [vmem:[#allocation10_spill] sm:$0xff] %v15145_v5  ;;  %19476 = vst [vmem:[#allocation11_spill] sm:$0xff] %v15151_v6  ;;  %v15156_v7 = vld [vmem:[%s19392_s0 + $0x38] sm:$0xff]  ;;  %v15161_v8 = vld [vmem:[%s19392_s0 + $0x40] sm:$0xff] }
  0x10   : > { %19477 = vst [vmem:[#allocation12_spill] sm:$0xff] %v15156_v7  ;;  %v15166_v9 = vld [vmem:[%s19392_s0 + $0x48] sm:$0xff]  ;;  %v15171_v10 = vld [vmem:[%s19392_s0 + $0x50] sm:$0xff]  ;;  %v15176_v11 = vld [vmem:[%s19392_s0 + $0x58] sm:$0xff]  ;;  %s12991_s22 = sshll.u32 %s518_s17, 2 }
  0x11   : > { %19478 = vst [vmem:[#allocation13_spill] sm:$0xff] %v15166_v9  ;;  %19479 = vst [vmem:[#allocation14_spill] sm:$0xff] %v15171_v10  ;;  %v15186_v12 = vld [vmem:[%s19392_s0 + $0x60] sm:$0xff]  ;;  %v15191_v13 = vld [vmem:[%s19392_s0 + $0x68] sm:$0xff]  ;;  %s15201_s20 = scalar_lea.vmem %s19405_s13, %s12991_s22 }
  0x12   : > { %19480 = vst [vmem:[#allocation15_spill] sm:$0xff] %v15176_v11  ;;  %s15181_s21 = scalar_lea.vmem %s19481_s1, %s518_s17  ;;  %19482 = vst [vmem:[#allocation16_spill] sm:$0xff] %v15186_v12  ;;  %v15196_v14 = vld [vmem:[%s19392_s0 + $0x70] sm:$0xff]  ;;  %s11769_s1 = sshll.u32 %s518_s17, 1  ;;  %v15206_v15 = vld [vmem:[%s19392_s0 + $0x78] sm:$0xff] }
  0x13   : > { %19483 = vst [vmem:[#allocation17_spill] sm:$0xff] %v15191_v13  ;;  %19484 = vst [vmem:[#allocation18_spill] sm:$0xff] %v15196_v14  ;;  %v15211_v16 = vld [vmem:[%s19392_s0 + $0x80] sm:$0xff]  ;;  %v15216_v17 = vld [vmem:[%s19392_s0 + $0x88] sm:$0xff]  ;;  %s15221_s22 = scalar_lea.vmem %s19406_s14, %s11769_s1 }
  0x14   : > { %19485 = vst [vmem:[#allocation19_spill] sm:$0xff] %v15206_v15  ;;  %19486 = vst [vmem:[#allocation20_spill] sm:$0xff] %v15211_v16  ;;  %v15226_v18 = vld [vmem:[%s19392_s0 + $0x90] sm:$0xff]  ;;  %v15231_v19 = vld [vmem:[%s19392_s0 + $0x98] sm:$0xff] }
  0x15   : > { %19487 = vst [vmem:[#allocation21_spill] sm:$0xff] %v15216_v17  ;;  %19488 = vst [vmem:[#allocation22_spill] sm:$0xff] %v15226_v18  ;;  %v15236_v20 = vld [vmem:[%s19392_s0 + $0xa0] sm:$0xff]  ;;  %v15241_v21 = vld [vmem:[%s19392_s0 + $0xa8] sm:$0xff] }
  0x16   : > { %19489 = vst [vmem:[#allocation23_spill] sm:$0xff] %v15231_v19  ;;  %19490 = vst [vmem:[#allocation24_spill] sm:$0xff] %v15236_v20  ;;  %v15246_v22 = vld [vmem:[%s19392_s0 + $0xb0] sm:$0xff]  ;;  %v15251_v23 = vld [vmem:[%s19392_s0 + $0xb8] sm:$0xff] }
  0x17   : > { %19491 = vst [vmem:[#allocation25_spill] sm:$0xff] %v15241_v21  ;;  %19492 = vst [vmem:[#allocation26_spill] sm:$0xff] %v15246_v22  ;;  %v15256_v24 = vld [vmem:[%s19392_s0 + $0xc0] sm:$0xff]  ;;  %v15261_v25 = vld [vmem:[%s19392_s0 + $0xc8] sm:$0xff] }
  0x18   : > { %19493 = vst [vmem:[#allocation27_spill] sm:$0xff] %v15251_v23  ;;  %19494 = vst [vmem:[#allocation28_spill] sm:$0xff] %v15256_v24  ;;  %v15266_v26 = vld [vmem:[%s19392_s0 + $0xd0] sm:$0xff]  ;;  %v15271_v27 = vld [vmem:[%s19392_s0 + $0xd8] sm:$0xff]  ;;  %575 = sbr.rel (%p11770_p5) target bundleno = 632 (0x278), region = 76 }
  0x19   : > { %19495 = vst [vmem:[#allocation29_spill] sm:$0xff] %v15261_v25  ;;  %19496 = vst [vmem:[#allocation30_spill] sm:$0xff] %v15266_v26  ;;  %v15276_v28 = vld [vmem:[%s19392_s0 + $0xe0] sm:$0xff]  ;;  %v15281_v29 = vld [vmem:[%s19392_s0 + $0xe8] sm:$0xff] }
  0x1a   : > { %19497 = vst [vmem:[#allocation31_spill] sm:$0xff] %v15271_v27  ;;  %19498 = vst [vmem:[#allocation32_spill] sm:$0xff] %v15276_v28  ;;  %v15286_v30 = vld [vmem:[%s19392_s0 + $0xf0] sm:$0xff]  ;;  %v15291_v31 = vld [vmem:[%s19392_s0 + $0xf8] sm:$0xff] }
  0x1b   : > { %19499 = vst [vmem:[#allocation33_spill] sm:$0xff] %v15281_v29  ;;  %19500 = vst [vmem:[#allocation34_spill] sm:$0xff] %v15286_v30 }
  0x1c   : > { %19501 = vst [vmem:[#allocation35_spill] sm:$0xff] %v15291_v31 }
  0x1d   : > { %v13297_v32 = vld [vmem:[%s19394_s2 + $0x74] ss:$8 sps:$4 sm:$0xff]   ;;  %v577_v33 = vunpack.c.h.bf16 %v15120_v0  ;;  %v593_v34 = vunpack.c.h.bf16 %v15161_v8  ;;  %v609_v35 = vunpack.c.h.bf16 %v15211_v16  ;;  %v625_v36 = vunpack.c.h.bf16 %v15256_v24  ;;  %v13301_v41 = vld [vmem:[%s19394_s2 + $0x70] ss:$8 sps:$4 sm:$0xff]   ;;  %v13303_v46 = vld [vmem:[%s19394_s2 + $0x64] ss:$8 sps:$4 sm:$0xff]  }
  0x1e   : > { %v13299_v37 = vld [vmem:[%s19394_s2 + $0x174] ss:$8 sps:$4 sm:$0xff]   ;;  %v579_v38 = vunpack.c.h.bf16 %v15125_v1  ;;  %v595_v39 = vunpack.c.h.bf16 %v15166_v9  ;;  %v611_v40 = vunpack.c.h.bf16 %v15216_v17  ;;  %2590 = vmatprep.subr.bf16.mxu0 %v13297_v32  ;;  %v13302_v42 = vld [vmem:[%s19394_s2 + $0x170] ss:$8 sps:$4 sm:$0xff]   ;;  %v627_v45 = vunpack.c.h.bf16 %v15261_v25  ;;  %v13305_v48 = vld [vmem:[%s19394_s2 + $0x164] ss:$8 sps:$4 sm:$0xff]  }
  0x1f   : > { %v647_v43 = vadd.f32 %v593_v34, %v577_v33  ;;  %v759_v44 = vadd.f32 %v625_v36, %v609_v35  ;;  %2631 = vmatprep.subr.bf16.mxu1 %v13299_v37  ;;  %2591 = vmatpush1.bf16.msra.mxu0 %v13301_v41  ;;  %v13307_v49 = vld [vmem:[%s19394_s2 + $0x60] ss:$8 sps:$4 sm:$0xff]   ;;  %v13309_v55 = vld [vmem:[%s19394_s2 + $0x54] ss:$8 sps:$4 sm:$0xff]   ;;  %v13313_v59 = vld [vmem:[%s19394_s2 + $0x50] ss:$8 sps:$4 sm:$0xff]  }
  0x20   : > { %v661_v47 = vadd.f32 %v595_v39, %v579_v38  ;;  %2632 = vmatpush1.bf16.msra.mxu1 %v13302_v42  ;;  %v773_v51 = vadd.f32 %v627_v45, %v611_v40  ;;  %2592 = vmatprep.subr.bf16.mxu0 %v13303_v46  ;;  %v13308_v52 = vld [vmem:[%s19394_s2 + $0x160] ss:$8 sps:$4 sm:$0xff]   ;;  %v13311_v58 = vld [vmem:[%s19394_s2 + $0x154] ss:$8 sps:$4 sm:$0xff]   ;;  %v13314_v60 = vld [vmem:[%s19394_s2 + $0x150] ss:$8 sps:$4 sm:$0xff]   ;;  %v576_v42 = vunpack.c.l.bf16 %v15120_v0 }
  0x21   : > { %v648_v50 = vrot.slane %v647_v43, 4  ;;  %v760_v53 = vrot.slane %v759_v44, 4  ;;  %2633 = vmatprep.subr.bf16.mxu1 %v13305_v48  ;;  %v13315_v63 = vld [vmem:[%s19394_s2 + $0x44] ss:$8 sps:$4 sm:$0xff]   ;;  %v13319_v39 = vld [vmem:[%s19394_s2 + $0x40] ss:$8 sps:$4 sm:$0xff]   ;;  %v608_v48 = vunpack.c.l.bf16 %v15211_v16 }
  0x22   : > { %v662_v54 = vrot.slane %v661_v47, 4  ;;  %v774_v57 = vrot.slane %v773_v51, 4  ;;  %v13317_v34 = vld [vmem:[%s19394_s2 + $0x144] ss:$8 sps:$4 sm:$0xff]   ;;  %v13321_v45 = vld [vmem:[%s19394_s2 + $0x34] ss:$8 sps:$4 sm:$0xff]  }
  0x23   : > { %v649_v56 = vadd.f32 %v648_v50, %v647_v43  ;;  %v761_v61 = vadd.f32 %v760_v53, %v759_v44  ;;  %2593 = vmatpush1.bf16.msra.mxu0 %v13307_v49  ;;  %v592_v43 = vunpack.c.l.bf16 %v15161_v8  ;;  %v13320_v44 = vld [vmem:[%s19394_s2 + $0x140] ss:$8 sps:$4 sm:$0xff]   ;;  %v624_v49 = vunpack.c.l.bf16 %v15256_v24  ;;  %v13323_v50 = vld [vmem:[%s19394_s2 + $0x134] ss:$8 sps:$4 sm:$0xff]  }
  0x24   : > { %v663_v62 = vadd.f32 %v662_v54, %v661_v47  ;;  %2634 = vmatpush1.bf16.msra.mxu1 %v13308_v52  ;;  %v775_v33 = vadd.f32 %v774_v57, %v773_v51  ;;  %2594 = vmatprep.subr.bf16.mxu0 %v13309_v55  ;;  %v578_v53 = vunpack.c.l.bf16 %v15125_v1  ;;  %v594_v54 = vunpack.c.l.bf16 %v15166_v9 }
  0x25   : > { %v650_v32 = vrot.slane %v649_v56, 2  ;;  %2635 = vmatprep.subr.bf16.mxu1 %v13311_v58  ;;  %v762_v35 = vrot.slane %v761_v61, 2  ;;  %v610_v57 = vunpack.c.l.bf16 %v15216_v17  ;;  %v626_v58 = vunpack.c.l.bf16 %v15261_v25 }
  0x26   : > { %v664_v36 = vrot.slane %v663_v62, 2  ;;  %v776_v38 = vrot.slane %v775_v33, 2  ;;  %vm1261_vm0 = vcmask 1041409  }
  0x27   : > { %v651_v37 = vadd.f32 %v650_v32, %v649_v56  ;;  %v763_v40 = vadd.f32 %v762_v35, %v761_v61  ;;  %2595 = vmatpush1.bf16.msra.mxu0 %v13313_v59  ;;  %v13325_v59 = vld [vmem:[%s19394_s2 + $0x30] ss:$8 sps:$4 sm:$0xff]   ;;  %v752_v35 = vadd.f32 %v624_v49, %v608_v48  ;;  %v629_v48 = vunpack.c.h.bf16 %v15266_v26  ;;  %v13332_v49 = vld [vmem:[%s19394_s2 + $0x120] ss:$8 sps:$4 sm:$0xff]  }
  0x28   : > { %v665_v41 = vadd.f32 %v664_v36, %v663_v62  ;;  %2636 = vmatpush1.bf16.msra.mxu1 %v13314_v60  ;;  %v777_v47 = vadd.f32 %v776_v38, %v775_v33  ;;  %2596 = vmatprep.subr.bf16.mxu0 %v13315_v63  ;;  %v13326_v60 = vld [vmem:[%s19394_s2 + $0x130] ss:$8 sps:$4 sm:$0xff]   ;;  %v13327_v63 = vld [vmem:[%s19394_s2 + $0x24] ss:$8 sps:$4 sm:$0xff]  }
  0x29   : > { %v652_v46 = vrot.slane %v651_v37, 1  ;;  %2637 = vmatprep.subr.bf16.mxu1 %v13317_v34  ;;  %v764_v51 = vrot.slane %v763_v40, 1  ;;  %v640_v34 = vadd.f32 %v592_v43, %v576_v42  ;;  %v13329_v36 = vld [vmem:[%s19394_s2 + $0x124] ss:$8 sps:$4 sm:$0xff]   ;;  %v13331_v42 = vld [vmem:[%s19394_s2 + $0x20] ss:$8 sps:$4 sm:$0xff]  }
  0x2a   : > { %v666_v52 = vrot.slane %v665_v41, 1  ;;  %v778_v56 = vrot.slane %v777_v47, 1 }
  0x2b   : > { %v653_v55 = vadd.f32 %v652_v46, %v651_v37  ;;  %v765_v61 = vadd.f32 %v764_v51, %v763_v40  ;;  %2597 = vmatpush1.bf16.msra.mxu0 %v13319_v39  ;;  %v654_v40 = vadd.f32 %v594_v54, %v578_v53  ;;  %v581_v39 = vunpack.c.h.bf16 %v15130_v2 }
  0x2c   : > { %v667_v62 = vadd.f32 %v666_v52, %v665_v41  ;;  %2638 = vmatpush1.bf16.msra.mxu1 %v13320_v44  ;;  %v779_v33 = vadd.f32 %v778_v56, %v777_v47  ;;  %2598 = vmatprep.subr.bf16.mxu0 %v13321_v45  ;;  %v766_v46 = vadd.f32 %v626_v58, %v610_v57  ;;  %v597_v51 = vunpack.c.h.bf16 %v15171_v10  ;;  %v13335_v56 = vld [vmem:[%s19394_s2 + $0x114] ss:$8 sps:$4 sm:$0xff]  }
  0x2d   : > { %v866_v32 = vmul.f32 0.0625, %v653_v55  ;;  %2639 = vmatprep.subr.bf16.mxu1 %v13323_v50  ;;  %v882_v37 = vmul.f32 0.0625, %v765_v61  ;;  %v613_v47 = vunpack.c.h.bf16 %v15226_v18  ;;  %v13333_v50 = vld [vmem:[%s19394_s2 + $0x14] ss:$8 sps:$4 sm:$0xff]   ;;  %v583_v54 = vunpack.c.h.bf16 %v15135_v3 }
  0x2e   : > { %v868_v38 = vmul.f32 0.0625, %v667_v62  ;;  %v884_v44 = vmul.f32 0.0625, %v779_v33  ;;  %v599_v55 = vunpack.c.h.bf16 %v15176_v11  ;;  %v641_v62 = vrot.slane %v640_v34, 4  ;;  %v13337_v33 = vld [vmem:[%s19394_s2 + $0x10] ss:$8 sps:$4 sm:$0xff]  }
  0x2f   : > { %v898_v41 = vpack.c.bf16 %v866_v32, %v866_v32  ;;  %v914_v43 = vpack.c.bf16 %v882_v37, %v882_v37  ;;  %2599 = vmatpush1.bf16.msra.mxu0 %v13325_v59  ;;  %v615_v59 = vunpack.c.h.bf16 %v15231_v19  ;;  %v753_v32 = vrot.slane %v752_v35, 4 }
  0x30   : > { %v900_v45 = vpack.c.bf16 %v868_v38, %v868_v38  ;;  %2640 = vmatpush1.bf16.msra.mxu1 %v13326_v60  ;;  %v916_v53 = vpack.c.bf16 %v884_v44, %v884_v44  ;;  %2600 = vmatprep.subr.bf16.mxu0 %v13327_v63  ;;  %v631_v60 = vunpack.c.h.bf16 %v15271_v27  ;;  %v13338_v63 = vld [vmem:[%s19394_s2 + $0x110] ss:$8 sps:$4 sm:$0xff]   ;;  %v655_v37 = vrot.slane %v654_v40, 4  ;;  %v13339_v44 = vld [vmem:[%s19394_s2 + $0x4] ss:$8 sps:$4 sm:$0xff]  }
  0x31   : > { %v1230_v52 = vunpack.c.l.b16 %v898_v41  ;;  %2641 = vmatprep.subr.bf16.mxu1 %v13329_v36  ;;  %v1246_v57 = vunpack.c.l.b16 %v914_v43  ;;  %v675_v38 = vadd.f32 %v597_v51, %v581_v39  ;;  %v787_v41 = vadd.f32 %v629_v48, %v613_v47  ;;  %v13343_v47 = vld [vmem:[%s19394_s2] ss:$8 sps:$4 sm:$0xff]  }
  0x32   : > { %v1232_v58 = vunpack.c.l.b16 %v900_v45  ;;  %v1248_v61 = vunpack.c.l.b16 %v916_v53  ;;  %v767_v53 = vrot.slane %v766_v46, 4  ;;  %v689_v17 = vadd.f32 %v599_v55, %v583_v54  ;;  %v13345_v54 = vld [vmem:[%s19394_s2 + $0xf4] ss:$8 sps:$4 sm:$0xff]  }
  0x33   : > { %v1263_v36 = vsel %vm1261_vm0, %v1246_v57, %v1230_v52  ;;  %2601 = vmatpush1.bf16.msra.mxu0 %v13331_v42  ;;  %v13341_v52 = vld [vmem:[%s19394_s2 + $0x104] ss:$8 sps:$4 sm:$0xff]   ;;  %v801_v39 = vadd.f32 %v631_v60, %v615_v59  ;;  %v642_v51 = vadd.f32 %v641_v62, %v640_v34  ;;  %v754_v42 = vadd.f32 %v753_v32, %v752_v35  ;;  %v13350_v62 = vld [vmem:[%s19394_s2 + $0x1f0] ss:$8 sps:$4 sm:$0xff]  }
  0x34   : > { %2642 = vmatpush1.bf16.msra.mxu1 %v13332_v49  ;;  %v1279_v43 = vpack.c.b16 %v1263_v36, %v1263_v36  ;;  %v1265_v45 = vsel %vm1261_vm0, %v1248_v61, %v1232_v58  ;;  %2602 = vmatprep.subr.bf16.mxu0 %v13333_v50  ;;  %v676_v48 = vrot.slane %v675_v38, 4  ;;  %v788_v49 = vrot.slane %v787_v41, 4  ;;  %v13344_v50 = vld [vmem:[%s19394_s2 + $0x100] ss:$8 sps:$4 sm:$0xff]   ;;  %v13349_v61 = vld [vmem:[%s19394_s2 + $0xf0] ss:$8 sps:$4 sm:$0xff]  }
  0x35   : > { %2643 = vmatprep.subr.bf16.mxu1 %v13335_v56  ;;  %v1281_v57 = vpack.c.b16 %v1265_v45, %v1265_v45  ;;  %v656_v55 = vadd.f32 %v655_v37, %v654_v40  ;;  %v768_v34 = vadd.f32 %v767_v53, %v766_v46  ;;  %v690_v35 = vrot.slane %v689_v17, 4  ;;  %v13347_v56 = vld [vmem:[%s19394_s2 + $0x1f4] ss:$8 sps:$4 sm:$0xff]  }
  0x36   : > { %2622 = vmatprep.mubr.bf16.mxu0 %v1279_v43  ;;  %v802_v58 = vrot.slane %v801_v39, 4  ;;  %v643_v59 = vrot.slane %v642_v51, 2  ;;  %v755_v60 = vrot.slane %v754_v42, 2  ;;  %v677_v40 = vadd.f32 %v676_v48, %v675_v38  ;;  %v13355_v38 = vld [vmem:[%s19394_s2 + $0xe0] ss:$8 sps:$4 sm:$0xff]  }
  0x37   : > { %2663 = vmatprep.mubr.bf16.mxu1 %v1281_v57  ;;  %2603 = vmatpush1.bf16.msra.mxu0 %v13337_v33  ;;  %v789_v46 = vadd.f32 %v788_v49, %v787_v41  ;;  %v691_v32 = vadd.f32 %v690_v35, %v689_v17  ;;  %v657_v36 = vrot.slane %v656_v55, 2  ;;  %v769_v37 = vrot.slane %v768_v34, 2  ;;  %v13356_v57 = vld [vmem:[%s19394_s2 + $0x1e0] ss:$8 sps:$4 sm:$0xff]  }
  0x38   : > { %2644 = vmatpush1.bf16.msra.mxu1 %v13338_v63  ;;  %2604 = vmatprep.subr.bf16.mxu0 %v13339_v44  ;;  %v803_v33 = vadd.f32 %v802_v58, %v801_v39  ;;  %v13351_v63 = vld [vmem:[%s19394_s2 + $0xe4] ss:$8 sps:$4 sm:$0xff]   ;;  %v644_v17 = vadd.f32 %v643_v59, %v642_v51  ;;  %v756_v41 = vadd.f32 %v755_v60, %v754_v42  ;;  %v678_v43 = vrot.slane %v677_v40, 2  ;;  %v13357_v39 = vld [vmem:[%s19394_s2 + $0xd4] ss:$8 sps:$4 sm:$0xff]  }
  0x39   : > { %2645 = vmatprep.subr.bf16.mxu1 %v13341_v52  ;;  %v13353_v44 = vld [vmem:[%s19394_s2 + $0x1e4] ss:$8 sps:$4 sm:$0xff]   ;;  %v790_v45 = vrot.slane %v789_v46, 2  ;;  %v692_v53 = vrot.slane %v691_v32, 2  ;;  %v770_v48 = vadd.f32 %v769_v37, %v768_v34  ;;  %v13359_v51 = vld [vmem:[%s19394_s2 + $0x1d4] ss:$8 sps:$4 sm:$0xff]  }
  0x3a   : > { %v804_v52 = vrot.slane %v803_v33, 2  ;;  %v645_v42 = vrot.slane %v644_v17, 1  ;;  %v757_v49 = vrot.slane %v756_v41, 1  ;;  %v679_v35 = vadd.f32 %v678_v43, %v677_v40  ;;  %v13363_v58 = vld [vmem:[%s19394_s2 + $0xc4] ss:$8 sps:$4 sm:$0xff]  }
  0x3b   : > { %2605 = vmatpush1.bf16.msra.mxu0 %v13343_v47  ;;  %v658_v47 = vadd.f32 %v657_v36, %v656_v55  ;;  %v693_v55 = vadd.f32 %v692_v53, %v691_v32  ;;  %v771_v60 = vrot.slane %v770_v48, 1  ;;  %v13368_v40 = vld [vmem:[%s19394_s2 + $0x1c0] ss:$8 sps:$4 sm:$0xff]   ;;  %v13373_v53 = vld [vmem:[%s19394_s2 + $0xb0] ss:$8 sps:$4 sm:$0xff]  }
  0x3c   : > { %2646 = vmatpush1.bf16.msra.mxu1 %v13344_v50  ;;  %2606 = vmatprep.subr.bf16.mxu0 %v13345_v54  ;;  %v13361_v50 = vld [vmem:[%s19394_s2 + $0xd0] ss:$8 sps:$4 sm:$0xff]   ;;  %v805_v34 = vadd.f32 %v804_v52, %v803_v33  ;;  %v758_v32 = vadd.f32 %v757_v49, %v756_v41  ;;  %v680_v33 = vrot.slane %v679_v35, 1 }
  0x3d   : > { %2647 = vmatprep.subr.bf16.mxu1 %v13347_v56  ;;  %v13362_v54 = vld [vmem:[%s19394_s2 + $0x1d0] ss:$8 sps:$4 sm:$0xff]   ;;  %v791_v56 = vadd.f32 %v790_v45, %v789_v46  ;;  %v659_v59 = vrot.slane %v658_v47, 1  ;;  %v646_v46 = vadd.f32 %v645_v42, %v644_v17  ;;  %v694_v36 = vrot.slane %v693_v55, 1  ;;  %v13371_v45 = vld [vmem:[%s19394_s2 + $0x1b4] ss:$8 sps:$4 sm:$0xff]  }
  0x3e   : > { %v806_v37 = vrot.slane %v805_v34, 1  ;;  %v772_v43 = vadd.f32 %v771_v60, %v770_v48  ;;  %v881_v41 = vmul.f32 0.0625, %v758_v32  ;;  %v13374_v52 = vld [vmem:[%s19394_s2 + $0x1b0] ss:$8 sps:$4 sm:$0xff]   ;;  %v13381_v60 = vld [vmem:[%s19394_s2 + $0x94] ss:$8 sps:$4 sm:$0xff]  }
  0x3f   : > { %2607 = vmatpush2.bf16.msra.mxu0 %v13349_v61  ;;  %v13365_v61 = vld [vmem:[%s19394_s2 + $0x1c4] ss:$8 sps:$4 sm:$0xff]   ;;  %v865_v17 = vmul.f32 0.0625, %v646_v46  ;;  %v13383_v46 = vld [vmem:[%s19394_s2 + $0x194] ss:$8 sps:$4 sm:$0xff]  }
  0x40   : > { %2648 = vmatpush2.bf16.msra.mxu1 %v13350_v62  ;;  %2608 = vmatprep.subr.bf16.mxu0 %v13351_v63  ;;  %v13367_v62 = vld [vmem:[%s19394_s2 + $0xc0] ss:$8 sps:$4 sm:$0xff]   ;;  %v792_v63 = vrot.slane %v791_v56, 1  ;;  %v807_v48 = vadd.f32 %v806_v37, %v805_v34  ;;  %v883_v49 = vmul.f32 0.0625, %v772_v43  ;;  %v13385_v32 = vld [vmem:[%s19394_s2 + $0x90] ss:$8 sps:$4 sm:$0xff]  }
  0x41   : > { %2649 = vmatprep.subr.bf16.mxu1 %v13353_v44  ;;  %v13369_v44 = vld [vmem:[%s19394_s2 + $0xb4] ss:$8 sps:$4 sm:$0xff]  }
  0x43   : > { %2609 = vmatpush2.bf16.msra.mxu0 %v13355_v38  ;;  %v660_v38 = vadd.f32 %v659_v59, %v658_v47  ;;  %v695_v47 = vadd.f32 %v694_v36, %v693_v55  ;;  %v888_v59 = vmul.f32 0.0625, %v807_v48 }
  0x44   : > { %2650 = vmatpush2.bf16.msra.mxu1 %v13356_v57  ;;  %2610 = vmatprep.subr.bf16.mxu0 %v13357_v39  ;;  %v681_v57 = vadd.f32 %v680_v33, %v679_v35  ;;  %v793_v39 = vadd.f32 %v792_v63, %v791_v56  ;;  %v13380_v35 = vld [vmem:[%s19394_s2 + $0x1a0] ss:$8 sps:$4 sm:$0xff]   ;;  %v897_v56 = vpack.c.bf16 %v865_v17, %v865_v17  ;;  %v13386_v33 = vld [vmem:[%s19394_s2 + $0x190] ss:$8 sps:$4 sm:$0xff]  }
  0x45   : > { %2651 = vmatprep.subr.bf16.mxu1 %v13359_v51  ;;  %v13375_v51 = vld [vmem:[%s19394_s2 + $0xa4] ss:$8 sps:$4 sm:$0xff]   ;;  %v867_v42 = vmul.f32 0.0625, %v660_v38 }
  0x46   : > { %v870_v55 = vmul.f32 0.0625, %v681_v57  ;;  %v886_v34 = vmul.f32 0.0625, %v793_v39  ;;  %v13387_v38 = vld [vmem:[%s19394_s2 + $0x84] ss:$8 sps:$4 sm:$0xff]   ;;  %v1229_v43 = vunpack.c.l.b16 %v897_v56  ;;  %v13392_v57 = vld [vmem:[%s19394_s2 + $0x180] ss:$8 sps:$4 sm:$0xff]  }
  0x47   : > { %2611 = vmatpush2.bf16.msra.mxu0 %v13361_v50  ;;  %v13377_v50 = vld [vmem:[%s19394_s2 + $0x1a4] ss:$8 sps:$4 sm:$0xff]  }
  0x48   : > { %2652 = vmatpush2.bf16.msra.mxu1 %v13362_v54  ;;  %2612 = vmatprep.subr.bf16.mxu0 %v13363_v58  ;;  %v13379_v54 = vld [vmem:[%s19394_s2 + $0xa0] ss:$8 sps:$4 sm:$0xff]   ;;  %v872_v58 = vmul.f32 0.0625, %v695_v47  ;;  %v902_v63 = vpack.c.bf16 %v870_v55, %v870_v55  ;;  %v918_v36 = vpack.c.bf16 %v886_v34, %v886_v34  ;;  %v13393_v55 = vld [vmem:[%s19394_s2 + $0x270] ss:$8 sps:$4 sm:$0xff]  }
  0x49   : > { %2653 = vmatprep.subr.bf16.mxu1 %v13365_v61  ;;  %v913_v61 = vpack.c.bf16 %v881_v41, %v881_v41  ;;  %v13396_v34 = vld [vmem:[%s19394_s2 + $0x370] ss:$8 sps:$4 sm:$0xff]  }
  0x4a   : > { %v904_v37 = vpack.c.bf16 %v872_v58, %v872_v58  ;;  %v1234_v39 = vunpack.c.l.b16 %v902_v63  ;;  %v1250_v47 = vunpack.c.l.b16 %v918_v36  ;;  %v13410_v63 = vld [vmem:[%s19394_s2 + $0x354] ss:$8 sps:$4 sm:$0xff]   ;;  %v13405_v36 = vld [vmem:[%s19394_s2 + $0x250] ss:$8 sps:$4 sm:$0xff]  }
  0x4b   : > { %2613 = vmatpush2.bf16.msra.mxu0 %v13367_v62  ;;  %v899_v62 = vpack.c.bf16 %v867_v42, %v867_v42 }
  0x4c   : > { %2654 = vmatpush2.bf16.msra.mxu1 %v13368_v40  ;;  %2614 = vmatprep.subr.bf16.mxu0 %v13369_v44  ;;  %v915_v40 = vpack.c.bf16 %v883_v49, %v883_v49  ;;  %v920_v44 = vpack.c.bf16 %v888_v59, %v888_v59  ;;  %v1236_v48 = vunpack.c.l.b16 %v904_v37  ;;  %v1267_v58 = vsel %vm1261_vm0, %v1250_v47, %v1234_v39  ;;  %v13408_v37 = vld [vmem:[%s19394_s2 + $0x350] ss:$8 sps:$4 sm:$0xff]  }
  0x4d   : > { %2655 = vmatprep.subr.bf16.mxu1 %v13371_v45  ;;  %v1245_v45 = vunpack.c.l.b16 %v913_v61  ;;  %v1231_v17 = vunpack.c.l.b16 %v899_v62  ;;  %v13404_v61 = vld [vmem:[%s19394_s2 + $0x364] ss:$8 sps:$4 sm:$0xff]   ;;  %v1283_v62 = vpack.c.b16 %v1267_v58, %v1267_v58  ;;  %v13420_v39 = vld [vmem:[%s19394_s2 + $0x330] ss:$8 sps:$4 sm:$0xff]   ;;  %v612_v47 = vunpack.c.l.bf16 %v15226_v18 }
  0x4e   : > { %v1247_v41 = vunpack.c.l.b16 %v915_v40  ;;  %v617_v58 = vunpack.c.h.bf16 %v15236_v20 }
  0x4f   : > { %2615 = vmatpush2.bf16.msra.mxu0 %v13373_v53  ;;  %v13389_v53 = vld [vmem:[%s19394_s2 + $0x184] ss:$8 sps:$4 sm:$0xff]   ;;  %v1262_v42 = vsel %vm1261_vm0, %v1245_v45, %v1229_v43  ;;  %v13411_v43 = vld [vmem:[%s19394_s2 + $0x240] ss:$8 sps:$4 sm:$0xff]  }
  0x50   : > { %2656 = vmatpush2.bf16.msra.mxu1 %v13374_v52  ;;  %2616 = vmatprep.subr.bf16.mxu0 %v13375_v51  ;;  %v13391_v52 = vld [vmem:[%s19394_s2 + $0x80] ss:$8 sps:$4 sm:$0xff]   ;;  %v1252_v51 = vunpack.c.l.b16 %v920_v44  ;;  %v1264_v49 = vsel %vm1261_vm0, %v1247_v41, %v1231_v17  ;;  %v13413_v44 = vld [vmem:[%s19394_s2 + $0x244] ss:$8 sps:$4 sm:$0xff]   ;;  %v13419_v17 = vld [vmem:[%s19394_s2 + $0x234] ss:$8 sps:$4 sm:$0xff]  }
  0x51   : > { %2657 = vmatprep.subr.bf16.mxu1 %v13377_v50  ;;  %v13395_v50 = vld [vmem:[%s19394_s2 + $0x274] ss:$8 sps:$4 sm:$0xff]   ;;  %v1280_v56 = vpack.c.b16 %v1264_v49, %v1264_v49  ;;  %v13414_v45 = vld [vmem:[%s19394_s2 + $0x340] ss:$8 sps:$4 sm:$0xff]   ;;  %v598_v49 = vunpack.c.l.bf16 %v15176_v11 }
  0x52   : > { %v1269_v59 = vsel %vm1261_vm0, %v1252_v51, %v1236_v48  ;;  %v13422_v41 = vld [vmem:[%s19394_s2 + $0x334] ss:$8 sps:$4 sm:$0xff]   ;;  %v628_v48 = vunpack.c.l.bf16 %v15266_v26  ;;  %v13425_v51 = vld [vmem:[%s19394_s2 + $0x224] ss:$8 sps:$4 sm:$0xff]  }
  0x53   : > { %2617 = vmatpush2.bf16.msra.mxu0 %v13379_v54  ;;  %v13398_v54 = vld [vmem:[%s19394_s2 + $0x374] ss:$8 sps:$4 sm:$0xff]   ;;  %v1285_v40 = vpack.c.b16 %v1269_v59, %v1269_v59  ;;  %v633_v59 = vunpack.c.h.bf16 %v15276_v28 }
  0x54   : > { %2658 = vmatpush2.bf16.msra.mxu1 %v13380_v35  ;;  %2618 = vmatprep.subr.bf16.mxu0 %v13381_v60  ;;  %v1278_v35 = vpack.c.b16 %v1262_v42, %v1262_v42  ;;  %v13401_v60 = vld [vmem:[%s19394_s2 + $0x264] ss:$8 sps:$4 sm:$0xff]   ;;  %v582_v42 = vunpack.c.l.bf16 %v15135_v3 }
  0x55   : > { %2659 = vmatprep.subr.bf16.mxu1 %v13383_v46  ;;  %v13399_v46 = vld [vmem:[%s19394_s2 + $0x260] ss:$8 sps:$4 sm:$0xff]  }
  0x57   : > { %2619 = vmatpush2.bf16.msra.mxu0 %v13385_v32  ;;  %v13402_v32 = vld [vmem:[%s19394_s2 + $0x360] ss:$8 sps:$4 sm:$0xff]  }
  0x58   : > { %2660 = vmatpush2.bf16.msra.mxu1 %v13386_v33  ;;  %2620 = vmatprep.subr.bf16.mxu0 %v13387_v38  ;;  %v13407_v33 = vld [vmem:[%s19394_s2 + $0x254] ss:$8 sps:$4 sm:$0xff]   ;;  %v13416_v38 = vld [vmem:[%s19394_s2 + $0x344] ss:$8 sps:$4 sm:$0xff]  }
  0x59   : > { %2661 = vmatprep.subr.bf16.mxu1 %v13389_v53  ;;  %v580_v53 = vunpack.c.l.bf16 %v15130_v2 }
  0x5b   : > { %2621 = vmatpush2.bf16.msra.mxu0 %v13391_v52  ;;  %v596_v52 = vunpack.c.l.bf16 %v15171_v10 }
  0x5c   : > { %2662 = vmatpush2.bf16.msra.mxu1 %v13392_v57  ;;  %2672 = vmatprep.subr.bf16.mxu0 %v13395_v50  ;;  %v13417_v57 = vld [vmem:[%s19394_s2 + $0x230] ss:$8 sps:$4 sm:$0xff]   ;;  %v614_v50 = vunpack.c.l.bf16 %v15231_v19 }
  0x5d   : > { %2713 = vmatprep.subr.bf16.mxu1 %v13398_v54  ;;  %v630_v54 = vunpack.c.l.bf16 %v15271_v27 }
  0x5e   : > { %2623 = vmatmul.mubr.bf16.vlgmr.msra.gmra.mxu0 %v1278_v35  ;;  %v13428_v35 = vld [vmem:[%s19394_s2 + $0x324] ss:$8 sps:$4 sm:$0xff]  }
  0x5f   : > { %2664 = vmatmul.mubr.bf16.vlgmr.msra.gmra.mxu1 %v1280_v56  ;;  %2673 = vmatpush1.bf16.msra.mxu0 %v13393_v55  ;;  %v668_v56 = vadd.f32 %v596_v52, %v580_v53  ;;  %v585_v55 = vunpack.c.h.bf16 %v15140_v4  ;;  %v13432_v53 = vld [vmem:[%s19394_s2 + $0x310] ss:$8 sps:$4 sm:$0xff]  }
  0x60   : > { %2714 = vmatpush1.bf16.msra.mxu1 %v13396_v34  ;;  %2674 = vmatprep.subr.bf16.mxu0 %v13401_v60  ;;  %v601_v34 = vunpack.c.h.bf16 %v15186_v12  ;;  %v587_v60 = vunpack.c.h.bf16 %v15145_v5 }
  0x61   : > { %2715 = vmatprep.subr.bf16.mxu1 %v13404_v61  ;;  %2704 = vmatprep.mubr.bf16.mxu0 %v1283_v62  ;;  %v603_v61 = vunpack.c.h.bf16 %v15191_v13  ;;  %v13423_v62 = vld [vmem:[%s19394_s2 + $0x220] ss:$8 sps:$4 sm:$0xff]  }
  0x62   : > { %2745 = vmatprep.mubr.bf16.mxu1 %v1285_v40  ;;  %v13426_v40 = vld [vmem:[%s19394_s2 + $0x320] ss:$8 sps:$4 sm:$0xff]  }
  0x63   : > { %2675 = vmatpush1.bf16.msra.mxu0 %v13399_v46  ;;  %v780_v46 = vadd.f32 %v628_v48, %v612_v47 }
  0x64   : > { %2716 = vmatpush1.bf16.msra.mxu1 %v13402_v32  ;;  %2676 = vmatprep.subr.bf16.mxu0 %v13407_v33  ;;  %v619_v32 = vunpack.c.h.bf16 %v15241_v21  ;;  %v635_v33 = vunpack.c.h.bf16 %v15281_v29 }
  0x65   : > { %2717 = vmatprep.subr.bf16.mxu1 %v13410_v63  ;;  %v13431_v63 = vld [vmem:[%s19394_s2 + $0x214] ss:$8 sps:$4 sm:$0xff]   ;;  %v781_v52 = vrot.slane %v780_v46, 4 }
  0x67   : > { %2677 = vmatpush1.bf16.msra.mxu0 %v13405_v36  ;;  %v682_v36 = vadd.f32 %v598_v49, %v582_v42 }
  0x68   : > { %2718 = vmatpush1.bf16.msra.mxu1 %v13408_v37  ;;  %2678 = vmatprep.subr.bf16.mxu0 %v13413_v44  ;;  %v794_v37 = vadd.f32 %v630_v54, %v614_v50  ;;  %v13434_v44 = vld [vmem:[%s19394_s2 + $0x314] ss:$8 sps:$4 sm:$0xff]  }
  0x69   : > { %2719 = vmatprep.subr.bf16.mxu1 %v13416_v38  ;;  %v669_v38 = vrot.slane %v668_v56, 4  ;;  %v683_v47 = vrot.slane %v682_v36, 4 }
  0x6a   : > { %v795_v48 = vrot.slane %v794_v37, 4 }
  0x6b   : > { %2679 = vmatpush1.bf16.msra.mxu0 %v13411_v43  ;;  %v703_v43 = vadd.f32 %v601_v34, %v585_v55  ;;  %v670_v42 = vadd.f32 %v669_v38, %v668_v56  ;;  %v13438_v55 = vld [vmem:[%s19394_s2 + $0x300] ss:$8 sps:$4 sm:$0xff]   ;;  %v782_v34 = vadd.f32 %v781_v52, %v780_v46  ;;  %v684_v56 = vadd.f32 %v683_v47, %v682_v36  ;;  %v13441_v46 = vld [vmem:[%s19394_s2 + $0x2f0] ss:$8 sps:$4 sm:$0xff]  }
  0x6c   : > { %2720 = vmatpush1.bf16.msra.mxu1 %v13414_v45  ;;  %2680 = vmatprep.subr.bf16.mxu0 %v13419_v17  ;;  %v815_v45 = vadd.f32 %v633_v59, %v617_v58  ;;  %v717_v17 = vadd.f32 %v603_v61, %v587_v60  ;;  %v13443_v59 = vld [vmem:[%s19394_s2 + $0x2f4] ss:$8 sps:$4 sm:$0xff]   ;;  %v796_v60 = vadd.f32 %v795_v48, %v794_v37 }
  0x6d   : > { %2721 = vmatprep.subr.bf16.mxu1 %v13422_v41  ;;  %v13429_v41 = vld [vmem:[%s19394_s2 + $0x210] ss:$8 sps:$4 sm:$0xff]   ;;  %v704_v49 = vrot.slane %v703_v43, 4  ;;  %v13446_v61 = vld [vmem:[%s19394_s2 + $0x3f4] ss:$8 sps:$4 sm:$0xff]   ;;  %v783_v36 = vrot.slane %v782_v34, 2 }
  0x6e   : > { %v816_v50 = vrot.slane %v815_v45, 4  ;;  %v718_v54 = vrot.slane %v717_v17, 4  ;;  %v685_v38 = vrot.slane %v684_v56, 2 }
  0x6f   : > { %2681 = vmatpush1.bf16.msra.mxu0 %v13417_v57  ;;  %v829_v57 = vadd.f32 %v635_v33, %v619_v32  ;;  %v784_v47 = vadd.f32 %v783_v36, %v782_v34  ;;  %v13453_v34 = vld [vmem:[%s19394_s2 + $0x2d0] ss:$8 sps:$4 sm:$0xff]  }
  0x70   : > { %2722 = vmatpush1.bf16.msra.mxu1 %v13420_v39  ;;  %2682 = vmatprep.subr.bf16.mxu0 %v13425_v51  ;;  %v13437_v39 = vld [vmem:[%s19394_s2 + $0x204] ss:$8 sps:$4 sm:$0xff]   ;;  %v817_v32 = vadd.f32 %v816_v50, %v815_v45  ;;  %v719_v33 = vadd.f32 %v718_v54, %v717_v17  ;;  %v13458_v50 = vld [vmem:[%s19394_s2 + $0x3d4] ss:$8 sps:$4 sm:$0xff]  }
  0x71   : > { %2723 = vmatprep.subr.bf16.mxu1 %v13428_v35  ;;  %v13440_v51 = vld [vmem:[%s19394_s2 + $0x304] ss:$8 sps:$4 sm:$0xff]   ;;  %v13435_v35 = vld [vmem:[%s19394_s2 + $0x200] ss:$8 sps:$4 sm:$0xff]   ;;  %v830_v58 = vrot.slane %v829_v57, 4 }
  0x72   : > { %v13452_v45 = vld [vmem:[%s19394_s2 + $0x3e4] ss:$8 sps:$4 sm:$0xff]   ;;  %v720_v52 = vrot.slane %v719_v33, 2 }
  0x73   : > { %2683 = vmatpush1.bf16.msra.mxu0 %v13423_v62  ;;  %v671_v62 = vrot.slane %v670_v42, 2  ;;  %v831_v37 = vadd.f32 %v830_v58, %v829_v57  ;;  %v13447_v57 = vld [vmem:[%s19394_s2 + $0x2e0] ss:$8 sps:$4 sm:$0xff]  }
  0x74   : > { %2724 = vmatpush1.bf16.msra.mxu1 %v13426_v40  ;;  %2684 = vmatprep.subr.bf16.mxu0 %v13431_v63  ;;  %v705_v40 = vadd.f32 %v704_v49, %v703_v43  ;;  %v13444_v63 = vld [vmem:[%s19394_s2 + $0x3f0] ss:$8 sps:$4 sm:$0xff]   ;;  %v797_v43 = vrot.slane %v796_v60, 2  ;;  %v721_v58 = vadd.f32 %v720_v52, %v719_v33 }
  0x75   : > { %2725 = vmatprep.subr.bf16.mxu1 %v13434_v44  ;;  %v13449_v44 = vld [vmem:[%s19394_s2 + $0x2e4] ss:$8 sps:$4 sm:$0xff]   ;;  %v672_v17 = vadd.f32 %v671_v62, %v670_v42  ;;  %v832_v48 = vrot.slane %v831_v37, 2  ;;  %v686_v42 = vadd.f32 %v685_v38, %v684_v56  ;;  %v785_v56 = vrot.slane %v784_v47, 1 }
  0x76   : > { %v798_v49 = vadd.f32 %v797_v43, %v796_v60  ;;  %v722_v36 = vrot.slane %v721_v58, 1 }
  0x77   : > { %2685 = vmatpush1.bf16.msra.mxu0 %v13429_v41  ;;  %v706_v41 = vrot.slane %v705_v40, 2  ;;  %v673_v54 = vrot.slane %v672_v17, 1  ;;  %v833_v60 = vadd.f32 %v832_v48, %v831_v37  ;;  %v687_v62 = vrot.slane %v686_v42, 1  ;;  %v13459_v37 = vld [vmem:[%s19394_s2 + $0x2c0] ss:$8 sps:$4 sm:$0xff]  }
  0x78   : > { %2726 = vmatpush1.bf16.msra.mxu1 %v13432_v53  ;;  %2686 = vmatprep.subr.bf16.mxu0 %v13437_v39  ;;  %v818_v53 = vrot.slane %v817_v32, 2  ;;  %v13450_v39 = vld [vmem:[%s19394_s2 + $0x3e0] ss:$8 sps:$4 sm:$0xff]   ;;  %v786_v38 = vadd.f32 %v785_v56, %v784_v47  ;;  %v723_v48 = vadd.f32 %v722_v36, %v721_v58  ;;  %v13465_v47 = vld [vmem:[%s19394_s2 + $0x2b0] ss:$8 sps:$4 sm:$0xff]  }
  0x79   : > { %2727 = vmatprep.subr.bf16.mxu1 %v13440_v51  ;;  %v13455_v51 = vld [vmem:[%s19394_s2 + $0x2d4] ss:$8 sps:$4 sm:$0xff]   ;;  %v674_v33 = vadd.f32 %v673_v54, %v672_v17  ;;  %v834_v43 = vrot.slane %v833_v60, 1  ;;  %v688_v17 = vadd.f32 %v687_v62, %v686_v42  ;;  %v13471_v56 = vld [vmem:[%s19394_s2 + $0x2a0] ss:$8 sps:$4 sm:$0xff]  }
  0x7a   : > { %v885_v42 = vmul.f32 0.0625, %v786_v38  ;;  %v13477_v36 = vld [vmem:[%s19394_s2 + $0x290] ss:$8 sps:$4 sm:$0xff]  }
  0x7b   : > { %2687 = vmatpush1.bf16.msra.mxu0 %v13435_v35  ;;  %v707_v35 = vadd.f32 %v706_v41, %v705_v40  ;;  %v799_v40 = vrot.slane %v798_v49, 1  ;;  %v869_v52 = vmul.f32 0.0625, %v674_v33  ;;  %v871_v54 = vmul.f32 0.0625, %v688_v17  ;;  %v13485_v17 = vld [vmem:[%s19394_s2 + $0x284] ss:$8 sps:$4 sm:$0xff]  }
  0x7c   : > { %2728 = vmatpush1.bf16.msra.mxu1 %v13438_v55  ;;  %2688 = vmatprep.subr.bf16.mxu0 %v13443_v59  ;;  %v819_v55 = vadd.f32 %v818_v53, %v817_v32  ;;  %v13456_v59 = vld [vmem:[%s19394_s2 + $0x3d0] ss:$8 sps:$4 sm:$0xff]   ;;  %v13464_v32 = vld [vmem:[%s19394_s2 + $0x3c4] ss:$8 sps:$4 sm:$0xff]   ;;  %v13470_v53 = vld [vmem:[%s19394_s2 + $0x3b4] ss:$8 sps:$4 sm:$0xff]  }
  0x7d   : > { %2729 = vmatprep.subr.bf16.mxu1 %v13446_v61  ;;  %v13461_v61 = vld [vmem:[%s19394_s2 + $0x2c4] ss:$8 sps:$4 sm:$0xff]   ;;  %v800_v41 = vadd.f32 %v799_v40, %v798_v49  ;;  %v835_v49 = vadd.f32 %v834_v43, %v833_v60  ;;  %v13474_v60 = vld [vmem:[%s19394_s2 + $0x3a0] ss:$8 sps:$4 sm:$0xff]   ;;  %v13479_v40 = vld [vmem:[%s19394_s2 + $0x294] ss:$8 sps:$4 sm:$0xff]   ;;  %v903_v33 = vpack.c.bf16 %v871_v54, %v871_v54 }
  0x7f   : > { %2689 = vmatpush2.bf16.msra.mxu0 %v13441_v46  ;;  %v708_v46 = vrot.slane %v707_v35, 1  ;;  %v892_v62 = vmul.f32 0.0625, %v835_v49 }
  0x80   : > { %2730 = vmatpush2.bf16.msra.mxu1 %v13444_v63  ;;  %2690 = vmatprep.subr.bf16.mxu0 %v13449_v44  ;;  %v820_v63 = vrot.slane %v819_v55, 1  ;;  %v13462_v44 = vld [vmem:[%s19394_s2 + $0x3c0] ss:$8 sps:$4 sm:$0xff]  }
  0x81   : > { %2731 = vmatprep.subr.bf16.mxu1 %v13452_v45  ;;  %v13467_v45 = vld [vmem:[%s19394_s2 + $0x2b4] ss:$8 sps:$4 sm:$0xff]  }
  0x83   : > { %2691 = vmatpush2.bf16.msra.mxu0 %v13447_v57  ;;  %v709_v57 = vadd.f32 %v708_v46, %v707_v35  ;;  %v887_v35 = vmul.f32 0.0625, %v800_v41 }
  0x84   : > { %2732 = vmatpush2.bf16.msra.mxu1 %v13450_v39  ;;  %2692 = vmatprep.subr.bf16.mxu0 %v13455_v51  ;;  %v821_v39 = vadd.f32 %v820_v63, %v819_v55  ;;  %v13468_v51 = vld [vmem:[%s19394_s2 + $0x3b0] ss:$8 sps:$4 sm:$0xff]   ;;  %v13476_v55 = vld [vmem:[%s19394_s2 + $0x3a4] ss:$8 sps:$4 sm:$0xff]   ;;  %v13482_v63 = vld [vmem:[%s19394_s2 + $0x394] ss:$8 sps:$4 sm:$0xff]  }
  0x85   : > { %2733 = vmatprep.subr.bf16.mxu1 %v13458_v50  ;;  %v13473_v50 = vld [vmem:[%s19394_s2 + $0x2a4] ss:$8 sps:$4 sm:$0xff]   ;;  %v874_v58 = vmul.f32 0.0625, %v709_v57  ;;  %v919_v46 = vpack.c.bf16 %v887_v35, %v887_v35 }
  0x87   : > { %2693 = vmatpush2.bf16.msra.mxu0 %v13453_v34  ;;  %v890_v34 = vmul.f32 0.0625, %v821_v39  ;;  %v1251_v57 = vunpack.c.l.b16 %v919_v46  ;;  %v13488_v39 = vld [vmem:[%s19394_s2 + $0x384] ss:$8 sps:$4 sm:$0xff]  }
  0x88   : > { %2734 = vmatpush2.bf16.msra.mxu1 %v13456_v59  ;;  %2694 = vmatprep.subr.bf16.mxu0 %v13461_v61  ;;  %v876_v59 = vmul.f32 0.0625, %v723_v48  ;;  %v901_v61 = vpack.c.bf16 %v869_v52, %v869_v52  ;;  %v1235_v52 = vunpack.c.l.b16 %v903_v33  ;;  %v13483_v48 = vld [vmem:[%s19394_s2 + $0x280] ss:$8 sps:$4 sm:$0xff]  }
  0x89   : > { %2735 = vmatprep.subr.bf16.mxu1 %v13464_v32  ;;  %v917_v32 = vpack.c.bf16 %v885_v42, %v885_v42  ;;  %v922_v38 = vpack.c.bf16 %v890_v34, %v890_v34 }
  0x8a   : > { %v908_v43 = vpack.c.bf16 %v876_v59, %v876_v59  ;;  %v1233_v41 = vunpack.c.l.b16 %v901_v61  ;;  %v1268_v35 = vsel %vm1261_vm0, %v1251_v57, %v1235_v52  ;;  %v632_v52 = vunpack.c.l.bf16 %v15276_v28  ;;  %v13512_v57 = vld [vmem:[%s19394_s2 + $0x544] ss:$8 sps:$4 sm:$0xff]  }
  0x8b   : > { %2695 = vmatpush2.bf16.msra.mxu0 %v13459_v37  ;;  %v13480_v37 = vld [vmem:[%s19394_s2 + $0x390] ss:$8 sps:$4 sm:$0xff]   ;;  %v1254_v42 = vunpack.c.l.b16 %v922_v38  ;;  %v1284_v59 = vpack.c.b16 %v1268_v35, %v1268_v35 }
  0x8c   : > { %2736 = vmatpush2.bf16.msra.mxu1 %v13462_v44  ;;  %2696 = vmatprep.subr.bf16.mxu0 %v13467_v45  ;;  %v906_v44 = vpack.c.bf16 %v874_v58, %v874_v58  ;;  %v924_v45 = vpack.c.bf16 %v892_v62, %v892_v62  ;;  %v1240_v49 = vunpack.c.l.b16 %v908_v43  ;;  %v13494_v58 = vld [vmem:[%s19394_s2 + $0x574] ss:$8 sps:$4 sm:$0xff]   ;;  %v13501_v38 = vld [vmem:[%s19394_s2 + $0x450] ss:$8 sps:$4 sm:$0xff]  }
  0x8d   : > { %2737 = vmatprep.subr.bf16.mxu1 %v13470_v53  ;;  %v1249_v53 = vunpack.c.l.b16 %v917_v32  ;;  %v13500_v32 = vld [vmem:[%s19394_s2 + $0x564] ss:$8 sps:$4 sm:$0xff]   ;;  %v13504_v43 = vld [vmem:[%s19394_s2 + $0x550] ss:$8 sps:$4 sm:$0xff]  }
  0x8f   : > { %2697 = vmatpush2.bf16.msra.mxu0 %v13465_v47  ;;  %v13486_v47 = vld [vmem:[%s19394_s2 + $0x380] ss:$8 sps:$4 sm:$0xff]   ;;  %v1266_v54 = vsel %vm1261_vm0, %v1249_v53, %v1233_v41  ;;  %v13509_v41 = vld [vmem:[%s19394_s2 + $0x444] ss:$8 sps:$4 sm:$0xff]   ;;  %v616_v53 = vunpack.c.l.bf16 %v15236_v20 }
  0x90   : > { %2738 = vmatpush2.bf16.msra.mxu1 %v13468_v51  ;;  %2698 = vmatprep.subr.bf16.mxu0 %v13473_v50  ;;  %v1238_v51 = vunpack.c.l.b16 %v906_v44  ;;  %v1256_v50 = vunpack.c.l.b16 %v924_v45  ;;  %v1282_v34 = vpack.c.b16 %v1266_v54, %v1266_v54  ;;  %v13506_v44 = vld [vmem:[%s19394_s2 + $0x554] ss:$8 sps:$4 sm:$0xff]   ;;  %v584_v45 = vunpack.c.l.bf16 %v15140_v4 }
  0x91   : > { %2739 = vmatprep.subr.bf16.mxu1 %v13476_v55  ;;  %v13491_v55 = vld [vmem:[%s19394_s2 + $0x474] ss:$8 sps:$4 sm:$0xff]   ;;  %v808_v35 = vadd.f32 %v632_v52, %v616_v53  ;;  %v639_v53 = vunpack.c.h.bf16 %v15291_v31 }
  0x92   : > { %v1271_v61 = vsel %vm1261_vm0, %v1254_v42, %v1238_v51  ;;  %v1273_v62 = vsel %vm1261_vm0, %v1256_v50, %v1240_v49  ;;  %v634_v51 = vunpack.c.l.bf16 %v15281_v29  ;;  %v13507_v42 = vld [vmem:[%s19394_s2 + $0x440] ss:$8 sps:$4 sm:$0xff]   ;;  %v13515_v54 = vld [vmem:[%s19394_s2 + $0x434] ss:$8 sps:$4 sm:$0xff]  }
  0x93   : > { %2699 = vmatpush2.bf16.msra.mxu0 %v13471_v56  ;;  %v13489_v56 = vld [vmem:[%s19394_s2 + $0x470] ss:$8 sps:$4 sm:$0xff]   ;;  %v1287_v33 = vpack.c.b16 %v1271_v61, %v1271_v61  ;;  %v1289_v46 = vpack.c.b16 %v1273_v62, %v1273_v62  ;;  %v13510_v49 = vld [vmem:[%s19394_s2 + $0x540] ss:$8 sps:$4 sm:$0xff]   ;;  %v13521_v61 = vld [vmem:[%s19394_s2 + $0x424] ss:$8 sps:$4 sm:$0xff]  }
  0x94   : > { %2740 = vmatpush2.bf16.msra.mxu1 %v13474_v60  ;;  %2700 = vmatprep.subr.bf16.mxu0 %v13479_v40  ;;  %v13492_v60 = vld [vmem:[%s19394_s2 + $0x570] ss:$8 sps:$4 sm:$0xff]   ;;  %v13497_v40 = vld [vmem:[%s19394_s2 + $0x464] ss:$8 sps:$4 sm:$0xff]   ;;  %v809_v62 = vrot.slane %v808_v35, 4 }
  0x95   : > { %2741 = vmatprep.subr.bf16.mxu1 %v13482_v63  ;;  %v13495_v63 = vld [vmem:[%s19394_s2 + $0x460] ss:$8 sps:$4 sm:$0xff]   ;;  %v13527_v52 = vld [vmem:[%s19394_s2 + $0x414] ss:$8 sps:$4 sm:$0xff]  }
  0x97   : > { %2701 = vmatpush2.bf16.msra.mxu0 %v13477_v36  ;;  %v13498_v36 = vld [vmem:[%s19394_s2 + $0x560] ss:$8 sps:$4 sm:$0xff]  }
  0x98   : > { %2742 = vmatpush2.bf16.msra.mxu1 %v13480_v37  ;;  %2702 = vmatprep.subr.bf16.mxu0 %v13485_v17  ;;  %v13503_v37 = vld [vmem:[%s19394_s2 + $0x454] ss:$8 sps:$4 sm:$0xff]   ;;  %v600_v17 = vunpack.c.l.bf16 %v15186_v12 }
  0x99   : > { %2743 = vmatprep.subr.bf16.mxu1 %v13488_v39  ;;  %v586_v39 = vunpack.c.l.bf16 %v15145_v5 }
  0x9a   : > { %v696_v50 = vadd.f32 %v600_v17, %v584_v45  ;;  %v13522_v45 = vld [vmem:[%s19394_s2 + $0x520] ss:$8 sps:$4 sm:$0xff]  }
  0x9b   : > { %2703 = vmatpush2.bf16.msra.mxu0 %v13483_v48  ;;  %v602_v48 = vunpack.c.l.bf16 %v15191_v13 }
  0x9c   : > { %2744 = vmatpush2.bf16.msra.mxu1 %v13486_v47  ;;  %2754 = vmatprep.subr.bf16.mxu0 %v13491_v55  ;;  %v618_v47 = vunpack.c.l.bf16 %v15241_v21  ;;  %v13518_v55 = vld [vmem:[%s19394_s2 + $0x534] ss:$8 sps:$4 sm:$0xff]  }
  0x9d   : > { %2795 = vmatprep.subr.bf16.mxu1 %v13494_v58  ;;  %v710_v58 = vadd.f32 %v602_v48, %v586_v39  ;;  %v13530_v48 = vld [vmem:[%s19394_s2 + $0x514] ss:$8 sps:$4 sm:$0xff]  }
  0x9e   : > { %2705 = vmatmul.mubr.bf16.vlgmr.msra.gmra.mxu0 %v1282_v34  ;;  %v822_v34 = vadd.f32 %v634_v51, %v618_v47 }
  0x9f   : > { %2746 = vmatmul.mubr.bf16.vlgmr.msra.gmra.mxu1 %v1284_v59  ;;  %2755 = vmatpush1.bf16.msra.mxu0 %v13489_v56  ;;  %v13513_v59 = vld [vmem:[%s19394_s2 + $0x430] ss:$8 sps:$4 sm:$0xff]  }
  0xa0   : > { %2796 = vmatpush1.bf16.msra.mxu1 %v13492_v60  ;;  %2756 = vmatprep.subr.bf16.mxu0 %v13497_v40  ;;  %v13516_v56 = vld [vmem:[%s19394_s2 + $0x530] ss:$8 sps:$4 sm:$0xff]   ;;  %v697_v60 = vrot.slane %v696_v50, 4  ;;  %v589_v40 = vunpack.c.h.bf16 %v15151_v6 }
  0xa1   : > { %2797 = vmatprep.subr.bf16.mxu1 %v13500_v32  ;;  %2786 = vmatprep.mubr.bf16.mxu0 %v1287_v33  ;;  %v605_v32 = vunpack.c.h.bf16 %v15196_v14  ;;  %v13524_v33 = vld [vmem:[%s19394_s2 + $0x524] ss:$8 sps:$4 sm:$0xff]  }
  0xa2   : > { %2827 = vmatprep.mubr.bf16.mxu1 %v1289_v46  ;;  %v711_v46 = vrot.slane %v710_v58, 4  ;;  %v698_v17 = vadd.f32 %v697_v60, %v696_v50  ;;  %v13533_v60 = vld [vmem:[%s19394_s2 + $0x404] ss:$8 sps:$4 sm:$0xff]  }
  0xa3   : > { %2757 = vmatpush1.bf16.msra.mxu0 %v13495_v63  ;;  %v823_v63 = vrot.slane %v822_v34, 4  ;;  %v731_v39 = vadd.f32 %v605_v32, %v589_v40  ;;  %v13536_v40 = vld [vmem:[%s19394_s2 + $0x504] ss:$8 sps:$4 sm:$0xff]  }
  0xa4   : > { %2798 = vmatpush1.bf16.msra.mxu1 %v13498_v36  ;;  %2758 = vmatprep.subr.bf16.mxu0 %v13503_v37  ;;  %v621_v36 = vunpack.c.h.bf16 %v15246_v22  ;;  %v637_v37 = vunpack.c.h.bf16 %v15286_v30  ;;  %v712_v47 = vadd.f32 %v711_v46, %v710_v58  ;;  %v699_v58 = vrot.slane %v698_v17, 2 }
  0xa5   : > { %2799 = vmatprep.subr.bf16.mxu1 %v13506_v44  ;;  %v591_v44 = vunpack.c.h.bf16 %v15156_v7  ;;  %v824_v51 = vadd.f32 %v823_v63, %v822_v34 }
  0xa6   : > { %v713_v32 = vrot.slane %v712_v47, 2 }
  0xa7   : > { %2759 = vmatpush1.bf16.msra.mxu0 %v13501_v38  ;;  %v607_v38 = vunpack.c.h.bf16 %v15206_v15 }
  0xa8   : > { %2800 = vmatpush1.bf16.msra.mxu1 %v13504_v43  ;;  %2760 = vmatprep.subr.bf16.mxu0 %v13509_v41  ;;  %v13519_v43 = vld [vmem:[%s19394_s2 + $0x420] ss:$8 sps:$4 sm:$0xff]   ;;  %v623_v41 = vunpack.c.h.bf16 %v15251_v23 }
  0xa9   : > { %2801 = vmatprep.subr.bf16.mxu1 %v13512_v57  ;;  %v810_v57 = vadd.f32 %v809_v62, %v808_v35  ;;  %v745_v50 = vadd.f32 %v607_v38, %v591_v44  ;;  %v13525_v35 = vld [vmem:[%s19394_s2 + $0x410] ss:$8 sps:$4 sm:$0xff]   ;;  %v732_v62 = vrot.slane %v731_v39, 4  ;;  %v13531_v44 = vld [vmem:[%s19394_s2 + $0x400] ss:$8 sps:$4 sm:$0xff]  }
  0xaa   : > { %v857_v34 = vadd.f32 %v639_v53, %v623_v41  ;;  %v13534_v38 = vld [vmem:[%s19394_s2 + $0x500] ss:$8 sps:$4 sm:$0xff]   ;;  %v13539_v41 = vld [vmem:[%s19394_s2 + $0x4f4] ss:$8 sps:$4 sm:$0xff]  }
  0xab   : > { %2761 = vmatpush1.bf16.msra.mxu0 %v13507_v42  ;;  %v843_v42 = vadd.f32 %v637_v37, %v621_v36  ;;  %v746_v63 = vrot.slane %v745_v50, 4 }
  0xac   : > { %2802 = vmatpush1.bf16.msra.mxu1 %v13510_v49  ;;  %2762 = vmatprep.subr.bf16.mxu0 %v13515_v54  ;;  %v588_v49 = vunpack.c.l.bf16 %v15151_v6  ;;  %v604_v54 = vunpack.c.l.bf16 %v15196_v14 }
  0xad   : > { %2803 = vmatprep.subr.bf16.mxu1 %v13518_v55  ;;  %v620_v55 = vunpack.c.l.bf16 %v15246_v22  ;;  %v844_v46 = vrot.slane %v843_v42, 4 }
  0xae   : > { %v724_v36 = vadd.f32 %v604_v54, %v588_v49  ;;  %v714_v49 = vadd.f32 %v713_v32, %v712_v47  ;;  %v13545_v47 = vld [vmem:[%s19394_s2 + $0x4e4] ss:$8 sps:$4 sm:$0xff]  }
  0xaf   : > { %2763 = vmatpush1.bf16.msra.mxu0 %v13513_v59  ;;  %v636_v59 = vunpack.c.l.bf16 %v15286_v30 }
  0xb0   : > { %2804 = vmatpush1.bf16.msra.mxu1 %v13516_v56  ;;  %2764 = vmatprep.subr.bf16.mxu0 %v13521_v61  ;;  %v13528_v56 = vld [vmem:[%s19394_s2 + $0x510] ss:$8 sps:$4 sm:$0xff]   ;;  %v811_v61 = vrot.slane %v810_v57, 2 }
  0xb1   : > { %2805 = vmatprep.subr.bf16.mxu1 %v13524_v33  ;;  %v825_v33 = vrot.slane %v824_v51, 2  ;;  %v836_v37 = vadd.f32 %v636_v59, %v620_v55  ;;  %v845_v55 = vadd.f32 %v844_v46, %v843_v42  ;;  %v747_v59 = vadd.f32 %v746_v63, %v745_v50  ;;  %v13548_v50 = vld [vmem:[%s19394_s2 + $0x5e4] ss:$8 sps:$4 sm:$0xff]   ;;  %v13546_v46 = vld [vmem:[%s19394_s2 + $0x5e0] ss:$8 sps:$4 sm:$0xff]  }
  0xb2   : > { %v812_v53 = vadd.f32 %v811_v61, %v810_v57  ;;  %v13540_v57 = vld [vmem:[%s19394_s2 + $0x5f0] ss:$8 sps:$4 sm:$0xff]  }
  0xb3   : > { %2765 = vmatpush1.bf16.msra.mxu0 %v13519_v43  ;;  %v700_v43 = vadd.f32 %v699_v58, %v698_v17  ;;  %v826_v54 = vadd.f32 %v825_v33, %v824_v51  ;;  %v725_v17 = vrot.slane %v724_v36, 4  ;;  %v837_v58 = vrot.slane %v836_v37, 4  ;;  %v13543_v33 = vld [vmem:[%s19394_s2 + $0x4e0] ss:$8 sps:$4 sm:$0xff]  }
  0xb4   : > { %2806 = vmatpush1.bf16.msra.mxu1 %v13522_v45  ;;  %2766 = vmatprep.subr.bf16.mxu0 %v13527_v52  ;;  %v858_v45 = vrot.slane %v857_v34, 4  ;;  %v733_v52 = vadd.f32 %v732_v62, %v731_v39  ;;  %v813_v51 = vrot.slane %v812_v53, 1  ;;  %v846_v62 = vrot.slane %v845_v55, 2 }
  0xb5   : > { %2807 = vmatprep.subr.bf16.mxu1 %v13530_v48  ;;  %v13542_v48 = vld [vmem:[%s19394_s2 + $0x5f4] ss:$8 sps:$4 sm:$0xff]   ;;  %v701_v39 = vrot.slane %v700_v43, 1  ;;  %v827_v61 = vrot.slane %v826_v54, 1  ;;  %v726_v32 = vadd.f32 %v725_v17, %v724_v36 }
  0xb6   : > { %v734_v42 = vrot.slane %v733_v52, 2  ;;  %v13554_v36 = vld [vmem:[%s19394_s2 + $0x5d4] ss:$8 sps:$4 sm:$0xff]  }
  0xb7   : > { %2767 = vmatpush1.bf16.msra.mxu0 %v13525_v35  ;;  %v13537_v35 = vld [vmem:[%s19394_s2 + $0x4f0] ss:$8 sps:$4 sm:$0xff]  }
  0xb8   : > { %2808 = vmatpush1.bf16.msra.mxu1 %v13528_v56  ;;  %2768 = vmatprep.subr.bf16.mxu0 %v13533_v60  ;;  %v859_v56 = vadd.f32 %v858_v45, %v857_v34  ;;  %v715_v60 = vrot.slane %v714_v49, 1  ;;  %v838_v34 = vadd.f32 %v837_v58, %v836_v37  ;;  %v735_v45 = vadd.f32 %v734_v42, %v733_v52 }
  0xb9   : > { %2809 = vmatprep.subr.bf16.mxu1 %v13536_v40  ;;  %v748_v40 = vrot.slane %v747_v59, 2  ;;  %v814_v37 = vadd.f32 %v813_v51, %v812_v53  ;;  %v727_v58 = vrot.slane %v726_v32, 2  ;;  %v828_v52 = vadd.f32 %v827_v61, %v826_v54  ;;  %v13557_v53 = vld [vmem:[%s19394_s2 + $0x4c4] ss:$8 sps:$4 sm:$0xff]   ;;  %v13555_v54 = vld [vmem:[%s19394_s2 + $0x4c0] ss:$8 sps:$4 sm:$0xff]  }
  0xba   : > { %v860_v63 = vrot.slane %v859_v56, 2  ;;  %v839_v22 = vrot.slane %v838_v34, 2 }
  0xbb   : > { %2769 = vmatpush1.bf16.msra.mxu0 %v13531_v44  ;;  %v13551_v44 = vld [vmem:[%s19394_s2 + $0x4d4] ss:$8 sps:$4 sm:$0xff]   ;;  %v749_v17 = vadd.f32 %v748_v40, %v747_v59  ;;  %v13560_v59 = vld [vmem:[%s19394_s2 + $0x5c4] ss:$8 sps:$4 sm:$0xff]   ;;  %v891_v61 = vmul.f32 0.0625, %v828_v52 }
  0xbc   : > { %2810 = vmatpush1.bf16.msra.mxu1 %v13534_v38  ;;  %2770 = vmatprep.subr.bf16.mxu0 %v13539_v41  ;;  %v702_v38 = vadd.f32 %v701_v39, %v700_v43  ;;  %v716_v41 = vadd.f32 %v715_v60, %v714_v49  ;;  %v13552_v43 = vld [vmem:[%s19394_s2 + $0x5d0] ss:$8 sps:$4 sm:$0xff]   ;;  %v889_v39 = vmul.f32 0.0625, %v814_v37  ;;  %v840_v60 = vadd.f32 %v839_v22, %v838_v34  ;;  %v13563_v40 = vld [vmem:[%s19394_s2 + $0x4b4] ss:$8 sps:$4 sm:$0xff]  }
  0xbd   : > { %2811 = vmatprep.subr.bf16.mxu1 %v13542_v48  ;;  %v847_v48 = vadd.f32 %v846_v62, %v845_v55  ;;  %v736_v55 = vrot.slane %v735_v45, 1  ;;  %v750_v42 = vrot.slane %v749_v17, 1  ;;  %v13561_v22 = vld [vmem:[%s19394_s2 + $0x4b0] ss:$8 sps:$4 sm:$0xff]  }
  0xbe   : > { %v873_v49 = vmul.f32 0.0625, %v702_v38 }
  0xbf   : > { %2771 = vmatpush2.bf16.msra.mxu0 %v13537_v35  ;;  %v13549_v35 = vld [vmem:[%s19394_s2 + $0x4d0] ss:$8 sps:$4 sm:$0xff]   ;;  %v848_v51 = vrot.slane %v847_v48, 1 }
  0xc0   : > { %2812 = vmatpush2.bf16.msra.mxu1 %v13540_v57  ;;  %2772 = vmatprep.subr.bf16.mxu0 %v13545_v47  ;;  %v861_v57 = vadd.f32 %v860_v63, %v859_v56  ;;  %v875_v47 = vmul.f32 0.0625, %v716_v41  ;;  %v13558_v56 = vld [vmem:[%s19394_s2 + $0x5c0] ss:$8 sps:$4 sm:$0xff]   ;;  %v590_v63 = vunpack.c.l.bf16 %v15156_v7  ;;  %v606_v41 = vunpack.c.l.bf16 %v15206_v15 }
  0xc1   : > { %2813 = vmatprep.subr.bf16.mxu1 %v13548_v50  ;;  %v728_v50 = vadd.f32 %v727_v58, %v726_v32  ;;  %v13564_v32 = vld [vmem:[%s19394_s2 + $0x5b0] ss:$8 sps:$4 sm:$0xff]   ;;  %v849_v34 = vadd.f32 %v848_v51, %v847_v48  ;;  %v622_v58 = vunpack.c.l.bf16 %v15251_v23  ;;  %v13572_v48 = vld [vmem:[%s19394_s2 + $0x5a4] ss:$8 sps:$4 sm:$0xff]  }
  0xc2   : > { %v862_v62 = vrot.slane %v861_v57, 1 }
  0xc3   : > { %2773 = vmatpush2.bf16.msra.mxu0 %v13543_v33  ;;  %v737_v33 = vadd.f32 %v736_v55, %v735_v45  ;;  %v729_v38 = vrot.slane %v728_v50, 1  ;;  %v841_v45 = vrot.slane %v840_v60, 1  ;;  %v923_v55 = vpack.c.bf16 %v891_v61, %v891_v61  ;;  %v13578_v61 = vld [vmem:[%s19394_s2 + $0x594] ss:$8 sps:$4 sm:$0xff]  }
  0xc4   : > { %2814 = vmatpush2.bf16.msra.mxu1 %v13546_v46  ;;  %2774 = vmatprep.subr.bf16.mxu0 %v13551_v44  ;;  %v13566_v46 = vld [vmem:[%s19394_s2 + $0x5b4] ss:$8 sps:$4 sm:$0xff]   ;;  %v751_v44 = vadd.f32 %v750_v42, %v749_v17  ;;  %v863_v37 = vadd.f32 %v862_v62, %v861_v57  ;;  %v921_v17 = vpack.c.bf16 %v889_v39, %v889_v39  ;;  %v13567_v57 = vld [vmem:[%s19394_s2 + $0x4a0] ss:$8 sps:$4 sm:$0xff]  }
  0xc5   : > { %2815 = vmatprep.subr.bf16.mxu1 %v13554_v36  ;;  %v13569_v36 = vld [vmem:[%s19394_s2 + $0x4a4] ss:$8 sps:$4 sm:$0xff]   ;;  %v878_v52 = vmul.f32 0.0625, %v737_v33  ;;  %v842_v51 = vadd.f32 %v841_v45, %v840_v60  ;;  %v738_v62 = vadd.f32 %v606_v41, %v590_v63  ;;  %v13575_v39 = vld [vmem:[%s19394_s2 + $0x494] ss:$8 sps:$4 sm:$0xff]  }
  0xc6   : > { %v896_v42 = vmul.f32 0.0625, %v863_v37  ;;  %v1253_v33 = vunpack.c.l.b16 %v921_v17  ;;  %v13573_v63 = vld [vmem:[%s19394_s2 + $0x490] ss:$8 sps:$4 sm:$0xff]  }
  0xc7   : > { %2775 = vmatpush2.bf16.msra.mxu0 %v13549_v35  ;;  %v638_v35 = vunpack.c.l.bf16 %v15291_v31  ;;  %v910_v60 = vpack.c.bf16 %v878_v52, %v878_v52  ;;  %v739_v37 = vrot.slane %v738_v62, 4  ;;  %v13579_v52 = vld [vmem:[%s19394_s2 + $0x480] ss:$8 sps:$4 sm:$0xff]  }
  0xc8   : > { %2816 = vmatpush2.bf16.msra.mxu1 %v13552_v43  ;;  %2776 = vmatprep.subr.bf16.mxu0 %v13557_v53  ;;  %v905_v43 = vpack.c.bf16 %v873_v49, %v873_v49  ;;  %v907_v53 = vpack.c.bf16 %v875_v47, %v875_v47  ;;  %v880_v49 = vmul.f32 0.0625, %v751_v44  ;;  %v928_v45 = vpack.c.bf16 %v896_v42, %v896_v42  ;;  %v13590_v42 = vld [vmem:[%s19394_s2 + $0x774] ss:$8 sps:$4 sm:$0xff]  }
  0xc9   : > { %2817 = vmatprep.subr.bf16.mxu1 %v13560_v59  ;;  %v13570_v59 = vld [vmem:[%s19394_s2 + $0x5a0] ss:$8 sps:$4 sm:$0xff]  }
  0xca   : > { %v1237_v47 = vunpack.c.l.b16 %v905_v43 }
  0xcb   : > { %2777 = vmatpush2.bf16.msra.mxu0 %v13555_v54  ;;  %v894_v54 = vmul.f32 0.0625, %v849_v34  ;;  %v912_v34 = vpack.c.bf16 %v880_v49, %v880_v49  ;;  %v740_v49 = vadd.f32 %v739_v37, %v738_v62  ;;  %v13588_v62 = vld [vmem:[%s19394_s2 + $0x770] ss:$8 sps:$4 sm:$0xff]  }
  0xcc   : > { %2818 = vmatpush2.bf16.msra.mxu1 %v13558_v56  ;;  %2778 = vmatprep.subr.bf16.mxu0 %v13563_v40  ;;  %v730_v56 = vadd.f32 %v729_v38, %v728_v50  ;;  %v850_v40 = vadd.f32 %v638_v35, %v622_v58  ;;  %v1255_v50 = vunpack.c.l.b16 %v923_v55  ;;  %v15934_v38 = vmul.f32 0.0625, %v842_v51  ;;  %v13581_v58 = vld [vmem:[%s19394_s2 + $0x484] ss:$8 sps:$4 sm:$0xff]   ;;  %v13587_v51 = vld [vmem:[%s19394_s2 + $0x674] ss:$8 sps:$4 sm:$0xff]  }
  0xcd   : > { %2819 = vmatprep.subr.bf16.mxu1 %v13566_v46  ;;  %v1239_v46 = vunpack.c.l.b16 %v907_v53  ;;  %v13584_v35 = vld [vmem:[%s19394_s2 + $0x584] ss:$8 sps:$4 sm:$0xff]   ;;  %v1270_v43 = vsel %vm1261_vm0, %v1253_v33, %v1237_v47  ;;  %v1242_v53 = vunpack.c.l.b16 %v910_v60 }
  0xce   : > { %v15932_v44 = vmul.f32 0.0625, %v730_v56  ;;  %v851_v41 = vrot.slane %v850_v40, 4  ;;  %v13593_v60 = vld [vmem:[%s19394_s2 + $0x664] ss:$8 sps:$4 sm:$0xff]  }
  0xcf   : > { %2779 = vmatpush2.bf16.msra.mxu0 %v13561_v22  ;;  %v13576_v22 = vld [vmem:[%s19394_s2 + $0x590] ss:$8 sps:$4 sm:$0xff]   ;;  %v1272_v17 = vsel %vm1261_vm0, %v1255_v50, %v1239_v46  ;;  %v741_v46 = vrot.slane %v740_v49, 2 }
  0xd0   : > { %2820 = vmatpush2.bf16.msra.mxu1 %v13564_v32  ;;  %2780 = vmatprep.subr.bf16.mxu0 %v13569_v36  ;;  %v926_v32 = vpack.c.bf16 %v894_v54, %v894_v54  ;;  %v1187_v36 = vlaneseq  ;;  %v852_v56 = vadd.f32 %v851_v41, %v850_v40  ;;  %v1288_v47 = vpack.c.b16 %v1272_v17, %v1272_v17  ;;  %v13599_v41 = vld [vmem:[%s19394_s2 + $0x654] ss:$8 sps:$4 sm:$0xff]   ;;  %v13605_v17 = vld [vmem:[%s19394_s2 + $0x644] ss:$8 sps:$4 sm:$0xff]  }
  0xd1   : > { %2821 = vmatprep.subr.bf16.mxu1 %v13572_v48  ;;  %v13582_v48 = vld [vmem:[%s19394_s2 + $0x580] ss:$8 sps:$4 sm:$0xff]  }
  0xd2   : > { %v1258_v55 = vunpack.c.l.b16 %v926_v32  ;;  %v15950_v54 = vshrl.u32 %v1187_v36, 7  ;;  %v853_v50 = vrot.slane %v852_v56, 2  ;;  %v742_v36 = vadd.f32 %v741_v46, %v740_v49  ;;  %v13618_v46 = vld [vmem:[%s19394_s2 + $0x720] ss:$8 sps:$4 sm:$0xff]  }
  0xd3   : > { %2781 = vmatpush2.bf16.msra.mxu0 %v13567_v57  ;;  %v1244_v57 = vunpack.c.l.b16 %v912_v34 }
  0xd4   : > { %2822 = vmatpush2.bf16.msra.mxu1 %v13570_v59  ;;  %2782 = vmatprep.subr.bf16.mxu0 %v13575_v39  ;;  %v1260_v59 = vunpack.c.l.b16 %v928_v45  ;;  %v1286_v39 = vpack.c.b16 %v1270_v43, %v1270_v43  ;;  %v1275_v40 = vsel %vm1261_vm0, %v1258_v55, %v1242_v53  ;;  %v13594_v45 = vld [vmem:[%s19394_s2 + $0x760] ss:$8 sps:$4 sm:$0xff]   ;;  %v854_v37 = vadd.f32 %v853_v50, %v852_v56  ;;  %v13600_v43 = vld [vmem:[%s19394_s2 + $0x750] ss:$8 sps:$4 sm:$0xff]   ;;  %v13608_v53 = vld [vmem:[%s19394_s2 + $0x744] ss:$8 sps:$4 sm:$0xff]  }
  0xd5   : > { %2823 = vmatprep.subr.bf16.mxu1 %v13578_v61  ;;  %v13585_v61 = vld [vmem:[%s19394_s2 + $0x670] ss:$8 sps:$4 sm:$0xff]   ;;  %v1291_v32 = vpack.c.b16 %v1275_v40, %v1275_v40  ;;  %v13603_v55 = vld [vmem:[%s19394_s2 + $0x640] ss:$8 sps:$4 sm:$0xff]   ;;  %v13611_v56 = vld [vmem:[%s19394_s2 + $0x634] ss:$8 sps:$4 sm:$0xff]  }
  0xd6   : > { %v1277_v33 = vsel %vm1261_vm0, %v1260_v59, %v1244_v57  ;;  %v13606_v57 = vld [vmem:[%s19394_s2 + $0x740] ss:$8 sps:$4 sm:$0xff]   ;;  %v13620_v40 = vld [vmem:[%s19394_s2 + $0x724] ss:$8 sps:$4 sm:$0xff]   ;;  %v13623_v50 = vld [vmem:[%s19394_s2 + $0x614] ss:$8 sps:$4 sm:$0xff]  }
  0xd7   : > { %2783 = vmatpush2.bf16.msra.mxu0 %v13573_v63  ;;  %v13596_v63 = vld [vmem:[%s19394_s2 + $0x764] ss:$8 sps:$4 sm:$0xff]   ;;  %v1293_v34 = vpack.c.b16 %v1277_v33, %v1277_v33  ;;  %v13615_v33 = vld [vmem:[%s19394_s2 + $0x620] ss:$8 sps:$4 sm:$0xff]  }
  0xd8   : > { %2824 = vmatpush2.bf16.msra.mxu1 %v13576_v22  ;;  %2784 = vmatprep.subr.bf16.mxu0 %v13581_v58  ;;  %v13591_v22 = vld [vmem:[%s19394_s2 + $0x660] ss:$8 sps:$4 sm:$0xff]   ;;  %v13602_v58 = vld [vmem:[%s19394_s2 + $0x754] ss:$8 sps:$4 sm:$0xff]  }
  0xd9   : > { %2825 = vmatprep.subr.bf16.mxu1 %v13584_v35  ;;  %v13597_v35 = vld [vmem:[%s19394_s2 + $0x650] ss:$8 sps:$4 sm:$0xff]  }
  0xdb   : > { %2785 = vmatpush2.bf16.msra.mxu0 %v13579_v52  ;;  %v743_v52 = vrot.slane %v742_v36, 1 }
  0xdc   : > { %2826 = vmatpush2.bf16.msra.mxu1 %v13582_v48  ;;  %2836 = vmatprep.subr.bf16.mxu0 %v13587_v51  ;;  %v855_v48 = vrot.slane %v854_v37, 1  ;;  %v13614_v51 = vld [vmem:[%s19394_s2 + $0x734] ss:$8 sps:$4 sm:$0xff]  }
  0xdd   : > { %2877 = vmatprep.subr.bf16.mxu1 %v13590_v42  ;;  %v744_v59 = vadd.f32 %v743_v52, %v742_v36  ;;  %v13609_v42 = vld [vmem:[%s19394_s2 + $0x630] ss:$8 sps:$4 sm:$0xff]   ;;  %v13630_v36 = vld [vmem:[%s19394_s2 + $0x700] ss:$8 sps:$4 sm:$0xff]   ;;  %v13644_v52 = vld [vmem:[%s19394_s2 + $0x7e4] ss:$8 sps:$4 sm:$0xff]  }
  0xde   : > { %2787 = vmatmul.mubr.bf16.vlgmr.msra.gmra.mxu0 %v1286_v39  ;;  %v856_v49 = vadd.f32 %v855_v48, %v854_v37  ;;  %v13612_v39 = vld [vmem:[%s19394_s2 + $0x730] ss:$8 sps:$4 sm:$0xff]   ;;  %v13635_v37 = vld [vmem:[%s19394_s2 + $0x6f4] ss:$8 sps:$4 sm:$0xff]   ;;  %v13639_v48 = vld [vmem:[%s19394_s2 + $0x6e0] ss:$8 sps:$4 sm:$0xff]  }
  0xdf   : > { %2828 = vmatmul.mubr.bf16.vlgmr.msra.gmra.mxu1 %v1288_v47  ;;  %2837 = vmatpush1.bf16.msra.mxu0 %v13585_v61  ;;  %v16014_v47 = vmul.f32 0.0625, %v744_v59  ;;  %v13648_v59 = vld [vmem:[%s19394_s2 + $0x7d0] ss:$8 sps:$4 sm:$0xff]  }
  0xe0   : > { %2878 = vmatpush1.bf16.msra.mxu1 %v13588_v62  ;;  %2838 = vmatprep.subr.bf16.mxu0 %v13593_v60  ;;  %v16016_v61 = vmul.f32 0.0625, %v856_v49  ;;  %v13617_v62 = vld [vmem:[%s19394_s2 + $0x624] ss:$8 sps:$4 sm:$0xff]   ;;  %v13626_v60 = vld [vmem:[%s19394_s2 + $0x714] ss:$8 sps:$4 sm:$0xff]  }
  0xe1   : > { %2879 = vmatprep.subr.bf16.mxu1 %v13596_v63  ;;  %2868 = vmatprep.mubr.bf16.mxu0 %v1291_v32  ;;  %v13621_v63 = vld [vmem:[%s19394_s2 + $0x610] ss:$8 sps:$4 sm:$0xff]   ;;  %v13629_v32 = vld [vmem:[%s19394_s2 + $0x604] ss:$8 sps:$4 sm:$0xff]  }
  0xe2   : > { %2909 = vmatprep.mubr.bf16.mxu1 %v1293_v34  ;;  %v13632_v34 = vld [vmem:[%s19394_s2 + $0x704] ss:$8 sps:$4 sm:$0xff]  }
  0xe3   : > { %2839 = vmatpush1.bf16.msra.mxu0 %v13591_v22  ;;  %v13624_v22 = vld [vmem:[%s19394_s2 + $0x710] ss:$8 sps:$4 sm:$0xff]   ;;  %v13653_v49 = vld [vmem:[%s19394_s2 + $0x6c4] ss:$8 sps:$4 sm:$0xff]  }
  0xe4   : > { %2880 = vmatpush1.bf16.msra.mxu1 %v13594_v45  ;;  %2840 = vmatprep.subr.bf16.mxu0 %v13599_v41  ;;  %v13627_v45 = vld [vmem:[%s19394_s2 + $0x600] ss:$8 sps:$4 sm:$0xff]   ;;  %v13638_v41 = vld [vmem:[%s19394_s2 + $0x7f4] ss:$8 sps:$4 sm:$0xff]  }
  0xe5   : > { %2881 = vmatprep.subr.bf16.mxu1 %v13602_v58  ;;  %v13633_v58 = vld [vmem:[%s19394_s2 + $0x6f0] ss:$8 sps:$4 sm:$0xff]  }
  0xe7   : > { %2841 = vmatpush1.bf16.msra.mxu0 %v13597_v35  ;;  %v13636_v35 = vld [vmem:[%s19394_s2 + $0x7f0] ss:$8 sps:$4 sm:$0xff]  }
  0xe8   : > { %2882 = vmatpush1.bf16.msra.mxu1 %v13600_v43  ;;  %2842 = vmatprep.subr.bf16.mxu0 %v13605_v17  ;;  %v13641_v43 = vld [vmem:[%s19394_s2 + $0x6e4] ss:$8 sps:$4 sm:$0xff]   ;;  %v13642_v17 = vld [vmem:[%s19394_s2 + $0x7e0] ss:$8 sps:$4 sm:$0xff]  }
  0xe9   : > { %2883 = vmatprep.subr.bf16.mxu1 %v13608_v53  ;;  %v13647_v53 = vld [vmem:[%s19394_s2 + $0x6d4] ss:$8 sps:$4 sm:$0xff]  }
  0xeb   : > { %2843 = vmatpush1.bf16.msra.mxu0 %v13603_v55  ;;  %v13650_v55 = vld [vmem:[%s19394_s2 + $0x7d4] ss:$8 sps:$4 sm:$0xff]  }
  0xec   : > { %2884 = vmatpush1.bf16.msra.mxu1 %v13606_v57  ;;  %2844 = vmatprep.subr.bf16.mxu0 %v13611_v56  ;;  %v13645_v57 = vld [vmem:[%s19394_s2 + $0x6d0] ss:$8 sps:$4 sm:$0xff]   ;;  %v13656_v56 = vld [vmem:[%s19394_s2 + $0x7c4] ss:$8 sps:$4 sm:$0xff]  }
  0xed   : > { %2885 = vmatprep.subr.bf16.mxu1 %v13614_v51  ;;  %v13651_v51 = vld [vmem:[%s19394_s2 + $0x6c0] ss:$8 sps:$4 sm:$0xff]  }
  0xef   : > { %2845 = vmatpush1.bf16.msra.mxu0 %v13609_v42  ;;  %v13654_v42 = vld [vmem:[%s19394_s2 + $0x7c0] ss:$8 sps:$4 sm:$0xff]  }
  0xf0   : > { %2886 = vmatpush1.bf16.msra.mxu1 %v13612_v39  ;;  %2846 = vmatprep.subr.bf16.mxu0 %v13617_v62  ;;  %v13659_v39 = vld [vmem:[%s19394_s2 + $0x6b4] ss:$8 sps:$4 sm:$0xff]  }
  0xf1   : > { %2887 = vmatprep.subr.bf16.mxu1 %v13620_v40  ;;  %v13662_v62 = vld [vmem:[%s19394_s2 + $0x7b4] ss:$8 sps:$4 sm:$0xff]   ;;  %v13657_v40 = vld [vmem:[%s19394_s2 + $0x6b0] ss:$8 sps:$4 sm:$0xff]  }
  0xf3   : > { %2847 = vmatpush1.bf16.msra.mxu0 %v13615_v33  ;;  %v13660_v33 = vld [vmem:[%s19394_s2 + $0x7b0] ss:$8 sps:$4 sm:$0xff]  }
  0xf4   : > { %2888 = vmatpush1.bf16.msra.mxu1 %v13618_v46  ;;  %2848 = vmatprep.subr.bf16.mxu0 %v13623_v50  ;;  %v13665_v46 = vld [vmem:[%s19394_s2 + $0x6a4] ss:$8 sps:$4 sm:$0xff]  }
  0xf5   : > { %2889 = vmatprep.subr.bf16.mxu1 %v13626_v60  ;;  %v13668_v50 = vld [vmem:[%s19394_s2 + $0x7a4] ss:$8 sps:$4 sm:$0xff]   ;;  %v13663_v60 = vld [vmem:[%s19394_s2 + $0x6a0] ss:$8 sps:$4 sm:$0xff]  }
  0xf7   : > { %2849 = vmatpush1.bf16.msra.mxu0 %v13621_v63  ;;  %v13666_v63 = vld [vmem:[%s19394_s2 + $0x7a0] ss:$8 sps:$4 sm:$0xff]  }
  0xf8   : > { %2890 = vmatpush1.bf16.msra.mxu1 %v13624_v22  ;;  %2850 = vmatprep.subr.bf16.mxu0 %v13629_v32  ;;  %v909_v22 = vpack.c.bf16 %v15932_v44, %v15932_v44  ;;  %v13671_v32 = vld [vmem:[%s19394_s2 + $0x694] ss:$8 sps:$4 sm:$0xff]  }
  0xf9   : > { %2891 = vmatprep.subr.bf16.mxu1 %v13632_v34  ;;  %v925_v34 = vpack.c.bf16 %v15934_v38, %v15934_v38  ;;  %v13674_v44 = vld [vmem:[%s19394_s2 + $0x794] ss:$8 sps:$4 sm:$0xff]   ;;  %v13672_v38 = vld [vmem:[%s19394_s2 + $0x790] ss:$8 sps:$4 sm:$0xff]  }
  0xfb   : > { %2851 = vmatpush1.bf16.msra.mxu0 %v13627_v45  ;;  %v911_v45 = vpack.c.bf16 %v16014_v47, %v16014_v47  ;;  %v13677_v47 = vld [vmem:[%s19394_s2 + $0x684] ss:$8 sps:$4 sm:$0xff]  }
  0xfc   : > { %2892 = vmatpush1.bf16.msra.mxu1 %v13630_v36  ;;  %2852 = vmatprep.subr.bf16.mxu0 %v13635_v37  ;;  %v927_v36 = vpack.c.bf16 %v16016_v61, %v16016_v61  ;;  %v13669_v37 = vld [vmem:[%s19394_s2 + $0x690] ss:$8 sps:$4 sm:$0xff]   ;;  %v1241_v61 = vunpack.c.l.b16 %v909_v22 }
  0xfd   : > { %2893 = vmatprep.subr.bf16.mxu1 %v13638_v41  ;;  %v1257_v41 = vunpack.c.l.b16 %v925_v34  ;;  %v13688_v34 = vld [vmem:[%s19396_s4 + $0xb0] sm:$0xff]  }
  0xff   : > { %2853 = vmatpush2.bf16.msra.mxu0 %v13633_v58  ;;  %v1243_v58 = vunpack.c.l.b16 %v911_v45 }
 0x100   : > { %2894 = vmatpush2.bf16.msra.mxu1 %v13636_v35  ;;  %2854 = vmatprep.subr.bf16.mxu0 %v13641_v43  ;;  %v1259_v35 = vunpack.c.l.b16 %v927_v36  ;;  %v13680_v43 = vld [vmem:[%s19394_s2 + $0x784] ss:$8 sps:$4 sm:$0xff]  }
 0x101   : > { %2895 = vmatprep.subr.bf16.mxu1 %v13644_v52  ;;  %v13675_v52 = vld [vmem:[%s19394_s2 + $0x680] ss:$8 sps:$4 sm:$0xff]  }
 0x102   : > { %v13689_v36 = vld [vmem:[%s19396_s4 + $0x68] sm:$0xff]  }
 0x103   : > { %2855 = vmatpush2.bf16.msra.mxu0 %v13639_v48  ;;  %v13678_v48 = vld [vmem:[%s19394_s2 + $0x780] ss:$8 sps:$4 sm:$0xff]  }
 0x104   : > { %2896 = vmatpush2.bf16.msra.mxu1 %v13642_v17  ;;  %2856 = vmatprep.subr.bf16.mxu0 %v13647_v53  ;;  %v1185_v17 = vld [vmem:[%s19395_s3] sm:$0x3]  ;;  %v1189_v53 = vsub.s32 0, %v15950_v54 }
 0x105   : > { %2897 = vmatprep.subr.bf16.mxu1 %v13650_v55  ;;  %v1274_v55 = vsel %vm1261_vm0, %v1257_v41, %v1241_v61  ;;  %v13691_v41 = vld [vmem:[%s19396_s4 + $0x28] sm:$0xff]  }
 0x107   : > { %2857 = vmatpush2.bf16.msra.mxu0 %v13645_v57  ;;  %v1276_v57 = vsel %vm1261_vm0, %v1259_v35, %v1243_v58 }
 0x108   : > { %2898 = vmatpush2.bf16.msra.mxu1 %v13648_v59  ;;  %2858 = vmatprep.subr.bf16.mxu0 %v13653_v49  ;;  %v13681_v59 = vld [vmem:[%s19396_s4 + $0x78] sm:$0xff]  }
 0x109   : > { %2899 = vmatprep.subr.bf16.mxu1 %v13656_v56  ;;  %v13682_v49 = vld [vmem:[%s19396_s4 + $0xf8] sm:$0xff]  }
 0x10a   : > { %v13683_v56 = vld [vmem:[%s19396_s4 + $0x38] sm:$0xff]  }
 0x10b   : > { %2859 = vmatpush2.bf16.msra.mxu0 %v13651_v51  ;;  %v1193_v51 = vsub.s32 1, %v15950_v54 }
 0x10c   : > { %2900 = vmatpush2.bf16.msra.mxu1 %v13654_v42  ;;  %2860 = vmatprep.subr.bf16.mxu0 %v13659_v39  ;;  %v1290_v42 = vpack.c.b16 %v1274_v55, %v1274_v55  ;;  %v1292_v39 = vpack.c.b16 %v1276_v57, %v1276_v57  ;;  %v13694_v55 = vld [vmem:[%s19396_s4 + $0xe0] sm:$0xff]  }
 0x10d   : > { %2901 = vmatprep.subr.bf16.mxu1 %v13662_v62  ;;  %v13684_v62 = vld [vmem:[%s19396_s4 + $0xb8] sm:$0xff]   ;;  %v1194_v54 = vrot.slane %v1185_v17, %v1193_v51  ;;  %v13695_v57 = vld [vmem:[%s19396_s4 + $0x20] sm:$0xff]  }
 0x10e   : > { %v13699_v51 = vld [vmem:[%s19396_s4 + $0x18] sm:$0xff]  }
 0x10f   : > { %2861 = vmatpush2.bf16.msra.mxu0 %v13657_v40  ;;  %v1190_v40 = vrot.slane %v1185_v17, %v1189_v53 }
 0x110   : > { %2902 = vmatpush2.bf16.msra.mxu1 %v13660_v33  ;;  %2862 = vmatprep.subr.bf16.mxu0 %v13665_v46  ;;  %v13685_v33 = vld [vmem:[%s19396_s4 + $0x70] sm:$0xff]  }
 0x111   : > { %2903 = vmatprep.subr.bf16.mxu1 %v13668_v50  ;;  %v13686_v46 = vld [vmem:[%s19396_s4 + $0xf0] sm:$0xff]  }
 0x112   : > { %v13687_v50 = vld [vmem:[%s19396_s4 + $0x30] sm:$0xff]  }
 0x113   : > { %2863 = vmatpush2.bf16.msra.mxu0 %v13663_v60  ;;  %v12028_v60 = vcombine.high %v15120_v0, %v15161_v8 }
 0x114   : > { %2904 = vmatpush2.bf16.msra.mxu1 %v13666_v63  ;;  %2864 = vmatprep.subr.bf16.mxu0 %v13671_v32  ;;  %v12030_v63 = vcombine.high %v15125_v1, %v15166_v9 }
 0x115   : > { %2905 = vmatprep.subr.bf16.mxu1 %v13674_v44 }
 0x117   : > { %2865 = vmatpush2.bf16.msra.mxu0 %v13669_v37 }
 0x118   : > { %2906 = vmatpush2.bf16.msra.mxu1 %v13672_v38  ;;  %2866 = vmatprep.subr.bf16.mxu0 %v13677_v47  ;;  %v13690_v38 = vld [vmem:[%s19396_s4 + $0xe8] sm:$0xff]  }
 0x119   : > { %2907 = vmatprep.subr.bf16.mxu1 %v13680_v43  ;;  %v13692_v43 = vld [vmem:[%s19396_s4 + $0xa8] sm:$0xff]  }
 0x11b   : > { %2867 = vmatpush2.bf16.msra.mxu0 %v13675_v52 }
 0x11c   : > { %2908 = vmatpush2.bf16.msra.mxu1 %v13678_v48  ;;  %13016 = vmatprep.subr.bf16.mxu0 %v13681_v59  ;;  %v13693_v48 = vld [vmem:[%s19396_s4 + $0x60] sm:$0xff]  }
 0x11d   : > { %13044 = vmatprep.subr.bf16.mxu1 %v13682_v49  ;;  %v13696_v59 = vld [vmem:[%s19396_s4 + $0xa0] sm:$0xff]   ;;  %v13697_v49 = vld [vmem:[%s19396_s4 + $0x58] sm:$0xff]  }
 0x11e   : > { %v2624_v22 = vpop.f32.mrf.mxu0  ;;  %2869 = vmatmul.mubr.bf16.vlgmr.msra.gmra.mxu0 %v1290_v42  ;;  %v13700_v42 = vld [vmem:[%s19396_s4 + $0x98] sm:$0xff]  }
 0x11f   : > { %v2665_v32 = vpop.f32.mrf.mxu1  ;;  %2910 = vmatmul.mubr.bf16.vlgmr.msra.gmra.mxu1 %v1292_v39  ;;  %v2625_v45 = vadd.f32 %v2624_v22, %v1190_v40  ;;  %13017 = vmatpush3.bf16.msra.mxu0 %v13683_v56  ;;  %v13698_v56 = vld [vmem:[%s19396_s4 + $0xd8] sm:$0xff]   ;;  %v13701_v39 = vld [vmem:[%s19396_s4 + $0x50] sm:$0xff]   ;;  %v13710_v22 = vld [vmem:[%s19396_s4 + $0xc0] sm:$0xff]  }
 0x120   : > { %13045 = vmatpush3.bf16.msra.mxu1 %v13684_v62  ;;  %v2626_v44 = vpop.f32.mrf.mxu0  ;;  %13018 = vmatprep.subr.bf16.mxu0 %v13685_v33  ;;  %v13702_v62 = vld [vmem:[%s19396_s4 + $0xd0] sm:$0xff]  }
 0x121   : > { %v2667_v37 = vpop.f32.mrf.mxu1  ;;  %13046 = vmatprep.subr.bf16.mxu1 %v13686_v46  ;;  %v16199_v47 = vadd.f32 %v2665_v32, %v2625_v45  ;;  %v2627_v61 = vadd.f32 %v2626_v44, %v1194_v54  ;;  %4136 = vmatprep.mubr.bf16.mxu0 %v12028_v60  ;;  %v13703_v40 = vld [vmem:[%s19396_s4 + $0x10] sm:$0xff]   ;;  %v13705_v46 = vld [vmem:[%s19396_s4 + $0x48] sm:$0xff]   ;;  %v13711_v32 = vld [vmem:[%s19396_s4] sm:$0xff]  }
 0x122   : > { %4185 = vmatprep.mubr.bf16.mxu1 %v12030_v63  ;;  %v2628_v58 = vpop.f32.mrf.mxu0  ;;  %v13704_v33 = vld [vmem:[%s19396_s4 + $0x90] sm:$0xff]   ;;  %v13706_v54 = vld [vmem:[%s19396_s4 + $0xc8] sm:$0xff]   ;;  %v13709_v63 = vld [vmem:[%s19396_s4 + $0x40] sm:$0xff]  }
 0x123   : > { %v2669_v35 = vpop.f32.mrf.mxu1  ;;  %v16207_v52 = vadd.f32 %v2667_v37, %v2627_v61  ;;  %13019 = vmatpush3.bf16.msra.mxu0 %v13687_v50  ;;  %v13707_v50 = vld [vmem:[%s19396_s4 + $0x8] sm:$0xff]   ;;  %v13713_v45 = vld [vmem:[%s19396_s4 + $0x178] sm:$0xff]   ;;  %v12027_v37 = vcombine.low %v15120_v0, %v15161_v8  ;;  %v13718_v58 = vld [vmem:[%s19396_s4 + $0x1f0] sm:$0xff]  }
 0x124   : > { %13047 = vmatpush3.bf16.msra.mxu1 %v13688_v34  ;;  %v2629_v17 = vpop.f32.mrf.mxu0  ;;  %13020 = vmatprep.subr.bf16.mxu0 %v13689_v36  ;;  %v13708_v60 = vld [vmem:[%s19396_s4 + $0x88] sm:$0xff]   ;;  %v13712_v34 = vld [vmem:[%s19396_s4 + $0x80] sm:$0xff]   ;;  %v13714_v36 = vld [vmem:[%s19396_s4 + $0x1f8] sm:$0xff]  }
 0x125   : > { %v2670_v53 = vpop.f32.mrf.mxu1  ;;  %13048 = vmatprep.subr.bf16.mxu1 %v13690_v38  ;;  %v13715_v44 = vld [vmem:[%s19396_s4 + $0x138] sm:$0xff]   ;;  %v12029_v38 = vcombine.low %v15125_v1, %v15166_v9  ;;  %v13719_v35 = vld [vmem:[%s19396_s4 + $0x130] sm:$0xff]  }
 0x126   : > { %v13716_v61 = vld [vmem:[%s19396_s4 + $0x1b8] sm:$0xff]   ;;  %v13720_v53 = vld [vmem:[%s19396_s4 + $0x1b0] sm:$0xff]  }
 0x127   : > { %13021 = vmatpush3.bf16.msra.mxu0 %v13691_v41  ;;  %v13717_v41 = vld [vmem:[%s19396_s4 + $0x170] sm:$0xff]  }
 0x128   : > { %13049 = vmatpush3.bf16.msra.mxu1 %v13692_v43  ;;  %13022 = vmatprep.subr.bf16.mxu0 %v13693_v48  ;;  %v12044_v43 = vcombine.high %v15211_v16, %v15256_v24  ;;  %v19502_v48 = vld [vmem:[#allocation21_spill] sm:$0xff] }
 0x129   : > { %13050 = vmatprep.subr.bf16.mxu1 %v13694_v55  ;;  %v12046_v17 = vcombine.high %v19502_v48, %v15261_v25  ;;  %v13721_v55 = vld [vmem:[%s19396_s4 + $0x168] sm:$0xff]  }
 0x12b   : > { %13023 = vmatpush3.bf16.msra.mxu0 %v13695_v57  ;;  %v13722_v57 = vld [vmem:[%s19396_s4 + $0x1e8] sm:$0xff]  }
 0x12c   : > { %13051 = vmatpush3.bf16.msra.mxu1 %v13696_v59  ;;  %13024 = vmatprep.subr.bf16.mxu0 %v13697_v49  ;;  %v13723_v59 = vld [vmem:[%s19396_s4 + $0x128] sm:$0xff]  }
 0x12d   : > { %13052 = vmatprep.subr.bf16.mxu1 %v13698_v56  ;;  %v13724_v49 = vld [vmem:[%s19396_s4 + $0x1a8] sm:$0xff]   ;;  %v12043_v56 = vcombine.low %v15211_v16, %v15256_v24 }
 0x12f   : > { %13025 = vmatpush3.bf16.msra.mxu0 %v13699_v51  ;;  %v12045_v51 = vcombine.low %v19502_v48, %v15261_v25  ;;  %v13746_v48 = vld [vmem:[%s19396_s4 + $0x2f8] sm:$0xff]  }
 0x130   : > { %13053 = vmatpush3.bf16.msra.mxu1 %v13700_v42  ;;  %13026 = vmatprep.subr.bf16.mxu0 %v13701_v39  ;;  %v13725_v42 = vld [vmem:[%s19396_s4 + $0x160] sm:$0xff]  }
 0x131   : > { %13054 = vmatprep.subr.bf16.mxu1 %v13702_v62  ;;  %v13726_v39 = vld [vmem:[%s19396_s4 + $0x1e0] sm:$0xff]   ;;  %v12032_v62 = vcombine.high %v15130_v2, %v15171_v10 }
 0x133   : > { %13027 = vmatpush3.bf16.msra.mxu0 %v13703_v40  ;;  %v12034_v40 = vcombine.high %v15135_v3, %v15176_v11 }
 0x134   : > { %13055 = vmatpush3.bf16.msra.mxu1 %v13704_v33  ;;  %13028 = vmatprep.subr.bf16.mxu0 %v13705_v46  ;;  %v13727_v33 = vld [vmem:[%s19396_s4 + $0x120] sm:$0xff]  }
 0x135   : > { %13056 = vmatprep.subr.bf16.mxu1 %v13706_v54  ;;  %v13728_v46 = vld [vmem:[%s19396_s4 + $0x1a0] sm:$0xff]   ;;  %v13729_v54 = vld [vmem:[%s19396_s4 + $0x158] sm:$0xff]  }
 0x137   : > { %13029 = vmatpush3.bf16.msra.mxu0 %v13707_v50  ;;  %v13730_v50 = vld [vmem:[%s19396_s4 + $0x1d8] sm:$0xff]  }
 0x138   : > { %13057 = vmatpush3.bf16.msra.mxu1 %v13708_v60  ;;  %13030 = vmatprep.subr.bf16.mxu0 %v13709_v63  ;;  %v13731_v60 = vld [vmem:[%s19396_s4 + $0x118] sm:$0xff]  }
 0x139   : > { %13058 = vmatprep.subr.bf16.mxu1 %v13710_v22  ;;  %v13732_v63 = vld [vmem:[%s19396_s4 + $0x198] sm:$0xff]   ;;  %v13733_v22 = vld [vmem:[%s19396_s4 + $0x150] sm:$0xff]  }
 0x13b   : > { %13031 = vmatpush3.bf16.msra.mxu0 %v13711_v32  ;;  %v13734_v32 = vld [vmem:[%s19396_s4 + $0x1d0] sm:$0xff]  }
 0x13c   : > { %13059 = vmatpush3.bf16.msra.mxu1 %v13712_v34  ;;  %13072 = vmatprep.subr.bf16.mxu0 %v13713_v45  ;;  %v13735_v34 = vld [vmem:[%s19396_s4 + $0x110] sm:$0xff]  }
 0x13d   : > { %13100 = vmatprep.subr.bf16.mxu1 %v13714_v36  ;;  %v13736_v45 = vld [vmem:[%s19396_s4 + $0x190] sm:$0xff]   ;;  %v13737_v36 = vld [vmem:[%s19396_s4 + $0x148] sm:$0xff]  }
 0x13e   : > { %4137 = vmatmul.mubr.bf16.vlgmr.msra.gmra.mxu0 %v12027_v37  ;;  %v13739_v37 = vld [vmem:[%s19396_s4 + $0x108] sm:$0xff]  }
 0x13f   : > { %4186 = vmatmul.mubr.bf16.vlgmr.msra.gmra.mxu1 %v12029_v38  ;;  %13073 = vmatpush3.bf16.msra.mxu0 %v13715_v44  ;;  %v13738_v44 = vld [vmem:[%s19396_s4 + $0x1c8] sm:$0xff]  }
 0x140   : > { %13101 = vmatpush3.bf16.msra.mxu1 %v13716_v61  ;;  %13074 = vmatprep.subr.bf16.mxu0 %v13717_v41  ;;  %v13740_v38 = vld [vmem:[%s19396_s4 + $0x188] sm:$0xff]   ;;  %v13741_v61 = vld [vmem:[%s19396_s4 + $0x140] sm:$0xff]  }
 0x141   : > { %13102 = vmatprep.subr.bf16.mxu1 %v13718_v58  ;;  %4144 = vmatprep.mubr.bf16.mxu0 %v12044_v43  ;;  %v13742_v41 = vld [vmem:[%s19396_s4 + $0x1c0] sm:$0xff]   ;;  %v13745_v43 = vld [vmem:[%s19396_s4 + $0x278] sm:$0xff]  }
 0x142   : > { %4193 = vmatprep.mubr.bf16.mxu1 %v12046_v17  ;;  %v13743_v58 = vld [vmem:[%s19396_s4 + $0x100] sm:$0xff]   ;;  %v12031_v17 = vcombine.low %v15130_v2, %v15171_v10 }
 0x143   : > { %13075 = vmatpush3.bf16.msra.mxu0 %v13719_v35  ;;  %v13744_v35 = vld [vmem:[%s19396_s4 + $0x180] sm:$0xff]  }
 0x144   : > { %13103 = vmatpush3.bf16.msra.mxu1 %v13720_v53  ;;  %13076 = vmatprep.subr.bf16.mxu0 %v13721_v55  ;;  %v12033_v53 = vcombine.low %v15135_v3, %v15176_v11  ;;  %v13747_v55 = vld [vmem:[%s19396_s4 + $0x238] sm:$0xff]  }
 0x145   : > { %13104 = vmatprep.subr.bf16.mxu1 %v13722_v57  ;;  %v13748_v57 = vld [vmem:[%s19396_s4 + $0x2b8] sm:$0xff]  }
 0x146   : > { %4145 = vmatmul.mubr.bf16.gmra.mxu0 %v12043_v56  ;;  %v12048_v56 = vcombine.high %v15226_v18, %v15266_v26 }
 0x147   : > { %4194 = vmatmul.mubr.bf16.gmra.mxu1 %v12045_v51  ;;  %13077 = vmatpush3.bf16.msra.mxu0 %v13723_v59  ;;  %v13749_v59 = vld [vmem:[%s19396_s4 + $0x270] sm:$0xff]   ;;  %v12050_v51 = vcombine.high %v15231_v19, %v15271_v27 }
 0x148   : > { %13105 = vmatpush3.bf16.msra.mxu1 %v13724_v49  ;;  %13078 = vmatprep.subr.bf16.mxu0 %v13725_v42  ;;  %v13750_v49 = vld [vmem:[%s19396_s4 + $0x2f0] sm:$0xff]  }
 0x149   : > { %13106 = vmatprep.subr.bf16.mxu1 %v13726_v39  ;;  %4234 = vmatprep.mubr.bf16.mxu0 %v12032_v62 }
 0x14a   : > { %4283 = vmatprep.mubr.bf16.mxu1 %v12034_v40  ;;  %v13751_v40 = vld [vmem:[%s19396_s4 + $0x230] sm:$0xff]  }
 0x14b   : > { %13079 = vmatpush3.bf16.msra.mxu0 %v13727_v33  ;;  %v13752_v33 = vld [vmem:[%s19396_s4 + $0x2b0] sm:$0xff]  }
 0x14c   : > { %13107 = vmatpush3.bf16.msra.mxu1 %v13728_v46  ;;  %13080 = vmatprep.subr.bf16.mxu0 %v13729_v54 }
 0x14d   : > { %13108 = vmatprep.subr.bf16.mxu1 %v13730_v50  ;;  %v13753_v50 = vld [vmem:[%s19396_s4 + $0x268] sm:$0xff]  }
 0x14f   : > { %13081 = vmatpush3.bf16.msra.mxu0 %v13731_v60 }
 0x150   : > { %13109 = vmatpush3.bf16.msra.mxu1 %v13732_v63  ;;  %13082 = vmatprep.subr.bf16.mxu0 %v13733_v22 }
 0x151   : > { %13110 = vmatprep.subr.bf16.mxu1 %v13734_v32 }
 0x153   : > { %13083 = vmatpush3.bf16.msra.mxu0 %v13735_v34  ;;  %v12047_v34 = vcombine.low %v15226_v18, %v15266_v26 }
 0x154   : > { %13111 = vmatpush3.bf16.msra.mxu1 %v13736_v45  ;;  %13084 = vmatprep.subr.bf16.mxu0 %v13737_v36  ;;  %v12049_v45 = vcombine.low %v15231_v19, %v15271_v27 }
 0x155   : > { %13112 = vmatprep.subr.bf16.mxu1 %v13738_v44  ;;  %v13755_v44 = vld [vmem:[%s19396_s4 + $0x228] sm:$0xff]  }
 0x157   : > { %13085 = vmatpush3.bf16.msra.mxu0 %v13739_v37 }
 0x158   : > { %13113 = vmatpush3.bf16.msra.mxu1 %v13740_v38  ;;  %13086 = vmatprep.subr.bf16.mxu0 %v13741_v61  ;;  %v13757_v61 = vld [vmem:[%s19396_s4 + $0x260] sm:$0xff]  }
 0x159   : > { %13114 = vmatprep.subr.bf16.mxu1 %v13742_v41  ;;  %v13758_v41 = vld [vmem:[%s19396_s4 + $0x2e0] sm:$0xff]  }
 0x15b   : > { %13087 = vmatpush3.bf16.msra.mxu0 %v13743_v58  ;;  %v12036_v58 = vcombine.high %v15140_v4, %v15186_v12 }
 0x15c   : > { %13115 = vmatpush3.bf16.msra.mxu1 %v13744_v35  ;;  %13128 = vmatprep.subr.bf16.mxu0 %v13745_v43  ;;  %v12038_v35 = vcombine.high %v15145_v5, %v15191_v13  ;;  %v13759_v43 = vld [vmem:[%s19396_s4 + $0x220] sm:$0xff]  }
 0x15d   : > { %13156 = vmatprep.subr.bf16.mxu1 %v13746_v48  ;;  %v13760_v48 = vld [vmem:[%s19396_s4 + $0x2a0] sm:$0xff]  }
 0x15e   : > { %v2706_v42 = vpop.f32.mrf.mxu0  ;;  %4235 = vmatmul.mubr.bf16.vlgmr.msra.gmra.mxu0 %v12031_v17  ;;  %v13761_v17 = vld [vmem:[%s19396_s4 + $0x258] sm:$0xff]  }
 0x15f   : > { %v2747_v39 = vpop.f32.mrf.mxu1  ;;  %4284 = vmatmul.mubr.bf16.vlgmr.msra.gmra.mxu1 %v12033_v53  ;;  %v2707_v62 = vadd.f32 %v2706_v42, %v16199_v47  ;;  %13129 = vmatpush3.bf16.msra.mxu0 %v13747_v55  ;;  %v13754_v47 = vld [vmem:[%s19396_s4 + $0x2e8] sm:$0xff]   ;;  %v13762_v53 = vld [vmem:[%s19396_s4 + $0x2d8] sm:$0xff]  }
 0x160   : > { %13157 = vmatpush3.bf16.msra.mxu1 %v13748_v57  ;;  %v2708_v46 = vpop.f32.mrf.mxu0  ;;  %13130 = vmatprep.subr.bf16.mxu0 %v13749_v59  ;;  %v13763_v55 = vld [vmem:[%s19396_s4 + $0x218] sm:$0xff]   ;;  %v13765_v59 = vld [vmem:[%s19396_s4 + $0x250] sm:$0xff]   ;;  %v13769_v42 = vld [vmem:[%s19396_s4 + $0x248] sm:$0xff]  }
 0x161   : > { %v2749_v54 = vpop.f32.mrf.mxu1  ;;  %13158 = vmatprep.subr.bf16.mxu1 %v13750_v49  ;;  %v16420_v60 = vadd.f32 %v2747_v39, %v2707_v62  ;;  %v2709_v63 = vadd.f32 %v2708_v46, %v16207_v52  ;;  %4242 = vmatprep.mubr.bf16.mxu0 %v12048_v56  ;;  %v13756_v52 = vld [vmem:[%s19396_s4 + $0x2a8] sm:$0xff]   ;;  %v13764_v57 = vld [vmem:[%s19396_s4 + $0x298] sm:$0xff]   ;;  %v13766_v49 = vld [vmem:[%s19396_s4 + $0x2d0] sm:$0xff]  }
 0x162   : > { %4291 = vmatprep.mubr.bf16.mxu1 %v12050_v51  ;;  %v2710_v22 = vpop.f32.mrf.mxu0  ;;  %v13767_v56 = vld [vmem:[%s19396_s4 + $0x210] sm:$0xff]   ;;  %v13770_v39 = vld [vmem:[%s19396_s4 + $0x2c8] sm:$0xff]   ;;  %v13774_v46 = vld [vmem:[%s19396_s4 + $0x2c0] sm:$0xff]  }
 0x163   : > { %v2751_v32 = vpop.f32.mrf.mxu1  ;;  %v16427_v36 = vadd.f32 %v2749_v54, %v2709_v63  ;;  %13131 = vmatpush3.bf16.msra.mxu0 %v13751_v40  ;;  %v13768_v51 = vld [vmem:[%s19396_s4 + $0x290] sm:$0xff]   ;;  %v13771_v62 = vld [vmem:[%s19396_s4 + $0x208] sm:$0xff]   ;;  %v13775_v54 = vld [vmem:[%s19396_s4 + $0x200] sm:$0xff]   ;;  %v12035_v22 = vcombine.low %v15140_v4, %v15186_v12 }
 0x164   : > { %13159 = vmatpush3.bf16.msra.mxu1 %v13752_v33  ;;  %v2711_v37 = vpop.f32.mrf.mxu0  ;;  %13132 = vmatprep.subr.bf16.mxu0 %v13753_v50  ;;  %v13772_v40 = vld [vmem:[%s19396_s4 + $0x288] sm:$0xff]   ;;  %v13773_v33 = vld [vmem:[%s19396_s4 + $0x240] sm:$0xff]   ;;  %v13778_v63 = vld [vmem:[%s19396_s4 + $0x3f8] sm:$0xff]   ;;  %v12037_v32 = vcombine.low %v15145_v5, %v15191_v13 }
 0x165   : > { %v2752_v38 = vpop.f32.mrf.mxu1  ;;  %13160 = vmatprep.subr.bf16.mxu1 %v13754_v47  ;;  %v13776_v50 = vld [vmem:[%s19396_s4 + $0x280] sm:$0xff]   ;;  %v13777_v47 = vld [vmem:[%s19396_s4 + $0x378] sm:$0xff]   ;;  %v12052_v37 = vcombine.high %v15236_v20, %v15276_v28 }
 0x166   : > { %4243 = vmatmul.mubr.bf16.gmra.mxu0 %v12047_v34  ;;  %v13779_v34 = vld [vmem:[%s19396_s4 + $0x338] sm:$0xff]   ;;  %v12054_v38 = vcombine.high %v15241_v21, %v15281_v29 }
 0x167   : > { %4292 = vmatmul.mubr.bf16.gmra.mxu1 %v12049_v45  ;;  %13133 = vmatpush3.bf16.msra.mxu0 %v13755_v44  ;;  %v13780_v45 = vld [vmem:[%s19396_s4 + $0x3b8] sm:$0xff]   ;;  %v13781_v44 = vld [vmem:[%s19396_s4 + $0x370] sm:$0xff]  }
 0x168   : > { %13161 = vmatpush3.bf16.msra.mxu1 %v13756_v52  ;;  %13134 = vmatprep.subr.bf16.mxu0 %v13757_v61  ;;  %v13782_v52 = vld [vmem:[%s19396_s4 + $0x3f0] sm:$0xff]  }
 0x169   : > { %13162 = vmatprep.subr.bf16.mxu1 %v13758_v41  ;;  %4332 = vmatprep.mubr.bf16.mxu0 %v12036_v58  ;;  %v13783_v61 = vld [vmem:[%s19396_s4 + $0x330] sm:$0xff]   ;;  %v13785_v58 = vld [vmem:[%s19396_s4 + $0x368] sm:$0xff]  }
 0x16a   : > { %4381 = vmatprep.mubr.bf16.mxu1 %v12038_v35  ;;  %v13784_v41 = vld [vmem:[%s19396_s4 + $0x3b0] sm:$0xff]   ;;  %v13786_v35 = vld [vmem:[%s19396_s4 + $0x3e8] sm:$0xff]  }
 0x16b   : > { %13135 = vmatpush3.bf16.msra.mxu0 %v13759_v43  ;;  %v12051_v43 = vcombine.low %v15236_v20, %v15276_v28 }
 0x16c   : > { %13163 = vmatpush3.bf16.msra.mxu1 %v13760_v48  ;;  %13136 = vmatprep.subr.bf16.mxu0 %v13761_v17  ;;  %v12053_v48 = vcombine.low %v15241_v21, %v15281_v29  ;;  %v13787_v17 = vld [vmem:[%s19396_s4 + $0x328] sm:$0xff]  }
 0x16d   : > { %13164 = vmatprep.subr.bf16.mxu1 %v13762_v53  ;;  %v13788_v53 = vld [vmem:[%s19396_s4 + $0x3a8] sm:$0xff]  }
 0x16f   : > { %13137 = vmatpush3.bf16.msra.mxu0 %v13763_v55  ;;  %v13789_v55 = vld [vmem:[%s19396_s4 + $0x360] sm:$0xff]  }
 0x170   : > { %13165 = vmatpush3.bf16.msra.mxu1 %v13764_v57  ;;  %13138 = vmatprep.subr.bf16.mxu0 %v13765_v59  ;;  %v13790_v57 = vld [vmem:[%s19396_s4 + $0x3e0] sm:$0xff]   ;;  %v12040_v59 = vcombine.high %v15151_v6, %v15196_v14 }
 0x171   : > { %13166 = vmatprep.subr.bf16.mxu1 %v13766_v49  ;;  %v12042_v49 = vcombine.high %v15156_v7, %v15206_v15 }
 0x173   : > { %13139 = vmatpush3.bf16.msra.mxu0 %v13767_v56  ;;  %v13791_v56 = vld [vmem:[%s19396_s4 + $0x320] sm:$0xff]  }
 0x174   : > { %13167 = vmatpush3.bf16.msra.mxu1 %v13768_v51  ;;  %13140 = vmatprep.subr.bf16.mxu0 %v13769_v42  ;;  %v13792_v51 = vld [vmem:[%s19396_s4 + $0x3a0] sm:$0xff]   ;;  %v13793_v42 = vld [vmem:[%s19396_s4 + $0x358] sm:$0xff]  }
 0x175   : > { %13168 = vmatprep.subr.bf16.mxu1 %v13770_v39  ;;  %v13794_v39 = vld [vmem:[%s19396_s4 + $0x3d8] sm:$0xff]  }
 0x177   : > { %13141 = vmatpush3.bf16.msra.mxu0 %v13771_v62  ;;  %v13795_v62 = vld [vmem:[%s19396_s4 + $0x318] sm:$0xff]  }
 0x178   : > { %13169 = vmatpush3.bf16.msra.mxu1 %v13772_v40  ;;  %13142 = vmatprep.subr.bf16.mxu0 %v13773_v33  ;;  %v13796_v40 = vld [vmem:[%s19396_s4 + $0x398] sm:$0xff]   ;;  %v13797_v33 = vld [vmem:[%s19396_s4 + $0x350] sm:$0xff]  }
 0x179   : > { %13170 = vmatprep.subr.bf16.mxu1 %v13774_v46  ;;  %v13798_v46 = vld [vmem:[%s19396_s4 + $0x3d0] sm:$0xff]  }
 0x17b   : > { %13143 = vmatpush3.bf16.msra.mxu0 %v13775_v54  ;;  %v13799_v54 = vld [vmem:[%s19396_s4 + $0x310] sm:$0xff]  }
 0x17c   : > { %13171 = vmatpush3.bf16.msra.mxu1 %v13776_v50  ;;  %13184 = vmatprep.subr.bf16.mxu0 %v13777_v47  ;;  %v13800_v50 = vld [vmem:[%s19396_s4 + $0x390] sm:$0xff]   ;;  %v13801_v47 = vld [vmem:[%s19396_s4 + $0x348] sm:$0xff]  }
 0x17d   : > { %13212 = vmatprep.subr.bf16.mxu1 %v13778_v63  ;;  %v13802_v63 = vld [vmem:[%s19396_s4 + $0x3c8] sm:$0xff]  }
 0x17e   : > { %4333 = vmatmul.mubr.bf16.vlgmr.msra.gmra.mxu0 %v12035_v22  ;;  %v13803_v22 = vld [vmem:[%s19396_s4 + $0x308] sm:$0xff]  }
 0x17f   : > { %4382 = vmatmul.mubr.bf16.vlgmr.msra.gmra.mxu1 %v12037_v32  ;;  %13185 = vmatpush3.bf16.msra.mxu0 %v13779_v34  ;;  %v13804_v32 = vld [vmem:[%s19396_s4 + $0x388] sm:$0xff]   ;;  %v13805_v34 = vld [vmem:[%s19396_s4 + $0x340] sm:$0xff]  }
 0x180   : > { %13213 = vmatpush3.bf16.msra.mxu1 %v13780_v45  ;;  %13186 = vmatprep.subr.bf16.mxu0 %v13781_v44  ;;  %v13806_v45 = vld [vmem:[%s19396_s4 + $0x3c0] sm:$0xff]  }
 0x181   : > { %13214 = vmatprep.subr.bf16.mxu1 %v13782_v52  ;;  %4340 = vmatprep.mubr.bf16.mxu0 %v12052_v37  ;;  %v13807_v44 = vld [vmem:[%s19396_s4 + $0x300] sm:$0xff]   ;;  %v12039_v37 = vcombine.low %v15151_v6, %v15196_v14 }
 0x182   : > { %4389 = vmatprep.mubr.bf16.mxu1 %v12054_v38  ;;  %v13808_v52 = vld [vmem:[%s19396_s4 + $0x380] sm:$0xff]   ;;  %v12041_v38 = vcombine.low %v15156_v7, %v15206_v15 }
 0x183   : > { %13187 = vmatpush3.bf16.msra.mxu0 %v13783_v61  ;;  %v19503_v61 = vld [vmem:[#allocation26_spill] sm:$0xff] }
 0x184   : > { %13215 = vmatpush3.bf16.msra.mxu1 %v13784_v41  ;;  %13188 = vmatprep.subr.bf16.mxu0 %v13785_v58  ;;  %v12056_v41 = vcombine.high %v19503_v61, %v15286_v30  ;;  %v12058_v58 = vcombine.high %v15251_v23, %v15291_v31 }
 0x185   : > { %13216 = vmatprep.subr.bf16.mxu1 %v13786_v35 }
 0x186   : > { %4341 = vmatmul.mubr.bf16.gmra.mxu0 %v12051_v43 }
 0x187   : > { %4390 = vmatmul.mubr.bf16.gmra.mxu1 %v12053_v48  ;;  %13189 = vmatpush3.bf16.msra.mxu0 %v13787_v17 }
 0x188   : > { %13217 = vmatpush3.bf16.msra.mxu1 %v13788_v53  ;;  %13190 = vmatprep.subr.bf16.mxu0 %v13789_v55 }
 0x189   : > { %13218 = vmatprep.subr.bf16.mxu1 %v13790_v57  ;;  %4430 = vmatprep.mubr.bf16.mxu0 %v12040_v59  ;;  %v12055_v57 = vcombine.low %v19503_v61, %v15286_v30  ;;  %v12057_v59 = vcombine.low %v15251_v23, %v15291_v31 }
 0x18a   : > { %4479 = vmatprep.mubr.bf16.mxu1 %v12042_v49 }
 0x18b   : > { %13191 = vmatpush3.bf16.msra.mxu0 %v13791_v56 }
 0x18c   : > { %13219 = vmatpush3.bf16.msra.mxu1 %v13792_v51  ;;  %13192 = vmatprep.subr.bf16.mxu0 %v13793_v42 }
 0x18d   : > { %13220 = vmatprep.subr.bf16.mxu1 %v13794_v39 }
 0x18f   : > { %13193 = vmatpush3.bf16.msra.mxu0 %v13795_v62 }
 0x190   : > { %13221 = vmatpush3.bf16.msra.mxu1 %v13796_v40  ;;  %13194 = vmatprep.subr.bf16.mxu0 %v13797_v33 }
 0x191   : > { %13222 = vmatprep.subr.bf16.mxu1 %v13798_v46 }
 0x193   : > { %13195 = vmatpush3.bf16.msra.mxu0 %v13799_v54 }
 0x194   : > { %13223 = vmatpush3.bf16.msra.mxu1 %v13800_v50  ;;  %13196 = vmatprep.subr.bf16.mxu0 %v13801_v47 }
 0x195   : > { %13224 = vmatprep.subr.bf16.mxu1 %v13802_v63 }
 0x197   : > { %13197 = vmatpush3.bf16.msra.mxu0 %v13803_v22 }
 0x198   : > { %13225 = vmatpush3.bf16.msra.mxu1 %v13804_v32  ;;  %13198 = vmatprep.subr.bf16.mxu0 %v13805_v34 }
 0x199   : > { %13226 = vmatprep.subr.bf16.mxu1 %v13806_v45 }
 0x19b   : > { %13199 = vmatpush3.bf16.msra.mxu0 %v13807_v44 }
 0x19c   : > { %13227 = vmatpush3.bf16.msra.mxu1 %v13808_v52 }
 0x19e   : > { %v2788_v35 = vpop.f32.mrf.mxu0  ;;  %4431 = vmatmul.mubr.bf16.vlgmr.msra.gmra.mxu0 %v12039_v37 }
 0x19f   : > { %v2829_v43 = vpop.f32.mrf.mxu1  ;;  %4480 = vmatmul.mubr.bf16.vlgmr.msra.gmra.mxu1 %v12041_v38  ;;  %4438 = vmatprep.mubr.bf16.mxu0 %v12056_v41  ;;  %v2789_v51 = vadd.f32 %v2788_v35, %v16420_v60 }
 0x1a0   : > { %4487 = vmatprep.mubr.bf16.mxu1 %v12058_v58  ;;  %v2790_v48 = vpop.f32.mrf.mxu0 }
 0x1a1   : > { %v2831_v17 = vpop.f32.mrf.mxu1  ;;  %v2791_v42 = vadd.f32 %v2790_v48, %v16427_v36  ;;  %v2830_v39 = vadd.f32 %v2829_v43, %v2789_v51 }
 0x1a2   : > { %v2792_v53 = vpop.f32.mrf.mxu0 }
 0x1a3   : > { %v2833_v55 = vpop.f32.mrf.mxu1  ;;  %v2832_v33 = vadd.f32 %v2831_v17, %v2791_v42 }
 0x1a4   : > { %v2793_v49 = vpop.f32.mrf.mxu0 }
 0x1a5   : > { %v2834_v56 = vpop.f32.mrf.mxu1 }
 0x1a6   : > { %4439 = vmatmul.mubr.bf16.gmra.mxu0 %v12055_v57 }
 0x1a7   : > { %4488 = vmatmul.mubr.bf16.gmra.mxu1 %v12057_v59 }
 0x1de   : > { %v2870_v62 = vpop.f32.mrf.mxu0 }
 0x1df   : > { %v2911_v40 = vpop.f32.mrf.mxu1  ;;  %v2871_v46 = vadd.f32 %v2870_v62, %v2830_v39 }
 0x1e0   : > { %v2872_v54 = vpop.f32.mrf.mxu0 }
 0x1e1   : > { %v2913_v50 = vpop.f32.mrf.mxu1  ;;  %v2912_v47 = vadd.f32 %v2911_v40, %v2871_v46  ;;  %v2873_v63 = vadd.f32 %v2872_v54, %v2832_v33 }
 0x1e2   : > { %v2874_v22 = vpop.f32.mrf.mxu0 }
 0x1e3   : > { %v2915_v32 = vpop.f32.mrf.mxu1  ;;  %2918 = vst [vmem:[#allocation2] sm:$0x3] %v2912_v47  ;;  %v2914_v34 = vadd.f32 %v2913_v50, %v2873_v63 }
 0x1e4   : > { %v2875_v45 = vpop.f32.mrf.mxu0 }
 0x1e5   : > { %v2916_v44 = vpop.f32.mrf.mxu1  ;;  %2919 = vst [vmem:[#allocation3] sm:$0x3] %v2914_v34 }
 0x1fe   : > { %v13032_v52 = vpop.f32.mrf.mxu0 }
 0x1ff   : > { %v13060_v60 = vpop.f32.mrf.mxu1 }
 0x200   : > { %v13033_v37 = vpop.f32.mrf.mxu0 }
 0x201   : > { %v13061_v36 = vpop.f32.mrf.mxu1  ;;  %v13034_v15 = vadd.f32 %v13033_v37, %v13032_v52 }
 0x202   : > { %v13035_v38 = vpop.f32.mrf.mxu0  ;;  %v13062_v6 = vadd.f32 %v13061_v36, %v13060_v60 }
 0x203   : > { %v13063_v61 = vpop.f32.mrf.mxu1 }
 0x204   : > { %v13036_v41 = vpop.f32.mrf.mxu0  ;;  %v4188_v30 = vadd.f32 %v13062_v6, %v13034_v15 }
 0x205   : > { %v13064_v35 = vpop.f32.mrf.mxu1  ;;  %v13037_v4 = vadd.f32 %v13036_v41, %v13035_v38 }
 0x206   : > { %v13038_v58 = vpop.f32.mrf.mxu0  ;;  %v13065_v12 = vadd.f32 %v13064_v35, %v13063_v61 }
 0x207   : > { %v13066_v43 = vpop.f32.mrf.mxu1 }
 0x208   : > { %v13039_v48 = vpop.f32.mrf.mxu0  ;;  %v4191_v26 = vadd.f32 %v13065_v12, %v13037_v4 }
 0x209   : > { %v13067_v17 = vpop.f32.mrf.mxu1  ;;  %v13040_v11 = vadd.f32 %v13039_v48, %v13038_v58 }
 0x20a   : > { %v13041_v53 = vpop.f32.mrf.mxu0  ;;  %v13068_v2 = vadd.f32 %v13067_v17, %v13066_v43 }
 0x20b   : > { %v13069_v55 = vpop.f32.mrf.mxu1 }
 0x20c   : > { %v13042_v57 = vpop.f32.mrf.mxu0  ;;  %v4196_v52 = vadd.f32 %v13068_v2, %v13040_v11 }
 0x20d   : > { %v13070_v49 = vpop.f32.mrf.mxu1  ;;  %v13043_v60 = vadd.f32 %v13042_v57, %v13041_v53 }
 0x20e   : > { %v13071_v37 = vadd.f32 %v13070_v49, %v13069_v55 }
 0x21e   : > { %v13088_v59 = vpop.f32.mrf.mxu0 }
 0x21f   : > { %v13116_v56 = vpop.f32.mrf.mxu1 }
 0x220   : > { %v13089_v51 = vpop.f32.mrf.mxu0 }
 0x221   : > { %v13117_v42 = vpop.f32.mrf.mxu1  ;;  %v13090_v14 = vadd.f32 %v13089_v51, %v13088_v59 }
 0x222   : > { %v13091_v39 = vpop.f32.mrf.mxu0  ;;  %v13118_v28 = vadd.f32 %v13117_v42, %v13116_v56 }
 0x223   : > { %v13119_v62 = vpop.f32.mrf.mxu1  ;;  %v4237_v20 = vadd.f32 %v13090_v14, %v4188_v30 }
 0x224   : > { %v13092_v40 = vpop.f32.mrf.mxu0 }
 0x225   : > { %v13120_v33 = vpop.f32.mrf.mxu1  ;;  %v13093_v3 = vadd.f32 %v13092_v40, %v13091_v39  ;;  %v4286_v1 = vadd.f32 %v13118_v28, %v4237_v20  ;;  %v4199_v20 = vadd.f32 %v13071_v37, %v13043_v60 }
 0x226   : > { %v13094_v46 = vpop.f32.mrf.mxu0  ;;  %v13121_v6 = vadd.f32 %v13120_v33, %v13119_v62 }
 0x227   : > { %v13122_v54 = vpop.f32.mrf.mxu1  ;;  %v4240_v9 = vadd.f32 %v13093_v3, %v4191_v26 }
 0x228   : > { %v13095_v50 = vpop.f32.mrf.mxu0 }
 0x229   : > { %v13123_v47 = vpop.f32.mrf.mxu1  ;;  %v13096_v24 = vadd.f32 %v13095_v50, %v13094_v46  ;;  %v4289_v35 = vadd.f32 %v13121_v6, %v4240_v9 }
 0x22a   : > { %v13097_v63 = vpop.f32.mrf.mxu0  ;;  %v13124_v61 = vadd.f32 %v13123_v47, %v13122_v54 }
 0x22b   : > { %v13125_v22 = vpop.f32.mrf.mxu1  ;;  %v4245_v30 = vadd.f32 %v13096_v24, %v4196_v52 }
 0x22c   : > { %v13098_v32 = vpop.f32.mrf.mxu0 }
 0x22d   : > { %v13126_v34 = vpop.f32.mrf.mxu1  ;;  %v13099_v43 = vadd.f32 %v13098_v32, %v13097_v63  ;;  %v4294_v26 = vadd.f32 %v13124_v61, %v4245_v30 }
 0x22f   : > { %v4248_v17 = vadd.f32 %v13099_v43, %v4199_v20 }
 0x23e   : > { %v13144_v45 = vpop.f32.mrf.mxu0 }
 0x23f   : > { %v13172_v44 = vpop.f32.mrf.mxu1 }
 0x240   : > { %v13145_v23 = vpop.f32.mrf.mxu0 }
 0x241   : > { %v13173_v31 = vpop.f32.mrf.mxu1  ;;  %v13146_v16 = vadd.f32 %v13145_v23, %v13144_v45 }
 0x242   : > { %v13147_v21 = vpop.f32.mrf.mxu0  ;;  %v13174_v38 = vadd.f32 %v13173_v31, %v13172_v44 }
 0x243   : > { %v13175_v29 = vpop.f32.mrf.mxu1  ;;  %v4335_v15 = vadd.f32 %v13146_v16, %v4286_v1  ;;  %v13127_v1 = vadd.f32 %v13126_v34, %v13125_v22 }
 0x244   : > { %v13148_v19 = vpop.f32.mrf.mxu0 }
 0x245   : > { %v13176_v27 = vpop.f32.mrf.mxu1  ;;  %v13149_v14 = vadd.f32 %v13148_v19, %v13147_v21  ;;  %v4384_v3 = vadd.f32 %v13174_v38, %v4335_v15  ;;  %v4297_v56 = vadd.f32 %v13127_v1, %v4248_v17 }
 0x246   : > { %v13150_v25 = vpop.f32.mrf.mxu0  ;;  %v13177_v16 = vadd.f32 %v13176_v27, %v13175_v29  ;;  %v12187_v27 = vld [vmem:[%s19397_s5] ss:$0 sm:$0xff] }
 0x247   : > { %v13178_v7 = vpop.f32.mrf.mxu1  ;;  %v4338_v2 = vadd.f32 %v13149_v14, %v4289_v35 }
 0x248   : > { %v13151_v5 = vpop.f32.mrf.mxu0 }
 0x249   : > { %v13179_v13 = vpop.f32.mrf.mxu1  ;;  %v13152_v4 = vadd.f32 %v13151_v5, %v13150_v25  ;;  %v4387_v9 = vadd.f32 %v13177_v16, %v4338_v2 }
 0x24a   : > { %v13153_v10 = vpop.f32.mrf.mxu0  ;;  %v13180_v24 = vadd.f32 %v13179_v13, %v13178_v7 }
 0x24b   : > { %v13181_v18 = vpop.f32.mrf.mxu1  ;;  %v4343_v21 = vadd.f32 %v13152_v4, %v4294_v26 }
 0x24c   : > { %v13154_v36 = vpop.f32.mrf.mxu0 }
 0x24d   : > { %v13182_v59 = vpop.f32.mrf.mxu1  ;;  %v13155_v55 = vadd.f32 %v13154_v36, %v13153_v10  ;;  %v4392_v62 = vadd.f32 %v13180_v24, %v4343_v21 }
 0x24e   : > { %v13183_v13 = vadd.f32 %v13182_v59, %v13181_v18 }
 0x24f   : > { %v4346_v7 = vadd.f32 %v13155_v55, %v4297_v56 }
 0x251   : > { %v4395_v34 = vadd.f32 %v13183_v13, %v4346_v7 }
 0x25e   : > { %v13200_v41 = vpop.f32.mrf.mxu0 }
 0x25f   : > { %v13228_v58 = vpop.f32.mrf.mxu1 }
 0x260   : > { %v13201_v12 = vpop.f32.mrf.mxu0 }
 0x261   : > { %v13229_v23 = vpop.f32.mrf.mxu1  ;;  %v13202_v11 = vadd.f32 %v13201_v12, %v13200_v41 }
 0x262   : > { %v13203_v28 = vpop.f32.mrf.mxu0  ;;  %v13230_v5 = vadd.f32 %v13229_v23, %v13228_v58 }
 0x263   : > { %v13231_v48 = vpop.f32.mrf.mxu1  ;;  %v4433_v19 = vadd.f32 %v13202_v11, %v4384_v3 }
 0x264   : > { %v13204_v31 = vpop.f32.mrf.mxu0 }
 0x265   : > { %v13232_v53 = vpop.f32.mrf.mxu1  ;;  %v13205_v25 = vadd.f32 %v13204_v31, %v13203_v28  ;;  %v4482_v51 = vadd.f32 %v13230_v5, %v4433_v19 }
 0x266   : > { %v13206_v57 = vpop.f32.mrf.mxu0  ;;  %v13233_v39 = vadd.f32 %v13232_v53, %v13231_v48 }
 0x267   : > { %v13234_v49 = vpop.f32.mrf.mxu1  ;;  %v4436_v42 = vadd.f32 %v13205_v25, %v4387_v9  ;;  %v4503_v50 = vadd.f32 %v12187_v27, %v4482_v51 }
 0x268   : > { %v13207_v29 = vpop.f32.mrf.mxu0 }
 0x269   : > { %v13235_v40 = vpop.f32.mrf.mxu1  ;;  %v4485_v33 = vadd.f32 %v13233_v39, %v4436_v42  ;;  %v13208_v46 = vadd.f32 %v13207_v29, %v13206_v57 }
 0x26a   : > { %v13209_v10 = vpop.f32.mrf.mxu0  ;;  %v13236_v44 = vadd.f32 %v13235_v40, %v13234_v49 }
 0x26b   : > { %v13237_v54 = vpop.f32.mrf.mxu1  ;;  %v4504_v47 = vadd.f32 %v12187_v27, %v4485_v33  ;;  %v4441_v63 = vadd.f32 %v13208_v46, %v4392_v62 }
 0x26c   : > { %v13210_v22 = vpop.f32.mrf.mxu0 }
 0x26d   : > { %v13238_v32 = vpop.f32.mrf.mxu1  ;;  %v12999_v45 = vpack.c.bf16 %v4504_v47, %v4503_v50  ;;  %v13211_v52 = vadd.f32 %v13210_v22, %v13209_v10  ;;  %v4490_v60 = vadd.f32 %v13236_v44, %v4441_v63 }
 0x26e   : > { %v13239_v36 = vadd.f32 %v13238_v32, %v13237_v54 }
 0x26f   : > { %13000 = vst [vmem:[#allocation4] sm:$0xff] %v12999_v45   ;;  %v4444_v37 = vadd.f32 %v13211_v52, %v4395_v34  ;;  %v4505_v15 = vadd.f32 %v12187_v27, %v4490_v60 }
 0x271   : > { %v4493_v6 = vadd.f32 %v13239_v36, %v4444_v37 }
 0x273   : > { %v4506_v18 = vadd.f32 %v12187_v27, %v4493_v6 }
 0x275   : > { %v13004_v59 = vpack.c.bf16 %v4506_v18, %v4505_v15 }
 0x277   : > { %13014 = vst [vmem:[#allocation4 + $0x8] sm:$0xff] %v13004_v59  }
 0x278 PF: > { %v13811_v38 = vld [vmem:[%s19398_s6 + $0x49c] ss:$84 sps:$4 sm:$0xff]   ;;  %v13813_v14 = vld [vmem:[%s19398_s6 + $0x498] ss:$84 sps:$4 sm:$0xff]   ;;  %v15017_v30 = vmov 0   ;;  %v4713_v1 = vlaneseq  ;;  %v4707_v24 = vld [vmem:[%s19399_s7] sm:$0xff] }
 0x279   : > { %5698 = vmatprep.mubr.bf16.mxu0 %v15017_v30  ;;  %13810 = vset.pattern.permute.xlu0 %v15017_v30  ;;  %v13814_v61 = vld [vmem:[%s19398_s6 + $0x3f4] ss:$84 sps:$4 sm:$0xff]   ;;  %v13816_v41 = vld [vmem:[%s19398_s6 + $0x3f0] ss:$84 sps:$4 sm:$0xff]   ;;  %v13817_v58 = vld [vmem:[%s19398_s6 + $0x34c] ss:$84 sps:$4 sm:$0xff]  }
 0x27a   : > { %5666 = vmatprep.subr.bf16.mxu0 %v13811_v38  ;;  %13809 = vset.pattern.permute.xlu1 %v15017_v30  ;;  %v13819_v35 = vld [vmem:[%s19398_s6 + $0x348] ss:$84 sps:$4 sm:$0xff]   ;;  %v13820_v43 = vld [vmem:[%s19398_s6 + $0x2a4] ss:$84 sps:$4 sm:$0xff]   ;;  %v13822_v4 = vld [vmem:[%s19398_s6 + $0x2a0] ss:$84 sps:$4 sm:$0xff]  }
 0x27b   : > { %5667 = vmatpush1.bf16.msra.mxu0 %v13813_v14  ;;  %5739 = vmatprep.mubr.bf16.mxu1 %v15017_v30  ;;  %v13823_v12 = vld [vmem:[%s19398_s6 + $0x1fc] ss:$84 sps:$4 sm:$0xff]   ;;  %v13825_v23 = vld [vmem:[%s19398_s6 + $0x1f8] ss:$84 sps:$4 sm:$0xff]   ;;  %v13826_v20 = vld [vmem:[%s19398_s6 + $0x154] ss:$84 sps:$4 sm:$0xff]  }
 0x27c   : > { %5668 = vmatprep.subr.bf16.mxu0 %v13814_v61  ;;  %v13828_v3 = vld [vmem:[%s19398_s6 + $0x150] ss:$84 sps:$4 sm:$0xff]   ;;  %v13829_v2 = vld [vmem:[%s19398_s6 + $0xac] ss:$84 sps:$4 sm:$0xff]   ;;  %v13831_v11 = vld [vmem:[%s19398_s6 + $0xa8] ss:$84 sps:$4 sm:$0xff]  }
 0x27d   : > { %v13832_v26 = vld [vmem:[%s19398_s6 + $0x4] ss:$84 sps:$4 sm:$0xff]   ;;  %v13834_v28 = vld [vmem:[%s19398_s6] ss:$84 sps:$4 sm:$0xff]   ;;  %v16684_v16 = vshrl.u32 %v4713_v1, 7  ;;  %v6189_v6 = vand.u32 127, %v4713_v1 }
 0x27e   : > { %v4527_v48 = vld [vmem:[#allocation2] sm:$0x3]  ;;  %v15018_v19 = vmov 1966171168   ;;  %v13007_v25 = vld [vmem:[#allocation4] sm:$0xff]   ;;  %v13015_v56 = vld [vmem:[#allocation4 + $0x8] sm:$0xff]  }
 0x27f   : > { %5669 = vmatpush1.bf16.msra.mxu0 %v13816_v41  ;;  %v16680_v17 = vpack.c.bf16 %v4527_v48, %v4527_v48  ;;  %v6122_v21 = vunpack.c.l.s4 %v15018_v19  ;;  %v16690_v31 = vsub.s32 0, %v16684_v16  ;;  %v13008_v27 = vunpack.c.l.bf16 %v13007_v25  ;;  %v12360_v10 = vld [vmem:[%s19400_s8] ss:$0 sm:$0xff] }
 0x280   : > { %5670 = vmatprep.subr.bf16.mxu0 %v13817_v58  ;;  %v13009_v29 = vunpack.c.h.bf16 %v13007_v25  ;;  %v13012_v13 = vunpack.c.l.bf16 %v13015_v56  ;;  %v13013_v46 = vunpack.c.h.bf16 %v13015_v56  ;;  %v6194_v15 = vadd.s32 4294967288, %v6189_v6 }
 0x281   : > { %v6123_v53 = vunpack.c.0.s8 %v6122_v21  ;;  %v4716_v9 = vrot.slane %v4707_v24, %v16690_v31  ;;  %v16705_v14 = vsub.s32 %v6189_v6, %v16684_v16  ;;  %vm6199_vm1 = vcmask 130112  }
 0x282   : > { %v16702_v59 = vsub.s32 %v6194_v15, %v16684_v16  ;;  %vm6210_vm2 = vcmask 1041409   ;;  %vm6213_vm3 = vcmask 123904   ;;  %v13856_v15 = vld [vmem:[%s19398_s6 + $0x15c] ss:$84 sps:$4 sm:$0xff]   ;;  %vm15020_vm4 = vmmov 0  }
 0x283   : > { %5671 = vmatpush1.bf16.msra.mxu0 %v13819_v35  ;;  %v6126_v55 = vsub.s32 %v6123_v53, %v16684_v16  ;;  %vm6397_vm5 = vcmask 130048  }
 0x284   : > { %5672 = vmatprep.subr.bf16.mxu0 %v13820_v43 }
 0x287   : > { %5673 = vmatpush1.bf16.msra.mxu0 %v13822_v4 }
 0x288   : > { %5674 = vmatprep.subr.bf16.mxu0 %v13823_v12 }
 0x28b   : > { %5675 = vmatpush1.bf16.msra.mxu0 %v13825_v23 }
 0x28c   : > { %5676 = vmatprep.subr.bf16.mxu0 %v13826_v20 }
 0x28f   : > { %5677 = vmatpush1.bf16.msra.mxu0 %v13828_v3 }
 0x290   : > { %5678 = vmatprep.subr.bf16.mxu0 %v13829_v2  ;;  %v16716_v2 = vsub.s32 1, %v16684_v16 }
 0x293   : > { %5679 = vmatpush1.bf16.msra.mxu0 %v13831_v11 }
 0x294   : > { %5680 = vmatprep.subr.bf16.mxu0 %v13832_v26 }
 0x297   : > { %5681 = vmatpush1.bf16.msra.mxu0 %v13834_v28 }
 0x29a   : > { %5699 = vmatmul.mubr.bf16.vlgmr.msra.gmra.mxu0 %v16680_v17 }
 0x29b   : > { %5780 = vmatprep.mubr.bf16.mxu0 %v15017_v30 }
 0x35a   : > { %v5700_v5 = vpop.f32.mrf.mxu0 }
 0x35b   : > { %v5701_v57 = vadd.f32 %v5700_v5, %v4716_v9 }
 0x35c   : > { %v16694_v49 = vpop.f32.mrf.mxu0 }
 0x35d   : > { %v6127_v51 = vrot.slane %v5701_v57, %v6126_v55 }
 0x35e   : > { %v5704_v42 = vpop.f32.mrf.mxu0 }
 0x35f   : > { %v6128_v39 = vcombine.high %v6127_v51, %v6127_v51  ;;  %v6135_v62 = vrot.slane %v6127_v51, %v6126_v55  ;;  %v13835_v51 = vld [vmem:[%s19398_s6 + $0x4a4] ss:$84 sps:$4 sm:$0xff]   ;;  %v13837_v42 = vld [vmem:[%s19398_s6 + $0x4a0] ss:$84 sps:$4 sm:$0xff]  }
 0x360   : > { %v5705_v40 = vpop.f32.mrf.mxu0  ;;  %5707 = vmatprep.subr.bf16.mxu1 %v13835_v51  ;;  %v13894_v51 = vld [vmem:[%s19398_s6 + $0x2bc] ss:$84 sps:$4 sm:$0xff]  }
 0x361   : > { %v6150_v7 = vrot.slane %v6135_v62, %v16690_v31  ;;  %v6142_v33 = vrot.slane %v6128_v39, %v6126_v55  ;;  %v13838_v39 = vld [vmem:[%s19398_s6 + $0x3fc] ss:$84 sps:$4 sm:$0xff]   ;;  %5708 = vmatpush1.bf16.msra.mxu1 %v13837_v42  ;;  %v13841_v40 = vld [vmem:[%s19398_s6 + $0x354] ss:$84 sps:$4 sm:$0xff]   ;;  %v13892_v42 = vld [vmem:[%s19398_s6 + $0x2b8] ss:$84 sps:$4 sm:$0xff]  }
 0x362   : > { %v13847_v62 = vld [vmem:[%s19398_s6 + $0x4a8] ss:$84 sps:$4 sm:$0xff]   ;;  %5709 = vmatprep.subr.bf16.mxu1 %v13838_v39  ;;  %v13895_v39 = vld [vmem:[%s19398_s6 + $0x4b8] ss:$84 sps:$4 sm:$0xff]  }
 0x363   : > { %v6157_v54 = vadd.f32 %v13008_v27, %v6150_v7  ;;  %v6154_v50 = vrot.slane %v6142_v33, %v16690_v31  ;;  %v6158_v47 = vadd.f32 %v13009_v29, %v6150_v7  ;;  %v13840_v27 = vld [vmem:[%s19398_s6 + $0x3f8] ss:$84 sps:$4 sm:$0xff]   ;;  %v13843_v33 = vld [vmem:[%s19398_s6 + $0x350] ss:$84 sps:$4 sm:$0xff]  }
 0x364   : > { %v13849_v29 = vld [vmem:[%s19398_s6 + $0x4ac] ss:$84 sps:$4 sm:$0xff]   ;;  %v13855_v7 = vld [vmem:[%s19398_s6 + $0x404] ss:$84 sps:$4 sm:$0xff]  }
 0x365   : > { %v6161_v63 = vmax.f32 %v6157_v54, 0.0  ;;  %v6159_v22 = vadd.f32 %v13012_v13, %v6154_v50  ;;  %v6160_v32 = vadd.f32 %v13013_v46, %v6154_v50  ;;  %v6162_v44 = vmax.f32 %v6158_v47, 0.0  ;;  %5748 = vmatprep.subr.bf16.mxu0 %v13849_v29  ;;  %v13853_v13 = vld [vmem:[%s19398_s6 + $0x400] ss:$84 sps:$4 sm:$0xff]   ;;  %5710 = vmatpush1.bf16.msra.mxu1 %v13840_v27  ;;  %v13850_v54 = vld [vmem:[%s19398_s6 + $0x204] ss:$84 sps:$4 sm:$0xff]  }
 0x366   : > { %5749 = vmatpush1.bf16.msra.mxu0 %v13847_v62  ;;  %5711 = vmatprep.subr.bf16.mxu1 %v13841_v40  ;;  %v13844_v46 = vld [vmem:[%s19398_s6 + $0x2ac] ss:$84 sps:$4 sm:$0xff]   ;;  %v13897_v62 = vld [vmem:[%s19398_s6 + $0x4bc] ss:$84 sps:$4 sm:$0xff]   ;;  %v13900_v27 = vld [vmem:[%s19398_s6 + $0x214] ss:$84 sps:$4 sm:$0xff]  }
 0x367   : > { %v6172_v34 = vmul.f32 %v12360_v10, %v6161_v63  ;;  %v6163_v45 = vmax.f32 %v6159_v22, 0.0  ;;  %v6164_v60 = vmax.f32 %v6160_v32, 0.0  ;;  %v6173_v37 = vmul.f32 %v12360_v10, %v6162_v44  ;;  %5750 = vmatprep.subr.bf16.mxu0 %v13855_v7  ;;  %v13852_v50 = vld [vmem:[%s19398_s6 + $0x200] ss:$84 sps:$4 sm:$0xff]   ;;  %v13898_v29 = vld [vmem:[%s19398_s6 + $0x210] ss:$84 sps:$4 sm:$0xff]  }
 0x368   : > { %v13901_v40 = vld [vmem:[%s19398_s6 + $0x410] ss:$84 sps:$4 sm:$0xff]   ;;  %v13903_v7 = vld [vmem:[%s19398_s6 + $0x414] ss:$84 sps:$4 sm:$0xff]  }
 0x369   : > { %6176 = vadd.xlane.f32.xlu0 %v6172_v34  ;;  %v6174_v52 = vmul.f32 %v12360_v10, %v6163_v45  ;;  %v6175_v36 = vmul.f32 %v12360_v10, %v6164_v60  ;;  %5712 = vmatpush1.bf16.msra.mxu1 %v13843_v33  ;;  %v13846_v10 = vld [vmem:[%s19398_s6 + $0x2a8] ss:$84 sps:$4 sm:$0xff]  }
 0x36a   : > { %5751 = vmatpush1.bf16.msra.mxu0 %v13853_v13  ;;  %5713 = vmatprep.subr.bf16.mxu1 %v13844_v46  ;;  %v13906_v13 = vld [vmem:[%s19398_s6 + $0x16c] ss:$84 sps:$4 sm:$0xff]   ;;  %v13904_v33 = vld [vmem:[%s19398_s6 + $0x168] ss:$84 sps:$4 sm:$0xff]  }
 0x36b   : > { %6180 = vadd.xlane.f32.xlu1 %v6174_v52  ;;  %v13907_v46 = vld [vmem:[%s19398_s6 + $0x368] ss:$84 sps:$4 sm:$0xff]  }
 0x36d   : > { %6178 = vadd.xlane.f32.xlu0 %v6173_v37  ;;  %5714 = vmatpush1.bf16.msra.mxu1 %v13846_v10  ;;  %v13909_v10 = vld [vmem:[%s19398_s6 + $0x36c] ss:$84 sps:$4 sm:$0xff]  }
 0x36e   : > { %5715 = vmatprep.subr.bf16.mxu1 %v13850_v54  ;;  %v13912_v54 = vld [vmem:[%s19398_s6 + $0xc4] ss:$84 sps:$4 sm:$0xff]  }
 0x36f   : > { %6182 = vadd.xlane.f32.xlu1 %v6175_v36 }
 0x371   : > { %5716 = vmatpush1.bf16.msra.mxu1 %v13852_v50  ;;  %v13910_v50 = vld [vmem:[%s19398_s6 + $0xc0] ss:$84 sps:$4 sm:$0xff]  }
 0x372   : > { %5717 = vmatprep.subr.bf16.mxu1 %v13856_v15  ;;  %v13928_v15 = vld [vmem:[%s19398_s6 + $0x418] ss:$84 sps:$4 sm:$0xff]  }
 0x3f2   : > { %v6177_v18 = vpop.xlane.xlu0 %6176 }
 0x3f3   : > { %v6193_v35 = vrot.slane %v6177_v18, %v16705_v14 }
 0x3f4   : > { %v6181_v38 = vpop.xlane.xlu1 %6180 }
 0x3f5   : > { %v6204_v43 = vrot.slane %v6181_v38, %v16705_v14 }
 0x3f6   : > { %v6179_v61 = vpop.xlane.xlu0 %6178 }
 0x3f7   : > { %v6198_v41 = vrot.slane %v6179_v61, %v16702_v59 }
 0x3f8   : > { %v6183_v58 = vpop.xlane.xlu1 %6182 }
 0x3f9   : > { %v6208_v4 = vrot.slane %v6183_v58, %v16702_v59  ;;  %v6200_v12 = vsel %vm6199_vm1, %v6198_v41, %v6193_v35  ;;  %v13862_v41 = vld [vmem:[%s19398_s6 + $0xb4] ss:$84 sps:$4 sm:$0xff]  }
 0x3fa   : > { %v13867_v35 = vld [vmem:[%s19398_s6 + $0x2b4] ss:$84 sps:$4 sm:$0xff]  }
 0x3fb   : > { %v6209_v23 = vsel %vm6199_vm1, %v6208_v4, %v6204_v43  ;;  %v13865_v43 = vld [vmem:[%s19398_s6 + $0x2b0] ss:$84 sps:$4 sm:$0xff]   ;;  %v13868_v4 = vld [vmem:[%s19398_s6 + $0xc] ss:$84 sps:$4 sm:$0xff]  }
 0x3fc   : > { %v6211_v20 = vsel %vm6210_vm2, %v6209_v23, %v6200_v12  ;;  %v13873_v12 = vld [vmem:[%s19398_s6 + $0x20c] ss:$84 sps:$4 sm:$0xff]   ;;  %v13870_v23 = vld [vmem:[%s19398_s6 + $0x8] ss:$84 sps:$4 sm:$0xff]  }
 0x3fd   : > { %v6214_v3 = vsel %vm6213_vm3, %v6211_v20, -inf  ;;  %v13871_v20 = vld [vmem:[%s19398_s6 + $0x208] ss:$84 sps:$4 sm:$0xff]  }
 0x3fe   : > { %6215 = vmax.xlane.f32.xlu0 %v6214_v3  ;;  %v13876_v3 = vld [vmem:[%s19398_s6 + $0x4b4] ss:$84 sps:$4 sm:$0xff]  }
 0x487   : > { %v6216_v11 = vpop.xlane.xlu0 %6215 }
 0x488   : > { %v6221_v26 = vrot.slane %v6216_v11, %v16690_v31  ;;  %v6225_v28 = vrot.slane %v6216_v11, %v16716_v2  ;;  %v13879_v11 = vld [vmem:[%s19398_s6 + $0x164] ss:$84 sps:$4 sm:$0xff]  }
 0x48a   : > { %v6228_v48 = vsub.f32 %v6177_v18, %v6221_v26  ;;  %v6229_v1 = vsub.f32 %v6179_v61, %v6221_v26  ;;  %v6230_v19 = vsub.f32 %v6181_v38, %v6225_v28  ;;  %v6231_v53 = vsub.f32 %v6183_v58, %v6225_v28  ;;  %v13858_v18 = vld [vmem:[%s19398_s6 + $0x158] ss:$84 sps:$4 sm:$0xff]   ;;  %v13861_v61 = vld [vmem:[%s19398_s6 + $0x35c] ss:$84 sps:$4 sm:$0xff]   ;;  %v13877_v28 = vld [vmem:[%s19398_s6 + $0x160] ss:$84 sps:$4 sm:$0xff]  }
 0x48b   : > { %v13859_v38 = vld [vmem:[%s19398_s6 + $0x358] ss:$84 sps:$4 sm:$0xff]   ;;  %5718 = vmatpush1.bf16.msra.mxu1 %v13858_v18  ;;  %5752 = vmatprep.subr.bf16.mxu0 %v13861_v61  ;;  %v13864_v58 = vld [vmem:[%s19398_s6 + $0xb0] ss:$84 sps:$4 sm:$0xff]   ;;  %v13931_v18 = vld [vmem:[%s19398_s6 + $0xc8] ss:$84 sps:$4 sm:$0xff]  }
 0x48c   : > { %v6232_v21 = vmul.f32 1.442695, %v6228_v48  ;;  %v6234_v24 = vmul.f32 1.442695, %v6229_v1  ;;  %v6236_v9 = vmul.f32 1.442695, %v6230_v19  ;;  %5753 = vmatpush1.bf16.msra.mxu0 %v13859_v38  ;;  %5719 = vmatprep.subr.bf16.mxu1 %v13862_v41 }
 0x48d   : > { %v6238_v55 = vmul.f32 1.442695, %v6231_v53  ;;  %5754 = vmatprep.subr.bf16.mxu0 %v13867_v35  ;;  %v13874_v26 = vld [vmem:[%s19398_s6 + $0x4b0] ss:$84 sps:$4 sm:$0xff]   ;;  %v13882_v48 = vld [vmem:[%s19398_s6 + $0x40c] ss:$84 sps:$4 sm:$0xff]  }
 0x48e   : > { %14899 = vpow2.f32 %v6232_v21  ;;  %v13880_v1 = vld [vmem:[%s19398_s6 + $0x408] ss:$84 sps:$4 sm:$0xff]   ;;  %v13883_v19 = vld [vmem:[%s19398_s6 + $0xb8] ss:$84 sps:$4 sm:$0xff]   ;;  %v13886_v53 = vld [vmem:[%s19398_s6 + $0x360] ss:$84 sps:$4 sm:$0xff]  }
 0x48f   : > { %14901 = vpow2.f32 %v6234_v24  ;;  %5720 = vmatpush1.bf16.msra.mxu1 %v13864_v58  ;;  %v13885_v21 = vld [vmem:[%s19398_s6 + $0xbc] ss:$84 sps:$4 sm:$0xff]   ;;  %v13888_v24 = vld [vmem:[%s19398_s6 + $0x364] ss:$84 sps:$4 sm:$0xff]   ;;  %v13936_v38 = vld [vmem:[%s19398_s6 + $0x374] ss:$84 sps:$4 sm:$0xff]  }
 0x490   : > { %14903 = vpow2.f32 %v6236_v9  ;;  %5755 = vmatpush1.bf16.msra.mxu0 %v13865_v43  ;;  %5721 = vmatprep.subr.bf16.mxu1 %v13868_v4  ;;  %v13889_v9 = vld [vmem:[%s19398_s6 + $0x10] ss:$84 sps:$4 sm:$0xff]   ;;  %v13937_v58 = vld [vmem:[%s19398_s6 + $0x20] ss:$84 sps:$4 sm:$0xff]   ;;  %v13940_v4 = vld [vmem:[%s19398_s6 + $0x2c8] ss:$84 sps:$4 sm:$0xff]  }
 0x491   : > { %14905 = vpow2.f32 %v6238_v55  ;;  %5756 = vmatprep.subr.bf16.mxu0 %v13873_v12  ;;  %v13891_v55 = vld [vmem:[%s19398_s6 + $0x14] ss:$84 sps:$4 sm:$0xff]   ;;  %v13939_v61 = vld [vmem:[%s19398_s6 + $0x24] ss:$84 sps:$4 sm:$0xff]   ;;  %v13942_v35 = vld [vmem:[%s19398_s6 + $0x2cc] ss:$84 sps:$4 sm:$0xff]  }
 0x492   : > { %v13934_v41 = vld [vmem:[%s19398_s6 + $0x370] ss:$84 sps:$4 sm:$0xff]   ;;  %v13945_v43 = vld [vmem:[%s19398_s6 + $0x4cc] ss:$84 sps:$4 sm:$0xff]   ;;  %v13943_v12 = vld [vmem:[%s19398_s6 + $0x4c8] ss:$84 sps:$4 sm:$0xff]  }
 0x493   : > { %5722 = vmatpush1.bf16.msra.mxu1 %v13870_v23  ;;  %v13948_v23 = vld [vmem:[%s19398_s6 + $0x224] ss:$84 sps:$4 sm:$0xff]  }
 0x494   : > { %5757 = vmatpush1.bf16.msra.mxu0 %v13871_v20  ;;  %5789 = vmatprep.subr.bf16.mxu1 %v13876_v3  ;;  %v13951_v20 = vld [vmem:[%s19398_s6 + $0x424] ss:$84 sps:$4 sm:$0xff]   ;;  %v13946_v3 = vld [vmem:[%s19398_s6 + $0x220] ss:$84 sps:$4 sm:$0xff]  }
 0x495   : > { %5758 = vmatprep.subr.bf16.mxu0 %v13879_v11  ;;  %v13949_v11 = vld [vmem:[%s19398_s6 + $0x420] ss:$84 sps:$4 sm:$0xff]  }
 0x496   : > { %5740 = vmatmul.mubr.bf16.vlgmr.msra.gmra.mxu1 %v16680_v17 }
 0x497   : > { %5790 = vmatpush1.bf16.msra.mxu1 %v13874_v26  ;;  %5821 = vmatprep.mubr.bf16.mxu1 %v15017_v30  ;;  %v13954_v26 = vld [vmem:[%s19398_s6 + $0x17c] ss:$84 sps:$4 sm:$0xff]  }
 0x498   : > { %5759 = vmatpush1.bf16.msra.mxu0 %v13877_v28  ;;  %5791 = vmatprep.subr.bf16.mxu1 %v13882_v48  ;;  %v13957_v28 = vld [vmem:[%s19398_s6 + $0x37c] ss:$84 sps:$4 sm:$0xff]   ;;  %v13952_v48 = vld [vmem:[%s19398_s6 + $0x178] ss:$84 sps:$4 sm:$0xff]  }
 0x499   : > { %5760 = vmatprep.subr.bf16.mxu0 %v13885_v21  ;;  %v13963_v21 = vld [vmem:[%s19398_s6 + $0x2d4] ss:$84 sps:$4 sm:$0xff]  }
 0x49b   : > { %v16720_v5 = vpop.eup %14899  ;;  %5792 = vmatpush1.bf16.msra.mxu1 %v13880_v1  ;;  %v13955_v1 = vld [vmem:[%s19398_s6 + $0x378] ss:$84 sps:$4 sm:$0xff]  }
 0x49c   : > { %v16722_v25 = vpop.eup %14901  ;;  %6245 = vperm.xlu1 %13809, %v16720_v5   ;;  %5761 = vmatpush1.bf16.msra.mxu0 %v13883_v19  ;;  %v13960_v19 = vld [vmem:[%s19398_s6 + $0xd4] ss:$84 sps:$4 sm:$0xff]  }
 0x49d   : > { %6248 = vperm.xlu0 %13810, %v16722_v25   ;;  %v16726_v57 = vpop.eup %14903  ;;  %5793 = vmatprep.subr.bf16.mxu1 %v13888_v24  ;;  %v13958_v24 = vld [vmem:[%s19398_s6 + $0xd0] ss:$84 sps:$4 sm:$0xff]  }
 0x49e   : > { %v16729_v56 = vpop.eup %14905  ;;  %5762 = vmatprep.subr.bf16.mxu0 %v13891_v55  ;;  %v13969_v55 = vld [vmem:[%s19398_s6 + $0x22c] ss:$84 sps:$4 sm:$0xff]  }
 0x49f   : > { %5794 = vmatpush1.bf16.msra.mxu1 %v13886_v53  ;;  %v13961_v53 = vld [vmem:[%s19398_s6 + $0x2d0] ss:$84 sps:$4 sm:$0xff]  }
 0x4a0   : > { %6251 = vperm.xlu1 %13809, %v16726_v57   ;;  %5763 = vmatpush1.bf16.msra.mxu0 %v13889_v9  ;;  %v13966_v9 = vld [vmem:[%s19398_s6 + $0x2c] ss:$84 sps:$4 sm:$0xff]  }
 0x4a1   : > { %5795 = vmatprep.subr.bf16.mxu1 %v13894_v51  ;;  %5830 = vmatprep.subr.bf16.mxu0 %v13897_v62  ;;  %v13964_v51 = vld [vmem:[%s19398_s6 + $0x28] ss:$84 sps:$4 sm:$0xff]   ;;  %v13975_v62 = vld [vmem:[%s19398_s6 + $0x184] ss:$84 sps:$4 sm:$0xff]  }
 0x4a3   : > { %5796 = vmatpush1.bf16.msra.mxu1 %v13892_v42  ;;  %5781 = vmatmul.mubr.bf16.vlgmr.msra.gmra.mxu0 %v16680_v17  ;;  %v13967_v42 = vld [vmem:[%s19398_s6 + $0x228] ss:$84 sps:$4 sm:$0xff]  }
 0x4a4   : > { %6254 = vperm.xlu1 %13809, %v16729_v56   ;;  %5831 = vmatpush1.bf16.msra.mxu0 %v13895_v39  ;;  %v13972_v39 = vld [vmem:[%s19398_s6 + $0x4d4] ss:$84 sps:$4 sm:$0xff]  }
 0x4a5   : > { %5797 = vmatprep.subr.bf16.mxu1 %v13900_v27  ;;  %5862 = vmatprep.mubr.bf16.mxu0 %v15017_v30  ;;  %v13970_v27 = vld [vmem:[%s19398_s6 + $0x4d0] ss:$84 sps:$4 sm:$0xff]  }
 0x4a6   : > { %5832 = vmatprep.subr.bf16.mxu0 %v13903_v7  ;;  %v13981_v7 = vld [vmem:[%s19398_s6 + $0xdc] ss:$84 sps:$4 sm:$0xff]  }
 0x4a7   : > { %5798 = vmatpush1.bf16.msra.mxu1 %v13898_v29  ;;  %v13973_v29 = vld [vmem:[%s19398_s6 + $0x180] ss:$84 sps:$4 sm:$0xff]  }
 0x4a8   : > { %5833 = vmatpush1.bf16.msra.mxu0 %v13901_v40  ;;  %5799 = vmatprep.subr.bf16.mxu1 %v13906_v13  ;;  %v13978_v40 = vld [vmem:[%s19398_s6 + $0x42c] ss:$84 sps:$4 sm:$0xff]   ;;  %v13976_v13 = vld [vmem:[%s19398_s6 + $0x428] ss:$84 sps:$4 sm:$0xff]  }
 0x4a9   : > { %5834 = vmatprep.subr.bf16.mxu0 %v13909_v10  ;;  %v13987_v10 = vld [vmem:[%s19398_s6 + $0x34] ss:$84 sps:$4 sm:$0xff]  }
 0x4ab   : > { %5800 = vmatpush1.bf16.msra.mxu1 %v13904_v33  ;;  %v13979_v33 = vld [vmem:[%s19398_s6 + $0xd8] ss:$84 sps:$4 sm:$0xff]  }
 0x4ac   : > { %5835 = vmatpush1.bf16.msra.mxu0 %v13907_v46  ;;  %5801 = vmatprep.subr.bf16.mxu1 %v13912_v54  ;;  %v13984_v46 = vld [vmem:[%s19398_s6 + $0x384] ss:$84 sps:$4 sm:$0xff]   ;;  %v13982_v54 = vld [vmem:[%s19398_s6 + $0x380] ss:$84 sps:$4 sm:$0xff]  }
 0x4af   : > { %5802 = vmatpush1.bf16.msra.mxu1 %v13910_v50  ;;  %v13985_v50 = vld [vmem:[%s19398_s6 + $0x30] ss:$84 sps:$4 sm:$0xff]  }
 0x517   : > { %v6246_v47 = vpop.permute.xlu1 %6245 }
 0x518   : > { %v6249_v63 = vpop.permute.xlu0 %6248  ;;  %v6259_v34 = vrot.slane %v6246_v47, %v16705_v14  ;;  %v13913_v47 = vld [vmem:[%s19398_s6 + $0x2c0] ss:$84 sps:$4 sm:$0xff]  }
 0x519   : > { %v6263_v32 = vrot.slane %v6249_v63, %v16702_v59  ;;  %v13915_v63 = vld [vmem:[%s19398_s6 + $0x2c4] ss:$84 sps:$4 sm:$0xff]  }
 0x51a   : > { %5836 = vmatprep.subr.bf16.mxu0 %v13915_v63  ;;  %v13993_v63 = vld [vmem:[%s19398_s6 + $0x4dc] ss:$84 sps:$4 sm:$0xff]  }
 0x51b   : > { %v6252_v22 = vpop.permute.xlu1 %6251  ;;  %v6264_v60 = vsel %vm6199_vm1, %v6263_v32, %v6259_v34  ;;  %v13916_v32 = vld [vmem:[%s19398_s6 + $0x18] ss:$84 sps:$4 sm:$0xff]   ;;  %5837 = vmatpush1.bf16.msra.mxu0 %v13913_v47  ;;  %v13990_v47 = vld [vmem:[%s19398_s6 + $0x2dc] ss:$84 sps:$4 sm:$0xff]  }
 0x51c   : > { %v6268_v44 = vrot.slane %v6252_v22, %v16705_v14  ;;  %v13918_v22 = vld [vmem:[%s19398_s6 + $0x1c] ss:$84 sps:$4 sm:$0xff]   ;;  %v13919_v34 = vld [vmem:[%s19398_s6 + $0x218] ss:$84 sps:$4 sm:$0xff]  }
 0x51d   : > { %5803 = vmatprep.subr.bf16.mxu1 %v13918_v22  ;;  %v13988_v22 = vld [vmem:[%s19398_s6 + $0x2d8] ss:$84 sps:$4 sm:$0xff]  }
 0x51e   : > { %5804 = vmatpush1.bf16.msra.mxu1 %v13916_v32  ;;  %v13991_v32 = vld [vmem:[%s19398_s6 + $0x4d8] ss:$84 sps:$4 sm:$0xff]  }
 0x51f   : > { %v6255_v45 = vpop.permute.xlu1 %6254 }
 0x520   : > { %v6272_v52 = vrot.slane %v6255_v45, %v16702_v59  ;;  %v13921_v45 = vld [vmem:[%s19398_s6 + $0x21c] ss:$84 sps:$4 sm:$0xff]  }
 0x521   : > { %5838 = vmatprep.subr.bf16.mxu0 %v13921_v45  ;;  %5822 = vmatmul.mubr.bf16.vlgmr.msra.gmra.mxu1 %v16680_v17  ;;  %v13999_v45 = vld [vmem:[%s19398_s6 + $0x434] ss:$84 sps:$4 sm:$0xff]  }
 0x522   : > { %v6273_v37 = vsel %vm6199_vm1, %v6272_v52, %v6268_v44  ;;  %v13924_v44 = vld [vmem:[%s19398_s6 + $0x4c4] ss:$84 sps:$4 sm:$0xff]   ;;  %v13922_v52 = vld [vmem:[%s19398_s6 + $0x4c0] ss:$84 sps:$4 sm:$0xff]   ;;  %5839 = vmatpush1.bf16.msra.mxu0 %v13919_v34  ;;  %5903 = vmatprep.mubr.bf16.mxu1 %v15017_v30 }
 0x523   : > { %v6274_v36 = vsel %vm6210_vm2, %v6273_v37, %v6264_v60  ;;  %5871 = vmatprep.subr.bf16.mxu1 %v13924_v44  ;;  %v13925_v60 = vld [vmem:[%s19398_s6 + $0x170] ss:$84 sps:$4 sm:$0xff]   ;;  %v13927_v37 = vld [vmem:[%s19398_s6 + $0x174] ss:$84 sps:$4 sm:$0xff]  }
 0x524   : > { %v6276_v6 = vsel %vm6213_vm3, %v6274_v36, 0.0  ;;  %v13930_v36 = vld [vmem:[%s19398_s6 + $0x41c] ss:$84 sps:$4 sm:$0xff]   ;;  %5840 = vmatprep.subr.bf16.mxu0 %v13927_v37  ;;  %5872 = vmatpush1.bf16.msra.mxu1 %v13922_v52  ;;  %v13996_v34 = vld [vmem:[%s19398_s6 + $0x234] ss:$84 sps:$4 sm:$0xff]  }
 0x525   : > { %6277 = vadd.xlane.f32.xlu1 %v6276_v6  ;;  %v13933_v6 = vld [vmem:[%s19398_s6 + $0xcc] ss:$84 sps:$4 sm:$0xff]   ;;  %5873 = vmatprep.subr.bf16.mxu1 %v13930_v36  ;;  %v13994_v44 = vld [vmem:[%s19398_s6 + $0x230] ss:$84 sps:$4 sm:$0xff]   ;;  %v14000_v36 = vld [vmem:[%s19398_s6 + $0x188] ss:$84 sps:$4 sm:$0xff]  }
 0x526   : > { %5841 = vmatpush1.bf16.msra.mxu0 %v13925_v60  ;;  %v13997_v52 = vld [vmem:[%s19398_s6 + $0x430] ss:$84 sps:$4 sm:$0xff]   ;;  %v14002_v60 = vld [vmem:[%s19398_s6 + $0x18c] ss:$84 sps:$4 sm:$0xff]  }
 0x527   : > { %5842 = vmatprep.subr.bf16.mxu0 %v13933_v6  ;;  %v14005_v37 = vld [vmem:[%s19398_s6 + $0x38c] ss:$84 sps:$4 sm:$0xff]   ;;  %v14003_v6 = vld [vmem:[%s19398_s6 + $0x388] ss:$84 sps:$4 sm:$0xff]  }
 0x528   : > { %5874 = vmatpush1.bf16.msra.mxu1 %v13928_v15  ;;  %v14008_v15 = vld [vmem:[%s19398_s6 + $0xe4] ss:$84 sps:$4 sm:$0xff]  }
 0x529   : > { %5875 = vmatprep.subr.bf16.mxu1 %v13936_v38  ;;  %v14006_v38 = vld [vmem:[%s19398_s6 + $0xe0] ss:$84 sps:$4 sm:$0xff]  }
 0x52a   : > { %5843 = vmatpush1.bf16.msra.mxu0 %v13931_v18  ;;  %v14011_v18 = vld [vmem:[%s19398_s6 + $0x2e4] ss:$84 sps:$4 sm:$0xff]  }
 0x52b   : > { %5844 = vmatprep.subr.bf16.mxu0 %v13939_v61  ;;  %v14009_v61 = vld [vmem:[%s19398_s6 + $0x2e0] ss:$84 sps:$4 sm:$0xff]  }
 0x52c   : > { %5876 = vmatpush1.bf16.msra.mxu1 %v13934_v41  ;;  %v14014_v41 = vld [vmem:[%s19398_s6 + $0x3c] ss:$84 sps:$4 sm:$0xff]  }
 0x52d   : > { %5877 = vmatprep.subr.bf16.mxu1 %v13942_v35  ;;  %v14012_v35 = vld [vmem:[%s19398_s6 + $0x38] ss:$84 sps:$4 sm:$0xff]  }
 0x52e   : > { %5845 = vmatpush1.bf16.msra.mxu0 %v13937_v58  ;;  %v14017_v58 = vld [vmem:[%s19398_s6 + $0x23c] ss:$84 sps:$4 sm:$0xff]  }
 0x52f   : > { %5912 = vmatprep.subr.bf16.mxu0 %v13945_v43  ;;  %v14015_v43 = vld [vmem:[%s19398_s6 + $0x238] ss:$84 sps:$4 sm:$0xff]  }
 0x530   : > { %5878 = vmatpush1.bf16.msra.mxu1 %v13940_v4  ;;  %v14020_v4 = vld [vmem:[%s19398_s6 + $0x4e4] ss:$84 sps:$4 sm:$0xff]  }
 0x531   : > { %5863 = vmatmul.mubr.bf16.vlgmr.msra.gmra.mxu0 %v16680_v17  ;;  %5879 = vmatprep.subr.bf16.mxu1 %v13948_v23  ;;  %v14018_v23 = vld [vmem:[%s19398_s6 + $0x4e0] ss:$84 sps:$4 sm:$0xff]  }
 0x532   : > { %5913 = vmatpush1.bf16.msra.mxu0 %v13943_v12  ;;  %5944 = vmatprep.mubr.bf16.mxu0 %v15017_v30  ;;  %v14023_v12 = vld [vmem:[%s19398_s6 + $0x194] ss:$84 sps:$4 sm:$0xff]  }
 0x533   : > { %5914 = vmatprep.subr.bf16.mxu0 %v13951_v20  ;;  %v14021_v20 = vld [vmem:[%s19398_s6 + $0x190] ss:$84 sps:$4 sm:$0xff]  }
 0x534   : > { %5880 = vmatpush1.bf16.msra.mxu1 %v13946_v3  ;;  %v14026_v3 = vld [vmem:[%s19398_s6 + $0x43c] ss:$84 sps:$4 sm:$0xff]  }
 0x535   : > { %5881 = vmatprep.subr.bf16.mxu1 %v13954_v26  ;;  %v14024_v26 = vld [vmem:[%s19398_s6 + $0x438] ss:$84 sps:$4 sm:$0xff]  }
 0x536   : > { %5915 = vmatpush1.bf16.msra.mxu0 %v13949_v11  ;;  %v14029_v11 = vld [vmem:[%s19398_s6 + $0xec] ss:$84 sps:$4 sm:$0xff]  }
 0x537   : > { %5916 = vmatprep.subr.bf16.mxu0 %v13957_v28  ;;  %v14027_v28 = vld [vmem:[%s19398_s6 + $0xe8] ss:$84 sps:$4 sm:$0xff]  }
 0x538   : > { %5882 = vmatpush1.bf16.msra.mxu1 %v13952_v48  ;;  %v14032_v48 = vld [vmem:[%s19398_s6 + $0x394] ss:$84 sps:$4 sm:$0xff]  }
 0x539   : > { %5883 = vmatprep.subr.bf16.mxu1 %v13960_v19  ;;  %v14030_v19 = vld [vmem:[%s19398_s6 + $0x390] ss:$84 sps:$4 sm:$0xff]  }
 0x53a   : > { %5917 = vmatpush1.bf16.msra.mxu0 %v13955_v1  ;;  %v14035_v1 = vld [vmem:[%s19398_s6 + $0x44] ss:$84 sps:$4 sm:$0xff]  }
 0x53b   : > { %5918 = vmatprep.subr.bf16.mxu0 %v13963_v21  ;;  %v14033_v21 = vld [vmem:[%s19398_s6 + $0x40] ss:$84 sps:$4 sm:$0xff]  }
 0x53c   : > { %5884 = vmatpush1.bf16.msra.mxu1 %v13958_v24  ;;  %v14038_v24 = vld [vmem:[%s19398_s6 + $0x2ec] ss:$84 sps:$4 sm:$0xff]  }
 0x53d   : > { %5885 = vmatprep.subr.bf16.mxu1 %v13966_v9  ;;  %v14039_v9 = vld [vmem:[%s19398_s6 + $0x4e8] ss:$84 sps:$4 sm:$0xff]  }
 0x53e   : > { %5919 = vmatpush1.bf16.msra.mxu0 %v13961_v53  ;;  %v14036_v53 = vld [vmem:[%s19398_s6 + $0x2e8] ss:$84 sps:$4 sm:$0xff]  }
 0x53f   : > { %5920 = vmatprep.subr.bf16.mxu0 %v13969_v55  ;;  %v14042_v55 = vld [vmem:[%s19398_s6 + $0x244] ss:$84 sps:$4 sm:$0xff]  }
 0x540   : > { %5886 = vmatpush1.bf16.msra.mxu1 %v13964_v51  ;;  %v15019_v51 = vmov 0.0  }
 0x541   : > { %5953 = vmatprep.subr.bf16.mxu1 %v13972_v39  ;;  %v14043_v39 = vld [vmem:[%s19398_s6 + $0x440] ss:$84 sps:$4 sm:$0xff]  }
 0x542   : > { %5921 = vmatpush1.bf16.msra.mxu0 %v13967_v42  ;;  %v14040_v42 = vld [vmem:[%s19398_s6 + $0x240] ss:$84 sps:$4 sm:$0xff]  }
 0x543   : > { %5922 = vmatprep.subr.bf16.mxu0 %v13975_v62  ;;  %5904 = vmatmul.mubr.bf16.vlgmr.msra.gmra.mxu1 %v16680_v17  ;;  %v14046_v62 = vld [vmem:[%s19398_s6 + $0x19c] ss:$84 sps:$4 sm:$0xff]  }
 0x544   : > { %5954 = vmatpush1.bf16.msra.mxu1 %v13970_v27  ;;  %5985 = vmatprep.mubr.bf16.mxu1 %v15017_v30 }
 0x545   : > { %5955 = vmatprep.subr.bf16.mxu1 %v13978_v40 }
 0x546   : > { %5923 = vmatpush1.bf16.msra.mxu0 %v13973_v29 }
 0x547   : > { %5924 = vmatprep.subr.bf16.mxu0 %v13981_v7  ;;  %v14044_v7 = vld [vmem:[%s19398_s6 + $0x198] ss:$84 sps:$4 sm:$0xff]  }
 0x548   : > { %5956 = vmatpush1.bf16.msra.mxu1 %v13976_v13  ;;  %v14047_v13 = vld [vmem:[%s19398_s6 + $0x398] ss:$84 sps:$4 sm:$0xff]  }
 0x549   : > { %5957 = vmatprep.subr.bf16.mxu1 %v13984_v46  ;;  %v14048_v46 = vld [vmem:[%s19398_s6 + $0xf0] ss:$84 sps:$4 sm:$0xff]  }
 0x54a   : > { %5925 = vmatpush1.bf16.msra.mxu0 %v13979_v33  ;;  %v14050_v33 = vld [vmem:[%s19398_s6 + $0xf4] ss:$84 sps:$4 sm:$0xff]  }
 0x54b   : > { %5926 = vmatprep.subr.bf16.mxu0 %v13987_v10  ;;  %v14051_v10 = vld [vmem:[%s19398_s6 + $0x2f0] ss:$84 sps:$4 sm:$0xff]  }
 0x54c   : > { %5958 = vmatpush1.bf16.msra.mxu1 %v13982_v54  ;;  %v14054_v54 = vld [vmem:[%s19398_s6 + $0x4c] ss:$84 sps:$4 sm:$0xff]  }
 0x54d   : > { %5959 = vmatprep.subr.bf16.mxu1 %v13990_v47  ;;  %v14055_v47 = vld [vmem:[%s19398_s6 + $0x248] ss:$84 sps:$4 sm:$0xff]  }
 0x54e   : > { %5927 = vmatpush1.bf16.msra.mxu0 %v13985_v50  ;;  %v14052_v50 = vld [vmem:[%s19398_s6 + $0x48] ss:$84 sps:$4 sm:$0xff]  }
 0x54f   : > { %5994 = vmatprep.subr.bf16.mxu0 %v13993_v63  ;;  %v14056_v63 = vld [vmem:[%s19398_s6 + $0x1a0] ss:$84 sps:$4 sm:$0xff]  }
 0x550   : > { %5960 = vmatpush1.bf16.msra.mxu1 %v13988_v22 }
 0x551   : > { %5945 = vmatmul.mubr.bf16.vlgmr.msra.gmra.mxu0 %v16680_v17  ;;  %5961 = vmatprep.subr.bf16.mxu1 %v13996_v34 }
 0x552   : > { %5995 = vmatpush1.bf16.msra.mxu0 %v13991_v32  ;;  %6026 = vmatprep.mubr.bf16.mxu0 %v15017_v30 }
 0x553   : > { %5996 = vmatprep.subr.bf16.mxu0 %v13999_v45 }
 0x554   : > { %5962 = vmatpush1.bf16.msra.mxu1 %v13994_v44 }
 0x555   : > { %5963 = vmatprep.subr.bf16.mxu1 %v14002_v60  ;;  %v12361_v60 = vcombine.low %v15120_v0, %v15161_v8 }
 0x556   : > { %5997 = vmatpush1.bf16.msra.mxu0 %v13997_v52  ;;  %v12362_v52 = vcombine.high %v15120_v0, %v15161_v8  ;;  %v14058_v0 = vld [vmem:[%s19398_s6 + $0x50] ss:$84 sps:$4 sm:$0xff]  }
 0x557   : > { %5998 = vmatprep.subr.bf16.mxu0 %v14005_v37  ;;  %v19504_v8 = vld [vmem:[#allocation13_spill] sm:$0xff] }
 0x558   : > { %5964 = vmatpush1.bf16.msra.mxu1 %v14000_v36 }
 0x559   : > { %5965 = vmatprep.subr.bf16.mxu1 %v14008_v15 }
 0x55a   : > { %5999 = vmatpush1.bf16.msra.mxu0 %v14003_v6 }
 0x55b   : > { %6000 = vmatprep.subr.bf16.mxu0 %v14011_v18  ;;  %v19505_v18 = vld [vmem:[#allocation6_spill] sm:$0xff] }
 0x55c   : > { %5966 = vmatpush1.bf16.msra.mxu1 %v14006_v38  ;;  %v12364_v38 = vcombine.high %v19505_v18, %v19504_v8 }
 0x55d   : > { %5967 = vmatprep.subr.bf16.mxu1 %v14014_v41  ;;  %v19507_v41 = vld [vmem:[#allocation20_spill] sm:$0xff] }
 0x55e   : > { %6001 = vmatpush1.bf16.msra.mxu0 %v14009_v61  ;;  %v19506_v61 = vld [vmem:[#allocation28_spill] sm:$0xff] }
 0x55f   : > { %6002 = vmatprep.subr.bf16.mxu0 %v14017_v58  ;;  %v12386_v58 = vcombine.high %v19507_v41, %v19506_v61 }
 0x560   : > { %5968 = vmatpush1.bf16.msra.mxu1 %v14012_v35  ;;  %v12385_v35 = vcombine.low %v19507_v41, %v19506_v61 }
 0x561   : > { %6035 = vmatprep.subr.bf16.mxu1 %v14020_v4  ;;  %v19509_v4 = vld [vmem:[#allocation22_spill] sm:$0xff] }
 0x562   : > { %6003 = vmatpush1.bf16.msra.mxu0 %v14015_v43  ;;  %v19508_v43 = vld [vmem:[#allocation30_spill] sm:$0xff] }
 0x563   : > { %6004 = vmatprep.subr.bf16.mxu0 %v14023_v12  ;;  %5986 = vmatmul.mubr.bf16.vlgmr.msra.gmra.mxu1 %v16680_v17  ;;  %v12390_v12 = vcombine.high %v19509_v4, %v19508_v43 }
 0x564   : > { %6036 = vmatpush1.bf16.msra.mxu1 %v14018_v23  ;;  %6067 = vmatprep.mubr.bf16.mxu1 %v15017_v30 }
 0x565   : > { %6037 = vmatprep.subr.bf16.mxu1 %v14026_v3 }
 0x566   : > { %6005 = vmatpush1.bf16.msra.mxu0 %v14021_v20 }
 0x567   : > { %6006 = vmatprep.subr.bf16.mxu0 %v14029_v11 }
 0x568   : > { %6038 = vmatpush1.bf16.msra.mxu1 %v14024_v26 }
 0x569   : > { %6039 = vmatprep.subr.bf16.mxu1 %v14032_v48  ;;  %v4739_v48 = vsub.s32 6, %v16684_v16 }
 0x56a   : > { %6007 = vmatpush1.bf16.msra.mxu0 %v14027_v28  ;;  %v17250_v28 = vpop.f32.mrf.mxu0 }
 0x56b   : > { %6008 = vmatprep.subr.bf16.mxu0 %v14035_v1  ;;  %v4743_v1 = vsub.s32 7, %v16684_v16 }
 0x56c   : > { %6040 = vmatpush1.bf16.msra.mxu1 %v14030_v19 }
 0x56d   : > { %6041 = vmatprep.subr.bf16.mxu1 %v14038_v24  ;;  %v4735_v24 = vsub.s32 5, %v16684_v16 }
 0x56e   : > { %6009 = vmatpush1.bf16.msra.mxu0 %v14033_v21  ;;  %v17255_v21 = vsub.s32 4, %v16684_v16 }
 0x56f   : > { %13249 = vmatprep.subr.bf16.mxu0 %v15019_v51 }
 0x570   : > { %6042 = vmatpush1.bf16.msra.mxu1 %v14036_v53  ;;  %v17258_v53 = vpop.f32.mrf.mxu0 }
 0x571   : > { %6027 = vmatmul.mubr.bf16.vlgmr.msra.gmra.mxu0 %v16680_v17  ;;  %6043 = vmatprep.subr.bf16.mxu1 %v14042_v55 }
 0x572   : > { %13250 = vmatpush3.bf16.msra.mxu0 %v14039_v9  ;;  %13265 = vmatprep.mubr.msk.bf16.mxu0 %vm15020_vm4, %v15019_v51  ;;  %v17263_v9 = vld [vmem:[%s19399_s7 + $0x8] sm:$0xff] }
 0x573   : > { %13251 = vmatprep.subr.bf16.mxu0 %v15019_v51 }
 0x574   : > { %6044 = vmatpush1.bf16.msra.mxu1 %v14040_v42  ;;  %v17273_v42 = vrot.slane %v17263_v9, %v4743_v1 }
 0x575   : > { %6045 = vmatprep.subr.bf16.mxu1 %v14046_v62  ;;  %v4768_v62 = vrot.slane %v17263_v9, %v4735_v24 }
 0x576   : > { %13252 = vmatpush3.bf16.msra.mxu0 %v14043_v39  ;;  %v4764_v39 = vrot.slane %v17263_v9, %v17255_v21 }
 0x577   : > { %13253 = vmatprep.subr.bf16.mxu0 %v15019_v51 }
 0x578   : > { %6046 = vmatpush1.bf16.msra.mxu1 %v14044_v7 }
 0x579   : > { %6047 = vmatprep.subr.bf16.mxu1 %v14050_v33 }
 0x57a   : > { %13254 = vmatpush3.bf16.msra.mxu0 %v14047_v13 }
 0x57b   : > { %13255 = vmatprep.subr.bf16.mxu0 %v15019_v51 }
 0x57c   : > { %6048 = vmatpush1.bf16.msra.mxu1 %v14048_v46 }
 0x57d   : > { %6049 = vmatprep.subr.bf16.mxu1 %v14054_v54  ;;  %v17292_v54 = vsub.s32 2, %v16684_v16 }
 0x57e   : > { %13256 = vmatpush3.bf16.msra.mxu0 %v14051_v10 }
 0x57f   : > { %13257 = vmatprep.subr.bf16.mxu0 %v15019_v51 }
 0x580   : > { %6050 = vmatpush1.bf16.msra.mxu1 %v14052_v50  ;;  %v4756_v50 = vrot.slane %v17263_v9, %v17292_v54 }
 0x581   : > { %6415 = vmatprep.subr.bf16.mxu1 %v12362_v52 }
 0x582   : > { %13258 = vmatpush3.bf16.msra.mxu0 %v14055_v47 }
 0x583   : > { %13259 = vmatprep.subr.bf16.mxu0 %v15019_v51  ;;  %6068 = vmatmul.mubr.bf16.vlgmr.msra.gmra.mxu1 %v16680_v17 }
 0x584   : > { %6433 = vmatprep.mubr.bf16.mxu1 %v15017_v30  ;;  %6416 = vmatpush1.bf16.msra.mxu1 %v12361_v60 }
 0x585   : > { %6456 = vmatprep.subr.bf16.mxu1 %v12364_v38 }
 0x586   : > { %13260 = vmatpush3.bf16.msra.mxu0 %v14056_v63 }
 0x587   : > { %13261 = vmatprep.subr.bf16.mxu0 %v15019_v51 }
 0x5ae   : > { %v6278_v27 = vpop.xlane.xlu1 %6277 }
 0x5af   : > { %v6283_v29 = vrot.slane %v6278_v27, %v16690_v31  ;;  %v6287_v40 = vrot.slane %v6278_v27, %v16716_v2  ;;  %v5786_v27 = vpop.f32.mrf.mxu0 }
 0x5b1   : > { %14907 = vrcp.f32 %v6283_v29  ;;  %v5787_v29 = vpop.f32.mrf.mxu0 }
 0x5b2   : > { %14909 = vrcp.f32 %v6287_v40  ;;  %v17283_v40 = vld [vmem:[%s19399_s7 + $0x10] sm:$0x1f] }
 0x5b3   : > { %v4796_v13 = vrot.slane %v17283_v40, %v17255_v21 }
 0x5be   : > { %v14908_v22 = vpop.eup %14907 }
 0x5bf   : > { %v6291_v32 = vmul.f32 %v14908_v22, %v16720_v5  ;;  %v6292_v34 = vmul.f32 %v14908_v22, %v16722_v25  ;;  %v14910_v45 = vpop.eup %14909  ;;  %v14057_v5 = vld [vmem:[%s19398_s6 + $0xf8] ss:$84 sps:$4 sm:$0xff]  }
 0x5c0   : > { %v6294_v37 = vmul.f32 %v14910_v45, %v16726_v57  ;;  %v6295_v36 = vmul.f32 %v14910_v45, %v16729_v56  ;;  %13262 = vmatpush3.bf16.msra.mxu0 %v14057_v5 }
 0x5c1   : > { %11586 = vperm.xlu1 %13809, %v6291_v32   ;;  %v6296_v44 = vpack.c.bf16 %v6292_v34, %v6291_v32  ;;  %13263 = vmatprep.subr.bf16.mxu0 %v15019_v51  ;;  %v17268_v51 = vrot.slane %v17263_v9, %v4739_v48 }
 0x5c2   : > { %v6297_v15 = vpack.c.bf16 %v6295_v36, %v6294_v37 }
 0x5c3   : > { %v6299_v25 = vunpack.c.l.b16 %v6296_v44  ;;  %v6300_v6 = vunpack.c.h.b16 %v6296_v44 }
 0x5c4   : > { %13264 = vmatpush3.bf16.msra.mxu0 %v14058_v0  ;;  %v6730_v57 = vunpack.c.l.b16 %v6297_v15  ;;  %v6731_v56 = vunpack.c.h.b16 %v6297_v15  ;;  %v19511_v15 = vld [vmem:[#allocation7_spill] sm:$0xff] }
 0x5c5   : > { %6302 = vperm.xlu0 %13810, %v6299_v25   ;;  %6845 = vmatprep.subr.bf16.mxu0 %v12386_v58  ;;  %v12363_v25 = vcombine.low %v19505_v18, %v19504_v8 }
 0x5c7   : > { %13266 = vmatmul.mubr.bf16.vlgmr.msra.gmra.mxu0 %v16680_v17  ;;  %v17242_v17 = vpop.f32.mrf.mxu1 }
 0x5c8   : > { %6863 = vmatprep.mubr.bf16.mxu0 %v15017_v30  ;;  %6846 = vmatpush1.bf16.msra.mxu0 %v12385_v35  ;;  %v12389_v35 = vcombine.low %v19509_v4, %v19508_v43 }
 0x5c9   : > { %6305 = vperm.xlu0 %13810, %v6300_v6   ;;  %6927 = vmatprep.subr.bf16.mxu0 %v12390_v12  ;;  %v17244_v23 = vpop.f32.mrf.mxu1  ;;  %v19510_v6 = vld [vmem:[#allocation14_spill] sm:$0xff] }
 0x5ca   : > { %v12366_v0 = vcombine.high %v19511_v15, %v19510_v6  ;;  %v12365_v58 = vcombine.low %v19511_v15, %v19510_v6  ;;  %v19519_v6 = vld [vmem:[#allocation26_spill] sm:$0xff] }
 0x5cb   : > { %v5745_v20 = vpop.f32.mrf.mxu1 }
 0x5cd   : > { %6733 = vperm.xlu0 %13810, %v6730_v57   ;;  %v5746_v3 = vpop.f32.mrf.mxu1 }
 0x5d1   : > { %6736 = vperm.xlu0 %13810, %v6731_v56  }
 0x5d5   : > { %11589 = vperm.xlu0 %13810, %v6292_v34  }
 0x5d9   : > { %11592 = vperm.xlu0 %13810, %v6294_v37  }
 0x5dd   : > { %11595 = vperm.xlu0 %13810, %v6295_v36  }
 0x5e1   : > { %v17246_v11 = vpop.f32.mrf.mxu1 }
 0x5e3   : > { %v17248_v26 = vpop.f32.mrf.mxu1 }
 0x5e5   : > { %v5827_v19 = vpop.f32.mrf.mxu1 }
 0x5e6   : > { %v19512_v19 = vld [vmem:[#allocation15_spill] sm:$0xff] }
 0x5e7   : > { %v5828_v55 = vpop.f32.mrf.mxu1 }
 0x5e8   : > { %v19513_v55 = vld [vmem:[#allocation8_spill] sm:$0xff] }
 0x5e9   : > { %v12368_v27 = vcombine.high %v19513_v55, %v19512_v19 }
 0x5f1   : > { %v17285_v7 = vpop.f32.mrf.mxu0 }
 0x5f3   : > { %v17289_v33 = vpop.f32.mrf.mxu0 }
 0x5f5   : > { %v5868_v46 = vpop.f32.mrf.mxu0 }
 0x5f6   : > { %v19515_v46 = vld [vmem:[#allocation24_spill] sm:$0xff] }
 0x5f7   : > { %v5869_v10 = vpop.f32.mrf.mxu0 }
 0x603   : > { %v5905_v47 = vpop.f32.mrf.mxu1 }
 0x604   : > { %v17296_v22 = vadd.f32 %v5905_v47, %v4756_v50  ;;  %v12367_v47 = vcombine.low %v19513_v55, %v19512_v19 }
 0x605   : > { %v17298_v32 = vpop.f32.mrf.mxu1 }
 0x607   : > { %v5909_v34 = vpop.f32.mrf.mxu1 }
 0x609   : > { %v5910_v60 = vpop.f32.mrf.mxu1 }
 0x611   : > { %v5946_v57 = vpop.f32.mrf.mxu0 }
 0x612   : > { %v17314_v8 = vadd.f32 %v5946_v57, %v4764_v39  ;;  %v19514_v39 = vld [vmem:[#allocation32_spill] sm:$0xff] }
 0x613   : > { %v5948_v18 = vpop.f32.mrf.mxu0  ;;  %v12394_v10 = vcombine.high %v19515_v46, %v19514_v39 }
 0x614   : > { %v17321_v12 = vadd.f32 %v5948_v18, %v4768_v62  ;;  %v19520_v18 = vld [vmem:[#allocation17_spill] sm:$0xff] }
 0x615   : > { %v5950_v29 = vpop.f32.mrf.mxu0 }
 0x617   : > { %v5951_v50 = vpop.f32.mrf.mxu0 }
 0x618   : > { %v14064_v50 = vld [vmem:[%s19401_s9 + $0xc4] ss:$16 sps:$4 sm:$0xff]  }
 0x63c   : > { %v11587_v4 = vpop.permute.xlu1 %11586 }
 0x63d   : > { %v11600_v60 = vrot.slane %v11587_v4, %v16705_v14  ;;  %v14062_v4 = vld [vmem:[%s19401_s9 + $0xc0] ss:$16 sps:$4 sm:$0xff]  }
 0x640   : > { %v6303_v63 = vpop.permute.xlu0 %6302 }
 0x641   : > { %v6310_v44 = vrot.slane %v6303_v63, %v16705_v14  ;;  %v12393_v63 = vcombine.low %v19515_v46, %v19514_v39  ;;  %v19522_v39 = vld [vmem:[#allocation18_spill] sm:$0xff]  ;;  %v19523_v46 = vld [vmem:[#allocation11_spill] sm:$0xff] }
 0x644   : > { %v6306_v45 = vpop.permute.xlu0 %6305 }
 0x645   : > { %v6314_v52 = vrot.slane %v6306_v45, %v16702_v59  ;;  %v19516_v45 = vld [vmem:[#allocation16_spill] sm:$0xff] }
 0x647   : > { %v6315_v5 = vsel %vm6199_vm1, %v6314_v52, %v6310_v44  ;;  %v19517_v44 = vld [vmem:[#allocation9_spill] sm:$0xff] }
 0x648   : > { %v17305_v37 = vpack.c.b16 %v6315_v5, %v6315_v5  ;;  %v6734_v36 = vpop.permute.xlu0 %6733  ;;  %v12370_v52 = vcombine.high %v19517_v44, %v19516_v45 }
 0x649   : > { %v6741_v56 = vrot.slane %v6734_v36, %v16705_v14  ;;  %v19518_v36 = vld [vmem:[#allocation34_spill] sm:$0xff] }
 0x64a   : > { %12377 = vmatmul.mubr.msk.bf16.vlgmr.msra.gmra.mxu1 %vm6397_vm5, %v17305_v37  ;;  %v12398_v15 = vcombine.high %v19519_v6, %v19518_v36 }
 0x64b   : > { %6457 = vmatpush1.bf16.msra.mxu1 %v12363_v25  ;;  %6474 = vmatprep.mubr.bf16.mxu1 %v15017_v30 }
 0x64c   : > { %v6737_v38 = vpop.permute.xlu0 %6736  ;;  %6497 = vmatprep.subr.bf16.mxu1 %v12366_v0 }
 0x64d   : > { %v6745_v61 = vrot.slane %v6737_v38, %v16702_v59 }
 0x64f   : > { %v6746_v41 = vsel %vm6199_vm1, %v6745_v61, %v6741_v56  ;;  %v12397_v56 = vcombine.low %v19519_v6, %v19518_v36  ;;  %v5987_v61 = vpop.f32.mrf.mxu1  ;;  %v14070_v36 = vld [vmem:[%s19401_s9 + $0x84] ss:$16 sps:$4 sm:$0xff]  }
 0x650   : > { %v17323_v20 = vpack.c.b16 %v6746_v41, %v6746_v41  ;;  %v11590_v3 = vpop.permute.xlu0 %11589  ;;  %v19521_v41 = vld [vmem:[#allocation10_spill] sm:$0xff] }
 0x651   : > { %v11604_v62 = vrot.slane %v11590_v3, %v16702_v59  ;;  %v14061_v3 = vld [vmem:[%s19401_s9 + $0xe4] ss:$16 sps:$4 sm:$0xff]   ;;  %v5989_v19 = vpop.f32.mrf.mxu1  ;;  %v12371_v29 = vcombine.low %v19521_v41, %v19520_v18 }
 0x652   : > { %12378 = vmatmul.mubr.msk.bf16.vlgmr.msra.gmra.mxu1 %vm6397_vm5, %v17305_v37  ;;  %12401 = vmatmul.mubr.msk.bf16.vlgmr.msra.gmra.mxu0 %vm6397_vm5, %v17323_v20  ;;  %v17375_v55 = vadd.f32 %v5989_v19, %v17273_v42  ;;  %v14059_v42 = vld [vmem:[%s19401_s9 + $0xe0] ss:$16 sps:$4 sm:$0xff]  }
 0x653   : > { %6498 = vmatpush1.bf16.msra.mxu1 %v12365_v58  ;;  %6928 = vmatpush1.bf16.msra.mxu0 %v12389_v35  ;;  %v11605_v0 = vsel %vm6199_vm1, %v11604_v62, %v11600_v60  ;;  %v12372_v58 = vcombine.high %v19521_v41, %v19520_v18  ;;  %v17365_v35 = vadd.f32 %v5987_v61, %v17268_v51  ;;  %v17399_v62 = vpop.f32.mrf.mxu0  ;;  %v14076_v61 = vld [vmem:[%s19401_s9 + $0x44] ss:$16 sps:$4 sm:$0xff]   ;;  %v17439_v18 = vsub.s32 3, %v16684_v16  ;;  %v14074_v41 = vld [vmem:[%s19401_s9 + $0x40] ss:$16 sps:$4 sm:$0xff]  }
 0x654   : > { %v11593_v43 = vpop.permute.xlu0 %11592  ;;  %6515 = vmatprep.mubr.bf16.mxu1 %v15017_v30  ;;  %6538 = vmatprep.subr.bf16.mxu1 %v12368_v27  ;;  %v5991_v27 = vpop.f32.mrf.mxu1  ;;  %v4748_v16 = vrot.slane %v17263_v9, %v16690_v31 }
 0x655   : > { %6945 = vmatprep.mubr.bf16.mxu0 %v15017_v30  ;;  %7009 = vmatprep.subr.bf16.mxu0 %v12394_v10  ;;  %v11609_v5 = vrot.slane %v11593_v43, %v16705_v14  ;;  %v12369_v14 = vcombine.low %v19517_v44, %v19516_v45  ;;  %v12374_v10 = vcombine.high %v19523_v46, %v19522_v39  ;;  %v19524_v44 = vld [vmem:[#allocation19_spill] sm:$0xff] }
 0x656   : > { %v5992_v51 = vpop.f32.mrf.mxu1  ;;  %v4784_v43 = vrot.slane %v17283_v40, %v16716_v2  ;;  %v4792_v19 = vrot.slane %v17283_v40, %v17439_v18 }
 0x658   : > { %v11596_v34 = vpop.permute.xlu0 %11595  ;;  %v6069_v51 = vpop.f32.mrf.mxu1 }
 0x659   : > { %v11613_v25 = vrot.slane %v11596_v34, %v16702_v59  ;;  %v12373_v34 = vcombine.low %v19523_v46, %v19522_v39  ;;  %v19529_v39 = vld [vmem:[#allocation23_spill] sm:$0xff] }
 0x65a   : > { %12379 = vmatmul.mubr.msk.bf16.vlgmr.msra.gmra.mxu1 %vm6397_vm5, %v17305_v37  ;;  %12403 = vmatmul.mubr.msk.bf16.vlgmr.msra.gmra.mxu0 %vm6397_vm5, %v17323_v20 }
 0x65b   : > { %v11614_v38 = vsel %vm6199_vm1, %v11613_v25, %v11609_v5  ;;  %6539 = vmatpush1.bf16.msra.mxu1 %v12367_v47  ;;  %7010 = vmatpush1.bf16.msra.mxu0 %v12393_v63  ;;  %v14067_v47 = vld [vmem:[%s19401_s9 + $0xa4] ss:$16 sps:$4 sm:$0xff]   ;;  %v6030_v63 = vpop.f32.mrf.mxu0  ;;  %v14065_v5 = vld [vmem:[%s19401_s9 + $0xa0] ss:$16 sps:$4 sm:$0xff]  }
 0x65c   : > { %v11615_v57 = vsel %vm6210_vm2, %v11614_v38, %v11605_v0  ;;  %6556 = vmatprep.mubr.bf16.mxu1 %v15017_v30  ;;  %6579 = vmatprep.subr.bf16.mxu1 %v12370_v52  ;;  %v17406_v45 = vadd.f32 %v6030_v63, %v4784_v43  ;;  %v19525_v52 = vld [vmem:[#allocation12_spill] sm:$0xff]  ;;  %v6071_v43 = vpop.f32.mrf.mxu1  ;;  %v14080_v63 = vld [vmem:[%s19401_s9] ss:$16 sps:$4 sm:$0xff]  }
 0x65d   : > { %v11617_v59 = vsel %vm6397_vm5, %v11615_v57, 0.0  ;;  %7027 = vmatprep.mubr.bf16.mxu0 %v15017_v30  ;;  %7091 = vmatprep.subr.bf16.mxu0 %v12398_v15  ;;  %v12376_v60 = vcombine.high %v19525_v52, %v19524_v44  ;;  %v6032_v25 = vpop.f32.mrf.mxu0  ;;  %v14068_v15 = vld [vmem:[%s19401_s9 + $0x80] ss:$16 sps:$4 sm:$0xff]   ;;  %v14073_v0 = vld [vmem:[%s19401_s9 + $0x64] ss:$16 sps:$4 sm:$0xff]   ;;  %v12375_v38 = vcombine.low %v19525_v52, %v19524_v44 }
 0x65e   : > { %11618 = vst [vmem:[%s15221_s22] sm:$0x3] %v11617_v59  ;;  %v19526_v57 = vld [vmem:[#allocation29_spill] sm:$0xff] }
 0x65f   : > { %v6033_v6 = vpop.f32.mrf.mxu0  ;;  %v19527_v59 = vld [vmem:[#allocation21_spill] sm:$0xff] }
 0x660   : > { %v12387_v27 = vcombine.low %v19527_v59, %v19526_v57  ;;  %v19530_v52 = vld [vmem:[#allocation33_spill] sm:$0xff] }
 0x661   : > { %v14083_v25 = vld [vmem:[%s19401_s9 + $0x1e0] ss:$16 sps:$4 sm:$0xff]  }
 0x662   : > { %12380 = vmatmul.mubr.msk.bf16.vlgmr.msra.gmra.mxu1 %vm6397_vm5, %v17305_v37  ;;  %12405 = vmatmul.mubr.msk.bf16.vlgmr.msra.gmra.mxu0 %vm6397_vm5, %v17323_v20  ;;  %v14086_v6 = vld [vmem:[%s19401_s9 + $0x1c0] ss:$16 sps:$4 sm:$0xff]  }
 0x663   : > { %6580 = vmatpush1.bf16.msra.mxu1 %v12369_v14  ;;  %7092 = vmatpush1.bf16.msra.mxu0 %v12397_v56  ;;  %v12388_v14 = vcombine.high %v19527_v59, %v19526_v57  ;;  %v14071_v56 = vld [vmem:[%s19401_s9 + $0x60] ss:$16 sps:$4 sm:$0xff]  }
 0x664   : > { %6597 = vmatprep.mubr.bf16.mxu1 %v15017_v30  ;;  %6620 = vmatprep.subr.bf16.mxu1 %v12372_v58  ;;  %v4788_v58 = vrot.slane %v17283_v40, %v17292_v54 }
 0x665   : > { %7109 = vmatprep.mubr.bf16.mxu0 %v15017_v30  ;;  %10631 = vmatprep.subr.bf16.mxu0 %v14061_v3  ;;  %v14079_v3 = vld [vmem:[%s19401_s9 + $0x24] ss:$16 sps:$4 sm:$0xff]  }
 0x66a   : > { %12381 = vmatmul.mubr.msk.bf16.vlgmr.msra.gmra.mxu1 %vm6397_vm5, %v17305_v37  ;;  %12407 = vmatmul.mubr.msk.bf16.vlgmr.msra.gmra.mxu0 %vm6397_vm5, %v17323_v20 }
 0x66b   : > { %6621 = vmatpush1.bf16.msra.mxu1 %v12371_v29  ;;  %6638 = vmatprep.mubr.bf16.mxu1 %v15017_v30  ;;  %v19528_v29 = vld [vmem:[#allocation31_spill] sm:$0xff] }
 0x66c   : > { %6661 = vmatprep.subr.bf16.mxu1 %v12374_v10  ;;  %10632 = vmatpush1.bf16.msra.mxu0 %v14059_v42  ;;  %v12392_v46 = vcombine.high %v19529_v39, %v19528_v29  ;;  %v14077_v10 = vld [vmem:[%s19401_s9 + $0x20] ss:$16 sps:$4 sm:$0xff]   ;;  %v17458_v42 = vadd.f32 %v6069_v51, %v4788_v58  ;;  %v14094_v58 = vld [vmem:[%s19401_s9 + $0x184] ss:$16 sps:$4 sm:$0xff]  }
 0x66d   : > { %10633 = vmatprep.subr.bf16.mxu0 %v14064_v50  ;;  %v14082_v50 = vld [vmem:[%s19401_s9 + $0x4] ss:$16 sps:$4 sm:$0xff]  }
 0x670   : > { %10634 = vmatpush1.bf16.msra.mxu0 %v14062_v4  ;;  %v17465_v4 = vadd.f32 %v6071_v43, %v4792_v19  ;;  %v14092_v19 = vld [vmem:[%s19401_s9 + $0x180] ss:$16 sps:$4 sm:$0xff]  }
 0x671   : > { %10635 = vmatprep.subr.bf16.mxu0 %v14067_v47  ;;  %v6073_v47 = vpop.f32.mrf.mxu1  ;;  %v14104_v43 = vld [vmem:[%s19401_s9 + $0x2e0] ss:$16 sps:$4 sm:$0xff]  }
 0x672   : > { %12382 = vmatmul.mubr.msk.bf16.vlgmr.msra.gmra.mxu1 %vm6397_vm5, %v17305_v37  ;;  %v14101_v47 = vld [vmem:[%s19401_s9 + $0x120] ss:$16 sps:$4 sm:$0xff]  }
 0x673   : > { %6662 = vmatpush1.bf16.msra.mxu1 %v12373_v34  ;;  %6679 = vmatprep.mubr.bf16.mxu1 %v15017_v30  ;;  %v14085_v34 = vld [vmem:[%s19401_s9 + $0x1e4] ss:$16 sps:$4 sm:$0xff]   ;;  %v6074_v44 = vpop.f32.mrf.mxu1 }
 0x674   : > { %6702 = vmatprep.subr.bf16.mxu1 %v12376_v60  ;;  %10636 = vmatpush1.bf16.msra.mxu0 %v14065_v5  ;;  %v19531_v60 = vld [vmem:[#allocation25_spill] sm:$0xff] }
 0x675   : > { %10637 = vmatprep.subr.bf16.mxu0 %v14070_v36  ;;  %v12396_v5 = vcombine.high %v19531_v60, %v19530_v52  ;;  %v14088_v36 = vld [vmem:[%s19401_s9 + $0x1c4] ss:$16 sps:$4 sm:$0xff]   ;;  %v12395_v57 = vcombine.low %v19531_v60, %v19530_v52  ;;  %v14110_v44 = vld [vmem:[%s19401_s9 + $0x2c0] ss:$16 sps:$4 sm:$0xff]  }
 0x676   : > { %v14115_v52 = vld [vmem:[%s19401_s9 + $0x2a4] ss:$16 sps:$4 sm:$0xff]   ;;  %v14113_v60 = vld [vmem:[%s19401_s9 + $0x2a0] ss:$16 sps:$4 sm:$0xff]  }
 0x678   : > { %10638 = vmatpush1.bf16.msra.mxu0 %v14068_v15  ;;  %v14091_v15 = vld [vmem:[%s19401_s9 + $0x1a4] ss:$16 sps:$4 sm:$0xff]  }
 0x679   : > { %10639 = vmatprep.subr.bf16.mxu0 %v14073_v0 }
 0x67a   : > { %12383 = vmatmul.mubr.msk.bf16.vlgmr.msra.gmra.mxu1 %vm6397_vm5, %v17305_v37 }
 0x67b   : > { %6703 = vmatpush1.bf16.msra.mxu1 %v12375_v38  ;;  %6720 = vmatprep.mubr.bf16.mxu1 %v15017_v30 }
 0x67c   : > { %6886 = vmatprep.subr.bf16.mxu1 %v12388_v14  ;;  %10640 = vmatpush1.bf16.msra.mxu0 %v14071_v56  ;;  %v19532_v14 = vld [vmem:[#allocation35_spill] sm:$0xff] }
 0x67d   : > { %10641 = vmatprep.subr.bf16.mxu0 %v14076_v61  ;;  %v19533_v56 = vld [vmem:[#allocation27_spill] sm:$0xff] }
 0x67e   : > { %v12400_v61 = vcombine.high %v19533_v56, %v19532_v14  ;;  %v12399_v51 = vcombine.low %v19533_v56, %v19532_v14  ;;  %v14145_v14 = vld [vmem:[%s19401_s9 + $0x204] ss:$16 sps:$4 sm:$0xff]   ;;  %v14143_v56 = vld [vmem:[%s19401_s9 + $0x200] ss:$16 sps:$4 sm:$0xff]  }
 0x680   : > { %10642 = vmatpush1.bf16.msra.mxu0 %v14074_v41  ;;  %v14089_v41 = vld [vmem:[%s19401_s9 + $0x1a0] ss:$16 sps:$4 sm:$0xff]  }
 0x681   : > { %10643 = vmatprep.subr.bf16.mxu0 %v14079_v3 }
 0x682   : > { %12384 = vmatmul.mubr.msk.bf16.vlgmr.msra.gmra.mxu1 %vm6397_vm5, %v17305_v37  ;;  %v12391_v37 = vcombine.low %v19529_v39, %v19528_v29  ;;  %v14095_v29 = vld [vmem:[%s19401_s9 + $0x160] ss:$16 sps:$4 sm:$0xff]   ;;  %v14106_v39 = vld [vmem:[%s19401_s9 + $0x2e4] ss:$16 sps:$4 sm:$0xff]  }
 0x683   : > { %6887 = vmatpush1.bf16.msra.mxu1 %v12387_v27  ;;  %6904 = vmatprep.mubr.bf16.mxu1 %v15017_v30  ;;  %v14097_v27 = vld [vmem:[%s19401_s9 + $0x164] ss:$16 sps:$4 sm:$0xff]  }
 0x684   : > { %6968 = vmatprep.subr.bf16.mxu1 %v12392_v46  ;;  %10644 = vmatpush1.bf16.msra.mxu0 %v14077_v10  ;;  %v14100_v46 = vld [vmem:[%s19401_s9 + $0x144] ss:$16 sps:$4 sm:$0xff]   ;;  %v14098_v10 = vld [vmem:[%s19401_s9 + $0x140] ss:$16 sps:$4 sm:$0xff]  }
 0x685   : > { %10645 = vmatprep.subr.bf16.mxu0 %v14082_v50  ;;  %v14103_v50 = vld [vmem:[%s19401_s9 + $0x124] ss:$16 sps:$4 sm:$0xff]  }
 0x687   : > { %v6110_v0 = vpop.f32.mrf.mxu0 }
 0x688   : > { %10646 = vmatpush1.bf16.msra.mxu0 %v14080_v63  ;;  %v17496_v38 = vadd.f32 %v6110_v0, %v4796_v13  ;;  %v14112_v63 = vld [vmem:[%s19401_s9 + $0x2c4] ss:$16 sps:$4 sm:$0xff]   ;;  %v14131_v0 = vld [vmem:[%s19401_s9 + $0x240] ss:$16 sps:$4 sm:$0xff]  }
 0x689   : > { %10647 = vmatprep.subr.bf16.mxu0 %v14085_v34  ;;  %v13267_v59 = vpop.f32.mrf.mxu0  ;;  %v14109_v34 = vld [vmem:[%s19401_s9 + $0x104] ss:$16 sps:$4 sm:$0xff]  }
 0x68a   : > { %12402 = vmatmul.mubr.msk.bf16.vlgmr.msra.gmra.mxu1 %vm6397_vm5, %v17323_v20  ;;  %v14137_v59 = vld [vmem:[%s19401_s9 + $0x220] ss:$16 sps:$4 sm:$0xff]  }
 0x68b   : > { %6969 = vmatpush1.bf16.msra.mxu1 %v12391_v37  ;;  %6986 = vmatprep.mubr.bf16.mxu1 %v15017_v30  ;;  %v6113_v3 = vpop.f32.mrf.mxu0  ;;  %v14107_v37 = vld [vmem:[%s19401_s9 + $0x100] ss:$16 sps:$4 sm:$0xff]  }
 0x68c   : > { %7050 = vmatprep.subr.bf16.mxu1 %v12396_v5  ;;  %10648 = vmatpush2.bf16.msra.mxu0 %v14083_v25  ;;  %v14121_v5 = vld [vmem:[%s19401_s9 + $0x284] ss:$16 sps:$4 sm:$0xff]   ;;  %v14119_v25 = vld [vmem:[%s19401_s9 + $0x280] ss:$16 sps:$4 sm:$0xff]  }
 0x68d   : > { %10649 = vmatprep.subr.bf16.mxu0 %v14088_v36  ;;  %v13268_v13 = vpop.f32.mrf.mxu0  ;;  %v14127_v36 = vld [vmem:[%s19401_s9 + $0x264] ss:$16 sps:$4 sm:$0xff]   ;;  %v14155_v3 = vld [vmem:[%s19401_s9 + $0x3c0] ss:$16 sps:$4 sm:$0xff]  }
 0x68e   : > { %v14163_v13 = vld [vmem:[%s19401_s9 + $0x3a4] ss:$16 sps:$4 sm:$0xff]  }
 0x690   : > { %10650 = vmatpush2.bf16.msra.mxu0 %v14086_v6  ;;  %v14125_v6 = vld [vmem:[%s19401_s9 + $0x260] ss:$16 sps:$4 sm:$0xff]  }
 0x691   : > { %10651 = vmatprep.subr.bf16.mxu0 %v14091_v15  ;;  %v14133_v15 = vld [vmem:[%s19401_s9 + $0x244] ss:$16 sps:$4 sm:$0xff]  }
 0x692   : > { %12404 = vmatmul.mubr.msk.bf16.vlgmr.msra.gmra.mxu1 %vm6397_vm5, %v17323_v20 }
 0x693   : > { %7051 = vmatpush1.bf16.msra.mxu1 %v12395_v57  ;;  %7068 = vmatprep.mubr.bf16.mxu1 %v15017_v30  ;;  %v14139_v57 = vld [vmem:[%s19401_s9 + $0x224] ss:$16 sps:$4 sm:$0xff]  }
 0x694   : > { %7132 = vmatprep.subr.bf16.mxu1 %v12400_v61  ;;  %10652 = vmatpush2.bf16.msra.mxu0 %v14089_v41  ;;  %v14151_v61 = vld [vmem:[%s19401_s9 + $0x3e4] ss:$16 sps:$4 sm:$0xff]   ;;  %v14149_v41 = vld [vmem:[%s19401_s9 + $0x3e0] ss:$16 sps:$4 sm:$0xff]  }
 0x695   : > { %10653 = vmatprep.subr.bf16.mxu0 %v14094_v58  ;;  %v14157_v58 = vld [vmem:[%s19401_s9 + $0x3c4] ss:$16 sps:$4 sm:$0xff]  }
 0x698   : > { %10654 = vmatpush2.bf16.msra.mxu0 %v14092_v19  ;;  %v14161_v19 = vld [vmem:[%s19401_s9 + $0x3a0] ss:$16 sps:$4 sm:$0xff]  }
 0x699   : > { %10655 = vmatprep.subr.bf16.mxu0 %v14097_v27  ;;  %v14169_v27 = vld [vmem:[%s19401_s9 + $0x384] ss:$16 sps:$4 sm:$0xff]  }
 0x69a   : > { %12406 = vmatmul.mubr.msk.bf16.vlgmr.msra.gmra.mxu1 %vm6397_vm5, %v17323_v20 }
 0x69b   : > { %7133 = vmatpush1.bf16.msra.mxu1 %v12399_v51  ;;  %7150 = vmatprep.mubr.bf16.mxu1 %v15017_v30  ;;  %v14167_v51 = vld [vmem:[%s19401_s9 + $0x380] ss:$16 sps:$4 sm:$0xff]  }
 0x69c   : > { %10656 = vmatpush2.bf16.msra.mxu0 %v14095_v29  ;;  %10672 = vmatprep.subr.bf16.mxu1 %v14106_v39  ;;  %v14175_v29 = vld [vmem:[%s19401_s9 + $0x364] ss:$16 sps:$4 sm:$0xff]   ;;  %v14173_v39 = vld [vmem:[%s19401_s9 + $0x360] ss:$16 sps:$4 sm:$0xff]  }
 0x69d   : > { %10657 = vmatprep.subr.bf16.mxu0 %v14100_v46  ;;  %v14181_v46 = vld [vmem:[%s19401_s9 + $0x344] ss:$16 sps:$4 sm:$0xff]  }
 0x6a0   : > { %10658 = vmatpush2.bf16.msra.mxu0 %v14098_v10  ;;  %v14179_v10 = vld [vmem:[%s19401_s9 + $0x340] ss:$16 sps:$4 sm:$0xff]  }
 0x6a1   : > { %10659 = vmatprep.subr.bf16.mxu0 %v14103_v50  ;;  %v14187_v50 = vld [vmem:[%s19401_s9 + $0x324] ss:$16 sps:$4 sm:$0xff]  }
 0x6a2   : > { %12408 = vmatmul.mubr.msk.bf16.vlgmr.msra.gmra.mxu1 %vm6397_vm5, %v17323_v20  ;;  %v14118_v20 = vld [vmem:[%s19401_s9 + $0x4e4] ss:$16 sps:$4 sm:$0xff]  }
 0x6a3   : > { %10673 = vmatpush1.bf16.msra.mxu1 %v14104_v43  ;;  %v14185_v43 = vld [vmem:[%s19401_s9 + $0x320] ss:$16 sps:$4 sm:$0xff]  }
 0x6a4   : > { %10660 = vmatpush2.bf16.msra.mxu0 %v14101_v47  ;;  %10674 = vmatprep.subr.bf16.mxu1 %v14112_v63  ;;  %v14193_v47 = vld [vmem:[%s19401_s9 + $0x304] ss:$16 sps:$4 sm:$0xff]   ;;  %v14191_v63 = vld [vmem:[%s19401_s9 + $0x300] ss:$16 sps:$4 sm:$0xff]  }
 0x6a5   : > { %10661 = vmatprep.subr.bf16.mxu0 %v14109_v34  ;;  %v14202_v34 = vld [vmem:[%s19401_s9 + $0x6e4] ss:$16 sps:$4 sm:$0xff]  }
 0x6a7   : > { %10675 = vmatpush1.bf16.msra.mxu1 %v14110_v44  ;;  %v17650_v44 = vld [vmem:[%s19399_s7] sm:$0xff] }
 0x6a8   : > { %10662 = vmatpush2.bf16.msra.mxu0 %v14107_v37  ;;  %10676 = vmatprep.subr.bf16.mxu1 %v14115_v52  ;;  %v4720_v37 = vrot.slane %v17650_v44, %v16716_v2  ;;  %v4724_v52 = vrot.slane %v17650_v44, %v17292_v54 }
 0x6a9   : > { %10713 = vmatprep.subr.bf16.mxu0 %v14118_v20 }
 0x6aa   : > { %v5703_v20 = vadd.f32 %v16694_v49, %v4720_v37 }
 0x6ab   : > { %10677 = vmatpush1.bf16.msra.mxu1 %v14113_v60  ;;  %v5742_v60 = vadd.f32 %v17242_v17, %v4724_v52  ;;  %v12422_v52 = vmul.f32 -1.442695, %v17365_v35 }
 0x6ac   : > { %10678 = vmatprep.subr.bf16.mxu1 %v14121_v5  ;;  %v12409_v5 = vmul.f32 -1.442695, %v5703_v20 }
 0x6ae   : > { %14911 = vpow2.f32 %v12409_v5 }
 0x6af   : > { %10679 = vmatpush1.bf16.msra.mxu1 %v14119_v25  ;;  %v4736_v25 = vrot.slane %v17650_v44, %v4735_v24  ;;  %v12418_v24 = vmul.f32 -1.442695, %v17296_v22 }
 0x6b0   : > { %10680 = vmatprep.subr.bf16.mxu1 %v14127_v36  ;;  %v12410_v36 = vmul.f32 -1.442695, %v5742_v60 }
 0x6b2   : > { %14913 = vpow2.f32 %v12410_v36  ;;  %v14116_v36 = vld [vmem:[%s19401_s9 + $0x4e0] ss:$16 sps:$4 sm:$0xff]  }
 0x6b3   : > { %10681 = vmatpush1.bf16.msra.mxu1 %v14125_v6  ;;  %v4740_v6 = vrot.slane %v17650_v44, %v4739_v48 }
 0x6b4   : > { %10682 = vmatprep.subr.bf16.mxu1 %v14133_v15  ;;  %v5785_v15 = vadd.f32 %v17258_v53, %v4736_v25 }
 0x6b7   : > { %10683 = vmatpush1.bf16.msra.mxu1 %v14131_v0  ;;  %v5824_v0 = vadd.f32 %v17246_v11, %v4740_v6  ;;  %v4529_v6 = vld [vmem:[%s15181_s21] sm:$0x1] }
 0x6b8   : > { %10684 = vmatprep.subr.bf16.mxu1 %v14139_v57  ;;  %v12413_v57 = vmul.f32 -1.442695, %v5785_v15  ;;  %v14124_v15 = vld [vmem:[%s19401_s9 + $0x4c4] ss:$16 sps:$4 sm:$0xff]  }
 0x6b9   : > { %v12414_v49 = vmul.f32 -1.442695, %v5824_v0 }
 0x6ba   : > { %14915 = vpow2.f32 %v12413_v57 }
 0x6bb   : > { %10685 = vmatpush1.bf16.msra.mxu1 %v14137_v59  ;;  %14917 = vpow2.f32 %v12414_v49  ;;  %v14912_v17 = vpop.eup %14911 }
 0x6bc   : > { %10686 = vmatprep.subr.bf16.mxu1 %v14145_v14  ;;  %v7207_v14 = vadd.f32 1.0, %v14912_v17 }
 0x6be   : > { %14919 = vrcp.f32 %v7207_v14  ;;  %v14122_v14 = vld [vmem:[%s19401_s9 + $0x4c0] ss:$16 sps:$4 sm:$0xff]  }
 0x6bf   : > { %10687 = vmatpush1.bf16.msra.mxu1 %v14143_v56  ;;  %v14914_v59 = vpop.eup %14913 }
 0x6c0   : > { %10688 = vmatprep.subr.bf16.mxu1 %v14151_v61  ;;  %v7208_v56 = vadd.f32 1.0, %v14914_v59 }
 0x6c2   : > { %14921 = vrcp.f32 %v7208_v56 }
 0x6c3   : > { %10689 = vmatpush2.bf16.msra.mxu1 %v14149_v41  ;;  %14923 = vpow2.f32 %v12418_v24 }
 0x6c4   : > { %10690 = vmatprep.subr.bf16.mxu1 %v14157_v58 }
 0x6c7   : > { %10691 = vmatpush2.bf16.msra.mxu1 %v14155_v3  ;;  %v14916_v61 = vpop.eup %14915 }
 0x6c8   : > { %10692 = vmatprep.subr.bf16.mxu1 %v14163_v13  ;;  %v14918_v41 = vpop.eup %14917  ;;  %v7211_v58 = vadd.f32 1.0, %v14916_v61 }
 0x6c9   : > { %v7212_v3 = vadd.f32 1.0, %v14918_v41 }
 0x6ca   : > { %14925 = vrcp.f32 %v7211_v58 }
 0x6cb   : > { %10693 = vmatpush2.bf16.msra.mxu1 %v14161_v19  ;;  %14927 = vrcp.f32 %v7212_v3  ;;  %v14920_v22 = vpop.eup %14919 }
 0x6cc   : > { %10694 = vmatprep.subr.bf16.mxu1 %v14169_v27 }
 0x6cf   : > { %10695 = vmatpush2.bf16.msra.mxu1 %v14167_v51 }
 0x6d0   : > { %10696 = vmatprep.subr.bf16.mxu1 %v14175_v29 }
 0x6d3   : > { %10697 = vmatpush2.bf16.msra.mxu1 %v14173_v39 }
 0x6d4   : > { %10698 = vmatprep.subr.bf16.mxu1 %v14181_v46 }
 0x6d7   : > { %10699 = vmatpush2.bf16.msra.mxu1 %v14179_v10 }
 0x6d8   : > { %10700 = vmatprep.subr.bf16.mxu1 %v14187_v50  ;;  %v12421_v50 = vmul.f32 -1.442695, %v17321_v12 }
 0x6da   : > { %14929 = vpow2.f32 %v12421_v50  ;;  %v14136_v50 = vld [vmem:[%s19401_s9 + $0x484] ss:$16 sps:$4 sm:$0xff]  }
 0x6db   : > { %10701 = vmatpush2.bf16.msra.mxu1 %v14185_v43  ;;  %14931 = vpow2.f32 %v12422_v52 }
 0x6dc   : > { %10702 = vmatprep.subr.bf16.mxu1 %v14193_v47 }
 0x6df   : > { %10703 = vmatpush2.bf16.msra.mxu1 %v14191_v63 }
 0x6e0   : > { %10754 = vmatprep.subr.bf16.mxu1 %v14202_v34  ;;  %v14922_v34 = vpop.eup %14921 }
 0x6e1   : > { %v14924_v12 = vpop.eup %14923 }
 0x6e2   : > { %v7216_v49 = vadd.f32 1.0, %v14924_v12  ;;  %v14926_v56 = vpop.eup %14925 }
 0x6e3   : > { %v14928_v3 = vpop.eup %14927 }
 0x6e4   : > { %14933 = vrcp.f32 %v7216_v49  ;;  %v4752_v49 = vrot.slane %v17263_v9, %v16716_v2 }
 0x70a   : > { %v6435_v48 = vpop.f32.mrf.mxu1 }
 0x70c   : > { %v6437_v53 = vpop.f32.mrf.mxu1 }
 0x70e   : > { %v6439_v11 = vpop.f32.mrf.mxu1 }
 0x710   : > { %v6440_v13 = vpop.f32.mrf.mxu1 }
 0x711   : > { %v4728_v13 = vrot.slane %v17650_v44, %v17439_v18 }
 0x712   : > { %v17667_v19 = vpop.f32.mrf.mxu1  ;;  %v6865_v27 = vpop.f32.mrf.mxu0 }
 0x713   : > { %v7287_v51 = vrot.slane %v6865_v27, 7 }
 0x714   : > { %v17669_v29 = vpop.f32.mrf.mxu1  ;;  %v6867_v39 = vpop.f32.mrf.mxu0 }
 0x715   : > { %v7288_v46 = vsel %vm6210_vm2, %v7287_v51, %v6435_v48  ;;  %v7289_v10 = vrot.slane %v6867_v39, 7  ;;  %v14130_v48 = vld [vmem:[%s19401_s9 + $0x4a4] ss:$16 sps:$4 sm:$0xff]  }
 0x716   : > { %v6480_v43 = vpop.f32.mrf.mxu1  ;;  %v6869_v47 = vpop.f32.mrf.mxu0  ;;  %v7335_v63 = vmul.f32 %v14920_v22, %v7288_v46  ;;  %v14128_v22 = vld [vmem:[%s19401_s9 + $0x4a0] ss:$16 sps:$4 sm:$0xff]  }
 0x717   : > { %v7290_v37 = vsel %vm6210_vm2, %v7289_v10, %v6437_v53  ;;  %v4732_v10 = vrot.slane %v17650_v44, %v17255_v21  ;;  %v14134_v21 = vld [vmem:[%s19401_s9 + $0x480] ss:$16 sps:$4 sm:$0xff]  }
 0x718   : > { %v17675_v20 = vmul.f32 %v14922_v34, %v7290_v37  ;;  %v6481_v60 = vpop.f32.mrf.mxu1  ;;  %v6870_v5 = vpop.f32.mrf.mxu0  ;;  %v17677_v25 = vpack.c.bf16 %v7335_v63, %v7335_v63  ;;  %v5744_v63 = vadd.f32 %v17244_v23, %v4728_v13  ;;  %v4744_v23 = vrot.slane %v17650_v44, %v4743_v1 }
 0x719   : > { %v5783_v52 = vadd.f32 %v17250_v28, %v4732_v10  ;;  %v14142_v60 = vld [vmem:[%s19401_s9 + $0x464] ss:$16 sps:$4 sm:$0xff]   ;;  %v14140_v28 = vld [vmem:[%s19401_s9 + $0x460] ss:$16 sps:$4 sm:$0xff]   ;;  %v4760_v10 = vrot.slane %v17263_v9, %v17439_v18 }
 0x71a   : > { %v6517_v0 = vpop.f32.mrf.mxu1  ;;  %v6947_v57 = vpop.f32.mrf.mxu0  ;;  %10663 = vmatprep.mubr.bf16.mxu0 %v17677_v25  ;;  %v12411_v12 = vmul.f32 -1.442695, %v5744_v63  ;;  %v14152_v63 = vld [vmem:[%s19401_s9 + $0x420] ss:$16 sps:$4 sm:$0xff]  }
 0x71b   : > { %v7295_v35 = vrot.slane %v6947_v57, 7  ;;  %10664 = vmatmul.mubr.bf16.vlgmr.msra.gmra.mxu0 %v4529_v6  ;;  %v14930_v6 = vpop.eup %14929  ;;  %v5908_v9 = vadd.f32 %v17298_v32, %v4760_v10  ;;  %v14164_v32 = vld [vmem:[%s19401_s9 + $0x5e0] ss:$16 sps:$4 sm:$0xff]  }
 0x71c   : > { %10714 = vmatpush1.bf16.msra.mxu0 %v14116_v36  ;;  %v6519_v17 = vpop.f32.mrf.mxu1  ;;  %v6949_v59 = vpop.f32.mrf.mxu0  ;;  %v7219_v1 = vadd.f32 1.0, %v14930_v6  ;;  %14935 = vpow2.f32 %v12411_v12 }
 0x71d   : > { %v7296_v24 = vsel %vm6210_vm2, %v7295_v35, %v6517_v0  ;;  %v7297_v61 = vrot.slane %v6949_v59, 7  ;;  %10715 = vmatprep.subr.bf16.mxu0 %v14124_v15  ;;  %v14932_v57 = vpop.eup %14931  ;;  %v12412_v35 = vmul.f32 -1.442695, %v5783_v52  ;;  %v12419_v12 = vmul.f32 -1.442695, %v5908_v9 }
 0x71e   : > { %v6521_v41 = vpop.f32.mrf.mxu1  ;;  %v6951_v58 = vpop.f32.mrf.mxu0  ;;  %v7339_v53 = vmul.f32 %v14926_v56, %v7296_v24  ;;  %v5826_v56 = vadd.f32 %v17248_v26, %v4744_v23  ;;  %v7220_v24 = vadd.f32 1.0, %v14932_v57  ;;  %v5865_v26 = vadd.f32 %v17285_v7, %v4748_v16  ;;  %v14160_v7 = vld [vmem:[%s19401_s9 + $0x404] ss:$16 sps:$4 sm:$0xff]  }
 0x71f   : > { %v7298_v11 = vsel %vm6210_vm2, %v7297_v61, %v6519_v17  ;;  %v14148_v17 = vld [vmem:[%s19401_s9 + $0x444] ss:$16 sps:$4 sm:$0xff]   ;;  %v14146_v41 = vld [vmem:[%s19401_s9 + $0x440] ss:$16 sps:$4 sm:$0xff]   ;;  %v14934_v58 = vpop.eup %14933  ;;  %14937 = vpow2.f32 %v12412_v35  ;;  %v12420_v35 = vmul.f32 -1.442695, %v17314_v8 }
 0x720   : > { %v17697_v27 = vmul.f32 %v14928_v3, %v7298_v11  ;;  %10716 = vmatpush1.bf16.msra.mxu0 %v14122_v14  ;;  %v6522_v51 = vpop.f32.mrf.mxu1  ;;  %v6952_v39 = vpop.f32.mrf.mxu0  ;;  %v17702_v46 = vpack.c.bf16 %v7339_v53, %v7339_v53  ;;  %v5867_v53 = vadd.f32 %v17289_v33, %v4752_v49  ;;  %v14154_v11 = vld [vmem:[%s19401_s9 + $0x424] ss:$16 sps:$4 sm:$0xff]   ;;  %14939 = vrcp.f32 %v7219_v1 }
 0x721   : > { %10717 = vmatprep.subr.bf16.mxu0 %v14130_v48  ;;  %14941 = vrcp.f32 %v7220_v24  ;;  %v4780_v49 = vrot.slane %v17283_v40, %v16690_v31  ;;  %v14178_v40 = vld [vmem:[%s19401_s9 + $0x5a4] ss:$16 sps:$4 sm:$0xff]  }
 0x722   : > { %v17709_v43 = vpop.f32.mrf.mxu1  ;;  %v17711_v47 = vpop.f32.mrf.mxu0  ;;  %10745 = vmatprep.mubr.bf16.mxu0 %v17702_v46 }
 0x724   : > { %10718 = vmatpush1.bf16.msra.mxu0 %v14128_v22  ;;  %v17715_v34 = vpop.f32.mrf.mxu1  ;;  %v7031_v37 = vpop.f32.mrf.mxu0  ;;  %v12415_v22 = vmul.f32 -1.442695, %v5826_v56 }
 0x725   : > { %10719 = vmatprep.subr.bf16.mxu0 %v14136_v50  ;;  %v7305_v14 = vrot.slane %v7031_v37, 7  ;;  %v12417_v37 = vmul.f32 -1.442695, %v5867_v53 }
 0x726   : > { %v6562_v5 = vpop.f32.mrf.mxu1  ;;  %v7033_v36 = vpop.f32.mrf.mxu0  ;;  %14943 = vpow2.f32 %v12415_v22  ;;  %v14184_v22 = vld [vmem:[%s19401_s9 + $0x584] ss:$16 sps:$4 sm:$0xff]  }
 0x727   : > { %v14158_v5 = vld [vmem:[%s19401_s9 + $0x400] ss:$16 sps:$4 sm:$0xff]   ;;  %14945 = vpow2.f32 %v12417_v37  ;;  %v14166_v36 = vld [vmem:[%s19401_s9 + $0x5e4] ss:$16 sps:$4 sm:$0xff]  }
 0x728   : > { %10720 = vmatpush1.bf16.msra.mxu0 %v14134_v21  ;;  %v6563_v15 = vpop.f32.mrf.mxu1  ;;  %v7034_v0 = vpop.f32.mrf.mxu0  ;;  %v12416_v21 = vmul.f32 -1.442695, %v5865_v26  ;;  %v14182_v37 = vld [vmem:[%s19401_s9 + $0x580] ss:$16 sps:$4 sm:$0xff]  }
 0x729   : > { %10721 = vmatprep.subr.bf16.mxu0 %v14142_v60  ;;  %v14936_v15 = vpop.eup %14935 }
 0x72a   : > { %v17737_v44 = vpop.f32.mrf.mxu1  ;;  %v7111_v59 = vpop.f32.mrf.mxu0  ;;  %14947 = vpow2.f32 %v12416_v21  ;;  %v7209_v56 = vadd.f32 1.0, %v14936_v15  ;;  %v14190_v21 = vld [vmem:[%s19401_s9 + $0x564] ss:$16 sps:$4 sm:$0xff]  }
 0x72b   : > { %v7311_v0 = vrot.slane %v7111_v59, 7  ;;  %14949 = vpow2.f32 %v12419_v12 }
 0x72c   : > { %10722 = vmatpush1.bf16.msra.mxu0 %v14140_v28  ;;  %v6601_v61 = vpop.f32.mrf.mxu1  ;;  %v7113_v48 = vpop.f32.mrf.mxu0  ;;  %v14172_v28 = vld [vmem:[%s19401_s9 + $0x5c4] ss:$16 sps:$4 sm:$0xff]   ;;  %14951 = vpow2.f32 %v12420_v35  ;;  %v14194_v35 = vld [vmem:[%s19401_s9 + $0x540] ss:$16 sps:$4 sm:$0xff]  }
 0x72d   : > { %v7306_v3 = vsel %vm6210_vm2, %v7305_v14, %v6601_v61  ;;  %10723 = vmatprep.subr.bf16.mxu0 %v14148_v17  ;;  %v14938_v57 = vpop.eup %14937  ;;  %v7313_v1 = vrot.slane %v7113_v48, 7  ;;  %v14170_v61 = vld [vmem:[%s19401_s9 + $0x5c0] ss:$16 sps:$4 sm:$0xff]   ;;  %14953 = vrcp.f32 %v7209_v56 }
 0x72e   : > { %v17749_v13 = vmul.f32 %v14934_v58, %v7306_v3  ;;  %v6603_v51 = vpop.f32.mrf.mxu1  ;;  %v7115_v39 = vpop.f32.mrf.mxu0  ;;  %v7210_v48 = vadd.f32 1.0, %v14938_v57  ;;  %v6029_v58 = vadd.f32 %v17399_v62, %v4780_v49 }
 0x72f   : > { %v14940_v16 = vpop.eup %14939  ;;  %v14176_v51 = vld [vmem:[%s19401_s9 + $0x5a0] ss:$16 sps:$4 sm:$0xff]  }
 0x730   : > { %10724 = vmatpush1.bf16.msra.mxu0 %v14146_v41  ;;  %v6604_v33 = vpop.f32.mrf.mxu1  ;;  %v7116_v50 = vpop.f32.mrf.mxu0  ;;  %14955 = vrcp.f32 %v7210_v48  ;;  %v12424_v62 = vmul.f32 -1.442695, %v6029_v58  ;;  %v14200_v58 = vld [vmem:[%s19401_s9 + $0x6e0] ss:$16 sps:$4 sm:$0xff]  }
 0x731   : > { %10725 = vmatprep.subr.bf16.mxu0 %v14154_v11  ;;  %v14942_v41 = vpop.eup %14941  ;;  %v12423_v11 = vmul.f32 -1.442695, %v17375_v55 }
 0x732   : > { %v17759_v52 = vpop.f32.mrf.mxu1 }
 0x733   : > { %v14944_v39 = vpop.eup %14943  ;;  %14957 = vpow2.f32 %v12423_v11  ;;  %v17835_v11 = vpack.c.bf16 %v17675_v20, %v17675_v20 }
 0x734   : > { %10726 = vmatpush1.bf16.msra.mxu0 %v14152_v63  ;;  %v17762_v60 = vpop.f32.mrf.mxu1  ;;  %v14946_v10 = vpop.eup %14945  ;;  %v7213_v63 = vadd.f32 1.0, %v14944_v39  ;;  %14959 = vpow2.f32 %v12424_v62 }
 0x735   : > { %10727 = vmatprep.subr.bf16.mxu0 %v14160_v7  ;;  %v7215_v7 = vadd.f32 1.0, %v14946_v10 }
 0x736   : > { %v6644_v6 = vpop.f32.mrf.mxu1  ;;  %14961 = vrcp.f32 %v7213_v63  ;;  %v14203_v63 = vld [vmem:[%s19401_s9 + $0x500] ss:$16 sps:$4 sm:$0xff]  }
 0x737   : > { %v14948_v50 = vpop.eup %14947  ;;  %v14188_v6 = vld [vmem:[%s19401_s9 + $0x560] ss:$16 sps:$4 sm:$0xff]   ;;  %14963 = vrcp.f32 %v7215_v7 }
 0x738   : > { %10728 = vmatpush1.bf16.msra.mxu0 %v14158_v5  ;;  %v6645_v23 = vpop.f32.mrf.mxu1  ;;  %v7214_v9 = vadd.f32 1.0, %v14948_v50  ;;  %v14950_v12 = vpop.eup %14949 }
 0x739   : > { %10729 = vmatprep.subr.bf16.mxu0 %v14166_v36  ;;  %v14196_v23 = vld [vmem:[%s19401_s9 + $0x544] ss:$16 sps:$4 sm:$0xff]   ;;  %v14952_v15 = vpop.eup %14951 }
 0x73a   : > { %v6681_v17 = vpop.f32.mrf.mxu1  ;;  %14965 = vrcp.f32 %v7214_v9  ;;  %v14954_v49 = vpop.eup %14953  ;;  %v14214_v9 = vld [vmem:[%s19401_s9 + $0x8e4] ss:$16 sps:$4 sm:$0xff]  }
 0x73b   : > { %v7312_v14 = vsel %vm6210_vm2, %v7311_v0, %v6681_v17 }
 0x73c   : > { %v17780_v24 = vmul.f32 %v14940_v16, %v7312_v14  ;;  %10730 = vmatpush2.bf16.msra.mxu0 %v14164_v32  ;;  %v6683_v59 = vpop.f32.mrf.mxu1  ;;  %v7218_v14 = vadd.f32 1.0, %v14952_v15 }
 0x73d   : > { %v7314_v8 = vsel %vm6210_vm2, %v7313_v1, %v6683_v59  ;;  %10731 = vmatprep.subr.bf16.mxu0 %v14172_v28  ;;  %v7217_v28 = vadd.f32 1.0, %v14950_v12  ;;  %v14199_v1 = vld [vmem:[%s19401_s9 + $0x524] ss:$16 sps:$4 sm:$0xff]  }
 0x73e   : > { %v17790_v53 = vmul.f32 %v14942_v41, %v7314_v8  ;;  %v6685_v3 = vpop.f32.mrf.mxu1 }
 0x73f   : > { %14967 = vrcp.f32 %v7217_v28  ;;  %v14209_v28 = vld [vmem:[%s19401_s9 + $0x6a0] ss:$16 sps:$4 sm:$0xff]  }
 0x740   : > { %10732 = vmatpush2.bf16.msra.mxu0 %v14170_v61  ;;  %v6686_v26 = vpop.f32.mrf.mxu1  ;;  %v14956_v61 = vpop.eup %14955  ;;  %14969 = vrcp.f32 %v7218_v14 }
 0x741   : > { %10733 = vmatprep.subr.bf16.mxu0 %v14178_v40  ;;  %v14958_v3 = vpop.eup %14957  ;;  %v14208_v26 = vld [vmem:[%s19401_s9 + $0x6c4] ss:$16 sps:$4 sm:$0xff]  }
 0x742   : > { %v17799_v33 = vpop.f32.mrf.mxu1  ;;  %v7221_v20 = vadd.f32 1.0, %v14958_v3 }
 0x744   : > { %10734 = vmatpush2.bf16.msra.mxu0 %v14176_v51  ;;  %v17801_v55 = vpop.f32.mrf.mxu1  ;;  %v7303_v51 = vrot.slane %v17711_v47, 7  ;;  %v14206_v47 = vld [vmem:[%s19401_s9 + $0x6c0] ss:$16 sps:$4 sm:$0xff]   ;;  %14971 = vrcp.f32 %v7221_v20  ;;  %v14229_v20 = vld [vmem:[%s19401_s9 + $0x644] ss:$16 sps:$4 sm:$0xff]  }
 0x745   : > { %10735 = vmatprep.subr.bf16.mxu0 %v14184_v22  ;;  %v14960_v22 = vpop.eup %14959 }
 0x746   : > { %v6726_v5 = vpop.f32.mrf.mxu1  ;;  %v7304_v62 = vsel %vm6210_vm2, %v7303_v51, %v17737_v44  ;;  %v14211_v44 = vld [vmem:[%s19401_s9 + $0x6a4] ss:$16 sps:$4 sm:$0xff]  }
 0x748   : > { %10736 = vmatpush2.bf16.msra.mxu0 %v14182_v37  ;;  %v6727_v36 = vpop.f32.mrf.mxu1  ;;  %v14962_v37 = vpop.eup %14961 }
 0x749   : > { %10737 = vmatprep.subr.bf16.mxu0 %v14190_v21  ;;  %v14964_v5 = vpop.eup %14963  ;;  %v7222_v36 = vadd.f32 1.0, %v14960_v22  ;;  %v14221_v22 = vld [vmem:[%s19401_s9 + $0x660] ss:$16 sps:$4 sm:$0xff]  }
 0x74a   : > { %v6906_v32 = vpop.f32.mrf.mxu1 }
 0x74b   : > { %v7291_v0 = vrot.slane %v6906_v32, 7  ;;  %v7343_v32 = vmul.f32 %v14964_v5, %v7304_v62  ;;  %14973 = vrcp.f32 %v7222_v36  ;;  %v14238_v5 = vld [vmem:[%s19401_s9 + $0x864] ss:$16 sps:$4 sm:$0xff]  }
 0x74c   : > { %10738 = vmatpush2.bf16.msra.mxu0 %v14188_v6  ;;  %v6908_v57 = vpop.f32.mrf.mxu1 }
 0x74d   : > { %v7292_v17 = vsel %vm6210_vm2, %v7291_v0, %v17667_v19  ;;  %v7293_v16 = vrot.slane %v6908_v57, 7  ;;  %10739 = vmatprep.subr.bf16.mxu0 %v14196_v23  ;;  %v14197_v19 = vld [vmem:[%s19401_s9 + $0x520] ss:$16 sps:$4 sm:$0xff]   ;;  %v14966_v23 = vpop.eup %14965 }
 0x74e   : > { %v6910_v56 = vpop.f32.mrf.mxu1  ;;  %v7337_v59 = vmul.f32 %v14954_v49, %v7292_v17 }
 0x74f   : > { %v7294_v41 = vsel %vm6210_vm2, %v7293_v16, %v17669_v29  ;;  %v14205_v29 = vld [vmem:[%s19401_s9 + $0x504] ss:$16 sps:$4 sm:$0xff]  }
 0x750   : > { %v7338_v8 = vmul.f32 %v14956_v61, %v7294_v41  ;;  %10740 = vmatpush2.bf16.msra.mxu0 %v14194_v35  ;;  %v6911_v40 = vpop.f32.mrf.mxu1  ;;  %v17825_v48 = vpack.c.bf16 %v7337_v59, %v7337_v59  ;;  %v14212_v35 = vld [vmem:[%s19401_s9 + $0x8e0] ss:$16 sps:$4 sm:$0xff]   ;;  %v14220_v16 = vld [vmem:[%s19401_s9 + $0x8c4] ss:$16 sps:$4 sm:$0xff]   ;;  %v14968_v41 = vpop.eup %14967 }
 0x751   : > { %10741 = vmatprep.subr.bf16.mxu0 %v14199_v1  ;;  %v17883_v1 = vpack.c.bf16 %v7343_v32, %v7343_v32  ;;  %v14215_v59 = vld [vmem:[%s19401_s9 + $0x680] ss:$16 sps:$4 sm:$0xff]  }
 0x752   : > { %v6988_v39 = vpop.f32.mrf.mxu1  ;;  %10704 = vmatprep.mubr.bf16.mxu1 %v17825_v48  ;;  %v17874_v49 = vpack.c.bf16 %v7338_v8, %v7338_v8  ;;  %v14218_v61 = vld [vmem:[%s19401_s9 + $0x8c0] ss:$16 sps:$4 sm:$0xff]  }
 0x753   : > { %v7299_v10 = vrot.slane %v6988_v39, 7  ;;  %10705 = vmatmul.mubr.bf16.vlgmr.msra.gmra.mxu1 %v17835_v11 }
 0x754   : > { %10742 = vmatpush2.bf16.msra.mxu0 %v14197_v19  ;;  %10755 = vmatpush1.bf16.msra.mxu1 %v14200_v58  ;;  %v6990_v50 = vpop.f32.mrf.mxu1  ;;  %v14223_v19 = vld [vmem:[%s19401_s9 + $0x664] ss:$16 sps:$4 sm:$0xff]  }
 0x755   : > { %v7300_v7 = vsel %vm6210_vm2, %v7299_v10, %v17709_v43  ;;  %v7301_v21 = vrot.slane %v6990_v50, 7  ;;  %10743 = vmatprep.subr.bf16.mxu0 %v14205_v29  ;;  %10756 = vmatprep.subr.bf16.mxu1 %v14208_v26  ;;  %v14226_v58 = vld [vmem:[%s19401_s9 + $0x8a4] ss:$16 sps:$4 sm:$0xff]   ;;  %v14970_v26 = vpop.eup %14969  ;;  %v14224_v10 = vld [vmem:[%s19401_s9 + $0x8a0] ss:$16 sps:$4 sm:$0xff]  }
 0x756   : > { %v6992_v6 = vpop.f32.mrf.mxu1  ;;  %v7341_v12 = vmul.f32 %v14962_v37, %v7300_v7  ;;  %v14230_v37 = vld [vmem:[%s19401_s9 + $0x880] ss:$16 sps:$4 sm:$0xff]   ;;  %v14972_v7 = vpop.eup %14971 }
 0x757   : > { %v7302_v43 = vsel %vm6210_vm2, %v7301_v21, %v17715_v34  ;;  %v14217_v34 = vld [vmem:[%s19401_s9 + $0x684] ss:$16 sps:$4 sm:$0xff]  }
 0x758   : > { %v17864_v15 = vmul.f32 %v14966_v23, %v7302_v43  ;;  %10744 = vmatpush2.bf16.msra.mxu0 %v14203_v63  ;;  %10757 = vmatpush1.bf16.msra.mxu1 %v14206_v47  ;;  %v6993_v0 = vpop.f32.mrf.mxu1  ;;  %v17869_v57 = vpack.c.bf16 %v7341_v12, %v7341_v12  ;;  %v14227_v47 = vld [vmem:[%s19401_s9 + $0x640] ss:$16 sps:$4 sm:$0xff]   ;;  %v14974_v12 = vpop.eup %14973 }
 0x759   : > { %10758 = vmatprep.subr.bf16.mxu1 %v14211_v44  ;;  %10795 = vmatprep.subr.bf16.mxu0 %v14214_v9  ;;  %v14235_v9 = vld [vmem:[%s19401_s9 + $0x624] ss:$16 sps:$4 sm:$0xff]   ;;  %v14233_v43 = vld [vmem:[%s19401_s9 + $0x620] ss:$16 sps:$4 sm:$0xff]  }
 0x75a   : > { %v7070_v17 = vpop.f32.mrf.mxu1  ;;  %10786 = vmatprep.mubr.bf16.mxu1 %v17869_v57  ;;  %v14236_v0 = vld [vmem:[%s19401_s9 + $0x860] ss:$16 sps:$4 sm:$0xff]  }
 0x75b   : > { %v7307_v14 = vrot.slane %v7070_v17, 7  ;;  %10746 = vmatmul.mubr.bf16.vlgmr.msra.gmra.mxu0 %v17874_v49  ;;  %v14247_v17 = vld [vmem:[%s19401_s9 + $0x7e4] ss:$16 sps:$4 sm:$0xff]  }
 0x75c   : > { %10759 = vmatpush1.bf16.msra.mxu1 %v14209_v28  ;;  %10796 = vmatpush1.bf16.msra.mxu0 %v14212_v35  ;;  %v7072_v56 = vpop.f32.mrf.mxu1  ;;  %v14241_v28 = vld [vmem:[%s19401_s9 + $0x604] ss:$16 sps:$4 sm:$0xff]   ;;  %v14239_v35 = vld [vmem:[%s19401_s9 + $0x600] ss:$16 sps:$4 sm:$0xff]  }
 0x75d   : > { %v7308_v8 = vsel %vm6210_vm2, %v7307_v14, %v17759_v52  ;;  %10827 = vmatprep.mubr.bf16.mxu0 %v17883_v1  ;;  %v7309_v40 = vrot.slane %v7072_v56, 7  ;;  %10760 = vmatprep.subr.bf16.mxu1 %v14217_v34  ;;  %v14242_v34 = vld [vmem:[%s19401_s9 + $0x840] ss:$16 sps:$4 sm:$0xff]  }
 0x75e   : > { %v7074_v3 = vpop.f32.mrf.mxu1  ;;  %10797 = vmatprep.subr.bf16.mxu0 %v14220_v16  ;;  %v17901_v29 = vmul.f32 %v14968_v41, %v7308_v8  ;;  %v14250_v16 = vld [vmem:[%s19401_s9 + $0x824] ss:$16 sps:$4 sm:$0xff]   ;;  %v14245_v14 = vld [vmem:[%s19401_s9 + $0x7e0] ss:$16 sps:$4 sm:$0xff]  }
 0x75f   : > { %v7310_v52 = vsel %vm6210_vm2, %v7309_v40, %v17762_v60  ;;  %v14232_v60 = vld [vmem:[%s19401_s9 + $0x884] ss:$16 sps:$4 sm:$0xff]   ;;  %v14248_v56 = vld [vmem:[%s19401_s9 + $0x820] ss:$16 sps:$4 sm:$0xff]  }
 0x760   : > { %v17905_v51 = vmul.f32 %v14970_v26, %v7310_v52  ;;  %10761 = vmatpush1.bf16.msra.mxu1 %v14215_v59  ;;  %10798 = vmatpush1.bf16.msra.mxu0 %v14218_v61  ;;  %v7075_v39 = vpop.f32.mrf.mxu1  ;;  %v14253_v59 = vld [vmem:[%s19401_s9 + $0x7c4] ss:$16 sps:$4 sm:$0xff]   ;;  %v14251_v41 = vld [vmem:[%s19401_s9 + $0x7c0] ss:$16 sps:$4 sm:$0xff]  }
 0x761   : > { %10762 = vmatprep.subr.bf16.mxu1 %v14223_v19  ;;  %10799 = vmatprep.subr.bf16.mxu0 %v14226_v58  ;;  %v14256_v61 = vld [vmem:[%s19401_s9 + $0x804] ss:$16 sps:$4 sm:$0xff]   ;;  %v14254_v8 = vld [vmem:[%s19401_s9 + $0x800] ss:$16 sps:$4 sm:$0xff]  }
 0x762   : > { %v7152_v62 = vpop.f32.mrf.mxu1  ;;  %v14259_v40 = vld [vmem:[%s19401_s9 + $0x7a4] ss:$16 sps:$4 sm:$0xff]   ;;  %v14257_v58 = vld [vmem:[%s19401_s9 + $0x7a0] ss:$16 sps:$4 sm:$0xff]  }
 0x763   : > { %v7315_v50 = vrot.slane %v7152_v62, 7  ;;  %v14262_v19 = vld [vmem:[%s19401_s9 + $0x9e4] ss:$16 sps:$4 sm:$0xff]   ;;  %v14260_v3 = vld [vmem:[%s19401_s9 + $0x9e0] ss:$16 sps:$4 sm:$0xff]  }
 0x764   : > { %10763 = vmatpush1.bf16.msra.mxu1 %v14221_v22  ;;  %10800 = vmatpush1.bf16.msra.mxu0 %v14224_v10  ;;  %v7154_v63 = vpop.f32.mrf.mxu1  ;;  %v14265_v26 = vld [vmem:[%s19401_s9 + $0x784] ss:$16 sps:$4 sm:$0xff]   ;;  %v14263_v39 = vld [vmem:[%s19401_s9 + $0x780] ss:$16 sps:$4 sm:$0xff]  }
 0x765   : > { %v7316_v21 = vsel %vm6210_vm2, %v7315_v50, %v17799_v33  ;;  %v7317_v44 = vrot.slane %v7154_v63, 7  ;;  %10764 = vmatprep.subr.bf16.mxu1 %v14229_v20  ;;  %10801 = vmatprep.subr.bf16.mxu0 %v14232_v60  ;;  %v14268_v52 = vld [vmem:[%s19401_s9 + $0x9c4] ss:$16 sps:$4 sm:$0xff]   ;;  %v14266_v22 = vld [vmem:[%s19401_s9 + $0x9c0] ss:$16 sps:$4 sm:$0xff]  }
 0x766   : > { %v7156_v36 = vpop.f32.mrf.mxu1  ;;  %v17933_v6 = vmul.f32 %v14972_v7, %v7316_v21  ;;  %v14271_v10 = vld [vmem:[%s19401_s9 + $0x764] ss:$16 sps:$4 sm:$0xff]   ;;  %v14269_v60 = vld [vmem:[%s19401_s9 + $0x760] ss:$16 sps:$4 sm:$0xff]  }
 0x767   : > { %v7318_v23 = vsel %vm6210_vm2, %v7317_v44, %v17801_v55  ;;  %v14244_v55 = vld [vmem:[%s19401_s9 + $0x844] ss:$16 sps:$4 sm:$0xff]   ;;  %v14272_v62 = vld [vmem:[%s19401_s9 + $0x9a0] ss:$16 sps:$4 sm:$0xff]  }
 0x768   : > { %v17937_v32 = vmul.f32 %v14974_v12, %v7318_v23  ;;  %10765 = vmatpush1.bf16.msra.mxu1 %v14227_v47  ;;  %10802 = vmatpush1.bf16.msra.mxu0 %v14230_v37  ;;  %v7157_v33 = vpop.f32.mrf.mxu1  ;;  %v14274_v20 = vld [vmem:[%s19401_s9 + $0x9a4] ss:$16 sps:$4 sm:$0xff]   ;;  %v14275_v47 = vld [vmem:[%s19401_s9 + $0x740] ss:$16 sps:$4 sm:$0xff]  }
 0x769   : > { %10766 = vmatprep.subr.bf16.mxu1 %v14235_v9  ;;  %10803 = vmatprep.subr.bf16.mxu0 %v14238_v5  ;;  %v14277_v50 = vld [vmem:[%s19401_s9 + $0x744] ss:$16 sps:$4 sm:$0xff]   ;;  %v14278_v37 = vld [vmem:[%s19401_s9 + $0x980] ss:$16 sps:$4 sm:$0xff]  }
 0x76a   : > { %v14280_v63 = vld [vmem:[%s19401_s9 + $0x984] ss:$16 sps:$4 sm:$0xff]   ;;  %v14281_v44 = vld [vmem:[%s19401_s9 + $0x720] ss:$16 sps:$4 sm:$0xff]  }
 0x76b   : > { %v14283_v7 = vld [vmem:[%s19401_s9 + $0x724] ss:$16 sps:$4 sm:$0xff]   ;;  %v14284_v9 = vld [vmem:[%s19401_s9 + $0x960] ss:$16 sps:$4 sm:$0xff]  }
 0x76c   : > { %10767 = vmatpush1.bf16.msra.mxu1 %v14233_v43  ;;  %10804 = vmatpush1.bf16.msra.mxu0 %v14236_v0  ;;  %v14286_v21 = vld [vmem:[%s19401_s9 + $0x964] ss:$16 sps:$4 sm:$0xff]   ;;  %v14287_v12 = vld [vmem:[%s19401_s9 + $0x700] ss:$16 sps:$4 sm:$0xff]  }
 0x76d   : > { %10768 = vmatprep.subr.bf16.mxu1 %v14241_v28  ;;  %10805 = vmatprep.subr.bf16.mxu0 %v14244_v55  ;;  %v14289_v5 = vld [vmem:[%s19401_s9 + $0x704] ss:$16 sps:$4 sm:$0xff]   ;;  %v14290_v23 = vld [vmem:[%s19401_s9 + $0x940] ss:$16 sps:$4 sm:$0xff]   ;;  %v18067_v55 = vpack.c.bf16 %v17697_v27, %v17697_v27 }
 0x76e   : > { %v14292_v36 = vld [vmem:[%s19401_s9 + $0x944] ss:$16 sps:$4 sm:$0xff]   ;;  %v14293_v0 = vld [vmem:[%s19401_s9 + $0x920] ss:$16 sps:$4 sm:$0xff]  }
 0x76f   : > { %v14295_v33 = vld [vmem:[%s19401_s9 + $0x924] ss:$16 sps:$4 sm:$0xff]   ;;  %v14296_v28 = vld [vmem:[%s19401_s9 + $0xae0] ss:$16 sps:$4 sm:$0xff]  }
 0x770   : > { %10769 = vmatpush1.bf16.msra.mxu1 %v14239_v35  ;;  %10806 = vmatpush1.bf16.msra.mxu0 %v14242_v34  ;;  %v14298_v43 = vld [vmem:[%s19401_s9 + $0xae4] ss:$16 sps:$4 sm:$0xff]   ;;  %v14299_v27 = vld [vmem:[%s19401_s9 + $0x900] ss:$16 sps:$4 sm:$0xff]  }
 0x771   : > { %10770 = vmatprep.subr.bf16.mxu1 %v14247_v17  ;;  %10807 = vmatprep.subr.bf16.mxu0 %v14250_v16  ;;  %v14301_v35 = vld [vmem:[%s19401_s9 + $0x904] ss:$16 sps:$4 sm:$0xff]   ;;  %v18078_v17 = vpack.c.bf16 %v17901_v29, %v17901_v29  ;;  %v14302_v16 = vld [vmem:[%s19401_s9 + $0xac0] ss:$16 sps:$4 sm:$0xff]  }
 0x772   : > { %v14304_v34 = vld [vmem:[%s19401_s9 + $0xac4] ss:$16 sps:$4 sm:$0xff]  }
 0x773   : > { %v14310_v29 = vld [vmem:[%s19401_s9 + $0xce4] ss:$16 sps:$4 sm:$0xff]  }
 0x774   : > { %10771 = vmatpush2.bf16.msra.mxu1 %v14245_v14  ;;  %10808 = vmatpush1.bf16.msra.mxu0 %v14248_v56  ;;  %v14307_v14 = vld [vmem:[%s19401_s9 + $0xaa4] ss:$16 sps:$4 sm:$0xff]   ;;  %v14305_v56 = vld [vmem:[%s19401_s9 + $0xaa0] ss:$16 sps:$4 sm:$0xff]  }
 0x775   : > { %10772 = vmatprep.subr.bf16.mxu1 %v14253_v59  ;;  %10809 = vmatprep.subr.bf16.mxu0 %v14256_v61  ;;  %v14308_v59 = vld [vmem:[%s19401_s9 + $0xce0] ss:$16 sps:$4 sm:$0xff]   ;;  %v18101_v61 = vpack.c.bf16 %v17864_v15, %v17864_v15 }
 0x776   : > { %v14311_v15 = vld [vmem:[%s19401_s9 + $0xa80] ss:$16 sps:$4 sm:$0xff]  }
 0x778   : > { %10773 = vmatpush2.bf16.msra.mxu1 %v14251_v41  ;;  %10810 = vmatpush1.bf16.msra.mxu0 %v14254_v8  ;;  %v14313_v41 = vld [vmem:[%s19401_s9 + $0xa84] ss:$16 sps:$4 sm:$0xff]  }
 0x779   : > { %10774 = vmatprep.subr.bf16.mxu1 %v14259_v40  ;;  %10811 = vmatprep.subr.bf16.mxu0 %v14262_v19  ;;  %v14316_v8 = vld [vmem:[%s19401_s9 + $0xcc4] ss:$16 sps:$4 sm:$0xff]   ;;  %v18111_v40 = vpack.c.bf16 %v17780_v24, %v17780_v24  ;;  %v14314_v19 = vld [vmem:[%s19401_s9 + $0xcc0] ss:$16 sps:$4 sm:$0xff]  }
 0x77a   : > { %v14319_v24 = vld [vmem:[%s19401_s9 + $0xa64] ss:$16 sps:$4 sm:$0xff]  }
 0x77c   : > { %10775 = vmatpush2.bf16.msra.mxu1 %v14257_v58  ;;  %10812 = vmatpush2.bf16.msra.mxu0 %v14260_v3  ;;  %v14322_v58 = vld [vmem:[%s19401_s9 + $0xca4] ss:$16 sps:$4 sm:$0xff]   ;;  %v14317_v3 = vld [vmem:[%s19401_s9 + $0xa60] ss:$16 sps:$4 sm:$0xff]  }
 0x77d   : > { %10776 = vmatprep.subr.bf16.mxu1 %v14265_v26  ;;  %10813 = vmatprep.subr.bf16.mxu0 %v14268_v52  ;;  %v14320_v26 = vld [vmem:[%s19401_s9 + $0xca0] ss:$16 sps:$4 sm:$0xff]   ;;  %v14325_v52 = vld [vmem:[%s19401_s9 + $0xa44] ss:$16 sps:$4 sm:$0xff]  }
 0x780   : > { %10777 = vmatpush2.bf16.msra.mxu1 %v14263_v39  ;;  %10814 = vmatpush2.bf16.msra.mxu0 %v14266_v22  ;;  %v14328_v39 = vld [vmem:[%s19401_s9 + $0xc84] ss:$16 sps:$4 sm:$0xff]   ;;  %v14323_v22 = vld [vmem:[%s19401_s9 + $0xa40] ss:$16 sps:$4 sm:$0xff]  }
 0x781   : > { %10778 = vmatprep.subr.bf16.mxu1 %v14271_v10  ;;  %10815 = vmatprep.subr.bf16.mxu0 %v14274_v20  ;;  %v14326_v10 = vld [vmem:[%s19401_s9 + $0xc80] ss:$16 sps:$4 sm:$0xff]   ;;  %v14331_v20 = vld [vmem:[%s19401_s9 + $0xa24] ss:$16 sps:$4 sm:$0xff]  }
 0x784   : > { %10779 = vmatpush2.bf16.msra.mxu1 %v14269_v60  ;;  %10816 = vmatpush2.bf16.msra.mxu0 %v14272_v62  ;;  %v14334_v60 = vld [vmem:[%s19401_s9 + $0xc64] ss:$16 sps:$4 sm:$0xff]   ;;  %v14329_v62 = vld [vmem:[%s19401_s9 + $0xa20] ss:$16 sps:$4 sm:$0xff]  }
 0x785   : > { %10780 = vmatprep.subr.bf16.mxu1 %v14277_v50  ;;  %10817 = vmatprep.subr.bf16.mxu0 %v14280_v63  ;;  %v14332_v50 = vld [vmem:[%s19401_s9 + $0xc60] ss:$16 sps:$4 sm:$0xff]   ;;  %v14337_v63 = vld [vmem:[%s19401_s9 + $0xa04] ss:$16 sps:$4 sm:$0xff]  }
 0x788   : > { %10781 = vmatpush2.bf16.msra.mxu1 %v14275_v47  ;;  %10818 = vmatpush2.bf16.msra.mxu0 %v14278_v37  ;;  %v14340_v47 = vld [vmem:[%s19401_s9 + $0xc44] ss:$16 sps:$4 sm:$0xff]   ;;  %v14335_v37 = vld [vmem:[%s19401_s9 + $0xa00] ss:$16 sps:$4 sm:$0xff]  }
 0x789   : > { %10782 = vmatprep.subr.bf16.mxu1 %v14283_v7  ;;  %10819 = vmatprep.subr.bf16.mxu0 %v14286_v21  ;;  %v14338_v7 = vld [vmem:[%s19401_s9 + $0xc40] ss:$16 sps:$4 sm:$0xff]   ;;  %v14343_v21 = vld [vmem:[%s19401_s9 + $0xbe4] ss:$16 sps:$4 sm:$0xff]  }
 0x78c   : > { %10783 = vmatpush2.bf16.msra.mxu1 %v14281_v44  ;;  %10820 = vmatpush2.bf16.msra.mxu0 %v14284_v9  ;;  %v14346_v44 = vld [vmem:[%s19401_s9 + $0xc24] ss:$16 sps:$4 sm:$0xff]   ;;  %v14341_v9 = vld [vmem:[%s19401_s9 + $0xbe0] ss:$16 sps:$4 sm:$0xff]  }
 0x78d   : > { %10784 = vmatprep.subr.bf16.mxu1 %v14289_v5  ;;  %10821 = vmatprep.subr.bf16.mxu0 %v14292_v36  ;;  %v14344_v5 = vld [vmem:[%s19401_s9 + $0xc20] ss:$16 sps:$4 sm:$0xff]   ;;  %v14349_v36 = vld [vmem:[%s19401_s9 + $0xbc4] ss:$16 sps:$4 sm:$0xff]  }
 0x790   : > { %10785 = vmatpush2.bf16.msra.mxu1 %v14287_v12  ;;  %10822 = vmatpush2.bf16.msra.mxu0 %v14290_v23  ;;  %v14352_v12 = vld [vmem:[%s19401_s9 + $0xc04] ss:$16 sps:$4 sm:$0xff]   ;;  %v14347_v23 = vld [vmem:[%s19401_s9 + $0xbc0] ss:$16 sps:$4 sm:$0xff]  }
 0x791   : > { %10823 = vmatprep.subr.bf16.mxu0 %v14295_v33  ;;  %10836 = vmatprep.subr.bf16.mxu1 %v14298_v43  ;;  %v14350_v33 = vld [vmem:[%s19401_s9 + $0xc00] ss:$16 sps:$4 sm:$0xff]   ;;  %v14355_v43 = vld [vmem:[%s19401_s9 + $0xba4] ss:$16 sps:$4 sm:$0xff]  }
 0x793   : > { %10787 = vmatmul.mubr.bf16.vlgmr.msra.gmra.mxu1 %v18067_v55 }
 0x794   : > { %10824 = vmatpush2.bf16.msra.mxu0 %v14293_v0  ;;  %10837 = vmatpush1.bf16.msra.mxu1 %v14296_v28  ;;  %v14358_v0 = vld [vmem:[%s19401_s9 + $0xde4] ss:$16 sps:$4 sm:$0xff]   ;;  %v14353_v28 = vld [vmem:[%s19401_s9 + $0xba0] ss:$16 sps:$4 sm:$0xff]  }
 0x795   : > { %10868 = vmatprep.mubr.bf16.mxu1 %v18078_v17  ;;  %10825 = vmatprep.subr.bf16.mxu0 %v14301_v35  ;;  %v14356_v35 = vld [vmem:[%s19401_s9 + $0xde0] ss:$16 sps:$4 sm:$0xff]  }
 0x796   : > { %10838 = vmatprep.subr.bf16.mxu1 %v14304_v34  ;;  %v14361_v34 = vld [vmem:[%s19401_s9 + $0xb84] ss:$16 sps:$4 sm:$0xff]  }
 0x798   : > { %10826 = vmatpush2.bf16.msra.mxu0 %v14299_v27  ;;  %10839 = vmatpush1.bf16.msra.mxu1 %v14302_v16  ;;  %v14364_v27 = vld [vmem:[%s19401_s9 + $0xdc4] ss:$16 sps:$4 sm:$0xff]   ;;  %v14359_v16 = vld [vmem:[%s19401_s9 + $0xb80] ss:$16 sps:$4 sm:$0xff]  }
 0x799   : > { %10840 = vmatprep.subr.bf16.mxu1 %v14307_v14  ;;  %10877 = vmatprep.subr.bf16.mxu0 %v14310_v29  ;;  %v14362_v14 = vld [vmem:[%s19401_s9 + $0xdc0] ss:$16 sps:$4 sm:$0xff]   ;;  %v14367_v29 = vld [vmem:[%s19401_s9 + $0xb64] ss:$16 sps:$4 sm:$0xff]  }
 0x79b   : > { %10828 = vmatmul.mubr.bf16.vlgmr.msra.gmra.mxu0 %v18101_v61 }
 0x79c   : > { %10841 = vmatpush1.bf16.msra.mxu1 %v14305_v56  ;;  %10878 = vmatpush1.bf16.msra.mxu0 %v14308_v59  ;;  %v14370_v56 = vld [vmem:[%s19401_s9 + $0xda4] ss:$16 sps:$4 sm:$0xff]   ;;  %v14365_v59 = vld [vmem:[%s19401_s9 + $0xb60] ss:$16 sps:$4 sm:$0xff]  }
 0x79d   : > { %10909 = vmatprep.mubr.bf16.mxu0 %v18111_v40  ;;  %10842 = vmatprep.subr.bf16.mxu1 %v14313_v41  ;;  %v14368_v41 = vld [vmem:[%s19401_s9 + $0xda0] ss:$16 sps:$4 sm:$0xff]  }
 0x79e   : > { %10879 = vmatprep.subr.bf16.mxu0 %v14316_v8  ;;  %v14373_v8 = vld [vmem:[%s19401_s9 + $0xb44] ss:$16 sps:$4 sm:$0xff]  }
 0x7a0   : > { %10843 = vmatpush1.bf16.msra.mxu1 %v14311_v15  ;;  %10880 = vmatpush1.bf16.msra.mxu0 %v14314_v19  ;;  %v14376_v15 = vld [vmem:[%s19401_s9 + $0xd84] ss:$16 sps:$4 sm:$0xff]   ;;  %v14371_v19 = vld [vmem:[%s19401_s9 + $0xb40] ss:$16 sps:$4 sm:$0xff]  }
 0x7a1   : > { %10844 = vmatprep.subr.bf16.mxu1 %v14319_v24  ;;  %10881 = vmatprep.subr.bf16.mxu0 %v14322_v58  ;;  %v14374_v24 = vld [vmem:[%s19401_s9 + $0xd80] ss:$16 sps:$4 sm:$0xff]   ;;  %v14379_v58 = vld [vmem:[%s19401_s9 + $0xb24] ss:$16 sps:$4 sm:$0xff]  }
 0x7a4   : > { %10845 = vmatpush1.bf16.msra.mxu1 %v14317_v3  ;;  %10882 = vmatpush1.bf16.msra.mxu0 %v14320_v26  ;;  %v14382_v3 = vld [vmem:[%s19401_s9 + $0xd64] ss:$16 sps:$4 sm:$0xff]   ;;  %v14377_v26 = vld [vmem:[%s19401_s9 + $0xb20] ss:$16 sps:$4 sm:$0xff]  }
 0x7a5   : > { %10846 = vmatprep.subr.bf16.mxu1 %v14325_v52  ;;  %10883 = vmatprep.subr.bf16.mxu0 %v14328_v39  ;;  %v14380_v52 = vld [vmem:[%s19401_s9 + $0xd60] ss:$16 sps:$4 sm:$0xff]   ;;  %v14385_v39 = vld [vmem:[%s19401_s9 + $0xb04] ss:$16 sps:$4 sm:$0xff]  }
 0x7a8   : > { %10847 = vmatpush1.bf16.msra.mxu1 %v14323_v22  ;;  %10884 = vmatpush1.bf16.msra.mxu0 %v14326_v10  ;;  %v14388_v22 = vld [vmem:[%s19401_s9 + $0xd44] ss:$16 sps:$4 sm:$0xff]   ;;  %v14383_v10 = vld [vmem:[%s19401_s9 + $0xb00] ss:$16 sps:$4 sm:$0xff]  }
 0x7a9   : > { %10848 = vmatprep.subr.bf16.mxu1 %v14331_v20  ;;  %10885 = vmatprep.subr.bf16.mxu0 %v14334_v60  ;;  %v14386_v20 = vld [vmem:[%s19401_s9 + $0xd40] ss:$16 sps:$4 sm:$0xff]   ;;  %v14391_v60 = vld [vmem:[%s19401_s9 + $0xd24] ss:$16 sps:$4 sm:$0xff]  }
 0x7ac   : > { %10849 = vmatpush1.bf16.msra.mxu1 %v14329_v62  ;;  %10886 = vmatpush1.bf16.msra.mxu0 %v14332_v50  ;;  %v14394_v62 = vld [vmem:[%s19401_s9 + $0xee4] ss:$16 sps:$4 sm:$0xff]   ;;  %v14389_v50 = vld [vmem:[%s19401_s9 + $0xd20] ss:$16 sps:$4 sm:$0xff]  }
 0x7ad   : > { %10850 = vmatprep.subr.bf16.mxu1 %v14337_v63  ;;  %10887 = vmatprep.subr.bf16.mxu0 %v14340_v47  ;;  %v14392_v63 = vld [vmem:[%s19401_s9 + $0xee0] ss:$16 sps:$4 sm:$0xff]   ;;  %v18279_v47 = vpack.c.bf16 %v17749_v13, %v17749_v13 }
 0x7ae   : > { %v14395_v13 = vld [vmem:[%s19401_s9 + $0xd00] ss:$16 sps:$4 sm:$0xff]  }
 0x7b0   : > { %10851 = vmatpush1.bf16.msra.mxu1 %v14335_v37  ;;  %10888 = vmatpush1.bf16.msra.mxu0 %v14338_v7  ;;  %v14397_v37 = vld [vmem:[%s19401_s9 + $0xd04] ss:$16 sps:$4 sm:$0xff]  }
 0x7b1   : > { %10852 = vmatprep.subr.bf16.mxu1 %v14343_v21  ;;  %10889 = vmatprep.subr.bf16.mxu0 %v14346_v44  ;;  %v14400_v7 = vld [vmem:[%s19401_s9 + $0xec4] ss:$16 sps:$4 sm:$0xff]   ;;  %v18290_v21 = vpack.c.bf16 %v17933_v6, %v17933_v6  ;;  %v14398_v44 = vld [vmem:[%s19401_s9 + $0xec0] ss:$16 sps:$4 sm:$0xff]  }
 0x7b2   : > { %v14406_v6 = vld [vmem:[%s19401_s9 + $0x10e4] ss:$16 sps:$4 sm:$0xff]  }
 0x7b4   : > { %10853 = vmatpush2.bf16.msra.mxu1 %v14341_v9  ;;  %10890 = vmatpush1.bf16.msra.mxu0 %v14344_v5  ;;  %v14403_v9 = vld [vmem:[%s19401_s9 + $0xea4] ss:$16 sps:$4 sm:$0xff]   ;;  %v14401_v5 = vld [vmem:[%s19401_s9 + $0xea0] ss:$16 sps:$4 sm:$0xff]  }
 0x7b5   : > { %10854 = vmatprep.subr.bf16.mxu1 %v14349_v36  ;;  %10891 = vmatprep.subr.bf16.mxu0 %v14352_v12  ;;  %v14404_v36 = vld [vmem:[%s19401_s9 + $0x10e0] ss:$16 sps:$4 sm:$0xff]   ;;  %v18313_v12 = vpack.c.bf16 %v17905_v51, %v17905_v51 }
 0x7b6   : > { %v14407_v51 = vld [vmem:[%s19401_s9 + $0xe80] ss:$16 sps:$4 sm:$0xff]  }
 0x7b8   : > { %10855 = vmatpush2.bf16.msra.mxu1 %v14347_v23  ;;  %10892 = vmatpush1.bf16.msra.mxu0 %v14350_v33  ;;  %v14409_v23 = vld [vmem:[%s19401_s9 + $0xe84] ss:$16 sps:$4 sm:$0xff]  }
 0x7b9   : > { %10856 = vmatprep.subr.bf16.mxu1 %v14355_v43  ;;  %10893 = vmatprep.subr.bf16.mxu0 %v14358_v0  ;;  %v14412_v33 = vld [vmem:[%s19401_s9 + $0x10c4] ss:$16 sps:$4 sm:$0xff]  }
 0x7bc   : > { %10857 = vmatpush2.bf16.msra.mxu1 %v14353_v28  ;;  %10894 = vmatpush2.bf16.msra.mxu0 %v14356_v35  ;;  %v14410_v28 = vld [vmem:[%s19401_s9 + $0x10c0] ss:$16 sps:$4 sm:$0xff]  }
 0x7bd   : > { %10858 = vmatprep.subr.bf16.mxu1 %v14361_v34  ;;  %10895 = vmatprep.subr.bf16.mxu0 %v14364_v27  ;;  %v14415_v34 = vld [vmem:[%s19401_s9 + $0xe64] ss:$16 sps:$4 sm:$0xff]  }
 0x7c0   : > { %10859 = vmatpush2.bf16.msra.mxu1 %v14359_v16  ;;  %10896 = vmatpush2.bf16.msra.mxu0 %v14362_v14  ;;  %v14413_v14 = vld [vmem:[%s19401_s9 + $0xe60] ss:$16 sps:$4 sm:$0xff]  }
 0x7c1   : > { %10860 = vmatprep.subr.bf16.mxu1 %v14367_v29  ;;  %10897 = vmatprep.subr.bf16.mxu0 %v14370_v56  ;;  %v14416_v29 = vld [vmem:[%s19401_s9 + $0x10a0] ss:$16 sps:$4 sm:$0xff]   ;;  %v14424_v56 = vld [vmem:[%s19401_s9 + $0x1084] ss:$16 sps:$4 sm:$0xff]  }
 0x7c4   : > { %10861 = vmatpush2.bf16.msra.mxu1 %v14365_v59  ;;  %10898 = vmatpush2.bf16.msra.mxu0 %v14368_v41  ;;  %v14419_v41 = vld [vmem:[%s19401_s9 + $0xe40] ss:$16 sps:$4 sm:$0xff]  }
 0x7c5   : > { %10862 = vmatprep.subr.bf16.mxu1 %v14373_v8  ;;  %10899 = vmatprep.subr.bf16.mxu0 %v14376_v15  ;;  %v14422_v8 = vld [vmem:[%s19401_s9 + $0x1080] ss:$16 sps:$4 sm:$0xff]   ;;  %v14427_v15 = vld [vmem:[%s19401_s9 + $0xe24] ss:$16 sps:$4 sm:$0xff]  }
 0x7c8   : > { %10863 = vmatpush2.bf16.msra.mxu1 %v14371_v19  ;;  %10900 = vmatpush2.bf16.msra.mxu0 %v14374_v24  ;;  %v14430_v19 = vld [vmem:[%s19401_s9 + $0x1064] ss:$16 sps:$4 sm:$0xff]   ;;  %v14425_v24 = vld [vmem:[%s19401_s9 + $0xe20] ss:$16 sps:$4 sm:$0xff]  }
 0x7c9   : > { %10864 = vmatprep.subr.bf16.mxu1 %v14379_v58  ;;  %10901 = vmatprep.subr.bf16.mxu0 %v14382_v3  ;;  %v14428_v58 = vld [vmem:[%s19401_s9 + $0x1060] ss:$16 sps:$4 sm:$0xff]   ;;  %v14433_v3 = vld [vmem:[%s19401_s9 + $0xe04] ss:$16 sps:$4 sm:$0xff]  }
 0x7cc   : > { %10865 = vmatpush2.bf16.msra.mxu1 %v14377_v26  ;;  %10902 = vmatpush2.bf16.msra.mxu0 %v14380_v52  ;;  %v14436_v26 = vld [vmem:[%s19401_s9 + $0x1044] ss:$16 sps:$4 sm:$0xff]   ;;  %v14431_v52 = vld [vmem:[%s19401_s9 + $0xe00] ss:$16 sps:$4 sm:$0xff]  }
 0x7cd   : > { %10866 = vmatprep.subr.bf16.mxu1 %v14385_v39  ;;  %10903 = vmatprep.subr.bf16.mxu0 %v14388_v22  ;;  %v14434_v39 = vld [vmem:[%s19401_s9 + $0x1040] ss:$16 sps:$4 sm:$0xff]   ;;  %v14439_v22 = vld [vmem:[%s19401_s9 + $0xfe4] ss:$16 sps:$4 sm:$0xff]  }
 0x7d0   : > { %10867 = vmatpush2.bf16.msra.mxu1 %v14383_v10  ;;  %10904 = vmatpush2.bf16.msra.mxu0 %v14386_v20  ;;  %v14442_v10 = vld [vmem:[%s19401_s9 + $0x1024] ss:$16 sps:$4 sm:$0xff]   ;;  %v14437_v20 = vld [vmem:[%s19401_s9 + $0xfe0] ss:$16 sps:$4 sm:$0xff]  }
 0x7d1   : > { %10905 = vmatprep.subr.bf16.mxu0 %v14391_v60  ;;  %10918 = vmatprep.subr.bf16.mxu1 %v14394_v62  ;;  %v14440_v60 = vld [vmem:[%s19401_s9 + $0x1020] ss:$16 sps:$4 sm:$0xff]   ;;  %v14445_v62 = vld [vmem:[%s19401_s9 + $0xfc4] ss:$16 sps:$4 sm:$0xff]  }
 0x7d3   : > { %10869 = vmatmul.mubr.bf16.vlgmr.msra.gmra.mxu1 %v18279_v47 }
 0x7d4   : > { %10906 = vmatpush2.bf16.msra.mxu0 %v14389_v50  ;;  %10919 = vmatpush1.bf16.msra.mxu1 %v14392_v63  ;;  %v14448_v50 = vld [vmem:[%s19401_s9 + $0x1004] ss:$16 sps:$4 sm:$0xff]   ;;  %v14443_v63 = vld [vmem:[%s19401_s9 + $0xfc0] ss:$16 sps:$4 sm:$0xff]  }
 0x7d5   : > { %10950 = vmatprep.mubr.bf16.mxu1 %v18290_v21  ;;  %10907 = vmatprep.subr.bf16.mxu0 %v14397_v37  ;;  %v14446_v37 = vld [vmem:[%s19401_s9 + $0x1000] ss:$16 sps:$4 sm:$0xff]  }
 0x7d6   : > { %10920 = vmatprep.subr.bf16.mxu1 %v14400_v7  ;;  %v14451_v7 = vld [vmem:[%s19401_s9 + $0xfa4] ss:$16 sps:$4 sm:$0xff]  }
 0x7d8   : > { %10908 = vmatpush2.bf16.msra.mxu0 %v14395_v13  ;;  %10921 = vmatpush1.bf16.msra.mxu1 %v14398_v44  ;;  %v14454_v13 = vld [vmem:[%s19401_s9 + $0x2ec] ss:$16 sps:$4 sm:$0xff]   ;;  %v14449_v44 = vld [vmem:[%s19401_s9 + $0xfa0] ss:$16 sps:$4 sm:$0xff]  }
 0x7d9   : > { %10922 = vmatprep.subr.bf16.mxu1 %v14403_v9  ;;  %10959 = vmatprep.subr.bf16.mxu0 %v14406_v6  ;;  %v14452_v9 = vld [vmem:[%s19401_s9 + $0x2e8] ss:$16 sps:$4 sm:$0xff]   ;;  %v18421_v6 = vpack.c.bf16 %v17937_v32, %v17937_v32 }
 0x7da   : > { %v14458_v32 = vld [vmem:[%s19401_s9 + $0x2c8] ss:$16 sps:$4 sm:$0xff]  }
 0x7db   : > { %10910 = vmatmul.mubr.bf16.vlgmr.msra.gmra.mxu0 %v18313_v12  ;;  %v10665_v43 = vpop.f32.mrf.mxu0 }
 0x7dc   : > { %v18323_v0 = vadd.f32 %v10665_v43, %v17406_v45  ;;  %10923 = vmatpush1.bf16.msra.mxu1 %v14401_v5  ;;  %10960 = vmatpush1.bf16.msra.mxu0 %v14404_v36  ;;  %v14418_v45 = vld [vmem:[%s19401_s9 + $0x10a4] ss:$16 sps:$4 sm:$0xff]   ;;  %v14460_v36 = vld [vmem:[%s19401_s9 + $0x2cc] ss:$16 sps:$4 sm:$0xff]  }
 0x7dd   : > { %v10667_v35 = vpop.f32.mrf.mxu0  ;;  %10924 = vmatprep.subr.bf16.mxu1 %v14409_v23  ;;  %10961 = vmatprep.subr.bf16.mxu0 %v14412_v33  ;;  %v14457_v5 = vld [vmem:[%s19401_s9 + $0xf84] ss:$16 sps:$4 sm:$0xff]   ;;  %v14455_v23 = vld [vmem:[%s19401_s9 + $0xf80] ss:$16 sps:$4 sm:$0xff]   ;;  %v14466_v43 = vld [vmem:[%s19401_s9 + $0x2ac] ss:$16 sps:$4 sm:$0xff]  }
 0x7de   : > { %v18338_v27 = vadd.f32 %v10667_v35, %v17458_v42  ;;  %10991 = vmatprep.mubr.bf16.mxu0 %v15017_v30  ;;  %v14421_v42 = vld [vmem:[%s19401_s9 + $0xe44] ss:$16 sps:$4 sm:$0xff]   ;;  %v14472_v35 = vld [vmem:[%s19401_s9 + $0x28c] ss:$16 sps:$4 sm:$0xff]  }
 0x7df   : > { %v10669_v16 = vpop.f32.mrf.mxu0  ;;  %v14463_v33 = vld [vmem:[%s19401_s9 + $0xf64] ss:$16 sps:$4 sm:$0xff]  }
 0x7e0   : > { %10925 = vmatpush1.bf16.msra.mxu1 %v14407_v51  ;;  %10962 = vmatpush1.bf16.msra.mxu0 %v14410_v28  ;;  %v14461_v51 = vld [vmem:[%s19401_s9 + $0xf60] ss:$16 sps:$4 sm:$0xff]   ;;  %v14469_v28 = vld [vmem:[%s19401_s9 + $0xf44] ss:$16 sps:$4 sm:$0xff]  }
 0x7e1   : > { %10926 = vmatprep.subr.bf16.mxu1 %v14415_v34  ;;  %10963 = vmatprep.subr.bf16.mxu0 %v14418_v45  ;;  %v10670_v59 = vpop.f32.mrf.mxu0  ;;  %v14467_v34 = vld [vmem:[%s19401_s9 + $0xf40] ss:$16 sps:$4 sm:$0xff]   ;;  %v14470_v45 = vld [vmem:[%s19401_s9 + $0x288] ss:$16 sps:$4 sm:$0xff]   ;;  %v14475_v16 = vld [vmem:[%s19401_s9 + $0xf24] ss:$16 sps:$4 sm:$0xff]  }
 0x7e2   : > { %v14484_v59 = vld [vmem:[%s19401_s9 + $0x24c] ss:$16 sps:$4 sm:$0xff]  }
 0x7e4   : > { %10927 = vmatpush1.bf16.msra.mxu1 %v14413_v14  ;;  %10964 = vmatpush1.bf16.msra.mxu0 %v14416_v29  ;;  %v14478_v14 = vld [vmem:[%s19401_s9 + $0x26c] ss:$16 sps:$4 sm:$0xff]   ;;  %v14473_v29 = vld [vmem:[%s19401_s9 + $0xf20] ss:$16 sps:$4 sm:$0xff]  }
 0x7e5   : > { %10928 = vmatprep.subr.bf16.mxu1 %v14421_v42  ;;  %10965 = vmatprep.subr.bf16.mxu0 %v14424_v56  ;;  %v14476_v42 = vld [vmem:[%s19401_s9 + $0x268] ss:$16 sps:$4 sm:$0xff]   ;;  %v14481_v56 = vld [vmem:[%s19401_s9 + $0xf04] ss:$16 sps:$4 sm:$0xff]  }
 0x7e8   : > { %10929 = vmatpush1.bf16.msra.mxu1 %v14419_v41  ;;  %10966 = vmatpush1.bf16.msra.mxu0 %v14422_v8  ;;  %v14479_v41 = vld [vmem:[%s19401_s9 + $0xf00] ss:$16 sps:$4 sm:$0xff]   ;;  %v14482_v8 = vld [vmem:[%s19401_s9 + $0x248] ss:$16 sps:$4 sm:$0xff]  }
 0x7e9   : > { %10930 = vmatprep.subr.bf16.mxu1 %v14427_v15  ;;  %10967 = vmatprep.subr.bf16.mxu0 %v14430_v19  ;;  %v14487_v15 = vld [vmem:[%s19401_s9 + $0xec] ss:$16 sps:$4 sm:$0xff]  }
 0x7ea   : > { %v14490_v19 = vld [vmem:[%s19401_s9 + $0x22c] ss:$16 sps:$4 sm:$0xff]  }
 0x7ec   : > { %10931 = vmatpush1.bf16.msra.mxu1 %v14425_v24  ;;  %10968 = vmatpush1.bf16.msra.mxu0 %v14428_v58  ;;  %v14485_v24 = vld [vmem:[%s19401_s9 + $0xe8] ss:$16 sps:$4 sm:$0xff]   ;;  %v18496_v58 = vpack.c.bf16 %v17790_v53, %v17790_v53 }
 0x7ed   : > { %10932 = vmatprep.subr.bf16.mxu1 %v14433_v3  ;;  %10969 = vmatprep.subr.bf16.mxu0 %v14436_v26  ;;  %v14488_v3 = vld [vmem:[%s19401_s9 + $0x228] ss:$16 sps:$4 sm:$0xff]   ;;  %v14493_v26 = vld [vmem:[%s19401_s9 + $0xcc] ss:$16 sps:$4 sm:$0xff]  }
 0x7f0   : > { %10933 = vmatpush1.bf16.msra.mxu1 %v14431_v52  ;;  %10970 = vmatpush1.bf16.msra.mxu0 %v14434_v39  ;;  %v14496_v52 = vld [vmem:[%s19401_s9 + $0x20c] ss:$16 sps:$4 sm:$0xff]  }
 0x7f1   : > { %10934 = vmatprep.subr.bf16.mxu1 %v14439_v22  ;;  %10971 = vmatprep.subr.bf16.mxu0 %v14442_v10  ;;  %v14491_v22 = vld [vmem:[%s19401_s9 + $0xc8] ss:$16 sps:$4 sm:$0xff]  }
 0x7f4   : > { %10935 = vmatpush2.bf16.msra.mxu1 %v14437_v20  ;;  %10972 = vmatpush1.bf16.msra.mxu0 %v14440_v60  ;;  %v14494_v20 = vld [vmem:[%s19401_s9 + $0x208] ss:$16 sps:$4 sm:$0xff]   ;;  %v14499_v60 = vld [vmem:[%s19401_s9 + $0xac] ss:$16 sps:$4 sm:$0xff]  }
 0x7f5   : > { %10936 = vmatprep.subr.bf16.mxu1 %v14445_v62  ;;  %10973 = vmatprep.subr.bf16.mxu0 %v14448_v50  ;;  %v14497_v50 = vld [vmem:[%s19401_s9 + $0xa8] ss:$16 sps:$4 sm:$0xff]  }
 0x7f8   : > { %10937 = vmatpush2.bf16.msra.mxu1 %v14443_v63  ;;  %10974 = vmatpush1.bf16.msra.mxu0 %v14446_v37  ;;  %v14500_v37 = vld [vmem:[%s19401_s9 + $0x3e8] ss:$16 sps:$4 sm:$0xff]  }
 0x7f9   : > { %10938 = vmatprep.subr.bf16.mxu1 %v14451_v7  ;;  %11041 = vmatprep.subr.bf16.mxu0 %v14454_v13  ;;  %v14508_v7 = vld [vmem:[%s19401_s9 + $0x3cc] ss:$16 sps:$4 sm:$0xff]  }
 0x7fb   : > { %10992 = vmatmul.mubr.bf16.vlgmr.msra.gmra.mxu0 %v18421_v6 }
 0x7fc   : > { %10939 = vmatpush2.bf16.msra.mxu1 %v14449_v44  ;;  %11042 = vmatpush1.bf16.msra.mxu0 %v14452_v9  ;;  %v14503_v9 = vld [vmem:[%s19401_s9 + $0x88] ss:$16 sps:$4 sm:$0xff]  }
 0x7fd   : > { %11073 = vmatprep.mubr.bf16.mxu0 %v17825_v48  ;;  %10940 = vmatprep.subr.bf16.mxu1 %v14457_v5  ;;  %v14464_v48 = vld [vmem:[%s19401_s9 + $0x2a8] ss:$16 sps:$4 sm:$0xff]  }
 0x7fe   : > { %11043 = vmatprep.subr.bf16.mxu0 %v14460_v36  ;;  %v14506_v36 = vld [vmem:[%s19401_s9 + $0x3c8] ss:$16 sps:$4 sm:$0xff]  }
 0x800   : > { %10941 = vmatpush2.bf16.msra.mxu1 %v14455_v23  ;;  %11044 = vmatpush1.bf16.msra.mxu0 %v14458_v32  ;;  %v14511_v23 = vld [vmem:[%s19401_s9 + $0x6c] ss:$16 sps:$4 sm:$0xff]  }
 0x801   : > { %10942 = vmatprep.subr.bf16.mxu1 %v14463_v33  ;;  %11045 = vmatprep.subr.bf16.mxu0 %v14466_v43  ;;  %v14514_v33 = vld [vmem:[%s19401_s9 + $0x3ac] ss:$16 sps:$4 sm:$0xff]  }
 0x804   : > { %10943 = vmatpush2.bf16.msra.mxu1 %v14461_v51  ;;  %11046 = vmatpush1.bf16.msra.mxu0 %v14464_v48  ;;  %v14509_v51 = vld [vmem:[%s19401_s9 + $0x68] ss:$16 sps:$4 sm:$0xff]  }
 0x805   : > { %10944 = vmatprep.subr.bf16.mxu1 %v14469_v28  ;;  %11047 = vmatprep.subr.bf16.mxu0 %v14472_v35  ;;  %v14512_v28 = vld [vmem:[%s19401_s9 + $0x3a8] ss:$16 sps:$4 sm:$0xff]   ;;  %v14517_v35 = vld [vmem:[%s19401_s9 + $0x4c] ss:$16 sps:$4 sm:$0xff]  }
 0x808   : > { %10945 = vmatpush2.bf16.msra.mxu1 %v14467_v34  ;;  %11048 = vmatpush1.bf16.msra.mxu0 %v14470_v45  ;;  %v14520_v34 = vld [vmem:[%s19401_s9 + $0x38c] ss:$16 sps:$4 sm:$0xff]   ;;  %v14515_v45 = vld [vmem:[%s19401_s9 + $0x48] ss:$16 sps:$4 sm:$0xff]  }
 0x809   : > { %10946 = vmatprep.subr.bf16.mxu1 %v14475_v16  ;;  %11049 = vmatprep.subr.bf16.mxu0 %v14478_v14  ;;  %v14518_v16 = vld [vmem:[%s19401_s9 + $0x388] ss:$16 sps:$4 sm:$0xff]   ;;  %v14523_v14 = vld [vmem:[%s19401_s9 + $0x2c] ss:$16 sps:$4 sm:$0xff]  }
 0x80c   : > { %10947 = vmatpush2.bf16.msra.mxu1 %v14473_v29  ;;  %11050 = vmatpush1.bf16.msra.mxu0 %v14476_v42  ;;  %v14526_v29 = vld [vmem:[%s19401_s9 + $0x36c] ss:$16 sps:$4 sm:$0xff]   ;;  %v14521_v42 = vld [vmem:[%s19401_s9 + $0x28] ss:$16 sps:$4 sm:$0xff]  }
 0x80d   : > { %10948 = vmatprep.subr.bf16.mxu1 %v14481_v56  ;;  %11051 = vmatprep.subr.bf16.mxu0 %v14484_v59  ;;  %v14524_v56 = vld [vmem:[%s19401_s9 + $0x368] ss:$16 sps:$4 sm:$0xff]   ;;  %v14529_v59 = vld [vmem:[%s19401_s9 + $0xc] ss:$16 sps:$4 sm:$0xff]  }
 0x810   : > { %10949 = vmatpush2.bf16.msra.mxu1 %v14479_v41  ;;  %11052 = vmatpush1.bf16.msra.mxu0 %v14482_v8  ;;  %v14532_v41 = vld [vmem:[%s19401_s9 + $0x34c] ss:$16 sps:$4 sm:$0xff]   ;;  %v14527_v8 = vld [vmem:[%s19401_s9 + $0x8] ss:$16 sps:$4 sm:$0xff]  }
 0x811   : > { %11000 = vmatprep.subr.bf16.mxu1 %v14487_v15  ;;  %11053 = vmatprep.subr.bf16.mxu0 %v14490_v19  ;;  %v14530_v15 = vld [vmem:[%s19401_s9 + $0x348] ss:$16 sps:$4 sm:$0xff]   ;;  %v14535_v19 = vld [vmem:[%s19401_s9 + $0x1ec] ss:$16 sps:$4 sm:$0xff]  }
 0x813   : > { %10951 = vmatmul.mubr.bf16.vlgmr.msra.gmra.mxu1 %v18496_v58  ;;  %v10706_v39 = vpop.f32.mrf.mxu1 }
 0x814   : > { %v10707_v53 = vadd.f32 %v10706_v39, %v18323_v0  ;;  %11001 = vmatpush1.bf16.msra.mxu1 %v14485_v24  ;;  %11032 = vmatprep.mubr.bf16.mxu1 %v17677_v25  ;;  %v14502_v25 = vld [vmem:[%s19401_s9 + $0x3ec] ss:$16 sps:$4 sm:$0xff]  }
 0x815   : > { %11054 = vmatpush1.bf16.msra.mxu0 %v14488_v3  ;;  %v10708_v10 = vpop.f32.mrf.mxu1  ;;  %11002 = vmatprep.subr.bf16.mxu1 %v14493_v26  ;;  %v14538_v24 = vld [vmem:[%s19401_s9 + $0x32c] ss:$16 sps:$4 sm:$0xff]   ;;  %v14533_v3 = vld [vmem:[%s19401_s9 + $0x1e8] ss:$16 sps:$4 sm:$0xff]  }
 0x816   : > { %v10709_v0 = vadd.f32 %v10708_v10, %v18338_v27  ;;  %11055 = vmatprep.subr.bf16.mxu0 %v14496_v52  ;;  %v14505_v27 = vld [vmem:[%s19401_s9 + $0x8c] ss:$16 sps:$4 sm:$0xff]   ;;  %v14536_v26 = vld [vmem:[%s19401_s9 + $0x328] ss:$16 sps:$4 sm:$0xff]  }
 0x817   : > { %v10710_v62 = vpop.f32.mrf.mxu1  ;;  %v14541_v52 = vld [vmem:[%s19401_s9 + $0x1cc] ss:$16 sps:$4 sm:$0xff]  }
 0x818   : > { %11003 = vmatpush1.bf16.msra.mxu1 %v14491_v22  ;;  %v14544_v39 = vld [vmem:[%s19401_s9 + $0x30c] ss:$16 sps:$4 sm:$0xff]   ;;  %v14542_v22 = vld [vmem:[%s19401_s9 + $0x308] ss:$16 sps:$4 sm:$0xff]  }
 0x819   : > { %11056 = vmatpush1.bf16.msra.mxu0 %v14494_v20  ;;  %v10711_v63 = vpop.f32.mrf.mxu1  ;;  %11004 = vmatprep.subr.bf16.mxu1 %v14499_v60  ;;  %v14547_v10 = vld [vmem:[%s19401_s9 + $0x1ac] ss:$16 sps:$4 sm:$0xff]   ;;  %v14545_v60 = vld [vmem:[%s19401_s9 + $0x1a8] ss:$16 sps:$4 sm:$0xff]  }
 0x81a   : > { %11057 = vmatprep.subr.bf16.mxu0 %v14502_v25  ;;  %v14550_v20 = vld [vmem:[%s19401_s9 + $0x6ec] ss:$16 sps:$4 sm:$0xff]   ;;  %v14554_v63 = vld [vmem:[%s19401_s9 + $0x6c8] ss:$16 sps:$4 sm:$0xff]  }
 0x81b   : > { %v10747_v13 = vpop.f32.mrf.mxu0  ;;  %v14553_v25 = vld [vmem:[%s19401_s9 + $0x18c] ss:$16 sps:$4 sm:$0xff]  }
 0x81c   : > { %v18535_v44 = vadd.f32 %v10747_v13, %v10707_v53  ;;  %11005 = vmatpush1.bf16.msra.mxu1 %v14497_v50  ;;  %v14539_v53 = vld [vmem:[%s19401_s9 + $0x1c8] ss:$16 sps:$4 sm:$0xff]   ;;  %v14556_v62 = vld [vmem:[%s19401_s9 + $0x6cc] ss:$16 sps:$4 sm:$0xff]  }
 0x81d   : > { %11058 = vmatpush2.bf16.msra.mxu0 %v14500_v37  ;;  %v10749_v5 = vpop.f32.mrf.mxu0  ;;  %11006 = vmatprep.subr.bf16.mxu1 %v14505_v27  ;;  %v14551_v50 = vld [vmem:[%s19401_s9 + $0x188] ss:$16 sps:$4 sm:$0xff]   ;;  %v14559_v37 = vld [vmem:[%s19401_s9 + $0x16c] ss:$16 sps:$4 sm:$0xff]  }
 0x81e   : > { %v18546_v32 = vadd.f32 %v10749_v5, %v10709_v0  ;;  %11059 = vmatprep.subr.bf16.mxu0 %v14508_v7  ;;  %v14548_v0 = vld [vmem:[%s19401_s9 + $0x6e8] ss:$16 sps:$4 sm:$0xff]   ;;  %v14565_v7 = vld [vmem:[%s19401_s9 + $0x14c] ss:$16 sps:$4 sm:$0xff]  }
 0x81f   : > { %v10751_v43 = vpop.f32.mrf.mxu0  ;;  %v14557_v27 = vld [vmem:[%s19401_s9 + $0x168] ss:$16 sps:$4 sm:$0xff]   ;;  %v14568_v13 = vld [vmem:[%s19401_s9 + $0x68c] ss:$16 sps:$4 sm:$0xff]  }
 0x820   : > { %11007 = vmatpush1.bf16.msra.mxu1 %v14503_v9  ;;  %v14563_v9 = vld [vmem:[%s19401_s9 + $0x148] ss:$16 sps:$4 sm:$0xff]  }
 0x821   : > { %11060 = vmatpush2.bf16.msra.mxu0 %v14506_v36  ;;  %v10752_v48 = vpop.f32.mrf.mxu0  ;;  %11008 = vmatprep.subr.bf16.mxu1 %v14511_v23  ;;  %v14566_v5 = vld [vmem:[%s19401_s9 + $0x688] ss:$16 sps:$4 sm:$0xff]   ;;  %v14571_v36 = vld [vmem:[%s19401_s9 + $0x12c] ss:$16 sps:$4 sm:$0xff]  }
 0x822   : > { %11061 = vmatprep.subr.bf16.mxu0 %v14514_v33  ;;  %v14574_v23 = vld [vmem:[%s19401_s9 + $0x66c] ss:$16 sps:$4 sm:$0xff]   ;;  %v14569_v33 = vld [vmem:[%s19401_s9 + $0x128] ss:$16 sps:$4 sm:$0xff]  }
 0x823   : > { %v14572_v43 = vld [vmem:[%s19401_s9 + $0x668] ss:$16 sps:$4 sm:$0xff]   ;;  %v14580_v48 = vld [vmem:[%s19401_s9 + $0x64c] ss:$16 sps:$4 sm:$0xff]  }
 0x824   : > { %11009 = vmatpush1.bf16.msra.mxu1 %v14509_v51  ;;  %v14577_v51 = vld [vmem:[%s19401_s9 + $0x10c] ss:$16 sps:$4 sm:$0xff]  }
 0x825   : > { %11062 = vmatpush2.bf16.msra.mxu0 %v14512_v28  ;;  %11010 = vmatprep.subr.bf16.mxu1 %v14517_v35  ;;  %v14575_v28 = vld [vmem:[%s19401_s9 + $0x108] ss:$16 sps:$4 sm:$0xff]  }
 0x826   : > { %11063 = vmatprep.subr.bf16.mxu0 %v14520_v34  ;;  %v14578_v35 = vld [vmem:[%s19401_s9 + $0x648] ss:$16 sps:$4 sm:$0xff]   ;;  %v14583_v34 = vld [vmem:[%s19401_s9 + $0x4ec] ss:$16 sps:$4 sm:$0xff]  }
 0x828   : > { %11011 = vmatpush1.bf16.msra.mxu1 %v14515_v45  ;;  %v14586_v45 = vld [vmem:[%s19401_s9 + $0x62c] ss:$16 sps:$4 sm:$0xff]  }
 0x829   : > { %11064 = vmatpush2.bf16.msra.mxu0 %v14518_v16  ;;  %11012 = vmatprep.subr.bf16.mxu1 %v14523_v14  ;;  %v14581_v16 = vld [vmem:[%s19401_s9 + $0x4e8] ss:$16 sps:$4 sm:$0xff]  }
 0x82a   : > { %11065 = vmatprep.subr.bf16.mxu0 %v14526_v29  ;;  %v14584_v14 = vld [vmem:[%s19401_s9 + $0x628] ss:$16 sps:$4 sm:$0xff]   ;;  %v14589_v29 = vld [vmem:[%s19401_s9 + $0x4cc] ss:$16 sps:$4 sm:$0xff]  }
 0x82c   : > { %11013 = vmatpush1.bf16.msra.mxu1 %v14521_v42  ;;  %v14592_v42 = vld [vmem:[%s19401_s9 + $0x60c] ss:$16 sps:$4 sm:$0xff]  }
 0x82d   : > { %11066 = vmatpush2.bf16.msra.mxu0 %v14524_v56  ;;  %11014 = vmatprep.subr.bf16.mxu1 %v14529_v59  ;;  %v14992_v59 = vld [vmem:[%s15181_s21] sm:$0x1] }
 0x82e   : > { %11067 = vmatprep.subr.bf16.mxu0 %v14532_v41 }
 0x830   : > { %11015 = vmatpush1.bf16.msra.mxu1 %v14527_v8  ;;  %v14587_v8 = vld [vmem:[%s19401_s9 + $0x4c8] ss:$16 sps:$4 sm:$0xff]  }
 0x831   : > { %11068 = vmatpush2.bf16.msra.mxu0 %v14530_v15  ;;  %11016 = vmatprep.subr.bf16.mxu1 %v14535_v19  ;;  %v14590_v19 = vld [vmem:[%s19401_s9 + $0x608] ss:$16 sps:$4 sm:$0xff]  }
 0x832   : > { %11069 = vmatprep.subr.bf16.mxu0 %v14538_v24  ;;  %v14595_v24 = vld [vmem:[%s19401_s9 + $0x4ac] ss:$16 sps:$4 sm:$0xff]  }
 0x834   : > { %11017 = vmatpush2.bf16.msra.mxu1 %v14533_v3 }
 0x835   : > { %11070 = vmatpush2.bf16.msra.mxu0 %v14536_v26  ;;  %11018 = vmatprep.subr.bf16.mxu1 %v14541_v52  ;;  %v14593_v26 = vld [vmem:[%s19401_s9 + $0x4a8] ss:$16 sps:$4 sm:$0xff]  }
 0x836   : > { %11071 = vmatprep.subr.bf16.mxu0 %v14544_v39  ;;  %v14596_v39 = vld [vmem:[%s19401_s9 + $0x7e8] ss:$16 sps:$4 sm:$0xff]  }
 0x838   : > { %11019 = vmatpush2.bf16.msra.mxu1 %v14539_v53  ;;  %v14604_v53 = vld [vmem:[%s19401_s9 + $0x7cc] ss:$16 sps:$4 sm:$0xff]  }
 0x839   : > { %11072 = vmatpush2.bf16.msra.mxu0 %v14542_v22  ;;  %11020 = vmatprep.subr.bf16.mxu1 %v14547_v10 }
 0x83a   : > { %11123 = vmatprep.subr.bf16.mxu0 %v14550_v20  ;;  %v14599_v20 = vld [vmem:[%s19401_s9 + $0x488] ss:$16 sps:$4 sm:$0xff]  }
 0x83c   : > { %11074 = vmatmul.mubr.bf16.vlgmr.msra.gmra.mxu0 %v17835_v11  ;;  %11021 = vmatpush2.bf16.msra.mxu1 %v14545_v60  ;;  %v14562_v11 = vld [vmem:[%s19401_s9 + $0x6ac] ss:$16 sps:$4 sm:$0xff]  }
 0x83d   : > { %11124 = vmatpush1.bf16.msra.mxu0 %v14548_v0  ;;  %11155 = vmatprep.mubr.bf16.mxu0 %v17869_v57  ;;  %v14560_v57 = vld [vmem:[%s19401_s9 + $0x6a8] ss:$16 sps:$4 sm:$0xff]  }
 0x83e   : > { %11022 = vmatprep.subr.bf16.mxu1 %v14553_v25  ;;  %11125 = vmatprep.subr.bf16.mxu0 %v14556_v62  ;;  %v14602_v0 = vld [vmem:[%s19401_s9 + $0x7c8] ss:$16 sps:$4 sm:$0xff]   ;;  %v14607_v25 = vld [vmem:[%s19401_s9 + $0x46c] ss:$16 sps:$4 sm:$0xff]  }
 0x840   : > { %11023 = vmatpush2.bf16.msra.mxu1 %v14551_v50  ;;  %v14610_v50 = vld [vmem:[%s19401_s9 + $0x7ac] ss:$16 sps:$4 sm:$0xff]  }
 0x841   : > { %11126 = vmatpush1.bf16.msra.mxu0 %v14554_v63  ;;  %11024 = vmatprep.subr.bf16.mxu1 %v14559_v37  ;;  %v14605_v37 = vld [vmem:[%s19401_s9 + $0x468] ss:$16 sps:$4 sm:$0xff]  }
 0x842   : > { %11127 = vmatprep.subr.bf16.mxu0 %v14562_v11 }
 0x844   : > { %11025 = vmatpush2.bf16.msra.mxu1 %v14557_v27  ;;  %v14608_v27 = vld [vmem:[%s19401_s9 + $0x7a8] ss:$16 sps:$4 sm:$0xff]  }
 0x845   : > { %11128 = vmatpush1.bf16.msra.mxu0 %v14560_v57  ;;  %11026 = vmatprep.subr.bf16.mxu1 %v14565_v7  ;;  %v14613_v57 = vld [vmem:[%s19401_s9 + $0x44c] ss:$16 sps:$4 sm:$0xff]  }
 0x846   : > { %11129 = vmatprep.subr.bf16.mxu0 %v14568_v13  ;;  %v14616_v7 = vld [vmem:[%s19401_s9 + $0x78c] ss:$16 sps:$4 sm:$0xff]   ;;  %v14611_v13 = vld [vmem:[%s19401_s9 + $0x448] ss:$16 sps:$4 sm:$0xff]  }
 0x848   : > { %11027 = vmatpush2.bf16.msra.mxu1 %v14563_v9  ;;  %v14614_v9 = vld [vmem:[%s19401_s9 + $0x788] ss:$16 sps:$4 sm:$0xff]  }
 0x849   : > { %11130 = vmatpush1.bf16.msra.mxu0 %v14566_v5  ;;  %11028 = vmatprep.subr.bf16.mxu1 %v14571_v36  ;;  %v14619_v5 = vld [vmem:[%s19401_s9 + $0x42c] ss:$16 sps:$4 sm:$0xff]  }
 0x84a   : > { %11131 = vmatprep.subr.bf16.mxu0 %v14574_v23  ;;  %v14622_v36 = vld [vmem:[%s19401_s9 + $0x76c] ss:$16 sps:$4 sm:$0xff]   ;;  %v14617_v23 = vld [vmem:[%s19401_s9 + $0x428] ss:$16 sps:$4 sm:$0xff]  }
 0x84c   : > { %11029 = vmatpush2.bf16.msra.mxu1 %v14569_v33  ;;  %v14620_v33 = vld [vmem:[%s19401_s9 + $0x768] ss:$16 sps:$4 sm:$0xff]  }
 0x84d   : > { %11132 = vmatpush1.bf16.msra.mxu0 %v14572_v43  ;;  %11030 = vmatprep.subr.bf16.mxu1 %v14577_v51  ;;  %v14625_v43 = vld [vmem:[%s19401_s9 + $0x40c] ss:$16 sps:$4 sm:$0xff]  }
 0x84e   : > { %11133 = vmatprep.subr.bf16.mxu0 %v14580_v48  ;;  %v14628_v51 = vld [vmem:[%s19401_s9 + $0x74c] ss:$16 sps:$4 sm:$0xff]   ;;  %v14623_v48 = vld [vmem:[%s19401_s9 + $0x408] ss:$16 sps:$4 sm:$0xff]  }
 0x850   : > { %11031 = vmatpush2.bf16.msra.mxu1 %v14575_v28  ;;  %v14626_v28 = vld [vmem:[%s19401_s9 + $0x748] ss:$16 sps:$4 sm:$0xff]  }
 0x851   : > { %11134 = vmatpush1.bf16.msra.mxu0 %v14578_v35  ;;  %11082 = vmatprep.subr.bf16.mxu1 %v14583_v34  ;;  %v14631_v35 = vld [vmem:[%s19401_s9 + $0x5ec] ss:$16 sps:$4 sm:$0xff]  }
 0x852   : > { %11135 = vmatprep.subr.bf16.mxu0 %v14586_v45  ;;  %v14634_v34 = vld [vmem:[%s19401_s9 + $0x72c] ss:$16 sps:$4 sm:$0xff]   ;;  %v14629_v45 = vld [vmem:[%s19401_s9 + $0x5e8] ss:$16 sps:$4 sm:$0xff]  }
 0x853   : > { %v10788_v56 = vpop.f32.mrf.mxu1  ;;  %11033 = vmatmul.mubr.bf16.vlgmr.msra.gmra.mxu1 %v14992_v59  ;;  %v14643_v59 = vld [vmem:[%s19401_s9 + $0x5ac] ss:$16 sps:$4 sm:$0xff]  }
 0x854   : > { %v10789_v41 = vadd.f32 %v10788_v56, %v18535_v44  ;;  %11083 = vmatpush1.bf16.msra.mxu1 %v14581_v16  ;;  %11114 = vmatprep.mubr.bf16.mxu1 %v17702_v46  ;;  %v14598_v46 = vld [vmem:[%s19401_s9 + $0x7ec] ss:$16 sps:$4 sm:$0xff]   ;;  %v14632_v16 = vld [vmem:[%s19401_s9 + $0x728] ss:$16 sps:$4 sm:$0xff]  }
 0x855   : > { %11136 = vmatpush1.bf16.msra.mxu0 %v14584_v14  ;;  %v10790_v15 = vpop.f32.mrf.mxu1  ;;  %11084 = vmatprep.subr.bf16.mxu1 %v14589_v29  ;;  %v14637_v14 = vld [vmem:[%s19401_s9 + $0x5cc] ss:$16 sps:$4 sm:$0xff]   ;;  %v14638_v56 = vld [vmem:[%s19401_s9 + $0x708] ss:$16 sps:$4 sm:$0xff]  }
 0x856   : > { %v10791_v44 = vadd.f32 %v10790_v15, %v18546_v32  ;;  %11137 = vmatprep.subr.bf16.mxu0 %v14592_v42  ;;  %v14601_v32 = vld [vmem:[%s19401_s9 + $0x48c] ss:$16 sps:$4 sm:$0xff]   ;;  %v14635_v42 = vld [vmem:[%s19401_s9 + $0x5c8] ss:$16 sps:$4 sm:$0xff]  }
 0x857   : > { %v10792_v3 = vpop.f32.mrf.mxu1  ;;  %v14640_v29 = vld [vmem:[%s19401_s9 + $0x70c] ss:$16 sps:$4 sm:$0xff]   ;;  %v14644_v15 = vld [vmem:[%s19401_s9 + $0xae8] ss:$16 sps:$4 sm:$0xff]  }
 0x858   : > { %11085 = vmatpush1.bf16.msra.mxu1 %v14587_v8  ;;  %v14641_v8 = vld [vmem:[%s19401_s9 + $0x5a8] ss:$16 sps:$4 sm:$0xff]   ;;  %v14655_v3 = vld [vmem:[%s19401_s9 + $0x56c] ss:$16 sps:$4 sm:$0xff]  }
 0x859   : > { %11138 = vmatpush1.bf16.msra.mxu0 %v14590_v19  ;;  %v10793_v52 = vpop.f32.mrf.mxu1  ;;  %11086 = vmatprep.subr.bf16.mxu1 %v14595_v24  ;;  %v14649_v19 = vld [vmem:[%s19401_s9 + $0x58c] ss:$16 sps:$4 sm:$0xff]  }
 0x85a   : > { %11139 = vmatprep.subr.bf16.mxu0 %v14598_v46  ;;  %v14652_v24 = vld [vmem:[%s19401_s9 + $0xacc] ss:$16 sps:$4 sm:$0xff]   ;;  %v14650_v46 = vld [vmem:[%s19401_s9 + $0xac8] ss:$16 sps:$4 sm:$0xff]  }
 0x85b   : > { %v10829_v22 = vpop.f32.mrf.mxu0  ;;  %v14661_v52 = vld [vmem:[%s19401_s9 + $0x54c] ss:$16 sps:$4 sm:$0xff]  }
 0x85c   : > { %v18737_v10 = vadd.f32 %v10829_v22, %v10789_v41  ;;  %11087 = vmatpush1.bf16.msra.mxu1 %v14593_v26  ;;  %v14646_v41 = vld [vmem:[%s19401_s9 + $0xaec] ss:$16 sps:$4 sm:$0xff]   ;;  %v14653_v26 = vld [vmem:[%s19401_s9 + $0x568] ss:$16 sps:$4 sm:$0xff]  }
 0x85d   : > { %11140 = vmatpush2.bf16.msra.mxu0 %v14596_v39  ;;  %v10831_v60 = vpop.f32.mrf.mxu0  ;;  %11088 = vmatprep.subr.bf16.mxu1 %v14601_v32  ;;  %v14664_v39 = vld [vmem:[%s19401_s9 + $0xa8c] ss:$16 sps:$4 sm:$0xff]   ;;  %v14659_v32 = vld [vmem:[%s19401_s9 + $0x548] ss:$16 sps:$4 sm:$0xff]  }
 0x85e   : > { %v18748_v62 = vadd.f32 %v10831_v60, %v10791_v44  ;;  %11141 = vmatprep.subr.bf16.mxu0 %v14604_v53  ;;  %v14647_v44 = vld [vmem:[%s19401_s9 + $0x588] ss:$16 sps:$4 sm:$0xff]   ;;  %v14667_v22 = vld [vmem:[%s19401_s9 + $0x52c] ss:$16 sps:$4 sm:$0xff]  }
 0x85f   : > { %v10833_v63 = vpop.f32.mrf.mxu0  ;;  %v14662_v53 = vld [vmem:[%s19401_s9 + $0xa88] ss:$16 sps:$4 sm:$0xff]  }
 0x860   : > { %11089 = vmatpush1.bf16.msra.mxu1 %v14599_v20  ;;  %v14670_v20 = vld [vmem:[%s19401_s9 + $0xa6c] ss:$16 sps:$4 sm:$0xff]   ;;  %v14665_v60 = vld [vmem:[%s19401_s9 + $0x528] ss:$16 sps:$4 sm:$0xff]  }
 0x861   : > { %11142 = vmatpush2.bf16.msra.mxu0 %v14602_v0  ;;  %v10834_v11 = vpop.f32.mrf.mxu0  ;;  %11090 = vmatprep.subr.bf16.mxu1 %v14607_v25  ;;  %v14668_v0 = vld [vmem:[%s19401_s9 + $0xa68] ss:$16 sps:$4 sm:$0xff]   ;;  %v14673_v25 = vld [vmem:[%s19401_s9 + $0x50c] ss:$16 sps:$4 sm:$0xff]  }
 0x862   : > { %11143 = vmatprep.subr.bf16.mxu0 %v14610_v50  ;;  %v14676_v50 = vld [vmem:[%s19401_s9 + $0xa4c] ss:$16 sps:$4 sm:$0xff]   ;;  %v14671_v63 = vld [vmem:[%s19401_s9 + $0x508] ss:$16 sps:$4 sm:$0xff]  }
 0x863   : > { %v14679_v11 = vld [vmem:[%s19401_s9 + $0x8ec] ss:$16 sps:$4 sm:$0xff]  }
 0x864   : > { %11091 = vmatpush1.bf16.msra.mxu1 %v14605_v37  ;;  %v14674_v37 = vld [vmem:[%s19401_s9 + $0xa48] ss:$16 sps:$4 sm:$0xff]  }
 0x865   : > { %11144 = vmatpush2.bf16.msra.mxu0 %v14608_v27  ;;  %11092 = vmatprep.subr.bf16.mxu1 %v14613_v57  ;;  %v14682_v27 = vld [vmem:[%s19401_s9 + $0xa2c] ss:$16 sps:$4 sm:$0xff]   ;;  %v14677_v57 = vld [vmem:[%s19401_s9 + $0x8e8] ss:$16 sps:$4 sm:$0xff]  }
 0x866   : > { %11145 = vmatprep.subr.bf16.mxu0 %v14616_v7  ;;  %v14680_v7 = vld [vmem:[%s19401_s9 + $0xa28] ss:$16 sps:$4 sm:$0xff]  }
 0x868   : > { %11093 = vmatpush1.bf16.msra.mxu1 %v14611_v13  ;;  %v14685_v13 = vld [vmem:[%s19401_s9 + $0x8cc] ss:$16 sps:$4 sm:$0xff]  }
 0x869   : > { %11146 = vmatpush2.bf16.msra.mxu0 %v14614_v9  ;;  %11094 = vmatprep.subr.bf16.mxu1 %v14619_v5  ;;  %v14688_v9 = vld [vmem:[%s19401_s9 + $0xa0c] ss:$16 sps:$4 sm:$0xff]  }
 0x86a   : > { %11147 = vmatprep.subr.bf16.mxu0 %v14622_v36 }
 0x86c   : > { %11095 = vmatpush1.bf16.msra.mxu1 %v14617_v23  ;;  %v14683_v23 = vld [vmem:[%s19401_s9 + $0x8c8] ss:$16 sps:$4 sm:$0xff]  }
 0x86d   : > { %11148 = vmatpush2.bf16.msra.mxu0 %v14620_v33  ;;  %11096 = vmatprep.subr.bf16.mxu1 %v14625_v43  ;;  %v14686_v43 = vld [vmem:[%s19401_s9 + $0xa08] ss:$16 sps:$4 sm:$0xff]  }
 0x86e   : > { %11149 = vmatprep.subr.bf16.mxu0 %v14628_v51 }
 0x870   : > { %11097 = vmatpush1.bf16.msra.mxu1 %v14623_v48  ;;  %v14689_v48 = vld [vmem:[%s19401_s9 + $0x8a8] ss:$16 sps:$4 sm:$0xff]  }
 0x871   : > { %11150 = vmatpush2.bf16.msra.mxu0 %v14626_v28  ;;  %11098 = vmatprep.subr.bf16.mxu1 %v14631_v35  ;;  %v14692_v35 = vld [vmem:[%s19401_s9 + $0xbe8] ss:$16 sps:$4 sm:$0xff]  }
 0x872   : > { %11151 = vmatprep.subr.bf16.mxu0 %v14634_v34  ;;  %v14700_v34 = vld [vmem:[%s19401_s9 + $0xbcc] ss:$16 sps:$4 sm:$0xff]  }
 0x874   : > { %11099 = vmatpush2.bf16.msra.mxu1 %v14629_v45 }
 0x875   : > { %11152 = vmatpush2.bf16.msra.mxu0 %v14632_v16  ;;  %11100 = vmatprep.subr.bf16.mxu1 %v14637_v14  ;;  %v14695_v14 = vld [vmem:[%s19401_s9 + $0x888] ss:$16 sps:$4 sm:$0xff]  }
 0x876   : > { %11153 = vmatprep.subr.bf16.mxu0 %v14640_v29 }
 0x878   : > { %11101 = vmatpush2.bf16.msra.mxu1 %v14635_v42  ;;  %v14698_v42 = vld [vmem:[%s19401_s9 + $0xbc8] ss:$16 sps:$4 sm:$0xff]  }
 0x879   : > { %11154 = vmatpush2.bf16.msra.mxu0 %v14638_v56  ;;  %11102 = vmatprep.subr.bf16.mxu1 %v14643_v59  ;;  %v14703_v56 = vld [vmem:[%s19401_s9 + $0x86c] ss:$16 sps:$4 sm:$0xff]  }
 0x87a   : > { %11205 = vmatprep.subr.bf16.mxu0 %v14646_v41  ;;  %v14706_v41 = vld [vmem:[%s19401_s9 + $0xbac] ss:$16 sps:$4 sm:$0xff]  }
 0x87c   : > { %11156 = vmatmul.mubr.bf16.vlgmr.msra.gmra.mxu0 %v18067_v55  ;;  %11103 = vmatpush2.bf16.msra.mxu1 %v14641_v8  ;;  %v14658_v55 = vld [vmem:[%s19401_s9 + $0xaac] ss:$16 sps:$4 sm:$0xff]  }
 0x87d   : > { %11206 = vmatpush1.bf16.msra.mxu0 %v14644_v15  ;;  %11237 = vmatprep.mubr.bf16.mxu0 %v18078_v17  ;;  %v14656_v17 = vld [vmem:[%s19401_s9 + $0xaa8] ss:$16 sps:$4 sm:$0xff]  }
 0x87e   : > { %11104 = vmatprep.subr.bf16.mxu1 %v14649_v19  ;;  %11207 = vmatprep.subr.bf16.mxu0 %v14652_v24  ;;  %v14701_v15 = vld [vmem:[%s19401_s9 + $0x868] ss:$16 sps:$4 sm:$0xff]  }
 0x87f   : > { %v14704_v24 = vld [vmem:[%s19401_s9 + $0xba8] ss:$16 sps:$4 sm:$0xff]  }
 0x880   : > { %11105 = vmatpush2.bf16.msra.mxu1 %v14647_v44  ;;  %v14709_v44 = vld [vmem:[%s19401_s9 + $0x84c] ss:$16 sps:$4 sm:$0xff]  }
 0x881   : > { %11208 = vmatpush1.bf16.msra.mxu0 %v14650_v46  ;;  %11106 = vmatprep.subr.bf16.mxu1 %v14655_v3  ;;  %v14712_v46 = vld [vmem:[%s19401_s9 + $0xb8c] ss:$16 sps:$4 sm:$0xff]   ;;  %v14707_v3 = vld [vmem:[%s19401_s9 + $0x848] ss:$16 sps:$4 sm:$0xff]  }
 0x882   : > { %11209 = vmatprep.subr.bf16.mxu0 %v14658_v55  ;;  %v14710_v55 = vld [vmem:[%s19401_s9 + $0xb88] ss:$16 sps:$4 sm:$0xff]  }
 0x884   : > { %11107 = vmatpush2.bf16.msra.mxu1 %v14653_v26  ;;  %v14715_v26 = vld [vmem:[%s19401_s9 + $0x82c] ss:$16 sps:$4 sm:$0xff]  }
 0x885   : > { %11210 = vmatpush1.bf16.msra.mxu0 %v14656_v17  ;;  %11108 = vmatprep.subr.bf16.mxu1 %v14661_v52  ;;  %v14718_v17 = vld [vmem:[%s19401_s9 + $0xb6c] ss:$16 sps:$4 sm:$0xff]   ;;  %v14713_v52 = vld [vmem:[%s19401_s9 + $0x828] ss:$16 sps:$4 sm:$0xff]  }
 0x886   : > { %11211 = vmatprep.subr.bf16.mxu0 %v14664_v39  ;;  %v14716_v39 = vld [vmem:[%s19401_s9 + $0xb68] ss:$16 sps:$4 sm:$0xff]  }
 0x888   : > { %11109 = vmatpush2.bf16.msra.mxu1 %v14659_v32  ;;  %v14721_v32 = vld [vmem:[%s19401_s9 + $0x80c] ss:$16 sps:$4 sm:$0xff]  }
 0x889   : > { %11212 = vmatpush1.bf16.msra.mxu0 %v14662_v53  ;;  %11110 = vmatprep.subr.bf16.mxu1 %v14667_v22  ;;  %v14724_v53 = vld [vmem:[%s19401_s9 + $0xb4c] ss:$16 sps:$4 sm:$0xff]   ;;  %v14719_v22 = vld [vmem:[%s19401_s9 + $0x808] ss:$16 sps:$4 sm:$0xff]  }
 0x88a   : > { %11213 = vmatprep.subr.bf16.mxu0 %v14670_v20  ;;  %v14722_v20 = vld [vmem:[%s19401_s9 + $0xb48] ss:$16 sps:$4 sm:$0xff]  }
 0x88c   : > { %11111 = vmatpush2.bf16.msra.mxu1 %v14665_v60  ;;  %v14727_v60 = vld [vmem:[%s19401_s9 + $0x9ec] ss:$16 sps:$4 sm:$0xff]  }
 0x88d   : > { %11214 = vmatpush1.bf16.msra.mxu0 %v14668_v0  ;;  %11112 = vmatprep.subr.bf16.mxu1 %v14673_v25  ;;  %v14730_v0 = vld [vmem:[%s19401_s9 + $0xb2c] ss:$16 sps:$4 sm:$0xff]   ;;  %v14725_v25 = vld [vmem:[%s19401_s9 + $0x9e8] ss:$16 sps:$4 sm:$0xff]  }
 0x88e   : > { %11215 = vmatprep.subr.bf16.mxu0 %v14676_v50  ;;  %v14728_v50 = vld [vmem:[%s19401_s9 + $0xb28] ss:$16 sps:$4 sm:$0xff]  }
 0x890   : > { %11113 = vmatpush2.bf16.msra.mxu1 %v14671_v63  ;;  %v14733_v63 = vld [vmem:[%s19401_s9 + $0x9cc] ss:$16 sps:$4 sm:$0xff]  }
 0x891   : > { %11216 = vmatpush1.bf16.msra.mxu0 %v14674_v37  ;;  %11164 = vmatprep.subr.bf16.mxu1 %v14679_v11  ;;  %v14736_v37 = vld [vmem:[%s19401_s9 + $0xb0c] ss:$16 sps:$4 sm:$0xff]   ;;  %v14731_v11 = vld [vmem:[%s19401_s9 + $0x9c8] ss:$16 sps:$4 sm:$0xff]  }
 0x892   : > { %11217 = vmatprep.subr.bf16.mxu0 %v14682_v27  ;;  %v14734_v27 = vld [vmem:[%s19401_s9 + $0xb08] ss:$16 sps:$4 sm:$0xff]  }
 0x893   : > { %v10870_v5 = vpop.f32.mrf.mxu1  ;;  %11115 = vmatmul.mubr.bf16.vlgmr.msra.gmra.mxu1 %v17874_v49  ;;  %v14691_v49 = vld [vmem:[%s19401_s9 + $0x8ac] ss:$16 sps:$4 sm:$0xff]  }
 0x894   : > { %v10871_v36 = vadd.f32 %v10870_v5, %v18737_v10  ;;  %11165 = vmatpush1.bf16.msra.mxu1 %v14677_v57  ;;  %11196 = vmatprep.mubr.bf16.mxu1 %v17883_v1  ;;  %v14694_v1 = vld [vmem:[%s19401_s9 + $0xbec] ss:$16 sps:$4 sm:$0xff]  }
 0x895   : > { %11218 = vmatpush1.bf16.msra.mxu0 %v14680_v7  ;;  %v10872_v33 = vpop.f32.mrf.mxu1  ;;  %11166 = vmatprep.subr.bf16.mxu1 %v14685_v13  ;;  %v14739_v57 = vld [vmem:[%s19401_s9 + $0x9ac] ss:$16 sps:$4 sm:$0xff]   ;;  %v14737_v13 = vld [vmem:[%s19401_s9 + $0x9a8] ss:$16 sps:$4 sm:$0xff]  }
 0x896   : > { %v10873_v10 = vadd.f32 %v10872_v33, %v18748_v62  ;;  %11219 = vmatprep.subr.bf16.mxu0 %v14688_v9  ;;  %v14697_v62 = vld [vmem:[%s19401_s9 + $0x88c] ss:$16 sps:$4 sm:$0xff]   ;;  %v14740_v9 = vld [vmem:[%s19401_s9 + $0xee8] ss:$16 sps:$4 sm:$0xff]  }
 0x897   : > { %v10874_v51 = vpop.f32.mrf.mxu1  ;;  %v14742_v7 = vld [vmem:[%s19401_s9 + $0xeec] ss:$16 sps:$4 sm:$0xff]   ;;  %v14743_v33 = vld [vmem:[%s19401_s9 + $0x988] ss:$16 sps:$4 sm:$0xff]  }
 0x898   : > { %11167 = vmatpush1.bf16.msra.mxu1 %v14683_v23  ;;  %v14745_v5 = vld [vmem:[%s19401_s9 + $0x98c] ss:$16 sps:$4 sm:$0xff]  }
 0x899   : > { %11220 = vmatpush1.bf16.msra.mxu0 %v14686_v43  ;;  %v10875_v28 = vpop.f32.mrf.mxu1  ;;  %11168 = vmatprep.subr.bf16.mxu1 %v14691_v49  ;;  %v14746_v49 = vld [vmem:[%s19401_s9 + $0xec8] ss:$16 sps:$4 sm:$0xff]  }
 0x89a   : > { %11221 = vmatprep.subr.bf16.mxu0 %v14694_v1  ;;  %v14757_v28 = vld [vmem:[%s19401_s9 + $0x94c] ss:$16 sps:$4 sm:$0xff]  }
 0x89b   : > { %v10911_v45 = vpop.f32.mrf.mxu0 }
 0x89c   : > { %v18939_v16 = vadd.f32 %v10911_v45, %v10871_v36  ;;  %11169 = vmatpush1.bf16.msra.mxu1 %v14689_v48  ;;  %v14748_v36 = vld [vmem:[%s19401_s9 + $0xecc] ss:$16 sps:$4 sm:$0xff]   ;;  %v14752_v48 = vld [vmem:[%s19401_s9 + $0xea8] ss:$16 sps:$4 sm:$0xff]  }
 0x89d   : > { %11222 = vmatpush2.bf16.msra.mxu0 %v14692_v35  ;;  %v10913_v29 = vpop.f32.mrf.mxu0  ;;  %11170 = vmatprep.subr.bf16.mxu1 %v14697_v62  ;;  %v14760_v35 = vld [vmem:[%s19401_s9 + $0xe8c] ss:$16 sps:$4 sm:$0xff]   ;;  %v14755_v62 = vld [vmem:[%s19401_s9 + $0x948] ss:$16 sps:$4 sm:$0xff]  }
 0x89e   : > { %v18950_v59 = vadd.f32 %v10913_v29, %v10873_v10  ;;  %11223 = vmatprep.subr.bf16.mxu0 %v14700_v34  ;;  %v14751_v10 = vld [vmem:[%s19401_s9 + $0x96c] ss:$16 sps:$4 sm:$0xff]   ;;  %v14758_v34 = vld [vmem:[%s19401_s9 + $0xe88] ss:$16 sps:$4 sm:$0xff]  }
 0x89f   : > { %v10915_v8 = vpop.f32.mrf.mxu0  ;;  %v14763_v45 = vld [vmem:[%s19401_s9 + $0x92c] ss:$16 sps:$4 sm:$0xff]   ;;  %v14761_v29 = vld [vmem:[%s19401_s9 + $0x928] ss:$16 sps:$4 sm:$0xff]  }
 0x8a0   : > { %11171 = vmatpush1.bf16.msra.mxu1 %v14695_v14  ;;  %v14766_v14 = vld [vmem:[%s19401_s9 + $0xe6c] ss:$16 sps:$4 sm:$0xff]   ;;  %v14767_v8 = vld [vmem:[%s19401_s9 + $0x908] ss:$16 sps:$4 sm:$0xff]  }
 0x8a1   : > { %11224 = vmatpush2.bf16.msra.mxu0 %v14698_v42  ;;  %v10916_v19 = vpop.f32.mrf.mxu0  ;;  %11172 = vmatprep.subr.bf16.mxu1 %v14703_v56  ;;  %v14764_v42 = vld [vmem:[%s19401_s9 + $0xe68] ss:$16 sps:$4 sm:$0xff]   ;;  %v14769_v56 = vld [vmem:[%s19401_s9 + $0x90c] ss:$16 sps:$4 sm:$0xff]  }
 0x8a2   : > { %11225 = vmatprep.subr.bf16.mxu0 %v14706_v41  ;;  %v14772_v41 = vld [vmem:[%s19401_s9 + $0xe4c] ss:$16 sps:$4 sm:$0xff]  }
 0x8a3   : > { %v14775_v19 = vld [vmem:[%s19401_s9 + $0xcec] ss:$16 sps:$4 sm:$0xff]  }
 0x8a4   : > { %11173 = vmatpush1.bf16.msra.mxu1 %v14701_v15  ;;  %v14770_v15 = vld [vmem:[%s19401_s9 + $0xe48] ss:$16 sps:$4 sm:$0xff]  }
 0x8a5   : > { %11226 = vmatpush2.bf16.msra.mxu0 %v14704_v24  ;;  %11174 = vmatprep.subr.bf16.mxu1 %v14709_v44  ;;  %v14778_v24 = vld [vmem:[%s19401_s9 + $0xe2c] ss:$16 sps:$4 sm:$0xff]   ;;  %v14773_v44 = vld [vmem:[%s19401_s9 + $0xce8] ss:$16 sps:$4 sm:$0xff]  }
 0x8a6   : > { %11227 = vmatprep.subr.bf16.mxu0 %v14712_v46  ;;  %v14776_v46 = vld [vmem:[%s19401_s9 + $0xe28] ss:$16 sps:$4 sm:$0xff]  }
 0x8a8   : > { %11175 = vmatpush1.bf16.msra.mxu1 %v14707_v3  ;;  %v14781_v3 = vld [vmem:[%s19401_s9 + $0xccc] ss:$16 sps:$4 sm:$0xff]  }
 0x8a9   : > { %11228 = vmatpush2.bf16.msra.mxu0 %v14710_v55  ;;  %11176 = vmatprep.subr.bf16.mxu1 %v14715_v26  ;;  %v14784_v55 = vld [vmem:[%s19401_s9 + $0xe0c] ss:$16 sps:$4 sm:$0xff]  }
 0x8aa   : > { %11229 = vmatprep.subr.bf16.mxu0 %v14718_v17 }
 0x8ac   : > { %11177 = vmatpush1.bf16.msra.mxu1 %v14713_v52  ;;  %v14779_v52 = vld [vmem:[%s19401_s9 + $0xcc8] ss:$16 sps:$4 sm:$0xff]  }
 0x8ad   : > { %11230 = vmatpush2.bf16.msra.mxu0 %v14716_v39  ;;  %11178 = vmatprep.subr.bf16.mxu1 %v14721_v32  ;;  %v14782_v32 = vld [vmem:[%s19401_s9 + $0xe08] ss:$16 sps:$4 sm:$0xff]  }
 0x8ae   : > { %11231 = vmatprep.subr.bf16.mxu0 %v14724_v53  ;;  %v14790_v53 = vld [vmem:[%s19401_s9 + $0xfec] ss:$16 sps:$4 sm:$0xff]  }
 0x8b0   : > { %11179 = vmatpush1.bf16.msra.mxu1 %v14719_v22 }
 0x8b1   : > { %11232 = vmatpush2.bf16.msra.mxu0 %v14722_v20  ;;  %11180 = vmatprep.subr.bf16.mxu1 %v14727_v60  ;;  %v14785_v60 = vld [vmem:[%s19401_s9 + $0xca8] ss:$16 sps:$4 sm:$0xff]  }
 0x8b2   : > { %11233 = vmatprep.subr.bf16.mxu0 %v14730_v0 }
 0x8b4   : > { %11181 = vmatpush2.bf16.msra.mxu1 %v14725_v25  ;;  %v14793_v25 = vld [vmem:[%s19401_s9 + $0xc8c] ss:$16 sps:$4 sm:$0xff]  }
 0x8b5   : > { %11234 = vmatpush2.bf16.msra.mxu0 %v14728_v50  ;;  %11182 = vmatprep.subr.bf16.mxu1 %v14733_v63  ;;  %v14796_v50 = vld [vmem:[%s19401_s9 + $0xfcc] ss:$16 sps:$4 sm:$0xff]   ;;  %v14791_v63 = vld [vmem:[%s19401_s9 + $0xc88] ss:$16 sps:$4 sm:$0xff]  }
 0x8b6   : > { %11235 = vmatprep.subr.bf16.mxu0 %v14736_v37  ;;  %v14794_v37 = vld [vmem:[%s19401_s9 + $0xfc8] ss:$16 sps:$4 sm:$0xff]  }
 0x8b8   : > { %11183 = vmatpush2.bf16.msra.mxu1 %v14731_v11  ;;  %v14799_v11 = vld [vmem:[%s19401_s9 + $0xc6c] ss:$16 sps:$4 sm:$0xff]  }
 0x8b9   : > { %11236 = vmatpush2.bf16.msra.mxu0 %v14734_v27  ;;  %11184 = vmatprep.subr.bf16.mxu1 %v14739_v57  ;;  %v14802_v27 = vld [vmem:[%s19401_s9 + $0xfac] ss:$16 sps:$4 sm:$0xff]   ;;  %v14797_v57 = vld [vmem:[%s19401_s9 + $0xc68] ss:$16 sps:$4 sm:$0xff]  }
 0x8ba   : > { %11287 = vmatprep.subr.bf16.mxu0 %v14742_v7  ;;  %v14800_v7 = vld [vmem:[%s19401_s9 + $0xfa8] ss:$16 sps:$4 sm:$0xff]  }
 0x8bb   : > { %v19039_v23 = vpop.f32.mrf.mxu0 }
 0x8bc   : > { %11238 = vmatmul.mubr.bf16.vlgmr.msra.gmra.mxu0 %v18279_v47  ;;  %11185 = vmatpush2.bf16.msra.mxu1 %v14737_v13  ;;  %v14754_v47 = vld [vmem:[%s19401_s9 + $0xeac] ss:$16 sps:$4 sm:$0xff]  }
 0x8bd   : > { %11288 = vmatpush1.bf16.msra.mxu0 %v14740_v9  ;;  %11319 = vmatprep.mubr.bf16.mxu0 %v18290_v21  ;;  %v19046_v43 = vpop.f32.mrf.mxu0  ;;  %v14749_v21 = vld [vmem:[%s19401_s9 + $0x968] ss:$16 sps:$4 sm:$0xff]   ;;  %v14805_v13 = vld [vmem:[%s19401_s9 + $0xc4c] ss:$16 sps:$4 sm:$0xff]  }
 0x8be   : > { %11186 = vmatprep.subr.bf16.mxu1 %v14745_v5  ;;  %11289 = vmatprep.subr.bf16.mxu0 %v14748_v36  ;;  %v14808_v9 = vld [vmem:[%s19401_s9 + $0xf8c] ss:$16 sps:$4 sm:$0xff]   ;;  %v14803_v5 = vld [vmem:[%s19401_s9 + $0xc48] ss:$16 sps:$4 sm:$0xff]  }
 0x8bf   : > { %v10997_v1 = vpop.f32.mrf.mxu0  ;;  %v14806_v36 = vld [vmem:[%s19401_s9 + $0xf88] ss:$16 sps:$4 sm:$0xff]  }
 0x8c0   : > { %11187 = vmatpush2.bf16.msra.mxu1 %v14743_v33  ;;  %v14814_v33 = vld [vmem:[%s19401_s9 + $0xf6c] ss:$16 sps:$4 sm:$0xff]   ;;  %v14815_v1 = vld [vmem:[%s19401_s9 + $0xc08] ss:$16 sps:$4 sm:$0xff]  }
 0x8c1   : > { %11290 = vmatpush1.bf16.msra.mxu0 %v14746_v49  ;;  %v10998_v51 = vpop.f32.mrf.mxu0  ;;  %11188 = vmatprep.subr.bf16.mxu1 %v14751_v10  ;;  %v14812_v49 = vld [vmem:[%s19401_s9 + $0xf68] ss:$16 sps:$4 sm:$0xff]   ;;  %v14817_v10 = vld [vmem:[%s19401_s9 + $0xc0c] ss:$16 sps:$4 sm:$0xff]  }
 0x8c2   : > { %11291 = vmatprep.subr.bf16.mxu0 %v14754_v47  ;;  %v14820_v47 = vld [vmem:[%s19401_s9 + $0xf4c] ss:$16 sps:$4 sm:$0xff]  }
 0x8c3   : > { %v14823_v51 = vld [vmem:[%s19401_s9 + $0xdec] ss:$16 sps:$4 sm:$0xff]  }
 0x8c4   : > { %11189 = vmatpush2.bf16.msra.mxu1 %v14749_v21  ;;  %v14818_v21 = vld [vmem:[%s19401_s9 + $0xf48] ss:$16 sps:$4 sm:$0xff]  }
 0x8c5   : > { %11292 = vmatpush1.bf16.msra.mxu0 %v14752_v48  ;;  %11190 = vmatprep.subr.bf16.mxu1 %v14757_v28  ;;  %v14826_v48 = vld [vmem:[%s19401_s9 + $0xf2c] ss:$16 sps:$4 sm:$0xff]   ;;  %v14821_v28 = vld [vmem:[%s19401_s9 + $0xde8] ss:$16 sps:$4 sm:$0xff]  }
 0x8c6   : > { %11293 = vmatprep.subr.bf16.mxu0 %v14760_v35  ;;  %v14824_v35 = vld [vmem:[%s19401_s9 + $0xf28] ss:$16 sps:$4 sm:$0xff]  }
 0x8c8   : > { %11191 = vmatpush2.bf16.msra.mxu1 %v14755_v62  ;;  %v14829_v62 = vld [vmem:[%s19401_s9 + $0xdcc] ss:$16 sps:$4 sm:$0xff]  }
 0x8c9   : > { %11294 = vmatpush1.bf16.msra.mxu0 %v14758_v34  ;;  %11192 = vmatprep.subr.bf16.mxu1 %v14763_v45  ;;  %v14832_v34 = vld [vmem:[%s19401_s9 + $0xf0c] ss:$16 sps:$4 sm:$0xff]   ;;  %v14827_v45 = vld [vmem:[%s19401_s9 + $0xdc8] ss:$16 sps:$4 sm:$0xff]  }
 0x8ca   : > { %11295 = vmatprep.subr.bf16.mxu0 %v14766_v14  ;;  %v14830_v14 = vld [vmem:[%s19401_s9 + $0xf08] ss:$16 sps:$4 sm:$0xff]  }
 0x8cc   : > { %11193 = vmatpush2.bf16.msra.mxu1 %v14761_v29  ;;  %v14835_v29 = vld [vmem:[%s19401_s9 + $0xdac] ss:$16 sps:$4 sm:$0xff]  }
 0x8cd   : > { %11296 = vmatpush1.bf16.msra.mxu0 %v14764_v42  ;;  %11194 = vmatprep.subr.bf16.mxu1 %v14769_v56  ;;  %v14833_v42 = vld [vmem:[%s19401_s9 + $0xda8] ss:$16 sps:$4 sm:$0xff]   ;;  %v14838_v56 = vld [vmem:[%s19401_s9 + $0xd8c] ss:$16 sps:$4 sm:$0xff]  }
 0x8ce   : > { %11297 = vmatprep.subr.bf16.mxu0 %v14772_v41 }
 0x8d0   : > { %11195 = vmatpush2.bf16.msra.mxu1 %v14767_v8  ;;  %v14836_v8 = vld [vmem:[%s19401_s9 + $0xd88] ss:$16 sps:$4 sm:$0xff]  }
 0x8d1   : > { %11298 = vmatpush1.bf16.msra.mxu0 %v14770_v15  ;;  %11246 = vmatprep.subr.bf16.mxu1 %v14775_v19  ;;  %v14841_v15 = vld [vmem:[%s19401_s9 + $0xd6c] ss:$16 sps:$4 sm:$0xff]  }
 0x8d2   : > { %11299 = vmatprep.subr.bf16.mxu0 %v14778_v24 }
 0x8d3   : > { %v10952_v26 = vpop.f32.mrf.mxu1  ;;  %11197 = vmatmul.mubr.bf16.vlgmr.msra.gmra.mxu1 %v18101_v61  ;;  %v14787_v61 = vld [vmem:[%s19401_s9 + $0xcac] ss:$16 sps:$4 sm:$0xff]  }
 0x8d4   : > { %v10953_v17 = vadd.f32 %v10952_v26, %v18939_v16  ;;  %11247 = vmatpush1.bf16.msra.mxu1 %v14773_v44  ;;  %11278 = vmatprep.mubr.bf16.mxu1 %v18111_v40  ;;  %v14839_v44 = vld [vmem:[%s19401_s9 + $0xd68] ss:$16 sps:$4 sm:$0xff]  }
 0x8d5   : > { %11300 = vmatpush1.bf16.msra.mxu0 %v14776_v46  ;;  %v10954_v39 = vpop.f32.mrf.mxu1  ;;  %11248 = vmatprep.subr.bf16.mxu1 %v14781_v3  ;;  %v14842_v3 = vld [vmem:[%s19401_s9 + $0xd48] ss:$16 sps:$4 sm:$0xff]  }
 0x8d6   : > { %v19130_v16 = vadd.f32 %v19039_v23, %v10953_v17  ;;  %v10955_v40 = vadd.f32 %v10954_v39, %v18950_v59  ;;  %11301 = vmatprep.subr.bf16.mxu0 %v14784_v55  ;;  %v14788_v59 = vld [vmem:[%s19401_s9 + $0xfe8] ss:$16 sps:$4 sm:$0xff]   ;;  %v14811_v23 = vld [vmem:[%s19401_s9 + $0xc2c] ss:$16 sps:$4 sm:$0xff]  }
 0x8d7   : > { %v10956_v22 = vpop.f32.mrf.mxu1  ;;  %v14847_v55 = vld [vmem:[%s19401_s9 + $0xd2c] ss:$16 sps:$4 sm:$0xff]   ;;  %v14845_v26 = vld [vmem:[%s19401_s9 + $0xd28] ss:$16 sps:$4 sm:$0xff]  }
 0x8d8   : > { %v19137_v20 = vadd.f32 %v19046_v43, %v10955_v40  ;;  %11249 = vmatpush1.bf16.msra.mxu1 %v14779_v52  ;;  %v14809_v43 = vld [vmem:[%s19401_s9 + $0xc28] ss:$16 sps:$4 sm:$0xff]   ;;  %v14850_v17 = vld [vmem:[%s19401_s9 + $0xd0c] ss:$16 sps:$4 sm:$0xff]  }
 0x8d9   : > { %11302 = vmatpush1.bf16.msra.mxu0 %v14782_v32  ;;  %v10957_v0 = vpop.f32.mrf.mxu1  ;;  %11250 = vmatprep.subr.bf16.mxu1 %v14787_v61  ;;  %v14848_v52 = vld [vmem:[%s19401_s9 + $0xd08] ss:$16 sps:$4 sm:$0xff]   ;;  %v14853_v39 = vld [vmem:[%s19401_s9 + $0x10ec] ss:$16 sps:$4 sm:$0xff]  }
 0x8da   : > { %11303 = vmatprep.subr.bf16.mxu0 %v14790_v53  ;;  %v14851_v32 = vld [vmem:[%s19401_s9 + $0x10e8] ss:$16 sps:$4 sm:$0xff]   ;;  %v14856_v61 = vld [vmem:[%s19401_s9 + $0x10cc] ss:$16 sps:$4 sm:$0xff]  }
 0x8db   : > { %v14854_v22 = vld [vmem:[%s19401_s9 + $0x10c8] ss:$16 sps:$4 sm:$0xff]   ;;  %v14859_v0 = vld [vmem:[%s19401_s9 + $0x10ac] ss:$16 sps:$4 sm:$0xff]  }
 0x8dc   : > { %11251 = vmatpush1.bf16.msra.mxu1 %v14785_v60 }
 0x8dd   : > { %11304 = vmatpush2.bf16.msra.mxu0 %v14788_v59  ;;  %11252 = vmatprep.subr.bf16.mxu1 %v14793_v25 }
 0x8de   : > { %11305 = vmatprep.subr.bf16.mxu0 %v14796_v50 }
 0x8e0   : > { %11253 = vmatpush1.bf16.msra.mxu1 %v14791_v63 }
 0x8e1   : > { %11306 = vmatpush2.bf16.msra.mxu0 %v14794_v37  ;;  %11254 = vmatprep.subr.bf16.mxu1 %v14799_v11  ;;  %v14860_v37 = vld [vmem:[%s19401_s9 + $0x1088] ss:$16 sps:$4 sm:$0xff]  }
 0x8e2   : > { %11307 = vmatprep.subr.bf16.mxu0 %v14802_v27  ;;  %v14863_v11 = vld [vmem:[%s19401_s9 + $0x1068] ss:$16 sps:$4 sm:$0xff]   ;;  %v14868_v27 = vld [vmem:[%s19401_s9 + $0x104c] ss:$16 sps:$4 sm:$0xff]  }
 0x8e4   : > { %11255 = vmatpush1.bf16.msra.mxu1 %v14797_v57  ;;  %v14866_v57 = vld [vmem:[%s19401_s9 + $0x1048] ss:$16 sps:$4 sm:$0xff]  }
 0x8e5   : > { %11308 = vmatpush2.bf16.msra.mxu0 %v14800_v7  ;;  %11256 = vmatprep.subr.bf16.mxu1 %v14805_v13  ;;  %v14871_v7 = vld [vmem:[%s19401_s9 + $0x102c] ss:$16 sps:$4 sm:$0xff]   ;;  %v14869_v13 = vld [vmem:[%s19401_s9 + $0x1028] ss:$16 sps:$4 sm:$0xff]  }
 0x8e6   : > { %11309 = vmatprep.subr.bf16.mxu0 %v14808_v9  ;;  %v14874_v9 = vld [vmem:[%s19401_s9 + $0x100c] ss:$16 sps:$4 sm:$0xff]  }
 0x8e8   : > { %11257 = vmatpush1.bf16.msra.mxu1 %v14803_v5  ;;  %v14872_v5 = vld [vmem:[%s19401_s9 + $0x1008] ss:$16 sps:$4 sm:$0xff]  }
 0x8e9   : > { %11310 = vmatpush2.bf16.msra.mxu0 %v14806_v36  ;;  %11258 = vmatprep.subr.bf16.mxu1 %v14811_v23 }
 0x8ea   : > { %11311 = vmatprep.subr.bf16.mxu0 %v14814_v33 }
 0x8ec   : > { %11259 = vmatpush1.bf16.msra.mxu1 %v14809_v43 }
 0x8ed   : > { %11312 = vmatpush2.bf16.msra.mxu0 %v14812_v49  ;;  %11260 = vmatprep.subr.bf16.mxu1 %v14817_v10 }
 0x8ee   : > { %11313 = vmatprep.subr.bf16.mxu0 %v14820_v47 }
 0x8f0   : > { %11261 = vmatpush1.bf16.msra.mxu1 %v14815_v1 }
 0x8f1   : > { %11314 = vmatpush2.bf16.msra.mxu0 %v14818_v21  ;;  %11262 = vmatprep.subr.bf16.mxu1 %v14823_v51 }
 0x8f2   : > { %11315 = vmatprep.subr.bf16.mxu0 %v14826_v48 }
 0x8f4   : > { %11263 = vmatpush2.bf16.msra.mxu1 %v14821_v28 }
 0x8f5   : > { %11316 = vmatpush2.bf16.msra.mxu0 %v14824_v35  ;;  %11264 = vmatprep.subr.bf16.mxu1 %v14829_v62 }
 0x8f6   : > { %11317 = vmatprep.subr.bf16.mxu0 %v14832_v34  ;;  %v14877_v34 = vld [vmem:[%s19403_s11 + $0x74] ss:$8 sps:$4 sm:$0xff]  }
 0x8f8   : > { %11265 = vmatpush2.bf16.msra.mxu1 %v14827_v45 }
 0x8f9   : > { %11318 = vmatpush2.bf16.msra.mxu0 %v14830_v14  ;;  %11266 = vmatprep.subr.bf16.mxu1 %v14835_v29  ;;  %v14880_v29 = vld [vmem:[%s19403_s11 + $0x64] ss:$8 sps:$4 sm:$0xff]  }
 0x8fa   : > { %11528 = vmatprep.subr.bf16.mxu0 %v14877_v34 }
 0x8fc   : > { %v11075_v41 = vpop.f32.mrf.mxu0  ;;  %11320 = vmatmul.mubr.bf16.vlgmr.msra.gmra.mxu0 %v18496_v58  ;;  %11267 = vmatpush2.bf16.msra.mxu1 %v14833_v42  ;;  %v14844_v58 = vld [vmem:[%s19401_s9 + $0xd4c] ss:$16 sps:$4 sm:$0xff]   ;;  %v14878_v42 = vld [vmem:[%s19403_s11 + $0x60] ss:$8 sps:$4 sm:$0xff]  }
 0x8fd   : > { %11268 = vmatprep.subr.bf16.mxu1 %v14838_v56  ;;  %11560 = vmatprep.mubr.bf16.mxu0 %v15017_v30  ;;  %v14883_v56 = vld [vmem:[%s19403_s11 + $0x54] ss:$8 sps:$4 sm:$0xff]  }
 0x8fe   : > { %v11077_v19 = vpop.f32.mrf.mxu0 }
 0x900   : > { %v11079_v24 = vpop.f32.mrf.mxu0  ;;  %11269 = vmatpush2.bf16.msra.mxu1 %v14836_v8  ;;  %v14886_v8 = vld [vmem:[%s19403_s11 + $0x44] ss:$8 sps:$4 sm:$0xff]  }
 0x901   : > { %11270 = vmatprep.subr.bf16.mxu1 %v14841_v15  ;;  %v14884_v15 = vld [vmem:[%s19403_s11 + $0x40] ss:$8 sps:$4 sm:$0xff]   ;;  %v14887_v24 = vld [vmem:[%s19403_s11 + $0x30] ss:$8 sps:$4 sm:$0xff]  }
 0x902   : > { %v11080_v46 = vpop.f32.mrf.mxu0 }
 0x903   : > { %v14895_v46 = vld [vmem:[%s19403_s11 + $0x14] ss:$8 sps:$4 sm:$0xff]  }
 0x904   : > { %11271 = vmatpush2.bf16.msra.mxu1 %v14839_v44  ;;  %v14892_v44 = vld [vmem:[%s19403_s11 + $0x24] ss:$8 sps:$4 sm:$0xff]  }
 0x905   : > { %11272 = vmatprep.subr.bf16.mxu1 %v14844_v58  ;;  %v14890_v58 = vld [vmem:[%s19403_s11 + $0x20] ss:$8 sps:$4 sm:$0xff]  }
 0x908   : > { %11273 = vmatpush2.bf16.msra.mxu1 %v14842_v3 }
 0x909   : > { %11274 = vmatprep.subr.bf16.mxu1 %v14847_v55 }
 0x90c   : > { %11275 = vmatpush2.bf16.msra.mxu1 %v14845_v26 }
 0x90d   : > { %11276 = vmatprep.subr.bf16.mxu1 %v14850_v17  ;;  %v14893_v17 = vld [vmem:[%s19403_s11 + $0x10] ss:$8 sps:$4 sm:$0xff]  }
 0x910   : > { %11277 = vmatpush2.bf16.msra.mxu1 %v14848_v52 }
 0x911   : > { %11328 = vmatprep.subr.bf16.mxu1 %v14853_v39 }
 0x913   : > { %v11034_v40 = vpop.f32.mrf.mxu1  ;;  %11279 = vmatmul.mubr.bf16.vlgmr.msra.gmra.mxu1 %v18313_v12 }
 0x914   : > { %v11035_v53 = vadd.f32 %v11034_v40, %v17465_v4  ;;  %11329 = vmatpush1.bf16.msra.mxu1 %v14851_v32  ;;  %11360 = vmatprep.mubr.bf16.mxu1 %v15017_v30  ;;  %v14857_v4 = vld [vmem:[%s19401_s9 + $0x10a8] ss:$16 sps:$4 sm:$0xff]   ;;  %v14862_v30 = vld [vmem:[%s19401_s9 + $0x108c] ss:$16 sps:$4 sm:$0xff]  }
 0x915   : > { %v11036_v60 = vpop.f32.mrf.mxu1  ;;  %11330 = vmatprep.subr.bf16.mxu1 %v14856_v61  ;;  %v14898_v32 = vld [vmem:[%s19403_s11 + $0x4] ss:$8 sps:$4 sm:$0xff]  }
 0x916   : > { %v11037_v59 = vadd.f32 %v11036_v60, %v17496_v38  ;;  %v11076_v25 = vadd.f32 %v11075_v41, %v11035_v53  ;;  %v14865_v38 = vld [vmem:[%s19401_s9 + $0x106c] ss:$16 sps:$4 sm:$0xff]   ;;  %v14881_v41 = vld [vmem:[%s19403_s11 + $0x50] ss:$8 sps:$4 sm:$0xff]  }
 0x917   : > { %v11038_v50 = vpop.f32.mrf.mxu1 }
 0x918   : > { %11331 = vmatpush1.bf16.msra.mxu1 %v14854_v22  ;;  %v11078_v12 = vadd.f32 %v11077_v19, %v11037_v59  ;;  %v14889_v19 = vld [vmem:[%s19403_s11 + $0x34] ss:$8 sps:$4 sm:$0xff]   ;;  %v14896_v22 = vld [vmem:[%s19403_s11] ss:$8 sps:$4 sm:$0xff]  }
 0x919   : > { %v11039_v63 = vpop.f32.mrf.mxu1  ;;  %11332 = vmatprep.subr.bf16.mxu1 %v14859_v0 }
 0x91c   : > { %11333 = vmatpush1.bf16.msra.mxu1 %v14857_v4  ;;  %v11369_v4 = vld [vmem:[%s19402_s10] sm:$0xf] }
 0x91d   : > { %11334 = vmatprep.subr.bf16.mxu1 %v14862_v30  ;;  %v11378_v63 = vrot.slane %v11369_v4, %v16716_v2  ;;  %v11374_v30 = vrot.slane %v11369_v4, %v16690_v31 }
 0x920   : > { %11335 = vmatpush1.bf16.msra.mxu1 %v14860_v37 }
 0x921   : > { %11336 = vmatprep.subr.bf16.mxu1 %v14865_v38 }
 0x924   : > { %11337 = vmatpush1.bf16.msra.mxu1 %v14863_v11  ;;  %v11392_v11 = vadd.f32 %v11378_v63, %v19137_v20  ;;  %v11386_v20 = vrot.slane %v11369_v4, %v17439_v18 }
 0x925   : > { %11338 = vmatprep.subr.bf16.mxu1 %v14868_v27  ;;  %v11391_v27 = vadd.f32 %v11374_v30, %v19130_v16 }
 0x928   : > { %11339 = vmatpush1.bf16.msra.mxu1 %v14866_v57  ;;  %v12970_v57 = vmul.f32 -1.442695, %v11392_v11 }
 0x929   : > { %11340 = vmatprep.subr.bf16.mxu1 %v14871_v7  ;;  %v12969_v7 = vmul.f32 -1.442695, %v11391_v27 }
 0x92a   : > { %14975 = vpow2.f32 %v12970_v57 }
 0x92b   : > { %14977 = vpow2.f32 %v12969_v7 }
 0x92c   : > { %11341 = vmatpush1.bf16.msra.mxu1 %v14869_v13 }
 0x92d   : > { %11342 = vmatprep.subr.bf16.mxu1 %v14874_v9 }
 0x930   : > { %11343 = vmatpush1.bf16.msra.mxu1 %v14872_v5 }
 0x933   : > { %11361 = vmatmul.mubr.bf16.vlgmr.msra.gmra.mxu1 %v18421_v6  ;;  %v14875_v6 = vld [vmem:[%s19403_s11 + $0x70] ss:$8 sps:$4 sm:$0xff]  }
 0x934   : > { %11529 = vmatpush1.bf16.msra.mxu0 %v14875_v6  ;;  %v4528_v6 = vld [vmem:[#allocation3] sm:$0x3] }
 0x935   : > { %11530 = vmatprep.subr.bf16.mxu0 %v14880_v29 }
 0x937   : > { %v14976_v9 = vpop.eup %14975 }
 0x938   : > { %11531 = vmatpush1.bf16.msra.mxu0 %v14878_v42  ;;  %v14978_v5 = vpop.eup %14977 }
 0x939   : > { %11532 = vmatprep.subr.bf16.mxu0 %v14883_v56 }
 0x93c   : > { %v11157_v36 = vpop.f32.mrf.mxu0  ;;  %11533 = vmatpush1.bf16.msra.mxu0 %v14881_v41 }
 0x93d   : > { %11534 = vmatprep.subr.bf16.mxu0 %v14886_v8 }
 0x93e   : > { %v11159_v23 = vpop.f32.mrf.mxu0 }
 0x940   : > { %v11161_v33 = vpop.f32.mrf.mxu0  ;;  %11535 = vmatpush1.bf16.msra.mxu0 %v14884_v15 }
 0x941   : > { %11536 = vmatprep.subr.bf16.mxu0 %v14889_v19 }
 0x942   : > { %v11162_v43 = vpop.f32.mrf.mxu0 }
 0x943   : > { %v11382_v43 = vrot.slane %v11369_v4, %v17292_v54 }
 0x944   : > { %11537 = vmatpush1.bf16.msra.mxu0 %v14887_v24  ;;  %v11436_v24 = vld [vmem:[%s19404_s12] sm:$0x3] }
 0x945   : > { %11538 = vmatprep.subr.bf16.mxu0 %v14892_v44  ;;  %v11441_v44 = vrot.slane %v11436_v24, %v16690_v31 }
 0x948   : > { %11539 = vmatpush1.bf16.msra.mxu0 %v14890_v58  ;;  %v11445_v58 = vrot.slane %v11436_v24, %v16716_v2 }
 0x949   : > { %11540 = vmatprep.subr.bf16.mxu0 %v14895_v46 }
 0x94c   : > { %11541 = vmatpush1.bf16.msra.mxu0 %v14893_v17 }
 0x94d   : > { %11542 = vmatprep.subr.bf16.mxu0 %v14898_v32 }
 0x950   : > { %11543 = vmatpush1.bf16.msra.mxu0 %v14896_v22 }
 0x953   : > { %v11116_v49 = vpop.f32.mrf.mxu1 }
 0x954   : > { %v11117_v10 = vadd.f32 %v11116_v49, %v11076_v25  ;;  %v11398_v49 = vadd.f32 1.0, %v14978_v5 }
 0x955   : > { %v11118_v47 = vpop.f32.mrf.mxu1 }
 0x956   : > { %v11119_v1 = vadd.f32 %v11118_v47, %v11078_v12  ;;  %v11158_v21 = vadd.f32 %v11157_v36, %v11117_v10 }
 0x957   : > { %v11120_v51 = vpop.f32.mrf.mxu1 }
 0x958   : > { %v11160_v48 = vadd.f32 %v11159_v23, %v11119_v1  ;;  %v11404_v23 = vadd.f32 1.0, %v14976_v9 }
 0x959   : > { %v11121_v28 = vpop.f32.mrf.mxu1 }
 0x95a   : > { %14979 = vrcp.f32 %v11404_v23 }
 0x95b   : > { %14981 = vrcp.f32 %v11398_v49 }
 0x967   : > { %v14980_v34 = vpop.eup %14979 }
 0x968   : > { %v14982_v54 = vpop.eup %14981 }
 0x97c   : > { %v11239_v35 = vpop.f32.mrf.mxu0 }
 0x97e   : > { %v11241_v62 = vpop.f32.mrf.mxu0 }
 0x980   : > { %v11243_v45 = vpop.f32.mrf.mxu0 }
 0x982   : > { %v11244_v14 = vpop.f32.mrf.mxu0 }
 0x983   : > { %v11414_v14 = vmul.f32 %v14980_v34, %v4528_v6 }
 0x993   : > { %v11198_v3 = vpop.f32.mrf.mxu1 }
 0x994   : > { %v11199_v55 = vadd.f32 %v11198_v3, %v11158_v21 }
 0x995   : > { %v11200_v26 = vpop.f32.mrf.mxu1 }
 0x996   : > { %v11201_v52 = vadd.f32 %v11200_v26, %v11160_v48  ;;  %v11240_v39 = vadd.f32 %v11239_v35, %v11199_v55 }
 0x997   : > { %v11202_v61 = vpop.f32.mrf.mxu1 }
 0x998   : > { %v11242_v40 = vadd.f32 %v11241_v62, %v11201_v52 }
 0x999   : > { %v11203_v53 = vpop.f32.mrf.mxu1 }
 0x9bc   : > { %v11321_v60 = vpop.f32.mrf.mxu0 }
 0x9be   : > { %v11323_v0 = vpop.f32.mrf.mxu0 }
 0x9c0   : > { %v11325_v59 = vpop.f32.mrf.mxu0 }
 0x9c2   : > { %v11326_v25 = vpop.f32.mrf.mxu0 }
 0x9d3   : > { %v11280_v50 = vpop.f32.mrf.mxu1 }
 0x9d4   : > { %v11281_v13 = vadd.f32 %v11280_v50, %v11240_v39 }
 0x9d5   : > { %v11282_v12 = vpop.f32.mrf.mxu1 }
 0x9d6   : > { %v11283_v36 = vadd.f32 %v11282_v12, %v11242_v40  ;;  %v11322_v33 = vadd.f32 %v11321_v60, %v11281_v13 }
 0x9d7   : > { %v11284_v37 = vpop.f32.mrf.mxu1 }
 0x9d8   : > { %v11324_v1 = vadd.f32 %v11323_v0, %v11283_v36 }
 0x9d9   : > { %v11285_v38 = vpop.f32.mrf.mxu1 }
 0x9f3   : > { %v11362_v10 = vpop.f32.mrf.mxu1 }
 0x9f4   : > { %v11363_v47 = vadd.f32 %v11362_v10, %v11322_v33 }
 0x9f5   : > { %v11364_v21 = vpop.f32.mrf.mxu1 }
 0x9f6   : > { %v11393_v16 = vadd.f32 %v11382_v43, %v11363_v47  ;;  %v11365_v51 = vadd.f32 %v11364_v21, %v11324_v1 }
 0x9f7   : > { %v11366_v48 = vpop.f32.mrf.mxu1 }
 0x9f8   : > { %14983 = vtanh.f32 %v11393_v16  ;;  %v11394_v28 = vadd.f32 %v11386_v20, %v11365_v51 }
 0x9f9   : > { %v11367_v35 = vpop.f32.mrf.mxu1 }
 0x9fa   : > { %v12971_v62 = vmul.f32 -1.442695, %v11394_v28 }
 0x9fc   : > { %14985 = vpow2.f32 %v12971_v62 }
 0xa05   : > { %v14984_v45 = vpop.eup %14983 }
 0xa06   : > { %v11415_v29 = vmul.f32 %v14984_v45, %v14982_v54 }
 0xa08   : > { %v11416_v42 = vadd.f32 %v11415_v29, %v11414_v14 }
 0xa09   : > { %v14986_v56 = vpop.eup %14985 }
 0xa0a   : > { %11620 = vst [vmem:[#allocation3] sm:$0x3] %v11416_v42  ;;  %v11411_v18 = vadd.f32 1.0, %v14986_v56  ;;  %14987 = vtanh.f32 %v11416_v42 }
 0xa0c   : > { %14989 = vrcp.f32 %v11411_v18 }
 0xa17   : > { %v14988_v41 = vpop.eup %14987 }
 0xa19   : > { %v14990_v8 = vpop.eup %14989 }
 0xa1a   : > { %v11418_v15 = vmul.f32 %v14990_v8, %v14988_v41 }
 0xa1c   : > { %v11419_v19 = vpack.c.bf16 %v11418_v15, %v11418_v15  ;;  %11619 = vst [vmem:[#allocation2] sm:$0x3] %v11418_v15 }
 0xa1e   : > { %11561 = vmatmul.mubr.bf16.vlgmr.msra.gmra.mxu0 %v11419_v19 }
 0xade   : > { %v11562_v46 = vpop.f32.mrf.mxu0 }
 0xadf   : > { %v11563_v55 = vadd.f32 %v11562_v46, %v11441_v44 }
 0xae0   : > { %v11564_v3 = vpop.f32.mrf.mxu0 }
 0xae1   : > { %v11565_v26 = vadd.f32 %v11564_v3, %v11445_v58 }
 0xae2   : > { %v11566_v17 = vpop.f32.mrf.mxu0 }
 0xae3   : > { %v11571_v52 = vcombine.low %v11563_v55, %v11565_v26 }
 0xae4   : > { %v11567_v39 = vpop.f32.mrf.mxu0 }
 0xae5   : > { %12988 = vst.sshfl [vmem:[%s15201_s20] sm:$0x33 pattern:$0x76325410] %v11571_v52 }
 0xae6 PF: > { %s25_s15 = sadd.s32 1, %s15015_s15   ;;  %s19534_s28 = sld [smem:[#allocation5_spill]] }
 0xae7   : > { %p22_p6 = scmp.ge.s32.totalorder %s25_s15, 10   ;;  %s19535_s29 = smov %s15011_s30 }
 0xae9   :  { %24 = sbr.rel (!%p22_p6) target bundleno = 2 (0x2), region = 121 }
 0xaec   : > { %s19536_s30 = smov %s19534_s28 }

</bundles_post_ra>
